<compile_context>
chip_gen: v5e
topology: v5e:2x2
jax: 0.10.0
libtpu: 0.0.40
codegen_flags: <defaults>
</compile_context>

<pallas_src>
import jax
import jax.numpy as jnp
from jax.experimental import pallas as pl
from jax.experimental.pallas import tpu as pltpu


def _round_up(x, m):
    return ((x + m - 1) // m) * m


def _discriminator_kernel(x_ref, w1_ref, b1_ref, w2_ref, b2_ref,
                          w3_ref, b3_ref, o_ref):
    # x_ref: [d_in, TB] bf16 (pre-concatenated, pre-transposed, pre-cast).
    x_t = x_ref[...]

    # Layer 1: single fused Linear(d_in -> 1024) on the MXU, f32 accumulation.
    h1 = jnp.dot(w1_ref[...], x_t, preferred_element_type=jnp.float32)
    # Fused bias + LeakyReLU(0.2) + bf16 cast (only bf16 h1 feeds layer 2).
    h1 = h1 + b1_ref[...]                              # [1024, TB] f32
    h1 = jnp.maximum(h1, 0.2 * h1).astype(jnp.bfloat16)

    # Layer 2: Linear(1024 -> 512) on the MXU.
    h2 = jnp.dot(w2_ref[...], h1, preferred_element_type=jnp.float32)
    h2 = h2 + b2_ref[...]                              # [512, TB] f32
    h2 = jnp.maximum(h2, 0.2 * h2)                     # LeakyReLU(0.2)

    # Layer 3 fused into the epilogue: Linear(512 -> 1) as a VPU
    # broadcast-multiply + cross-sublane reduce (XLU) -> lane-dense [1, TB].
    logit = jnp.sum(h2 * w3_ref[...], axis=0, keepdims=True) + b3_ref[0, 0]

    # Sigmoid (exact: tiny [1, TB] row, approx reciprocal not worth it).
    o_ref[...] = 1.0 / (1.0 + jnp.exp(-logit))


def discriminator_forward(embeddings, labels, params, *, block_b=512):
    """Pallas forward pass of the cGAN Discriminator.  Returns [B, 1] f32."""
    w1, b1, w2, b2, w3, b3 = params
    B = embeddings.shape[0]
    d_in = w1.shape[1]          # input_dim + label_dim
    h1_dim = w1.shape[0]        # 1024
    h2_dim = w2.shape[0]        # 512

    # Batch tile selection:
    #  * B > block_b: tiles of block_b (multiple of 256 -> lane-aligned).
    #  * 256 < B <= block_b: split into >= 2 lane-aligned tiles of >= 256 rows
    #    so v7x's second TensorCore gets work and the MXU N-dim stays full.
    #  * B <= 256: single tile (sublane-aligned) equal to the padded batch.
    if B > block_b:
        tb = block_b
    elif B > 256:
        tb = _round_up((B + 1) // 2, 256)
    else:
        tb = max(8, _round_up(B, 8))
    b_pad = _round_up(B, tb)
    n_tiles = b_pad // tb

    # Concat once, transpose once, cast once in the wrapper: [d_in, b_pad] bf16.
    x_t = jnp.concatenate([embeddings, labels], axis=1).T.astype(jnp.bfloat16)
    if b_pad != B:
        x_t = jnp.pad(x_t, ((0, 0), (0, b_pad - B)))

    resident = lambda i: (0, 0)   # same block every grid step -> stays in VMEM

    out = pl.pallas_call(
        _discriminator_kernel,
        out_shape=jax.ShapeDtypeStruct((1, b_pad), jnp.float32),
        grid=(n_tiles,),
        in_specs=[
            pl.BlockSpec((d_in, tb), lambda i: (0, i)),            # x^T tile  bf16
            pl.BlockSpec((h1_dim, d_in), resident),                # W1        bf16
            pl.BlockSpec((h1_dim, 1), resident),                   # b1        f32
            pl.BlockSpec((h2_dim, h1_dim), resident),              # W2        bf16
            pl.BlockSpec((h2_dim, 1), resident),                   # b2        f32
            pl.BlockSpec((h2_dim, 1), resident),                   # W3 column f32
            pl.BlockSpec((1, 1), resident,
                         memory_space=pltpu.MemorySpace.SMEM),     # b3 scalar
        ],
        out_specs=pl.BlockSpec((1, tb), lambda i: (0, i)),         # lane-dense logits
        compiler_params=pltpu.CompilerParams(
            dimension_semantics=("parallel",)),
    )(x_t, w1, b1, w2, b2, w3, b3)

    return out[0, :B].reshape(B, 1)


def init_params(key, input_dim, label_dim):
    """PyTorch nn.Linear-style init.  Weights kept in PyTorch (out, in) layout
    because the kernel runs the transposed forward pass; the two big matrices
    are stored in bfloat16 to halve HBM traffic."""
    d_in = input_dim + label_dim

    def linear(k, fan_in, fan_out):
        kw, kb = jax.random.split(k)
        bound = 1.0 / (fan_in ** 0.5)
        w = jax.random.uniform(kw, (fan_out, fan_in), jnp.float32, -bound, bound)
        b = jax.random.uniform(kb, (fan_out, 1), jnp.float32, -bound, bound)
        return w, b

    k1, k2, k3 = jax.random.split(key, 3)
    w1, b1 = linear(k1, d_in, 1024)
    w2, b2 = linear(k2, 1024, 512)
    w3, b3 = linear(k3, 512, 1)

    w1 = w1.astype(jnp.bfloat16)   # [1024, d_in]  (fused: no emb/label split)
    w2 = w2.astype(jnp.bfloat16)   # [512, 1024]
    w3 = w3.T                      # [512, 1] f32 (broadcast column for layer 3)
    # b1: [1024,1], b2: [512,1], b3: [1,1]  (all f32)
    return w1, b1, w2, b2, w3, b3


def _reference_forward(embeddings, labels, params):
    """Pure-JAX reference mirroring the kernel's numerics (bf16 weights /
    MXU inputs, f32 accumulation) for the correctness check."""
    w1, b1, w2, b2, w3, b3 = params
    x_t = jnp.concatenate([embeddings, labels], axis=1).T.astype(jnp.bfloat16)
    h1 = jnp.dot(w1, x_t, preferred_element_type=jnp.float32) + b1
    h1 = jnp.maximum(h1, 0.2 * h1).astype(jnp.bfloat16)
    h2 = jnp.dot(w2, h1, preferred_element_type=jnp.float32) + b2
    h2 = jnp.maximum(h2, 0.2 * h2)
    logit = jnp.sum(h2 * w3, axis=0, keepdims=True) + b3[0, 0]
    return jax.nn.sigmoid(logit)[0, :, None]       # [B, 1]


if __name__ == "__main__":
    key = jax.random.PRNGKey(0)

    input_dim = 32
    label_dim = 16
    k_emb, k_lab, k_par = jax.random.split(key, 3)
    params = init_params(k_par, input_dim, label_dim)

    # Small-batch check (single tile path).
    batch = 8
    embeddings = jax.random.normal(k_emb, (batch, input_dim), jnp.float32)
    labels = jax.random.normal(k_lab, (batch, label_dim), jnp.float32)

    out = discriminator_forward(embeddings, labels, params)
    out = jax.block_until_ready(out)
    ref = _reference_forward(embeddings, labels, params)
    assert out.shape == (batch, 1), out.shape
    assert jnp.allclose(out, ref, atol=1e-2, rtol=1e-2), (
        "mismatch vs reference: max abs diff = %s"
        % float(jnp.max(jnp.abs(out - ref))))

    # Multi-tile check (exercises batch padding + >=2 parallel grid steps).
    batch2 = 384
    k_emb2, k_lab2 = jax.random.split(k_emb)
    embeddings2 = jax.random.normal(k_emb2, (batch2, input_dim), jnp.float32)
    labels2 = jax.random.normal(k_lab2, (batch2, label_dim), jnp.float32)
    out2 = jax.block_until_ready(
        discriminator_forward(embeddings2, labels2, params))
    ref2 = _reference_forward(embeddings2, labels2, params)
    assert out2.shape == (batch2, 1), out2.shape
    assert jnp.allclose(out2, ref2, atol=1e-2, rtol=1e-2), (
        "multi-tile mismatch: max abs diff = %s"
        % float(jnp.max(jnp.abs(out2 - ref2))))

    print("KERNEL_OK")
</pallas_src>

<mosaic_0001>
module attributes {stable_mosaic.version = 11 : i64} {
  func.func @_discriminator_kernel(%arg0: i32, %arg1: memref<48x8xbf16, #tpu.memory_space<vmem>>, %arg2: memref<1024x48xbf16, #tpu.memory_space<vmem>>, %arg3: memref<1024x1xf32, #tpu.memory_space<vmem>>, %arg4: memref<512x1024xbf16, #tpu.memory_space<vmem>>, %arg5: memref<512x1xf32, #tpu.memory_space<vmem>>, %arg6: memref<512x1xf32, #tpu.memory_space<vmem>>, %arg7: memref<1x1xf32, #tpu.memory_space<smem>>, %arg8: memref<1x8xf32, #tpu.memory_space<vmem>>) attributes {dimension_semantics = [#tpu.dimension_semantics<parallel>], iteration_bounds = array<i64: 1>, scalar_prefetch = 0 : i64, scratch_operands = 0 : i64, tpu.core_type = #tpu.core_type<tc>, window_params = [{transform_indices = @transform_0, window_bounds = array<i64: 48, 8>}, {pipeline_mode = #tpu.pipeline_mode<synchronous>, transform_indices = @transform_1, window_bounds = array<i64: 1024, 48>}, {pipeline_mode = #tpu.pipeline_mode<synchronous>, transform_indices = @transform_2, window_bounds = array<i64: 1024, 1>}, {pipeline_mode = #tpu.pipeline_mode<synchronous>, transform_indices = @transform_3, window_bounds = array<i64: 512, 1024>}, {pipeline_mode = #tpu.pipeline_mode<synchronous>, transform_indices = @transform_4, window_bounds = array<i64: 512, 1>}, {pipeline_mode = #tpu.pipeline_mode<synchronous>, transform_indices = @transform_5, window_bounds = array<i64: 512, 1>}, {transform_indices = @transform_6, window_bounds = array<i64: 1, 1>}, {transform_indices = @transform_7, window_bounds = array<i64: 1, 8>}]} {
    %c0 = arith.constant 0 : index
    %c0_0 = arith.constant 0 : index
    %0 = vector.load %arg1[%c0, %c0_0] : memref<48x8xbf16, #tpu.memory_space<vmem>>, vector<48x8xbf16>
    %c0_1 = arith.constant 0 : index
    %c0_2 = arith.constant 0 : index
    %1 = vector.load %arg2[%c0_1, %c0_2] : memref<1024x48xbf16, #tpu.memory_space<vmem>>, vector<1024x48xbf16>
    %cst = arith.constant dense<0.000000e+00> : vector<1024x8xf32>
    %2 = tpu.matmul %1, %0, %cst {dimension_numbers = #tpu.dot_dimension_numbers<[1], [0], [0], [1], [0, 0, 1, 1], [], []>} : vector<1024x48xbf16>, vector<48x8xbf16>, vector<1024x8xf32> -> vector<1024x8xf32>
    %c0_3 = arith.constant 0 : index
    %c0_4 = arith.constant 0 : index
    %3 = vector.load %arg3[%c0_3, %c0_4] : memref<1024x1xf32, #tpu.memory_space<vmem>>, vector<1024x1xf32>
    %4 = vector.broadcast %3 : vector<1024x1xf32> to vector<1024x8xf32>
    %5 = arith.addf %2, %4 : vector<1024x8xf32>
    %cst_5 = arith.constant 2.000000e-01 : f32
    %6 = vector.broadcast %cst_5 : f32 to vector<1024x8xf32>
    %7 = arith.mulf %6, %5 : vector<1024x8xf32>
    %8 = arith.maximumf %5, %7 : vector<1024x8xf32>
    %9 = arith.truncf %8 : vector<1024x8xf32> to vector<1024x8xbf16>
    %c0_6 = arith.constant 0 : index
    %c0_7 = arith.constant 0 : index
    %10 = vector.load %arg4[%c0_6, %c0_7] : memref<512x1024xbf16, #tpu.memory_space<vmem>>, vector<512x1024xbf16>
    %cst_8 = arith.constant dense<0.000000e+00> : vector<512x8xf32>
    %11 = tpu.matmul %10, %9, %cst_8 {dimension_numbers = #tpu.dot_dimension_numbers<[1], [0], [0], [1], [0, 0, 1, 1], [], []>} : vector<512x1024xbf16>, vector<1024x8xbf16>, vector<512x8xf32> -> vector<512x8xf32>
    %c0_9 = arith.constant 0 : index
    %c0_10 = arith.constant 0 : index
    %12 = vector.load %arg5[%c0_9, %c0_10] : memref<512x1xf32, #tpu.memory_space<vmem>>, vector<512x1xf32>
    %13 = vector.broadcast %12 : vector<512x1xf32> to vector<512x8xf32>
    %14 = arith.addf %11, %13 : vector<512x8xf32>
    %cst_11 = arith.constant 2.000000e-01 : f32
    %15 = vector.broadcast %cst_11 : f32 to vector<512x8xf32>
    %16 = arith.mulf %15, %14 : vector<512x8xf32>
    %17 = arith.maximumf %14, %16 : vector<512x8xf32>
    %c0_12 = arith.constant 0 : index
    %c0_13 = arith.constant 0 : index
    %18 = vector.load %arg6[%c0_12, %c0_13] : memref<512x1xf32, #tpu.memory_space<vmem>>, vector<512x1xf32>
    %19 = vector.broadcast %18 : vector<512x1xf32> to vector<512x8xf32>
    %20 = arith.mulf %17, %19 : vector<512x8xf32>
    %cst_14 = arith.constant dense<0.000000e+00> : vector<8xf32>
    %21 = vector.multi_reduction <add>, %20, %cst_14 [0] : vector<512x8xf32> to vector<8xf32>
    %22 = vector.shape_cast %21 : vector<8xf32> to vector<1x8xf32>
    %c0_15 = arith.constant 0 : index
    %c0_16 = arith.constant 0 : index
    %23 = memref.load %arg7[%c0_15, %c0_16] : memref<1x1xf32, #tpu.memory_space<smem>>
    %24 = vector.broadcast %23 : f32 to vector<1x8xf32>
    %25 = arith.addf %22, %24 : vector<1x8xf32>
    %cst_17 = arith.constant 0.000000e+00 : f32
    %26 = vector.broadcast %cst_17 : f32 to vector<1x8xf32>
    %27 = arith.subf %26, %25 : vector<1x8xf32>
    %28 = math.exp %27 : vector<1x8xf32>
    %cst_18 = arith.constant 1.000000e+00 : f32
    %29 = vector.broadcast %cst_18 : f32 to vector<1x8xf32>
    %30 = arith.addf %29, %28 : vector<1x8xf32>
    %cst_19 = arith.constant 1.000000e+00 : f32
    %31 = vector.broadcast %cst_19 : f32 to vector<1x8xf32>
    %32 = arith.divf %31, %30 : vector<1x8xf32>
    %c0_20 = arith.constant 0 : index
    %c0_21 = arith.constant 0 : index
    %33 = vector.load %arg8[%c0_20, %c0_21] : memref<1x8xf32, #tpu.memory_space<vmem>>, vector<1x8xf32>
    tpu.vector_store %arg8[%c0_20, %c0_21], %32 {strides = array<i32>} : memref<1x8xf32, #tpu.memory_space<vmem>>, vector<1x8xf32>,
    return
  }
  func.func @transform_0(%arg0: i32) -> (i32, i32) {
    %c0_i32 = arith.constant 0 : i32
    %c0_i32_0 = arith.constant 0 : i32
    return %c0_i32, %arg0 : i32, i32
  }
  func.func @transform_1(%arg0: i32) -> (i32, i32) {
    %c0_i32 = arith.constant 0 : i32
    %c0_i32_0 = arith.constant 0 : i32
    %c0_i32_1 = arith.constant 0 : i32
    return %c0_i32, %c0_i32_0 : i32, i32
  }
  func.func @transform_2(%arg0: i32) -> (i32, i32) {
    %c0_i32 = arith.constant 0 : i32
    %c0_i32_0 = arith.constant 0 : i32
    %c0_i32_1 = arith.constant 0 : i32
    return %c0_i32, %c0_i32_0 : i32, i32
  }
  func.func @transform_3(%arg0: i32) -> (i32, i32) {
    %c0_i32 = arith.constant 0 : i32
    %c0_i32_0 = arith.constant 0 : i32
    %c0_i32_1 = arith.constant 0 : i32
    return %c0_i32, %c0_i32_0 : i32, i32
  }
  func.func @transform_4(%arg0: i32) -> (i32, i32) {
    %c0_i32 = arith.constant 0 : i32
    %c0_i32_0 = arith.constant 0 : i32
    %c0_i32_1 = arith.constant 0 : i32
    return %c0_i32, %c0_i32_0 : i32, i32
  }
  func.func @transform_5(%arg0: i32) -> (i32, i32) {
    %c0_i32 = arith.constant 0 : i32
    %c0_i32_0 = arith.constant 0 : i32
    %c0_i32_1 = arith.constant 0 : i32
    return %c0_i32, %c0_i32_0 : i32, i32
  }
  func.func @transform_6(%arg0: i32) -> (i32, i32) {
    %c0_i32 = arith.constant 0 : i32
    %c0_i32_0 = arith.constant 0 : i32
    %c0_i32_1 = arith.constant 0 : i32
    return %c0_i32, %c0_i32_0 : i32, i32
  }
  func.func @transform_7(%arg0: i32) -> (i32, i32) {
    %c0_i32 = arith.constant 0 : i32
    %c0_i32_0 = arith.constant 0 : i32
    return %c0_i32, %arg0 : i32, i32
  }
}

</mosaic_0001>

<bundles_post_ra>
// kernel: tpu_custom_call.1
= control target key start
LH: loop header
LB: loop body
LE: loop exit
PB: predicated region body
PF: predicated region fallthrough
CT: control target
= control target key end

     0   :  { %13 = vsyncpa [#allocation4], 0  ;;  %s10635_s0 = inlined_call_operand.vmem [shape: bf16[48,8], index: 0, kind: input, shape index: {}]   ;;  %s10636_s1 = inlined_call_operand.vmem [shape: bf16[1024,48], index: 1, kind: input, shape index: {}]   ;;  %s10637_s2 = inlined_call_operand.vmem [shape: f32[1024,1], index: 2, kind: input, shape index: {}]   ;;  %s10638_s3 = inlined_call_operand.hbm [shape: bf16[512,1024], index: 3, kind: input, shape index: {}]   ;;  %s10639_s4 = inlined_call_operand.vmem [shape: f32[512,1], index: 4, kind: input, shape index: {}]   ;;  %s10640_s5 = inlined_call_operand.vmem [shape: f32[512,1], index: 5, kind: input, shape index: {}]   ;;  %s10641_s6 = inlined_call_operand.<no memory space> [shape: f32[1,1], index: 6, kind: input, shape index: {}]   ;;  %s10642_s7 = inlined_call_operand.hbm [shape: f32[1,8], index: 7, kind: output, shape index: {}]  }
   0x1   :  { %14 = vsyncpa [#allocation5], 0  ;;  %s25_s26 = sshll.u32 %s10638_s3, 4  ;;  %s7904_s27 = smov [#allocation3]   ;;  %s26_s26 = int_to_ptr.hbm [resolvable:$true] %s25_s26 }
   0x2   :  { %s27_s28 = sshll.u32 %s7904_s27, 4  ;;  %s7905_s29 = smov 512   ;;  %s28_s28 = int_to_ptr.vmem [resolvable:$true] %s27_s28 }
   0x3   :  { %s7906_s30 = smov 32  }
   0x4   :  { %33 = dma.hbm_to_vmem [thread:$0]  %s26_s26, 32768, %s28_s28, [#allocation4], %s7905_s29, %s7905_s29, %s7906_s30  }
   0x5   :  { %7900 = dma.done.wait [#allocation4], 32768  }
   0x6   :  { %7901 = vsyncadd [#allocation4], 4294934528  ;;  %v7907_v0 = vmov 0   ;;  %v193_v1 = vld [vmem:[%s10637_s2 + $0x70] sm:$0xff]  ;;  %v191_v2 = vld [vmem:[%s10637_s2 + $0x60] sm:$0xff]  ;;  %vm1285_vm0 = vcmask 392192  }
   0x7   :  { %7847 = vset.pattern.permute.xlu2 %v7907_v0  ;;  %7846 = vset.pattern.permute.xlu1 %v7907_v0  ;;  %v189_v3 = vld [vmem:[%s10637_s2 + $0x50] sm:$0xff]  ;;  %v7507_v5 = vld [vmem:[%s10635_s0 + $0x8] sm:$0xff]  ;;  %v194_v6 = vld [vmem:[%s10637_s2 + $0x78] sm:$0xff]  ;;  %vm5975_vm1 = vcmask 64512   ;;  %vm6131_vm5 = vcmask 57344  }
   0x8   :  { %7845 = vset.pattern.permute.xlu0 %v7907_v0  ;;  %369 = vperm.xlu1 %7846, %v191_v2   ;;  %v7508_v4 = vld [vmem:[%s10635_s0 + $0x10] sm:$0xff]  ;;  %v192_v7 = vld [vmem:[%s10637_s2 + $0x68] sm:$0xff]  ;;  %v190_v8 = vld [vmem:[%s10637_s2 + $0x58] sm:$0xff] }
   0x9   :  { %379 = vperm.xlu0 %7845, %v193_v1   ;;  %359 = vperm.xlu2 %7847, %v189_v3   ;;  %v7506_v9 = vld [vmem:[%s10635_s0] sm:$0xff]  ;;  %v188_v11 = vld [vmem:[%s10637_s2 + $0x48] sm:$0xff]  ;;  %v185_v13 = vld [vmem:[%s10637_s2 + $0x30] sm:$0xff] }
   0xa   :  { %1483 = vmatpush.bf16.msra.mxu0 %v7508_v4  ;;  %7829 = vmatpush.bf16.msra.mxu3 %v7508_v4  ;;  %v7509_v10 = vld [vmem:[%s10636_s1] sm:$0xff]  ;;  %v186_v14 = vld [vmem:[%s10637_s2 + $0x38] sm:$0xff]  ;;  %v184_v16 = vld [vmem:[%s10637_s2 + $0x28] sm:$0xff] }
   0xb   :  { %v187_v12 = vld [vmem:[%s10637_s2 + $0x40] sm:$0xff]  ;;  %v7510_v17 = vld [vmem:[%s10636_s1 + $0x8] sm:$0xff]  ;;  %v182_v18 = vld [vmem:[%s10637_s2 + $0x18] sm:$0xff] }
   0xc   :  { %v183_v15 = vld [vmem:[%s10637_s2 + $0x20] sm:$0xff]  ;;  %v181_v19 = vld [vmem:[%s10637_s2 + $0x10] sm:$0xff]  ;;  %v7558_v21 = vld [vmem:[%s10636_s1 + $0x188] sm:$0xff] }
   0xd   :  { %v179_v20 = vld [vmem:[%s10637_s2] sm:$0xff]  ;;  %v180_v23 = vld [vmem:[%s10637_s2 + $0x8] sm:$0xff]  ;;  %v7511_v25 = vld [vmem:[%s10636_s1 + $0x10] sm:$0xff] }
   0xe   :  { %1484 = vmatpush.bf16.msra.mxu0 %v7507_v5  ;;  %7830 = vmatpush.bf16.msra.mxu3 %v7507_v5  ;;  %v195_v22 = vld [vmem:[%s10637_s2 + $0x80] sm:$0xff]  ;;  %v196_v24 = vld [vmem:[%s10637_s2 + $0x88] sm:$0xff]  ;;  %v198_v26 = vld [vmem:[%s10637_s2 + $0x98] sm:$0xff] }
   0xf   :  { %v197_v27 = vld [vmem:[%s10637_s2 + $0x90] sm:$0xff]  ;;  %v199_v28 = vld [vmem:[%s10637_s2 + $0xa0] sm:$0xff]  ;;  %v200_v31 = vld [vmem:[%s10637_s2 + $0xa8] sm:$0xff] }
  0x10   :  { %374 = vperm.xlu1 %7846, %v192_v7   ;;  %v7559_v29 = vld [vmem:[%s10636_s1 + $0x190] sm:$0xff]  ;;  %v202_v32 = vld [vmem:[%s10637_s2 + $0xb8] sm:$0xff]  ;;  %v204_v34 = vld [vmem:[%s10637_s2 + $0xc8] sm:$0xff] }
  0x11   :  { %384 = vperm.xlu0 %7845, %v194_v6   ;;  %364 = vperm.xlu2 %7847, %v190_v8   ;;  %v201_v30 = vld [vmem:[%s10637_s2 + $0xb0] sm:$0xff]  ;;  %v7512_v33 = vld [vmem:[%s10636_s1 + $0x18] sm:$0xff]  ;;  %v203_v35 = vld [vmem:[%s10637_s2 + $0xc0] sm:$0xff] }
  0x12   :  { %1485 = vmatpush.bf16.msra.mxu0 %v7506_v9  ;;  %7831 = vmatpush.bf16.msra.mxu3 %v7506_v9  ;;  %v205_v36 = vld [vmem:[%s10637_s2 + $0xd0] sm:$0xff]  ;;  %v7560_v37 = vld [vmem:[%s10636_s1 + $0x198] sm:$0xff]  ;;  %v207_v38 = vld [vmem:[%s10637_s2 + $0xe0] sm:$0xff] }
  0x13   :  { %v206_v39 = vld [vmem:[%s10637_s2 + $0xd8] sm:$0xff]  ;;  %v208_v40 = vld [vmem:[%s10637_s2 + $0xe8] sm:$0xff]  ;;  %v7513_v41 = vld [vmem:[%s10636_s1 + $0x20] sm:$0xff] }
  0x14   :  { %v210_v42 = vld [vmem:[%s10637_s2 + $0xf8] sm:$0xff]  ;;  %v209_v43 = vld [vmem:[%s10637_s2 + $0xf0] sm:$0xff]  ;;  %v211_v44 = vld [vmem:[%s10637_s2 + $0x100] sm:$0xff] }
  0x15   :  { %6418 = vmatmul.msk.bf16.vlgmr.msra.gmra.mxu0 %vm1285_vm0, %v7509_v10  ;;  %6467 = vmatmul.msk.bf16.vlgmr.msra.gmra.mxu3 %vm1285_vm0, %v7558_v21  ;;  %v7561_v45 = vld [vmem:[%s10636_s1 + $0x1a0] sm:$0xff]  ;;  %v213_v46 = vld [vmem:[%s10637_s2 + $0x110] sm:$0xff]  ;;  %v212_v47 = vld [vmem:[%s10637_s2 + $0x108] sm:$0xff] }
  0x16   :  { %v214_v48 = vld [vmem:[%s10637_s2 + $0x118] sm:$0xff]  ;;  %v7514_v49 = vld [vmem:[%s10636_s1 + $0x28] sm:$0xff]  ;;  %v215_v52 = vld [vmem:[%s10637_s2 + $0x120] sm:$0xff] }
  0x17   :  { %v216_v51 = vld [vmem:[%s10637_s2 + $0x128] sm:$0xff]  ;;  %v217_v53 = vld [vmem:[%s10637_s2 + $0x130] sm:$0xff]  ;;  %v219_v56 = vld [vmem:[%s10637_s2 + $0x140] sm:$0xff] }
  0x18   :  { %354 = vperm.xlu1 %7846, %v188_v11   ;;  %v7562_v55 = vld [vmem:[%s10636_s1 + $0x1a8] sm:$0xff]  ;;  %v218_v57 = vld [vmem:[%s10637_s2 + $0x138] sm:$0xff]  ;;  %v7515_v59 = vld [vmem:[%s10636_s1 + $0x30] sm:$0xff] }
  0x19   :  { %349 = vperm.xlu0 %7845, %v187_v12   ;;  %339 = vperm.xlu2 %7847, %v185_v13   ;;  %v220_v58 = vld [vmem:[%s10637_s2 + $0x148] sm:$0xff]  ;;  %v226_v61 = vld [vmem:[%s10637_s2 + $0x178] sm:$0xff]  ;;  %v225_v62 = vld [vmem:[%s10637_s2 + $0x170] sm:$0xff] }
  0x1a   :  { %v223_v63 = vld [vmem:[%s10637_s2 + $0x160] sm:$0xff]  ;;  %v7563_v3 = vld [vmem:[%s10636_s1 + $0x1b0] sm:$0xff]  ;;  %v224_v5 = vld [vmem:[%s10637_s2 + $0x168] sm:$0xff] }
  0x1b   :  { %v221_v4 = vld [vmem:[%s10637_s2 + $0x150] sm:$0xff]  ;;  %v222_v6 = vld [vmem:[%s10637_s2 + $0x158] sm:$0xff]  ;;  %v239_v13 = vld [vmem:[%s10637_s2 + $0x1e0] sm:$0xff] }
  0x1c   :  { %v7516_v7 = vld [vmem:[%s10636_s1 + $0x38] sm:$0xff]  ;;  %v241_v12 = vld [vmem:[%s10637_s2 + $0x1f0] sm:$0xff]  ;;  %v7517_v21 = vld [vmem:[%s10636_s1 + $0x40] sm:$0xff] }
  0x1d   :  { %v242_v11 = vld [vmem:[%s10637_s2 + $0x1f8] sm:$0xff] }
  0x20   :  { %329 = vperm.xlu1 %7846, %v183_v15  }
  0x21   :  { %344 = vperm.xlu0 %7845, %v186_v14   ;;  %334 = vperm.xlu2 %7847, %v184_v16  }
  0x25   :  { %6419 = vmatmul.msk.bf16.gmra.mxu0 %vm1285_vm0, %v7510_v17  ;;  %6468 = vmatmul.msk.bf16.gmra.mxu3 %vm1285_vm0, %v7559_v29  ;;  %v237_v17 = vld [vmem:[%s10637_s2 + $0x1d0] sm:$0xff] }
  0x28   :  { %324 = vperm.xlu1 %7846, %v182_v18   ;;  %v240_v18 = vld [vmem:[%s10637_s2 + $0x1e8] sm:$0xff] }
  0x29   :  { %319 = vperm.xlu0 %7845, %v181_v19   ;;  %309 = vperm.xlu2 %7847, %v179_v20   ;;  %v238_v19 = vld [vmem:[%s10637_s2 + $0x1d8] sm:$0xff] }
  0x2a   :  { %v7564_v20 = vld [vmem:[%s10636_s1 + $0x1b8] sm:$0xff] }
  0x30   :  { %389 = vperm.xlu1 %7846, %v195_v22  }
  0x31   :  { %314 = vperm.xlu0 %7845, %v180_v23   ;;  %394 = vperm.xlu2 %7847, %v196_v24  }
  0x35   :  { %6420 = vmatmul.msk.bf16.gmra.mxu0 %vm1285_vm0, %v7511_v25  ;;  %6469 = vmatmul.msk.bf16.gmra.mxu3 %vm1285_vm0, %v7560_v37 }
  0x38   :  { %404 = vperm.xlu1 %7846, %v198_v26   ;;  %v236_v26 = vld [vmem:[%s10637_s2 + $0x1c8] sm:$0xff] }
  0x39   :  { %399 = vperm.xlu0 %7845, %v197_v27   ;;  %409 = vperm.xlu2 %7847, %v199_v28   ;;  %v235_v27 = vld [vmem:[%s10637_s2 + $0x1c0] sm:$0xff]  ;;  %v233_v28 = vld [vmem:[%s10637_s2 + $0x1b0] sm:$0xff] }
  0x40   :  { %419 = vperm.xlu1 %7846, %v201_v30  }
  0x41   :  { %414 = vperm.xlu0 %7845, %v200_v31   ;;  %424 = vperm.xlu2 %7847, %v202_v32  }
  0x45   :  { %6421 = vmatmul.msk.bf16.gmra.mxu0 %vm1285_vm0, %v7512_v33  ;;  %6470 = vmatmul.msk.bf16.gmra.mxu3 %vm1285_vm0, %v7561_v45  ;;  %v231_v33 = vld [vmem:[%s10637_s2 + $0x1a0] sm:$0xff] }
  0x48   :  { %434 = vperm.xlu1 %7846, %v204_v34   ;;  %v234_v34 = vld [vmem:[%s10637_s2 + $0x1b8] sm:$0xff] }
  0x49   :  { %429 = vperm.xlu0 %7845, %v203_v35   ;;  %439 = vperm.xlu2 %7847, %v205_v36   ;;  %v232_v35 = vld [vmem:[%s10637_s2 + $0x1a8] sm:$0xff]  ;;  %v7565_v36 = vld [vmem:[%s10636_s1 + $0x1c0] sm:$0xff] }
  0x50   :  { %449 = vperm.xlu1 %7846, %v207_v38   ;;  %v7518_v38 = vld [vmem:[%s10636_s1 + $0x48] sm:$0xff] }
  0x51   :  { %444 = vperm.xlu0 %7845, %v206_v39   ;;  %454 = vperm.xlu2 %7847, %v208_v40  }
  0x55   :  { %6422 = vmatmul.msk.bf16.gmra.mxu0 %vm1285_vm0, %v7513_v41  ;;  %6471 = vmatmul.msk.bf16.gmra.mxu3 %vm1285_vm0, %v7562_v55 }
  0x58   :  { %464 = vperm.xlu1 %7846, %v210_v42  }
  0x59   :  { %459 = vperm.xlu0 %7845, %v209_v43   ;;  %469 = vperm.xlu2 %7847, %v211_v44  }
  0x60   :  { %479 = vperm.xlu1 %7846, %v213_v46   ;;  %v230_v46 = vld [vmem:[%s10637_s2 + $0x198] sm:$0xff] }
  0x61   :  { %474 = vperm.xlu0 %7845, %v212_v47   ;;  %484 = vperm.xlu2 %7847, %v214_v48   ;;  %v229_v47 = vld [vmem:[%s10637_s2 + $0x190] sm:$0xff]  ;;  %v227_v48 = vld [vmem:[%s10637_s2 + $0x180] sm:$0xff] }
  0x63   :  { %v8108_v50 = vpop.permute.xlu2 %359 }
  0x65   :  { %6423 = vmatmul.msk.bf16.gmra.mxu0 %vm1285_vm0, %v7514_v49  ;;  %6472 = vmatmul.msk.bf16.gmra.mxu3 %vm1285_vm0, %v7563_v3 }
  0x68   :  { %494 = vperm.xlu1 %7846, %v216_v51  }
  0x69   :  { %489 = vperm.xlu0 %7845, %v215_v52   ;;  %499 = vperm.xlu2 %7847, %v217_v53  }
  0x6b   :  { %v8120_v54 = vpop.permute.xlu2 %364 }
  0x70   :  { %509 = vperm.xlu1 %7846, %v219_v56  }
  0x71   :  { %504 = vperm.xlu0 %7845, %v218_v57   ;;  %514 = vperm.xlu2 %7847, %v220_v58  }
  0x73   :  { %v8138_v60 = vpop.permute.xlu2 %339 }
  0x75   :  { %6424 = vmatmul.msk.bf16.gmra.mxu0 %vm1285_vm0, %v7515_v59  ;;  %6473 = vmatmul.msk.bf16.gmra.mxu3 %vm1285_vm0, %v7564_v20  ;;  %v245_v20 = vld [vmem:[%s10637_s2 + $0x210] sm:$0xff] }
  0x78   :  { %544 = vperm.xlu1 %7846, %v226_v61  }
  0x79   :  { %539 = vperm.xlu0 %7845, %v225_v62   ;;  %529 = vperm.xlu2 %7847, %v223_v63   ;;  %v243_v62 = vld [vmem:[%s10637_s2 + $0x200] sm:$0xff]  ;;  %v228_v63 = vld [vmem:[%s10637_s2 + $0x188] sm:$0xff] }
  0x7a   :  { %v8152_v1 = vpop.permute.xlu1 %369 }
  0x7b   :  { %v8150_v0 = vpop.permute.xlu0 %379  ;;  %v8154_v2 = vpop.permute.xlu2 %334 }
  0x80   :  { %519 = vperm.xlu1 %7846, %v221_v4   ;;  %v244_v4 = vld [vmem:[%s10637_s2 + $0x208] sm:$0xff] }
  0x81   :  { %534 = vperm.xlu0 %7845, %v224_v5   ;;  %524 = vperm.xlu2 %7847, %v222_v6   ;;  %v7566_v5 = vld [vmem:[%s10636_s1 + $0x1c8] sm:$0xff] }
  0x82   :  { %v8174_v9 = vpop.permute.xlu1 %374 }
  0x83   :  { %v8172_v8 = vpop.permute.xlu0 %384  ;;  %v310_v10 = vpop.permute.xlu2 %309 }
  0x85   :  { %6425 = vmatmul.msk.bf16.gmra.mxu0 %vm1285_vm0, %v7516_v7  ;;  %6474 = vmatmul.msk.bf16.gmra.mxu3 %vm1285_vm0, %v7565_v36  ;;  %v7567_v36 = vld [vmem:[%s10636_s1 + $0x1d0] sm:$0xff] }
  0x88   :  { %624 = vperm.xlu1 %7846, %v242_v11  }
  0x89   :  { %619 = vperm.xlu0 %7845, %v241_v12   ;;  %609 = vperm.xlu2 %7847, %v239_v13  }
  0x8a   :  { %v8186_v14 = vpop.permute.xlu1 %354 }
  0x8b   :  { %v8188_v15 = vpop.permute.xlu0 %349  ;;  %v8190_v16 = vpop.permute.xlu2 %394 }
  0x90   :  { %599 = vperm.xlu1 %7846, %v237_v17  }
  0x91   :  { %614 = vperm.xlu0 %7845, %v240_v18   ;;  %604 = vperm.xlu2 %7847, %v238_v19   ;;  %v246_v19 = vld [vmem:[%s10637_s2 + $0x218] sm:$0xff] }
  0x92   :  { %v8210_v23 = vpop.permute.xlu1 %329  ;;  %v1487_v25 = vpop.f32.mrf.mxu0 }
  0x93   :  { %v8208_v22 = vpop.permute.xlu0 %344  ;;  %v8212_v24 = vpop.permute.xlu2 %409  ;;  %v1488_v37 = vadd.f32 %v1487_v25, %v310_v10  ;;  %v7519_v10 = vld [vmem:[%s10636_s1 + $0x50] sm:$0xff] }
  0x95   :  { %6426 = vmatmul.msk.bf16.gmra.mxu0 %vm1285_vm0, %v7517_v21  ;;  %v1807_v41 = vmul.f32 0.2, %v1488_v37  ;;  %6475 = vmatmul.msk.bf16.gmra.mxu3 %vm1285_vm0, %v7566_v5  ;;  %v247_v21 = vld [vmem:[%s10637_s2 + $0x220] sm:$0xff]  ;;  %v7568_v5 = vld [vmem:[%s10636_s1 + $0x1d8] sm:$0xff] }
  0x97   :  { %v1935_v49 = vmax.f32 %v1488_v37, %v1807_v41 }
  0x98   :  { %594 = vperm.xlu1 %7846, %v236_v26  }
  0x99   :  { %589 = vperm.xlu0 %7845, %v235_v27   ;;  %579 = vperm.xlu2 %7847, %v233_v28  }
  0x9a   :  { %v325_v29 = vpop.permute.xlu1 %324  ;;  %v1489_v32 = vpop.f32.mrf.mxu0 }
  0x9b   :  { %v320_v30 = vpop.permute.xlu0 %319  ;;  %v8224_v31 = vpop.permute.xlu2 %424 }
  0xa0   :  { %569 = vperm.xlu1 %7846, %v231_v33   ;;  %v249_v33 = vld [vmem:[%s10637_s2 + $0x230] sm:$0xff] }
  0xa1   :  { %584 = vperm.xlu0 %7845, %v234_v34   ;;  %574 = vperm.xlu2 %7847, %v232_v35   ;;  %v250_v35 = vld [vmem:[%s10637_s2 + $0x238] sm:$0xff] }
  0xa2   :  { %v8242_v39 = vpop.permute.xlu1 %389  ;;  %v1492_v44 = vpop.f32.mrf.mxu0 }
  0xa3   :  { %v315_v40 = vpop.permute.xlu0 %314  ;;  %v8244_v43 = vpop.permute.xlu2 %439  ;;  %v1493_v52 = vadd.f32 %v1492_v44, %v320_v30 }
  0xa4   :  { %v1490_v42 = vadd.f32 %v1489_v32, %v315_v40 }
  0xa5   :  { %6427 = vmatmul.msk.bf16.gmra.mxu0 %vm1285_vm0, %v7518_v38  ;;  %v1809_v59 = vmul.f32 0.2, %v1493_v52  ;;  %v7520_v38 = vld [vmem:[%s10636_s1 + $0x58] sm:$0xff]  ;;  %6476 = vmatmul.msk.bf16.gmra.mxu3 %vm1285_vm0, %v7567_v36  ;;  %v260_v36 = vld [vmem:[%s10637_s2 + $0x288] sm:$0xff] }
  0xa6   :  { %v1808_v45 = vmul.f32 0.2, %v1490_v42 }
  0xa7   :  { %v1937_v6 = vmax.f32 %v1493_v52, %v1809_v59 }
  0xa8   :  { %v1936_v51 = vmax.f32 %v1490_v42, %v1808_v45  ;;  %564 = vperm.xlu1 %7846, %v230_v46   ;;  %v252_v46 = vld [vmem:[%s10637_s2 + $0x248] sm:$0xff] }
  0xa9   :  { %559 = vperm.xlu0 %7845, %v229_v47   ;;  %549 = vperm.xlu2 %7847, %v227_v48   ;;  %v251_v47 = vld [vmem:[%s10637_s2 + $0x240] sm:$0xff]  ;;  %v253_v48 = vld [vmem:[%s10637_s2 + $0x250] sm:$0xff] }
  0xaa   :  { %v8256_v53 = vpack.c.bf16 %v1936_v51, %v1935_v49  ;;  %v8258_v55 = vpop.permute.xlu1 %404  ;;  %v1494_v58 = vpop.f32.mrf.mxu0 }
  0xab   :  { %v8260_v56 = vpop.permute.xlu0 %399  ;;  %v8262_v57 = vpop.permute.xlu2 %454  ;;  %v1495_v61 = vadd.f32 %v1494_v58, %v325_v29 }
  0xad   :  { %v1810_v3 = vmul.f32 0.2, %v1495_v61 }
  0xaf   :  { %v1938_v7 = vmax.f32 %v1495_v61, %v1810_v3 }
  0xb0   :  { %629 = vperm.xlu1 %7846, %v243_v62  }
  0xb1   :  { %554 = vperm.xlu0 %7845, %v228_v63   ;;  %634 = vperm.xlu2 %7847, %v244_v4   ;;  %v8284_v13 = vpack.c.bf16 %v1938_v7, %v1937_v6  ;;  %v255_v63 = vld [vmem:[%s10637_s2 + $0x260] sm:$0xff]  ;;  %v256_v4 = vld [vmem:[%s10637_s2 + $0x268] sm:$0xff] }
  0xb2   :  { %v8280_v11 = vpop.permute.xlu1 %419  ;;  %v1497_v18 = vpop.f32.mrf.mxu0  ;;  %v7521_v7 = vld [vmem:[%s10636_s1 + $0x60] sm:$0xff] }
  0xb3   :  { %v8282_v12 = vpop.permute.xlu0 %414  ;;  %v8286_v17 = vpop.permute.xlu2 %469  ;;  %v1498_v25 = vadd.f32 %v1497_v18, %v8210_v23  ;;  %v248_v23 = vld [vmem:[%s10637_s2 + $0x228] sm:$0xff] }
  0xb5   :  { %6428 = vmatmul.msk.bf16.gmra.mxu0 %vm1285_vm0, %v7519_v10  ;;  %v1811_v30 = vmul.f32 0.2, %v1498_v25  ;;  %6477 = vmatmul.msk.bf16.gmra.mxu3 %vm1285_vm0, %v7568_v5 }
  0xb7   :  { %v1939_v37 = vmax.f32 %v1498_v25, %v1811_v30  ;;  %v258_v25 = vld [vmem:[%s10637_s2 + $0x278] sm:$0xff]  ;;  %v259_v30 = vld [vmem:[%s10637_s2 + $0x280] sm:$0xff] }
  0xb8   :  { %644 = vperm.xlu1 %7846, %v246_v19  }
  0xb9   :  { %639 = vperm.xlu0 %7845, %v245_v20   ;;  %649 = vperm.xlu2 %7847, %v247_v21  }
  0xba   :  { %v8299_v26 = vpop.permute.xlu1 %434  ;;  %v1499_v29 = vpop.f32.mrf.mxu0 }
  0xbb   :  { %v8301_v27 = vpop.permute.xlu0 %429  ;;  %v8303_v28 = vpop.permute.xlu2 %484  ;;  %v1500_v32 = vadd.f32 %v1499_v29, %v8154_v2  ;;  %v257_v29 = vld [vmem:[%s10637_s2 + $0x270] sm:$0xff] }
  0xbd   :  { %v1812_v34 = vmul.f32 0.2, %v1500_v32 }
  0xbf   :  { %v1940_v2 = vmax.f32 %v1500_v32, %v1812_v34 }
  0xc0   :  { %659 = vperm.xlu1 %7846, %v249_v33  }
  0xc1   :  { %654 = vperm.xlu0 %7845, %v248_v23   ;;  %664 = vperm.xlu2 %7847, %v250_v35   ;;  %v8326_v42 = vpack.c.bf16 %v1940_v2, %v1939_v37  ;;  %v261_v35 = vld [vmem:[%s10637_s2 + $0x290] sm:$0xff]  ;;  %v262_v37 = vld [vmem:[%s10637_s2 + $0x298] sm:$0xff]  ;;  %v7569_v2 = vld [vmem:[%s10636_s1 + $0x1e0] sm:$0xff] }
  0xc2   :  { %v8322_v40 = vpop.permute.xlu1 %449  ;;  %v1502_v45 = vpop.f32.mrf.mxu0 }
  0xc3   :  { %v8324_v41 = vpop.permute.xlu0 %444  ;;  %v8328_v44 = vpop.permute.xlu2 %499  ;;  %v1503_v49 = vadd.f32 %v1502_v45, %v8138_v60  ;;  %v254_v60 = vld [vmem:[%s10637_s2 + $0x258] sm:$0xff]  ;;  %v7522_v45 = vld [vmem:[%s10636_s1 + $0x68] sm:$0xff] }
  0xc5   :  { %6429 = vmatmul.msk.bf16.gmra.mxu0 %vm1285_vm0, %v7520_v38  ;;  %v1813_v61 = vmul.f32 0.2, %v1503_v49  ;;  %v8404_v38 = vpop.f32.mrf.mxu3  ;;  %6478 = vmatmul.msk.bf16.gmra.mxu3 %vm1285_vm0, %v7569_v2  ;;  %v270_v2 = vld [vmem:[%s10637_s2 + $0x2d8] sm:$0xff] }
  0xc7   :  { %v1941_v6 = vmax.f32 %v1503_v49, %v1813_v61  ;;  %v263_v61 = vld [vmem:[%s10637_s2 + $0x2a0] sm:$0xff] }
  0xc8   :  { %674 = vperm.xlu1 %7846, %v252_v46  }
  0xc9   :  { %669 = vperm.xlu0 %7845, %v251_v47   ;;  %679 = vperm.xlu2 %7847, %v253_v48  }
  0xca   :  { %v8341_v51 = vpop.permute.xlu1 %464  ;;  %v1504_v59 = vpop.f32.mrf.mxu0 }
  0xcb   :  { %v8343_v52 = vpop.permute.xlu0 %459  ;;  %v8345_v58 = vpop.permute.xlu2 %514  ;;  %v1505_v62 = vadd.f32 %v1504_v59, %v8208_v22  ;;  %v264_v59 = vld [vmem:[%s10637_s2 + $0x2a8] sm:$0xff] }
  0xcc   :  { %10643 = vst [vmem:[#allocation9_spill] sm:$0xff] %v8345_v58 }
  0xcd   :  { %v1814_v3 = vmul.f32 0.2, %v1505_v62  ;;  %v8434_v5 = vpop.f32.mrf.mxu3 }
  0xcf   :  { %v1942_v22 = vmax.f32 %v1505_v62, %v1814_v3  ;;  %v265_v62 = vld [vmem:[%s10637_s2 + $0x2b0] sm:$0xff] }
  0xd0   :  { %689 = vperm.xlu1 %7846, %v255_v63  }
  0xd1   :  { %684 = vperm.xlu0 %7845, %v254_v60   ;;  %694 = vperm.xlu2 %7847, %v256_v4   ;;  %v8368_v19 = vpack.c.bf16 %v1942_v22, %v1941_v6  ;;  %v267_v6 = vld [vmem:[%s10637_s2 + $0x2c0] sm:$0xff]  ;;  %v266_v22 = vld [vmem:[%s10637_s2 + $0x2b8] sm:$0xff] }
  0xd2   :  { %v8364_v10 = vpop.permute.xlu1 %479  ;;  %v8372_v21 = vpop.f32.mrf.mxu0 }
  0xd3   :  { %v8366_v18 = vpop.permute.xlu0 %474  ;;  %v8370_v20 = vpop.permute.xlu2 %529 }
  0xd4   :  { %10644 = vst [vmem:[#allocation10_spill] sm:$0xff] %v8370_v20 }
  0xd5   :  { %6430 = vmatmul.msk.bf16.gmra.mxu0 %vm1285_vm0, %v7521_v7  ;;  %v268_v7 = vld [vmem:[%s10637_s2 + $0x2c8] sm:$0xff] }
  0xd8   :  { %704 = vperm.xlu1 %7846, %v258_v25   ;;  %v7570_v25 = vld [vmem:[%s10636_s1 + $0x1e8] sm:$0xff] }
  0xd9   :  { %699 = vperm.xlu0 %7845, %v257_v29   ;;  %709 = vperm.xlu2 %7847, %v259_v30   ;;  %v7523_v29 = vld [vmem:[%s10636_s1 + $0x70] sm:$0xff] }
  0xda   :  { %v8384_v32 = vpop.permute.xlu1 %494  ;;  %v8390_v34 = vpop.f32.mrf.mxu0  ;;  %6479 = vmatmul.msk.bf16.gmra.mxu3 %vm1285_vm0, %v7570_v25  ;;  %v273_v25 = vld [vmem:[%s10637_s2 + $0x2f0] sm:$0xff] }
  0xdb   :  { %v8386_v33 = vpop.permute.xlu0 %489  ;;  %v8388_v23 = vpop.permute.xlu2 %524 }
  0xdc   :  { %10645 = vst [vmem:[#allocation11_spill] sm:$0xff] %v8388_v23 }
  0xe0   :  { %719 = vperm.xlu1 %7846, %v261_v35  }
  0xe1   :  { %714 = vperm.xlu0 %7845, %v260_v36   ;;  %724 = vperm.xlu2 %7847, %v262_v37  }
  0xe2   :  { %v8410_v46 = vpop.permute.xlu1 %509  ;;  %v8416_v49 = vpop.f32.mrf.mxu0 }
  0xe3   :  { %10646 = vst [vmem:[#allocation12_spill] sm:$0xff] %v8410_v46  ;;  %v8412_v47 = vpop.permute.xlu0 %504  ;;  %v8414_v48 = vpop.permute.xlu2 %609 }
  0xe4   :  { %10647 = vst [vmem:[#allocation13_spill] sm:$0xff] %v8414_v48 }
  0xe5   :  { %6431 = vmatmul.msk.bf16.gmra.mxu0 %vm1285_vm0, %v7522_v45  ;;  %v269_v45 = vld [vmem:[%s10637_s2 + $0x2d0] sm:$0xff] }
  0xe8   :  { %734 = vperm.xlu1 %7846, %v264_v59   ;;  %v271_v59 = vld [vmem:[%s10637_s2 + $0x2e0] sm:$0xff] }
  0xe9   :  { %729 = vperm.xlu0 %7845, %v263_v61   ;;  %739 = vperm.xlu2 %7847, %v265_v62   ;;  %v8468_v61 = vpop.f32.mrf.mxu3 }
  0xea   :  { %v8428_v63 = vpop.permute.xlu1 %544  ;;  %v1514_v4 = vpop.f32.mrf.mxu0 }
  0xeb   :  { %10648 = vst [vmem:[#allocation14_spill] sm:$0xff] %v8428_v63  ;;  %v8430_v60 = vpop.permute.xlu0 %539  ;;  %v8432_v3 = vpop.permute.xlu2 %604  ;;  %v7533_v63 = vld [vmem:[%s10636_s1 + $0xc0] sm:$0xff] }
  0xec   :  { %10649 = vst [vmem:[#allocation15_spill] sm:$0xff] %v8430_v60 }
  0xed   :  { %10650 = vst [vmem:[#allocation16_spill] sm:$0xff] %v8432_v3  ;;  %v7524_v3 = vld [vmem:[%s10636_s1 + $0x78] sm:$0xff] }
  0xf0   :  { %749 = vperm.xlu1 %7846, %v267_v6  }
  0xf1   :  { %744 = vperm.xlu0 %7845, %v266_v22   ;;  %754 = vperm.xlu2 %7847, %v268_v7  }
  0xf2   :  { %v8452_v30 = vpop.permute.xlu1 %519  ;;  %v1517_v37 = vpop.f32.mrf.mxu0 }
  0xf3   :  { %10651 = vst [vmem:[#allocation17_spill] sm:$0xff] %v8452_v30  ;;  %v8454_v35 = vpop.permute.xlu0 %534  ;;  %v8456_v36 = vpop.permute.xlu2 %579  ;;  %v1518_v46 = vadd.f32 %v1517_v37, %v8152_v1  ;;  %v1513_v1 = vadd.f32 %v8416_v49, %v8108_v50 }
  0xf4   :  { %10652 = vst [vmem:[#allocation18_spill] sm:$0xff] %v8454_v35 }
  0xf5   :  { %10653 = vst [vmem:[#allocation19_spill] sm:$0xff] %v8456_v36  ;;  %6432 = vmatmul.msk.bf16.gmra.mxu0 %vm1285_vm0, %v7523_v29  ;;  %v272_v29 = vld [vmem:[%s10637_s2 + $0x2e8] sm:$0xff] }
  0xf8   :  { %764 = vperm.xlu1 %7846, %v270_v2   ;;  %v274_v2 = vld [vmem:[%s10637_s2 + $0x2f8] sm:$0xff] }
  0xf9   :  { %759 = vperm.xlu0 %7845, %v269_v45   ;;  %769 = vperm.xlu2 %7847, %v271_v59   ;;  %v7571_v45 = vld [vmem:[%s10636_s1 + $0x1f0] sm:$0xff]  ;;  %v8488_v59 = vpop.f32.mrf.mxu3 }
  0xfa   :  { %v8470_v62 = vpop.permute.xlu1 %624  ;;  %v1519_v7 = vpop.f32.mrf.mxu0  ;;  %6480 = vmatmul.msk.bf16.gmra.mxu3 %vm1285_vm0, %v7571_v45 }
  0xfb   :  { %10654 = vst [vmem:[#allocation20_spill] sm:$0xff] %v8470_v62  ;;  %v8472_v6 = vpop.permute.xlu0 %619  ;;  %v8474_v22 = vpop.permute.xlu2 %574 }
  0xfc   :  { %10655 = vst [vmem:[#allocation21_spill] sm:$0xff] %v8472_v6 }
  0xfd   :  { %10656 = vst [vmem:[#allocation22_spill] sm:$0xff] %v8474_v22 }
 0x100   :  { %779 = vperm.xlu1 %7846, %v273_v25   ;;  %v276_v25 = vld [vmem:[%s10637_s2 + $0x308] sm:$0xff] }
 0x101   :  { %774 = vperm.xlu0 %7845, %v272_v29   ;;  %784 = vperm.xlu2 %7847, %v274_v2   ;;  %v275_v29 = vld [vmem:[%s10637_s2 + $0x300] sm:$0xff]  ;;  %v277_v2 = vld [vmem:[%s10637_s2 + $0x310] sm:$0xff] }
 0x102   :  { %v8494_v62 = vpop.permute.xlu1 %599  ;;  %v1522_v36 = vpop.f32.mrf.mxu0 }
 0x103   :  { %10657 = vst [vmem:[#allocation23_spill] sm:$0xff] %v8494_v62  ;;  %v8496_v48 = vpop.permute.xlu0 %614  ;;  %v8498_v6 = vpop.permute.xlu2 %549  ;;  %v1523_v45 = vadd.f32 %v1522_v36, %v8150_v0  ;;  %v1520_v62 = vadd.f32 %v1519_v7, %v8174_v9  ;;  %v279_v0 = vld [vmem:[%s10637_s2 + $0x320] sm:$0xff]  ;;  %v278_v9 = vld [vmem:[%s10637_s2 + $0x318] sm:$0xff]  ;;  %v1515_v36 = vadd.f32 %v1514_v4, %v8120_v54  ;;  %v1510_v54 = vadd.f32 %v8390_v34, %v8186_v14 }
 0x104   :  { %10658 = vst [vmem:[#allocation24_spill] sm:$0xff] %v8496_v48 }
 0x105   :  { %10659 = vst [vmem:[#allocation25_spill] sm:$0xff] %v8498_v6  ;;  %6433 = vmatmul.msk.bf16.gmra.mxu0 %vm1285_vm0, %v7524_v3  ;;  %v1821_v58 = vmul.f32 0.2, %v1523_v45  ;;  %v1820_v7 = vmul.f32 0.2, %v1520_v62 }
 0x106   :  { %v1818_v4 = vmul.f32 0.2, %v1515_v36  ;;  %v1816_v14 = vmul.f32 0.2, %v1510_v54 }
 0x107   :  { %v1949_v37 = vmax.f32 %v1523_v45, %v1821_v58  ;;  %v1948_v50 = vmax.f32 %v1520_v62, %v1820_v7  ;;  %v1817_v45 = vmul.f32 0.2, %v1513_v1  ;;  %v281_v62 = vld [vmem:[%s10637_s2 + $0x330] sm:$0xff] }
 0x108   :  { %794 = vperm.xlu1 %7846, %v276_v25   ;;  %v1946_v7 = vmax.f32 %v1515_v36, %v1818_v4 }
 0x109   :  { %789 = vperm.xlu0 %7845, %v275_v29   ;;  %799 = vperm.xlu2 %7847, %v277_v2   ;;  %v280_v29 = vld [vmem:[%s10637_s2 + $0x328] sm:$0xff]  ;;  %v7525_v2 = vld [vmem:[%s10636_s1 + $0x80] sm:$0xff] }
 0x10a   :  { %v8512_v3 = vpop.permute.xlu1 %594  ;;  %v1524_v6 = vpop.f32.mrf.mxu0 }
 0x10b   :  { %10660 = vst [vmem:[#allocation26_spill] sm:$0xff] %v8512_v3  ;;  %v8514_v48 = vpop.permute.xlu0 %589  ;;  %v8516_v22 = vpop.permute.xlu2 %634  ;;  %v1525_v30 = vadd.f32 %v1524_v6, %v8172_v8  ;;  %v1819_v8 = vmul.f32 0.2, %v1518_v46 }
 0x10c   :  { %10661 = vst [vmem:[#allocation27_spill] sm:$0xff] %v8514_v48 }
 0x10d   :  { %10662 = vst [vmem:[#allocation28_spill] sm:$0xff] %v8516_v22  ;;  %v1822_v25 = vmul.f32 0.2, %v1525_v30 }
 0x10f   :  { %v1950_v6 = vmax.f32 %v1525_v30, %v1822_v25  ;;  %v1508_v30 = vadd.f32 %v8372_v21, %v8188_v15  ;;  %v8552_v25 = vpop.f32.mrf.mxu3  ;;  %v283_v15 = vld [vmem:[%s10637_s2 + $0x340] sm:$0xff] }
 0x110   :  { %809 = vperm.xlu1 %7846, %v279_v0   ;;  %v1947_v0 = vmax.f32 %v1518_v46, %v1819_v8  ;;  %v1945_v46 = vmax.f32 %v1513_v1, %v1817_v45  ;;  %v285_v45 = vld [vmem:[%s10637_s2 + $0x350] sm:$0xff] }
 0x111   :  { %804 = vperm.xlu0 %7845, %v278_v9   ;;  %814 = vperm.xlu2 %7847, %v280_v29   ;;  %v2070_v3 = vpack.c.bf16 %v1950_v6, %v1949_v37  ;;  %v282_v9 = vld [vmem:[%s10637_s2 + $0x338] sm:$0xff]  ;;  %v1815_v21 = vmul.f32 0.2, %v1508_v30  ;;  %v1944_v37 = vmax.f32 %v1510_v54, %v1816_v14 }
 0x112   :  { %v8537_v22 = vpop.permute.xlu1 %569  ;;  %v1527_v58 = vpop.f32.mrf.mxu0  ;;  %v2069_v34 = vpack.c.bf16 %v1948_v50, %v1947_v0  ;;  %v2068_v36 = vpack.c.bf16 %v1946_v7, %v1945_v46  ;;  %v284_v0 = vld [vmem:[%s10637_s2 + $0x348] sm:$0xff]  ;;  %v7572_v54 = vld [vmem:[%s10636_s1 + $0x1f8] sm:$0xff] }
 0x113   :  { %10663 = vst [vmem:[#allocation29_spill] sm:$0xff] %v8537_v22  ;;  %v8539_v48 = vpop.permute.xlu0 %584  ;;  %v8541_v49 = vpop.permute.xlu2 %649  ;;  %4047 = vmatpush.bf16.msra.mxu1 %v2070_v3  ;;  %7832 = vmatpush.bf16.msra.mxu2 %v2070_v3  ;;  %v1528_v3 = vadd.f32 %v1527_v58, %v8242_v39  ;;  %v1943_v4 = vmax.f32 %v1508_v30, %v1815_v21  ;;  %v7625_v22 = vld [vmem:[#allocation3 + $0x19c] sm:$0xf0] }
 0x114   :  { %10664 = vst [vmem:[#allocation30_spill] sm:$0xff] %v8539_v48 }
 0x115   :  { %10665 = vst [vmem:[#allocation31_spill] sm:$0xff] %v8541_v49  ;;  %6434 = vmatmul.msk.bf16.gmra.mxu0 %vm1285_vm0, %v7525_v2  ;;  %v1823_v50 = vmul.f32 0.2, %v1528_v3  ;;  %v2067_v58 = vpack.c.bf16 %v1944_v37, %v1943_v4  ;;  %v289_v37 = vld [vmem:[%s10637_s2 + $0x370] sm:$0xff] }
 0x117   :  { %4048 = vmatpush.bf16.msra.mxu1 %v2069_v34  ;;  %7833 = vmatpush.bf16.msra.mxu2 %v2069_v34  ;;  %v1951_v30 = vmax.f32 %v1528_v3, %v1823_v50  ;;  %v8577_v34 = vpop.f32.mrf.mxu3  ;;  %v288_v3 = vld [vmem:[%s10637_s2 + $0x368] sm:$0xff] }
 0x118   :  { %824 = vperm.xlu1 %7846, %v282_v9   ;;  %v7526_v9 = vld [vmem:[%s10636_s1 + $0x88] sm:$0xff]  ;;  %6481 = vmatmul.msk.bf16.gmra.mxu3 %vm1285_vm0, %v7572_v54 }
 0x119   :  { %819 = vperm.xlu0 %7845, %v281_v62   ;;  %829 = vperm.xlu2 %7847, %v283_v15  }
 0x11a   :  { %v8558_v29 = vpop.permute.xlu1 %564  ;;  %v1529_v2 = vpop.f32.mrf.mxu0 }
 0x11b   :  { %10666 = vst [vmem:[#allocation32_spill] sm:$0xff] %v8558_v29  ;;  %v8560_v8 = vpop.permute.xlu0 %559  ;;  %v8562_v6 = vpop.permute.xlu2 %664  ;;  %v1530_v1 = vadd.f32 %v1529_v2, %v8190_v16  ;;  %4049 = vmatpush.bf16.msra.mxu1 %v2068_v36  ;;  %7834 = vmatpush.bf16.msra.mxu2 %v2068_v36  ;;  %v286_v16 = vld [vmem:[%s10637_s2 + $0x358] sm:$0xff]  ;;  %v287_v36 = vld [vmem:[%s10637_s2 + $0x360] sm:$0xff] }
 0x11c   :  { %10667 = vst [vmem:[#allocation33_spill] sm:$0xff] %v8560_v8  ;;  %v7188_v29 = vld [vmem:[#allocation3 + $0x580] sm:$0xf] }
 0x11d   :  { %10668 = vst [vmem:[#allocation34_spill] sm:$0xff] %v8562_v6  ;;  %v1824_v39 = vmul.f32 0.2, %v1530_v1  ;;  %v7753_v8 = vld [vmem:[#allocation3 + $0x59c] sm:$0xf0] }
 0x11f   :  { %4050 = vmatpush.bf16.msra.mxu1 %v2067_v58  ;;  %7835 = vmatpush.bf16.msra.mxu2 %v2067_v58  ;;  %v1952_v14 = vmax.f32 %v1530_v1, %v1824_v39  ;;  %v6484_v39 = vld [vmem:[#allocation3] sm:$0xf] }
 0x120   :  { %839 = vperm.xlu1 %7846, %v285_v45   ;;  %v7577_v58 = vld [vmem:[#allocation3 + $0x1c] sm:$0xf0] }
 0x121   :  { %834 = vperm.xlu0 %7845, %v284_v0   ;;  %844 = vperm.xlu2 %7847, %v286_v16   ;;  %v8587_v15 = vpack.c.bf16 %v1952_v14, %v1951_v30  ;;  %v291_v16 = vld [vmem:[%s10637_s2 + $0x380] sm:$0xff]  ;;  %v290_v30 = vld [vmem:[%s10637_s2 + $0x378] sm:$0xff]  ;;  %v292_v14 = vld [vmem:[%s10637_s2 + $0x388] sm:$0xff] }
 0x122   :  { %v8582_v62 = vpop.permute.xlu1 %629  ;;  %v1532_v46 = vpop.f32.mrf.mxu0 }
 0x123   :  { %10669 = vst [vmem:[#allocation35_spill] sm:$0xff] %v8582_v62  ;;  %v8584_v7 = vpop.permute.xlu0 %554  ;;  %v8589_v21 = vpop.permute.xlu2 %679  ;;  %4051 = vmatpush.bf16.msra.mxu1 %v8368_v19  ;;  %7836 = vmatpush.bf16.msra.mxu2 %v8368_v19  ;;  %v1533_v2 = vadd.f32 %v1532_v46, %v8260_v56  ;;  %v6996_v56 = vld [vmem:[#allocation3 + $0x400] sm:$0xf] }
 0x124   :  { %10670 = vst [vmem:[#allocation36_spill] sm:$0xff] %v8584_v7 }
 0x125   :  { %10671 = vst [vmem:[#allocation37_spill] sm:$0xff] %v8589_v21  ;;  %6435 = vmatmul.msk.bf16.gmra.mxu0 %vm1285_vm0, %v7526_v9  ;;  %v1825_v45 = vmul.f32 0.2, %v1533_v2 }
 0x127   :  { %4052 = vmatpush.bf16.msra.mxu1 %v8326_v42  ;;  %7837 = vmatpush.bf16.msra.mxu2 %v8326_v42  ;;  %v7705_v42 = vld [vmem:[#allocation3 + $0x41c] sm:$0xf0]  ;;  %v1953_v46 = vmax.f32 %v1533_v2, %v1825_v45 }
 0x128   :  { %854 = vperm.xlu1 %7846, %v288_v3   ;;  %v6997_v9 = vor.u32 %v7705_v42, %v6996_v56  ;;  %v7527_v3 = vld [vmem:[%s10636_s1 + $0x90] sm:$0xff]  ;;  %v295_v45 = vld [vmem:[%s10637_s2 + $0x3a0] sm:$0xff] }
 0x129   :  { %849 = vperm.xlu0 %7845, %v287_v36   ;;  %859 = vperm.xlu2 %7847, %v289_v37  }
 0x12a   :  { %v8606_v19 = vpop.permute.xlu1 %644  ;;  %v1534_v1 = vpop.f32.mrf.mxu0 }
 0x12b   :  { %10672 = vst [vmem:[#allocation38_spill] sm:$0xff] %v8606_v19  ;;  %v8608_v4 = vpop.permute.xlu0 %639  ;;  %v8610_v50 = vpop.permute.xlu2 %694  ;;  %v1535_v0 = vadd.f32 %v1534_v1, %v8258_v55  ;;  %4053 = vmatpush.bf16.msra.mxu1 %v8284_v13  ;;  %7838 = vmatpush.bf16.msra.mxu2 %v8284_v13  ;;  %v6485_v55 = vor.u32 %v7577_v58, %v6484_v39  ;;  %v293_v58 = vld [vmem:[%s10637_s2 + $0x390] sm:$0xff] }
 0x12c   :  { %10673 = vst [vmem:[#allocation39_spill] sm:$0xff] %v8608_v4 }
 0x12d   :  { %10674 = vst [vmem:[#allocation40_spill] sm:$0xff] %v8610_v50  ;;  %v1826_v54 = vmul.f32 0.2, %v1535_v0 }
 0x12f   :  { %4054 = vmatpush.bf16.msra.mxu1 %v8256_v53  ;;  %7839 = vmatpush.bf16.msra.mxu2 %v8256_v53  ;;  %v1954_v13 = vmax.f32 %v1535_v0, %v1826_v54  ;;  %v294_v53 = vld [vmem:[%s10637_s2 + $0x398] sm:$0xff] }
 0x130   :  { %869 = vperm.xlu1 %7846, %v291_v16  }
 0x131   :  { %864 = vperm.xlu0 %7845, %v290_v30   ;;  %874 = vperm.xlu2 %7847, %v292_v14   ;;  %v8633_v1 = vpack.c.bf16 %v1954_v13, %v1953_v46  ;;  %v6516_v30 = vld [vmem:[#allocation3 + $0x40] sm:$0xf] }
 0x132   :  { %v8629_v36 = vpop.permute.xlu1 %659  ;;  %v1537_v2 = vpop.f32.mrf.mxu0  ;;  %4055 = vmatmul.bf16.vlgmr.msra.gmra.mxu1 %v6485_v55  ;;  %4135 = vmatmul.bf16.vlgmr.msra.gmra.mxu2 %v6997_v9  ;;  %v7585_v14 = vld [vmem:[#allocation3 + $0x5c] sm:$0xf0] }
 0x133   :  { %10675 = vst [vmem:[#allocation41_spill] sm:$0xff] %v8629_v36  ;;  %v8631_v37 = vpop.permute.xlu0 %654  ;;  %v8635_v39 = vpop.permute.xlu2 %709  ;;  %v1538_v0 = vadd.f32 %v1537_v2, %v8212_v24  ;;  %v7028_v46 = vld [vmem:[#allocation3 + $0x440] sm:$0xf]  ;;  %v297_v24 = vld [vmem:[%s10637_s2 + $0x3b0] sm:$0xff]  ;;  %v296_v2 = vld [vmem:[%s10637_s2 + $0x3a8] sm:$0xff] }
 0x134   :  { %10676 = vst [vmem:[#allocation42_spill] sm:$0xff] %v8631_v37  ;;  %v7713_v13 = vld [vmem:[#allocation3 + $0x45c] sm:$0xf0]  ;;  %v2397_v37 = vld [vmem:[%s10639_s4 + $0x70] sm:$0xff] }
 0x135   :  { %10677 = vst [vmem:[#allocation43_spill] sm:$0xff] %v8635_v39  ;;  %6436 = vmatmul.msk.bf16.gmra.mxu0 %vm1285_vm0, %v7527_v3  ;;  %v1827_v55 = vmul.f32 0.2, %v1538_v0 }
 0x137   :  { %v1955_v39 = vmax.f32 %v1538_v0, %v1827_v55  ;;  %v300_v0 = vld [vmem:[%s10637_s2 + $0x3c8] sm:$0xff] }
 0x138   :  { %884 = vperm.xlu1 %7846, %v294_v53   ;;  %v298_v53 = vld [vmem:[%s10637_s2 + $0x3b8] sm:$0xff] }
 0x139   :  { %879 = vperm.xlu0 %7845, %v293_v58   ;;  %889 = vperm.xlu2 %7847, %v295_v45   ;;  %v6517_v58 = vor.u32 %v7585_v14, %v6516_v30  ;;  %v7029_v45 = vor.u32 %v7713_v13, %v7028_v46  ;;  %v299_v30 = vld [vmem:[%s10637_s2 + $0x3c0] sm:$0xff] }
 0x13a   :  { %v8648_v56 = vpop.permute.xlu1 %674  ;;  %v1539_v16 = vpop.f32.mrf.mxu0  ;;  %v6548_v13 = vld [vmem:[#allocation3 + $0x80] sm:$0xf] }
 0x13b   :  { %10678 = vst [vmem:[#allocation44_spill] sm:$0xff] %v8648_v56  ;;  %v8650_v42 = vpop.permute.xlu0 %669  ;;  %v8652_v54 = vpop.permute.xlu2 %724  ;;  %v1540_v9 = vadd.f32 %v1539_v16, %v8282_v12  ;;  %v7528_v12 = vld [vmem:[%s10636_s1 + $0x98] sm:$0xff] }
 0x13c   :  { %10679 = vst [vmem:[#allocation45_spill] sm:$0xff] %v8650_v42 }
 0x13d   :  { %10680 = vst [vmem:[#allocation46_spill] sm:$0xff] %v8652_v54  ;;  %v1828_v3 = vmul.f32 0.2, %v1540_v9 }
 0x13f   :  { %v1956_v54 = vmax.f32 %v1540_v9, %v1828_v3  ;;  %v7593_v3 = vld [vmem:[#allocation3 + $0x9c] sm:$0xf0] }
 0x140   :  { %899 = vperm.xlu1 %7846, %v297_v24  }
 0x141   :  { %894 = vperm.xlu0 %7845, %v296_v2   ;;  %904 = vperm.xlu2 %7847, %v298_v53   ;;  %v8671_v56 = vpack.c.bf16 %v1956_v54, %v1955_v39  ;;  %v301_v39 = vld [vmem:[%s10637_s2 + $0x3d0] sm:$0xff]  ;;  %v7060_v53 = vld [vmem:[#allocation3 + $0x480] sm:$0xf] }
 0x142   :  { %v8667_v16 = vpop.permute.xlu1 %689  ;;  %v1542_v50 = vpop.f32.mrf.mxu0  ;;  %4060 = vmatmul.bf16.gmra.mxu1 %v6517_v58  ;;  %4140 = vmatmul.bf16.gmra.mxu2 %v7029_v45  ;;  %v7721_v58 = vld [vmem:[#allocation3 + $0x49c] sm:$0xf0] }
 0x143   :  { %10681 = vst [vmem:[#allocation47_spill] sm:$0xff] %v8667_v16  ;;  %v8669_v42 = vpop.permute.xlu0 %684  ;;  %v8673_v21 = vpop.permute.xlu2 %739  ;;  %v1543_v54 = vadd.f32 %v1542_v50, %v8280_v11  ;;  %v303_v11 = vld [vmem:[%s10637_s2 + $0x3e0] sm:$0xff]  ;;  %v302_v50 = vld [vmem:[%s10637_s2 + $0x3d8] sm:$0xff] }
 0x144   :  { %10682 = vst [vmem:[#allocation48_spill] sm:$0xff] %v8669_v42 }
 0x145   :  { %10683 = vst [vmem:[#allocation49_spill] sm:$0xff] %v8673_v21  ;;  %6437 = vmatmul.msk.bf16.gmra.mxu0 %vm1285_vm0, %v7528_v12  ;;  %v1829_v24 = vmul.f32 0.2, %v1543_v54  ;;  %v304_v12 = vld [vmem:[%s10637_s2 + $0x3e8] sm:$0xff] }
 0x148   :  { %914 = vperm.xlu1 %7846, %v300_v0   ;;  %v6549_v0 = vor.u32 %v7593_v3, %v6548_v13  ;;  %v305_v13 = vld [vmem:[%s10637_s2 + $0x3f0] sm:$0xff]  ;;  %v8725_v3 = vpop.f32.mrf.mxu3 }
 0x149   :  { %909 = vperm.xlu0 %7845, %v299_v30   ;;  %919 = vperm.xlu2 %7847, %v301_v39   ;;  %v7061_v30 = vor.u32 %v7721_v58, %v7060_v53  ;;  %v1957_v39 = vmax.f32 %v1543_v54, %v1829_v24  ;;  %v306_v54 = vld [vmem:[%s10637_s2 + $0x3f8] sm:$0xff] }
 0x14a   :  { %v8686_v14 = vpop.permute.xlu1 %704  ;;  %v1544_v46 = vpop.f32.mrf.mxu0 }
 0x14b   :  { %10684 = vst [vmem:[#allocation50_spill] sm:$0xff] %v8686_v14  ;;  %v8688_v55 = vpop.permute.xlu0 %699  ;;  %v8690_v9 = vpop.permute.xlu2 %754  ;;  %v1545_v2 = vadd.f32 %v1544_v46, %v8224_v31  ;;  %v7529_v31 = vld [vmem:[%s10636_s1 + $0xa0] sm:$0xff] }
 0x14c   :  { %10685 = vst [vmem:[#allocation51_spill] sm:$0xff] %v8688_v55 }
 0x14d   :  { %10686 = vst [vmem:[#allocation52_spill] sm:$0xff] %v8690_v9  ;;  %v1830_v45 = vmul.f32 0.2, %v1545_v2 }
 0x14f   :  { %v1958_v21 = vmax.f32 %v1545_v2, %v1830_v45  ;;  %v6580_v45 = vld [vmem:[#allocation3 + $0xc0] sm:$0xf] }
 0x150   :  { %929 = vperm.xlu1 %7846, %v303_v11   ;;  %v7601_v11 = vld [vmem:[#allocation3 + $0xdc] sm:$0xf0] }
 0x151   :  { %924 = vperm.xlu0 %7845, %v302_v50   ;;  %934 = vperm.xlu2 %7847, %v304_v12   ;;  %v8709_v42 = vpack.c.bf16 %v1958_v21, %v1957_v39  ;;  %v2383_v21 = vld [vmem:[%s10639_s4] sm:$0xff]  ;;  %v2386_v39 = vld [vmem:[%s10639_s4 + $0x18] sm:$0xff] }
 0x152   :  { %v8705_v46 = vpop.permute.xlu1 %719  ;;  %v8713_v16 = vpop.f32.mrf.mxu0  ;;  %4065 = vmatmul.bf16.gmra.mxu1 %v6549_v0  ;;  %4145 = vmatmul.bf16.gmra.mxu2 %v7061_v30  ;;  %v7092_v50 = vld [vmem:[#allocation3 + $0x4c0] sm:$0xf]  ;;  %v2385_v0 = vld [vmem:[%s10639_s4 + $0x10] sm:$0xff]  ;;  %v2384_v30 = vld [vmem:[%s10639_s4 + $0x8] sm:$0xff] }
 0x153   :  { %10687 = vst [vmem:[#allocation53_spill] sm:$0xff] %v8705_v46  ;;  %v8707_v9 = vpop.permute.xlu0 %714  ;;  %v8711_v14 = vpop.permute.xlu2 %769  ;;  %v7729_v12 = vld [vmem:[#allocation3 + $0x4dc] sm:$0xf0] }
 0x154   :  { %10688 = vst [vmem:[#allocation54_spill] sm:$0xff] %v8707_v9 }
 0x155   :  { %10689 = vst [vmem:[#allocation55_spill] sm:$0xff] %v8711_v14  ;;  %6438 = vmatmul.msk.bf16.gmra.mxu0 %vm1285_vm0, %v7529_v31  ;;  %v6581_v31 = vor.u32 %v7601_v11, %v6580_v45  ;;  %v2388_v45 = vld [vmem:[%s10639_s4 + $0x28] sm:$0xff]  ;;  %v2387_v11 = vld [vmem:[%s10639_s4 + $0x20] sm:$0xff] }
 0x158   :  { %944 = vperm.xlu1 %7846, %v306_v54   ;;  %v7093_v54 = vor.u32 %v7729_v12, %v7092_v50  ;;  %v2389_v50 = vld [vmem:[%s10639_s4 + $0x30] sm:$0xff] }
 0x159   :  { %939 = vperm.xlu0 %7845, %v305_v13   ;;  %2449 = vperm.xlu2 %7847, %v2383_v21   ;;  %v7530_v13 = vld [vmem:[%s10636_s1 + $0xa8] sm:$0xff] }
 0x15a   :  { %v8727_v24 = vpop.permute.xlu1 %734  ;;  %v8733_v58 = vpop.f32.mrf.mxu0 }
 0x15b   :  { %10690 = vst [vmem:[#allocation56_spill] sm:$0xff] %v8727_v24  ;;  %v8729_v2 = vpop.permute.xlu0 %729  ;;  %v8731_v53 = vpop.permute.xlu2 %784  ;;  %v1550_v20 = vadd.f32 %v8733_v58, %v8299_v26  ;;  %v2406_v26 = vld [vmem:[%s10639_s4 + $0xb8] sm:$0xff] }
 0x15c   :  { %10691 = vst [vmem:[#allocation57_spill] sm:$0xff] %v8729_v2  ;;  %v8755_v24 = vpop.f32.mrf.mxu3 }
 0x15d   :  { %10692 = vst [vmem:[#allocation58_spill] sm:$0xff] %v8731_v53  ;;  %v7531_v53 = vld [vmem:[%s10636_s1 + $0xb0] sm:$0xff]  ;;  %v1832_v58 = vmul.f32 0.2, %v1550_v20 }
 0x160   :  { %2459 = vperm.xlu1 %7846, %v2385_v0  }
 0x161   :  { %2454 = vperm.xlu0 %7845, %v2384_v30   ;;  %2464 = vperm.xlu2 %7847, %v2386_v39  }
 0x162   :  { %v8747_v21 = vpop.permute.xlu1 %749  ;;  %v8753_v2 = vpop.f32.mrf.mxu0  ;;  %4070 = vmatmul.bf16.gmra.mxu1 %v6581_v31  ;;  %4150 = vmatmul.bf16.gmra.mxu2 %v7093_v54  ;;  %v6612_v31 = vld [vmem:[#allocation3 + $0x100] sm:$0xf] }
 0x163   :  { %10693 = vst [vmem:[#allocation59_spill] sm:$0xff] %v8747_v21  ;;  %v8749_v9 = vpop.permute.xlu0 %744  ;;  %v8751_v46 = vpop.permute.xlu2 %799  ;;  %v7609_v54 = vld [vmem:[#allocation3 + $0x11c] sm:$0xf0] }
 0x164   :  { %10694 = vst [vmem:[#allocation60_spill] sm:$0xff] %v8749_v9  ;;  %v7737_v9 = vld [vmem:[#allocation3 + $0x51c] sm:$0xf0] }
 0x165   :  { %6439 = vmatmul.msk.bf16.gmra.mxu0 %vm1285_vm0, %v7530_v13  ;;  %v7124_v13 = vld [vmem:[#allocation3 + $0x500] sm:$0xf] }
 0x166   :  { %v2391_v21 = vld [vmem:[%s10639_s4 + $0x40] sm:$0xff] }
 0x168   :  { %2474 = vperm.xlu1 %7846, %v2388_v45   ;;  %v2390_v45 = vld [vmem:[%s10639_s4 + $0x38] sm:$0xff] }
 0x169   :  { %2469 = vperm.xlu0 %7845, %v2387_v11   ;;  %2479 = vperm.xlu2 %7847, %v2389_v50   ;;  %v8781_v11 = vpop.f32.mrf.mxu3  ;;  %v2392_v50 = vld [vmem:[%s10639_s4 + $0x48] sm:$0xff] }
 0x16a   :  { %v8767_v12 = vpop.permute.xlu1 %764  ;;  %v8773_v39 = vpop.f32.mrf.mxu0 }
 0x16b   :  { %10695 = vst [vmem:[#allocation61_spill] sm:$0xff] %v8767_v12  ;;  %v8769_v0 = vpop.permute.xlu0 %759  ;;  %v8771_v30 = vpop.permute.xlu2 %814  ;;  %v7125_v12 = vor.u32 %v7737_v9, %v7124_v13  ;;  %v2394_v9 = vld [vmem:[%s10639_s4 + $0x58] sm:$0xff]  ;;  %v6644_v13 = vld [vmem:[#allocation3 + $0x140] sm:$0xf] }
 0x16c   :  { %10696 = vst [vmem:[#allocation62_spill] sm:$0xff] %v8769_v0  ;;  %v6613_v0 = vor.u32 %v7609_v54, %v6612_v31  ;;  %v2395_v31 = vld [vmem:[%s10639_s4 + $0x60] sm:$0xff] }
 0x170   :  { %2489 = vperm.xlu1 %7846, %v2391_v21   ;;  %v2393_v21 = vld [vmem:[%s10639_s4 + $0x50] sm:$0xff] }
 0x171   :  { %2484 = vperm.xlu0 %7845, %v2390_v45   ;;  %2494 = vperm.xlu2 %7847, %v2392_v50   ;;  %v8805_v54 = vpop.f32.mrf.mxu3  ;;  %v7617_v50 = vld [vmem:[#allocation3 + $0x15c] sm:$0xf0] }
 0x172   :  { %v8789_v14 = vpop.permute.xlu1 %779  ;;  %v1557_v6 = vpop.f32.mrf.mxu0  ;;  %4075 = vmatmul.bf16.gmra.mxu1 %v6613_v0  ;;  %4155 = vmatmul.bf16.gmra.mxu2 %v7125_v12 }
 0x173   :  { %10697 = vst [vmem:[#allocation63_spill] sm:$0xff] %v8789_v14  ;;  %v8791_v55 = vpop.permute.xlu0 %774  ;;  %v8793_v36 = vpop.permute.xlu2 %829  ;;  %v7745_v14 = vld [vmem:[#allocation3 + $0x55c] sm:$0xf0]  ;;  %v1558_v7 = vadd.f32 %v1557_v6, %v8322_v40  ;;  %v2404_v40 = vld [vmem:[%s10639_s4 + $0xa8] sm:$0xff]  ;;  %v7189_v6 = vor.u32 %v7753_v8, %v7188_v29 }
 0x174   :  { %10698 = vst [vmem:[#allocation64_spill] sm:$0xff] %v8791_v55  ;;  %v7156_v55 = vld [vmem:[#allocation3 + $0x540] sm:$0xf] }
 0x175   :  { %6440 = vmatmul.msk.bf16.gmra.mxu0 %vm1285_vm0, %v7531_v53 }
 0x178   :  { %2504 = vperm.xlu1 %7846, %v2394_v9   ;;  %v2396_v9 = vld [vmem:[%s10639_s4 + $0x68] sm:$0xff] }
 0x179   :  { %2499 = vperm.xlu0 %7845, %v2393_v21   ;;  %2509 = vperm.xlu2 %7847, %v2395_v31   ;;  %v2398_v21 = vld [vmem:[%s10639_s4 + $0x78] sm:$0xff]  ;;  %v6645_v31 = vor.u32 %v7617_v50, %v6644_v13  ;;  %v8829_v62 = vpop.f32.mrf.mxu3 }
 0x17a   :  { %v8807_v12 = vpop.permute.xlu1 %794  ;;  %v1559_v0 = vpop.f32.mrf.mxu0 }
 0x17b   :  { %10699 = vst [vmem:[#allocation65_spill] sm:$0xff] %v8807_v12  ;;  %v8809_v53 = vpop.permute.xlu0 %789  ;;  %v8811_v45 = vpop.permute.xlu2 %844  ;;  %v7157_v12 = vor.u32 %v7745_v14, %v7156_v55  ;;  %v2399_v14 = vld [vmem:[%s10639_s4 + $0x80] sm:$0xff]  ;;  %v2401_v55 = vld [vmem:[%s10639_s4 + $0x90] sm:$0xff]  ;;  %v1560_v13 = vadd.f32 %v1559_v0, %v8262_v57  ;;  %v1555_v57 = vadd.f32 %v8773_v39, %v8324_v41  ;;  %v1835_v41 = vmul.f32 0.2, %v1558_v7 }
 0x17c   :  { %10700 = vst [vmem:[#allocation66_spill] sm:$0xff] %v8809_v53  ;;  %v7532_v53 = vld [vmem:[%s10636_s1 + $0xb8] sm:$0xff]  ;;  %v2403_v0 = vld [vmem:[%s10639_s4 + $0xa0] sm:$0xff] }
 0x17d   :  { %v1834_v35 = vmul.f32 0.2, %v1555_v57 }
 0x180   :  { %2519 = vperm.xlu1 %7846, %v2397_v37   ;;  %v2400_v37 = vld [vmem:[%s10639_s4 + $0x88] sm:$0xff] }
 0x181   :  { %2514 = vperm.xlu0 %7845, %v2396_v9   ;;  %2524 = vperm.xlu2 %7847, %v2398_v21   ;;  %v6676_v9 = vld [vmem:[#allocation3 + $0x180] sm:$0xf] }
 0x182   :  { %v8825_v49 = vpop.permute.xlu1 %809  ;;  %v1562_v4 = vpop.f32.mrf.mxu0  ;;  %4080 = vmatmul.bf16.gmra.mxu1 %v6645_v31  ;;  %4160 = vmatmul.bf16.gmra.mxu2 %v7157_v12 }
 0x183   :  { %v8827_v19 = vpop.permute.xlu0 %804  ;;  %v8831_v48 = vpop.permute.xlu2 %859  ;;  %v1563_v12 = vadd.f32 %v1562_v4, %v8343_v52 }
 0x184   :  { %v8853_v4 = vpop.f32.mrf.mxu3 }
 0x185   :  { %6441 = vmatmul.msk.bf16.gmra.mxu0 %vm1285_vm0, %v7532_v53  ;;  %v1837_v23 = vmul.f32 0.2, %v1563_v12 }
 0x187   :  { %v1965_v39 = vmax.f32 %v1563_v12, %v1837_v23 }
 0x188   :  { %2534 = vperm.xlu1 %7846, %v2400_v37   ;;  %v2402_v37 = vld [vmem:[%s10639_s4 + $0x98] sm:$0xff] }
 0x189   :  { %2529 = vperm.xlu0 %7845, %v2399_v14   ;;  %2539 = vperm.xlu2 %7847, %v2401_v55   ;;  %v1836_v14 = vmul.f32 0.2, %v1560_v13 }
 0x18a   :  { %v8845_v53 = vpop.permute.xlu1 %824  ;;  %v1564_v31 = vpop.f32.mrf.mxu0 }
 0x18b   :  { %v8847_v50 = vpop.permute.xlu0 %819  ;;  %v8849_v21 = vpop.permute.xlu2 %874  ;;  %v1565_v52 = vadd.f32 %v1564_v31, %v8341_v51  ;;  %v6677_v51 = vor.u32 %v7625_v22, %v6676_v9  ;;  %v1553_v31 = vadd.f32 %v8753_v2, %v8244_v43  ;;  %v1964_v23 = vmax.f32 %v1560_v13, %v1836_v14  ;;  %v2405_v13 = vld [vmem:[%s10639_s4 + $0xb0] sm:$0xff] }
 0x18c   :  { %10701 = vst [vmem:[#allocation67_spill] sm:$0xff] %v8849_v21  ;;  %v1548_v2 = vadd.f32 %v8713_v16, %v8301_v27  ;;  %v1963_v9 = vmax.f32 %v1558_v7, %v1835_v41  ;;  %v1962_v27 = vmax.f32 %v1555_v57, %v1834_v35  ;;  %v1762_v16 = vpop.f32.mrf.mxu3  ;;  %v7761_v35 = vld [vmem:[#allocation3 + $0x5dc] sm:$0xf0] }
 0x18d   :  { %v1838_v55 = vmul.f32 0.2, %v1565_v52  ;;  %v1833_v12 = vmul.f32 0.2, %v1553_v31 }
 0x18e   :  { %v1831_v7 = vmul.f32 0.2, %v1548_v2 }
 0x18f   :  { %v1966_v21 = vmax.f32 %v1565_v52, %v1838_v55  ;;  %v2077_v52 = vpack.c.bf16 %v1964_v23, %v1963_v9  ;;  %v2410_v9 = vld [vmem:[%s10639_s4 + $0xd8] sm:$0xff] }
 0x190   :  { %2549 = vperm.xlu1 %7846, %v2403_v0   ;;  %v1961_v0 = vmax.f32 %v1553_v31, %v1833_v12  ;;  %v1959_v57 = vmax.f32 %v1548_v2, %v1831_v7 }
 0x191   :  { %2544 = vperm.xlu0 %7845, %v2402_v37   ;;  %2554 = vperm.xlu2 %7847, %v2404_v40   ;;  %v2078_v43 = vpack.c.bf16 %v1966_v21, %v1965_v39  ;;  %v2407_v21 = vld [vmem:[%s10639_s4 + $0xc0] sm:$0xff]  ;;  %v1960_v40 = vmax.f32 %v1550_v20, %v1832_v58  ;;  %v2408_v20 = vld [vmem:[%s10639_s4 + $0xc8] sm:$0xff]  ;;  %v1763_v58 = vadd.f32 %v1762_v16, %v8831_v48 }
 0x192   :  { %v8873_v60 = vpop.permute.xlu1 %839  ;;  %4085 = vmatmul.bf16.gmra.mxu1 %v6677_v51  ;;  %4165 = vmatmul.bf16.gmra.mxu2 %v7189_v6  ;;  %v1567_v8 = vpop.f32.mrf.mxu0  ;;  %v2076_v55 = vpack.c.bf16 %v1962_v27, %v1961_v0  ;;  %v6708_v51 = vld [vmem:[#allocation3 + $0x1c0] sm:$0xf] }
 0x193   :  { %v8875_v22 = vpop.permute.xlu0 %834  ;;  %v8877_v29 = vpop.permute.xlu2 %889  ;;  %4216 = vmatpush.bf16.msrb.mxu2 %v2078_v43  ;;  %v7633_v39 = vld [vmem:[#allocation3 + $0x1dc] sm:$0xf0]  ;;  %v2075_v12 = vpack.c.bf16 %v1960_v40, %v1959_v57  ;;  %v1917_v16 = vmul.f32 0.2, %v1763_v58 }
 0x194   :  { %v7220_v43 = vld [vmem:[#allocation3 + $0x5c0] sm:$0xf] }
 0x195   :  { %6442 = vmatmul.msk.bf16.gmra.mxu0 %vm1285_vm0, %v7533_v63  ;;  %v1568_v63 = vadd.f32 %v1567_v8, %v8286_v17  ;;  %v2409_v17 = vld [vmem:[%s10639_s4 + $0xd0] sm:$0xff]  ;;  %v7221_v2 = vor.u32 %v7761_v35, %v7220_v43  ;;  %v2411_v43 = vld [vmem:[%s10639_s4 + $0xe0] sm:$0xff]  ;;  %v2045_v35 = vmax.f32 %v1763_v58, %v1917_v16 }
 0x197   :  { %4217 = vmatpush.bf16.msrb.mxu2 %v2077_v52  ;;  %v1839_v23 = vmul.f32 0.2, %v1568_v63  ;;  %v7534_v52 = vld [vmem:[%s10636_s1 + $0xc8] sm:$0xff] }
 0x198   :  { %2564 = vperm.xlu1 %7846, %v2406_v26   ;;  %v6709_v26 = vor.u32 %v7633_v39, %v6708_v51  ;;  %v1755_v39 = vadd.f32 %v8805_v54, %v8811_v45 }
 0x199   :  { %2559 = vperm.xlu0 %7845, %v2405_v13   ;;  %2569 = vperm.xlu2 %7847, %v2407_v21   ;;  %v1764_v21 = vpop.f32.mrf.mxu3 }
 0x19a   :  { %v855_v37 = vpop.permute.xlu1 %854  ;;  %v1569_v41 = vpop.f32.mrf.mxu0 }
 0x19b   :  { %v850_v14 = vpop.permute.xlu0 %849  ;;  %v8892_v6 = vpop.permute.xlu2 %904  ;;  %v1570_v31 = vadd.f32 %v1569_v41, %v8366_v18  ;;  %4218 = vmatpush.bf16.msrb.mxu2 %v2076_v55  ;;  %v1967_v18 = vmax.f32 %v1568_v63, %v1839_v23  ;;  %v1760_v27 = vadd.f32 %v8853_v4, %v855_v37  ;;  %v1753_v4 = vadd.f32 %v8781_v11, %v8873_v60 }
 0x19c   :  { %v1758_v7 = vadd.f32 %v8829_v62, %v850_v14  ;;  %v2412_v62 = vld [vmem:[%s10639_s4 + $0xe8] sm:$0xff]  ;;  %v8933_v23 = vadd.f32 %v8755_v24, %v8875_v22  ;;  %v1748_v24 = vadd.f32 %v8725_v3, %v8793_v36 }
 0x19d   :  { %v1840_v8 = vmul.f32 0.2, %v1570_v31  ;;  %v1916_v37 = vmul.f32 0.2, %v1760_v27  ;;  %v1913_v11 = vmul.f32 0.2, %v1753_v4 }
 0x19e   :  { %v1915_v14 = vmul.f32 0.2, %v1758_v7  ;;  %v1912_v36 = vmul.f32 0.2, %v8933_v23 }
 0x19f   :  { %4219 = vmatpush.bf16.msrb.mxu2 %v2075_v12  ;;  %v1968_v13 = vmax.f32 %v1570_v31, %v1840_v8  ;;  %v2044_v54 = vmax.f32 %v1760_v27, %v1916_v37 }
 0x1a0   :  { %2579 = vperm.xlu1 %7846, %v2409_v17   ;;  %v2043_v31 = vmax.f32 %v1758_v7, %v1915_v14  ;;  %v1914_v17 = vmul.f32 0.2, %v1755_v39  ;;  %v2040_v14 = vmax.f32 %v8933_v23, %v1912_v36  ;;  %v7284_v36 = vld [vmem:[#allocation3 + $0x640] sm:$0xf] }
 0x1a1   :  { %2574 = vperm.xlu0 %7845, %v2408_v20   ;;  %2584 = vperm.xlu2 %7847, %v2410_v9   ;;  %v8912_v48 = vpack.c.bf16 %v1968_v13, %v1967_v18  ;;  %v6740_v20 = vld [vmem:[#allocation3 + $0x200] sm:$0xf] }
 0x1a2   :  { %v8910_v0 = vpop.permute.xlu1 %869  ;;  %4090 = vmatmul.bf16.gmra.mxu1 %v6709_v26  ;;  %4170 = vmatmul.bf16.gmra.mxu2 %v7221_v2  ;;  %v1572_v51 = vpop.f32.mrf.mxu0  ;;  %v7252_v9 = vld [vmem:[#allocation3 + $0x600] sm:$0xf]  ;;  %v1745_v2 = vadd.f32 %v8577_v34, %v8845_v53  ;;  %v2117_v3 = vpack.c.bf16 %v2044_v54, %v2043_v31  ;;  %v2414_v34 = vld [vmem:[%s10639_s4 + $0xf8] sm:$0xff]  ;;  %v2042_v7 = vmax.f32 %v1755_v39, %v1914_v17 }
 0x1a3   :  { %v865_v55 = vpop.permute.xlu0 %864  ;;  %v8914_v40 = vpop.permute.xlu2 %919  ;;  %4220 = vmatpush.bf16.msrb.mxu2 %v8709_v42  ;;  %v2413_v42 = vld [vmem:[%s10639_s4 + $0xf0] sm:$0xff]  ;;  %v1573_v60 = vadd.f32 %v1572_v51, %v8364_v10  ;;  %v7769_v26 = vld [vmem:[#allocation3 + $0x61c] sm:$0xf0]  ;;  %v2418_v54 = vld [vmem:[%s10639_s4 + $0x118] sm:$0xff] }
 0x1a4   :  { %v1765_v63 = vadd.f32 %v1764_v21, %v865_v55  ;;  %v2415_v13 = vld [vmem:[%s10639_s4 + $0x100] sm:$0xff]  ;;  %v2041_v21 = vmax.f32 %v1753_v4, %v1913_v11  ;;  %v7253_v53 = vor.u32 %v7769_v26, %v7252_v9  ;;  %v1738_v55 = vadd.f32 %v8468_v61, %v8825_v49 }
 0x1a5   :  { %6443 = vmatmul.msk.bf16.gmra.mxu0 %vm1285_vm0, %v7534_v52  ;;  %v1841_v58 = vmul.f32 0.2, %v1573_v60  ;;  %v1743_v52 = vadd.f32 %v8552_v25, %v8847_v50  ;;  %v1911_v25 = vmul.f32 0.2, %v1748_v24  ;;  %v1740_v49 = vadd.f32 %v8488_v59, %v8771_v30  ;;  %v6772_v26 = vld [vmem:[#allocation3 + $0x240] sm:$0xf] }
 0x1a6   :  { %v1918_v41 = vmul.f32 0.2, %v1765_v63  ;;  %v2116_v37 = vpack.c.bf16 %v2042_v7, %v2041_v21  ;;  %v1907_v23 = vmul.f32 0.2, %v1738_v55 }
 0x1a7   :  { %4221 = vmatpush.bf16.msrb.mxu2 %v8671_v56  ;;  %v7641_v56 = vld [vmem:[#allocation3 + $0x21c] sm:$0xf0]  ;;  %v1969_v16 = vmax.f32 %v1573_v60, %v1841_v58  ;;  %v1909_v4 = vmul.f32 0.2, %v1743_v52  ;;  %v1908_v31 = vmul.f32 0.2, %v1740_v49 }
 0x1a8   :  { %v2046_v57 = vmax.f32 %v1765_v63, %v1918_v41  ;;  %2594 = vperm.xlu1 %7846, %v2412_v62   ;;  %v7535_v63 = vld [vmem:[%s10636_s1 + $0xd0] sm:$0xff]  ;;  %v1910_v62 = vmul.f32 0.2, %v1745_v2 }
 0x1a9   :  { %2589 = vperm.xlu0 %7845, %v2411_v43   ;;  %2599 = vperm.xlu2 %7847, %v2413_v42   ;;  %v2039_v42 = vmax.f32 %v1748_v24, %v1911_v25  ;;  %v2037_v59 = vmax.f32 %v1743_v52, %v1909_v4  ;;  %v7649_v52 = vld [vmem:[#allocation3 + $0x25c] sm:$0xf0]  ;;  %v2422_v25 = vld [vmem:[%s10639_s4 + $0x138] sm:$0xff] }
 0x1aa   :  { %v2118_v45 = vpack.c.bf16 %v2046_v57, %v2045_v35  ;;  %v8937_v8 = vpop.permute.xlu1 %884  ;;  %v1574_v10 = vpop.f32.mrf.mxu0  ;;  %v1735_v35 = vadd.f32 %v8434_v5, %v8827_v19  ;;  %v2038_v30 = vmax.f32 %v1745_v2, %v1910_v62  ;;  %v2417_v5 = vld [vmem:[%s10639_s4 + $0x110] sm:$0xff]  ;;  %v2419_v19 = vld [vmem:[%s10639_s4 + $0x120] sm:$0xff] }
 0x1ab   :  { %v8939_v12 = vpop.permute.xlu0 %879  ;;  %v8943_v22 = vpop.permute.xlu2 %934  ;;  %v1575_v18 = vadd.f32 %v1574_v10, %v8303_v28  ;;  %4222 = vmatpush.bf16.msrb.mxu2 %v8633_v1  ;;  %v2416_v28 = vld [vmem:[%s10639_s4 + $0x108] sm:$0xff]  ;;  %v6741_v1 = vor.u32 %v7641_v56, %v6740_v20  ;;  %v2115_v11 = vpack.c.bf16 %v2040_v14, %v2039_v42 }
 0x1ac   :  { %5061 = vmatpush.bf16.msrb.mxu0 %v2118_v45  ;;  %v1733_v45 = vadd.f32 %v8404_v38, %v8751_v46  ;;  %v1906_v24 = vmul.f32 0.2, %v1735_v35  ;;  %v2114_v10 = vpack.c.bf16 %v2038_v30, %v2037_v59  ;;  %v2035_v38 = vmax.f32 %v1738_v55, %v1907_v23  ;;  %v2424_v42 = vld [vmem:[%s10639_s4 + $0x148] sm:$0xff]  ;;  %v2425_v23 = vld [vmem:[%s10639_s4 + $0x150] sm:$0xff] }
 0x1ad   :  { %v1842_v27 = vmul.f32 0.2, %v1575_v18 }
 0x1ae   :  { %v1905_v46 = vmul.f32 0.2, %v1733_v45 }
 0x1af   :  { %v4056_v50 = vpop.f32.mrf.mxu1  ;;  %4223 = vmatpush.bf16.msrb.mxu2 %v8587_v15  ;;  %v1970_v51 = vmax.f32 %v1575_v18, %v1842_v27  ;;  %v2036_v18 = vmax.f32 %v1740_v49, %v1908_v31 }
 0x1b0   :  { %5062 = vmatpush.bf16.msrb.mxu0 %v2117_v3  ;;  %2609 = vperm.xlu1 %7846, %v2415_v13   ;;  %v7777_v3 = vld [vmem:[#allocation3 + $0x65c] sm:$0xf0]  ;;  %v2033_v55 = vmax.f32 %v1733_v45, %v1905_v46 }
 0x1b1   :  { %2604 = vperm.xlu0 %7845, %v2414_v34   ;;  %2614 = vperm.xlu2 %7847, %v2416_v28   ;;  %v8972_v61 = vpack.c.bf16 %v1970_v51, %v1969_v16  ;;  %v2113_v27 = vpack.c.bf16 %v2036_v18, %v2035_v38  ;;  %v2421_v34 = vld [vmem:[%s10639_s4 + $0x130] sm:$0xff]  ;;  %v2034_v28 = vmax.f32 %v1735_v35, %v1906_v24  ;;  %v2423_v35 = vld [vmem:[%s10639_s4 + $0x140] sm:$0xff]  ;;  %v2428_v18 = vld [vmem:[%s10639_s4 + $0x168] sm:$0xff] }
 0x1b2   :  { %v8968_v41 = vpop.permute.xlu1 %899  ;;  %4095 = vmatmul.bf16.gmra.mxu1 %v6741_v1  ;;  %4175 = vmatmul.bf16.gmra.mxu2 %v7253_v53  ;;  %v1577_v43 = vpop.f32.mrf.mxu0  ;;  %v2420_v53 = vld [vmem:[%s10639_s4 + $0x128] sm:$0xff]  ;;  %v7285_v7 = vor.u32 %v7777_v3, %v7284_v36  ;;  %v7316_v24 = vld [vmem:[#allocation3 + $0x680] sm:$0xf] }
 0x1b3   :  { %v8970_v39 = vpop.permute.xlu0 %894  ;;  %v2450_v15 = vpop.permute.xlu2 %2449  ;;  %v1578_v20 = vadd.f32 %v1577_v43, %v8386_v33  ;;  %v2112_v62 = vpack.c.bf16 %v2034_v28, %v2033_v55  ;;  %v2430_v55 = vld [vmem:[%s10639_s4 + $0x178] sm:$0xff] }
 0x1b4   :  { %5063 = vmatpush.bf16.msrb.mxu0 %v2116_v37  ;;  %v8978_v57 = vadd.f32 %v4056_v50, %v2450_v15  ;;  %v6773_v50 = vor.u32 %v7649_v52, %v6772_v26  ;;  %v2427_v26 = vld [vmem:[%s10639_s4 + $0x160] sm:$0xff] }
 0x1b5   :  { %6444 = vmatmul.msk.bf16.gmra.mxu0 %vm1285_vm0, %v7535_v63  ;;  %v8981_v60 = vpop.f32.mrf.mxu2  ;;  %v1843_v33 = vmul.f32 0.2, %v1578_v20  ;;  %v7536_v63 = vld [vmem:[%s10636_s1 + $0xd8] sm:$0xff] }
 0x1b6   :  { %10702 = vst [vmem:[#allocation68_spill] sm:$0xff] %v8981_v60  ;;  %v7540_v60 = vld [vmem:[%s10636_s1 + $0xf8] sm:$0xff] }
 0x1b7   :  { %v8994_v17 = vpop.f32.mrf.mxu1  ;;  %v1971_v16 = vmax.f32 %v1578_v20, %v1843_v33  ;;  %v7657_v20 = vld [vmem:[#allocation3 + $0x29c] sm:$0xf0] }
 0x1b8   :  { %5064 = vmatpush.bf16.msrb.mxu0 %v2115_v11  ;;  %2624 = vperm.xlu1 %7846, %v2418_v54  }
 0x1b9   :  { %2619 = vperm.xlu0 %7845, %v2417_v5   ;;  %2629 = vperm.xlu2 %7847, %v2419_v19   ;;  %v6804_v5 = vld [vmem:[#allocation3 + $0x280] sm:$0xf] }
 0x1ba   :  { %v8997_v56 = vpop.permute.xlu1 %914  ;;  %v1579_v58 = vpop.f32.mrf.mxu0  ;;  %v6805_v52 = vor.u32 %v7657_v20, %v6804_v5  ;;  %v7793_v5 = vld [vmem:[#allocation3 + $0x6dc] sm:$0xf0]  ;;  %v2433_v20 = vld [vmem:[%s10639_s4 + $0x190] sm:$0xff] }
 0x1bb   :  { %v8999_v9 = vpop.permute.xlu0 %909  ;;  %v2465_v2 = vpop.permute.xlu2 %2464  ;;  %v1580_v13 = vadd.f32 %v1579_v58, %v8384_v32  ;;  %v2426_v58 = vld [vmem:[%s10639_s4 + $0x158] sm:$0xff] }
 0x1bc   :  { %5065 = vmatpush.bf16.msrb.mxu0 %v2114_v10  ;;  %v7785_v10 = vld [vmem:[#allocation3 + $0x69c] sm:$0xf0] }
 0x1bd   :  { %v9002_v21 = vpop.f32.mrf.mxu2  ;;  %v1844_v1 = vmul.f32 0.2, %v1580_v13  ;;  %v7317_v36 = vor.u32 %v7785_v10, %v7316_v24  ;;  %v2432_v24 = vld [vmem:[%s10639_s4 + $0x188] sm:$0xff]  ;;  %v2434_v10 = vld [vmem:[%s10639_s4 + $0x198] sm:$0xff] }
 0x1be   :  { %10703 = vst [vmem:[#allocation69_spill] sm:$0xff] %v9002_v21 }
 0x1bf   :  { %v4061_v32 = vpop.f32.mrf.mxu1  ;;  %v1972_v51 = vmax.f32 %v1580_v13, %v1844_v1 }
 0x1c0   :  { %5066 = vmatpush.bf16.msrb.mxu0 %v2113_v27  ;;  %2639 = vperm.xlu1 %7846, %v2421_v34  }
 0x1c1   :  { %2634 = vperm.xlu0 %7845, %v2420_v53   ;;  %2644 = vperm.xlu2 %7847, %v2422_v25   ;;  %v9020_v14 = vpack.c.bf16 %v1972_v51, %v1971_v16 }
 0x1c2   :  { %v9016_v4 = vpop.permute.xlu1 %929  ;;  %4100 = vmatmul.bf16.gmra.mxu1 %v6773_v50  ;;  %4180 = vmatmul.bf16.gmra.mxu2 %v7285_v7  ;;  %v1582_v15 = vpop.f32.mrf.mxu0 }
 0x1c3   :  { %v9018_v37 = vpop.permute.xlu0 %924  ;;  %v9022_v49 = vpop.permute.xlu2 %2479  ;;  %v1583_v54 = vadd.f32 %v1582_v15, %v8328_v44 }
 0x1c4   :  { %5067 = vmatpush.bf16.msrb.mxu0 %v2112_v62  ;;  %v6836_v62 = vld [vmem:[#allocation3 + $0x2c0] sm:$0xf] }
 0x1c5   :  { %6445 = vmatmul.msk.bf16.gmra.mxu0 %vm1285_vm0, %v7536_v63  ;;  %v9025_v43 = vpop.f32.mrf.mxu2  ;;  %v1845_v38 = vmul.f32 0.2, %v1583_v54 }
 0x1c6   :  { %10704 = vst [vmem:[#allocation70_spill] sm:$0xff] %v9025_v43 }
 0x1c7   :  { %v4063_v11 = vpop.f32.mrf.mxu1  ;;  %v1973_v33 = vmax.f32 %v1583_v54, %v1845_v38  ;;  %v7348_v54 = vld [vmem:[#allocation3 + $0x6c0] sm:$0xf] }
 0x1c8   :  { %v9037_v59 = vadd.f32 %v4063_v11, %v2465_v2  ;;  %2654 = vperm.xlu1 %7846, %v2424_v42   ;;  %v7665_v11 = vld [vmem:[#allocation3 + $0x2dc] sm:$0xf0] }
 0x1c9   :  { %2649 = vperm.xlu0 %7845, %v2423_v35   ;;  %2659 = vperm.xlu2 %7847, %v2425_v23   ;;  %v6837_v38 = vor.u32 %v7665_v11, %v6836_v62  ;;  %v7380_v62 = vld [vmem:[#allocation3 + $0x700] sm:$0xf] }
 0x1ca   :  { %10705 = vst [vmem:[#allocation71_spill] sm:$0xff] %v9037_v59  ;;  %v9039_v30 = vpop.permute.xlu1 %944  ;;  %v1584_v31 = vpop.f32.mrf.mxu0  ;;  %v7801_v11 = vld [vmem:[#allocation3 + $0x71c] sm:$0xf0] }
 0x1cb   :  { %v9041_v45 = vpop.permute.xlu0 %939  ;;  %v9043_v19 = vpop.permute.xlu2 %2494  ;;  %v1585_v46 = vadd.f32 %v1584_v31, %v8412_v47  ;;  %v7537_v47 = vld [vmem:[%s10636_s1 + $0xe0] sm:$0xff] }
 0x1cc   :  { %10706 = vst [vmem:[#allocation72_spill] sm:$0xff] %v9043_v19  ;;  %v10739_v19 = vld [vmem:[#allocation17_spill] sm:$0xff] }
 0x1cd   :  { %v9046_v44 = vpop.f32.mrf.mxu2  ;;  %v1846_v2 = vmul.f32 0.2, %v1585_v46 }
 0x1ce   :  { %10707 = vst [vmem:[#allocation73_spill] sm:$0xff] %v9046_v44 }
 0x1cf   :  { %v4066_v3 = vpop.f32.mrf.mxu1  ;;  %v1974_v13 = vmax.f32 %v1585_v46, %v1846_v2  ;;  %v7349_v46 = vor.u32 %v7793_v5, %v7348_v54  ;;  %v2439_v5 = vld [vmem:[%s10639_s4 + $0x1c0] sm:$0xff] }
 0x1d0   :  { %2669 = vperm.xlu1 %7846, %v2427_v26  }
 0x1d1   :  { %2664 = vperm.xlu0 %7845, %v2426_v58   ;;  %2674 = vperm.xlu2 %7847, %v2428_v18   ;;  %v9060_v28 = vpack.c.bf16 %v1974_v13, %v1973_v33  ;;  %v7538_v58 = vld [vmem:[%s10636_s1 + $0xe8] sm:$0xff]  ;;  %v2437_v13 = vld [vmem:[%s10639_s4 + $0x1b0] sm:$0xff] }
 0x1d2   :  { %v2460_v27 = vpop.permute.xlu1 %2459  ;;  %4105 = vmatmul.bf16.gmra.mxu1 %v6805_v52  ;;  %4185 = vmatmul.bf16.gmra.mxu2 %v7317_v36  ;;  %v9069_v50 = vpop.f32.mrf.mxu0 }
 0x1d3   :  { %v2455_v34 = vpop.permute.xlu0 %2454  ;;  %v9062_v1 = vadd.f32 %v4061_v32, %v2460_v27  ;;  %v9067_v25 = vpop.permute.xlu2 %2509  ;;  %v2429_v32 = vld [vmem:[%s10639_s4 + $0x170] sm:$0xff] }
 0x1d4   :  { %v9065_v53 = vadd.f32 %v8994_v17, %v2455_v34  ;;  %v2431_v17 = vld [vmem:[%s10639_s4 + $0x180] sm:$0xff] }
 0x1d5   :  { %10708 = vst [vmem:[#allocation74_spill] sm:$0xff] %v9062_v1  ;;  %6446 = vmatmul.msk.bf16.gmra.mxu0 %vm1285_vm0, %v7537_v47  ;;  %v9072_v7 = vpop.f32.mrf.mxu2  ;;  %v2435_v47 = vld [vmem:[%s10639_s4 + $0x1a0] sm:$0xff] }
 0x1d7   :  { %v4068_v16 = vpop.f32.mrf.mxu1 }
 0x1d8   :  { %2684 = vperm.xlu1 %7846, %v2430_v55  }
 0x1d9   :  { %2679 = vperm.xlu0 %7845, %v2429_v32   ;;  %2689 = vperm.xlu2 %7847, %v2431_v17   ;;  %v6868_v17 = vld [vmem:[#allocation3 + $0x300] sm:$0xf] }
 0x1da   :  { %v2475_v63 = vpop.permute.xlu1 %2474  ;;  %v9089_v23 = vpop.f32.mrf.mxu0 }
 0x1db   :  { %v2470_v51 = vpop.permute.xlu0 %2469  ;;  %v9083_v15 = vadd.f32 %v4068_v16, %v2475_v63  ;;  %v9087_v35 = vpop.permute.xlu2 %2524 }
 0x1dc   :  { %v9085_v42 = vadd.f32 %v4066_v3, %v2470_v51  ;;  %10711 = vst [vmem:[#allocation77_spill] sm:$0xff] %v9087_v35  ;;  %v7673_v51 = vld [vmem:[#allocation3 + $0x31c] sm:$0xf0]  ;;  %v9218_v35 = vpop.f32.mrf.mxu3 }
 0x1dd   :  { %10709 = vst [vmem:[#allocation75_spill] sm:$0xff] %v9083_v15  ;;  %v9091_v31 = vpop.f32.mrf.mxu2 }
 0x1de   :  { %10710 = vst [vmem:[#allocation76_spill] sm:$0xff] %v9085_v42 }
 0x1df   :  { %10712 = vst [vmem:[#allocation78_spill] sm:$0xff] %v9091_v31  ;;  %v4071_v26 = vpop.f32.mrf.mxu1  ;;  %v2445_v31 = vld [vmem:[%s10639_s4 + $0x1f0] sm:$0xff] }
 0x1e0   :  { %v9103_v2 = vadd.f32 %v4071_v26, %v9022_v49  ;;  %2699 = vperm.xlu1 %7846, %v2433_v20   ;;  %v2436_v49 = vld [vmem:[%s10639_s4 + $0x1a8] sm:$0xff]  ;;  %v2438_v20 = vld [vmem:[%s10639_s4 + $0x1b8] sm:$0xff] }
 0x1e1   :  { %2694 = vperm.xlu0 %7845, %v2432_v24   ;;  %2704 = vperm.xlu2 %7847, %v2434_v10   ;;  %v2440_v24 = vld [vmem:[%s10639_s4 + $0x1c8] sm:$0xff]  ;;  %v6869_v10 = vor.u32 %v7673_v51, %v6868_v17  ;;  %v2441_v17 = vld [vmem:[%s10639_s4 + $0x1d0] sm:$0xff]  ;;  %v2443_v51 = vld [vmem:[%s10639_s4 + $0x1e0] sm:$0xff] }
 0x1e2   :  { %10713 = vst [vmem:[#allocation79_spill] sm:$0xff] %v9103_v2  ;;  %v2490_v18 = vpop.permute.xlu1 %2489  ;;  %4110 = vmatmul.bf16.gmra.mxu1 %v6837_v38  ;;  %4190 = vmatmul.bf16.gmra.mxu2 %v7349_v46  ;;  %v9110_v3 = vpop.f32.mrf.mxu0  ;;  %v7381_v38 = vor.u32 %v7801_v11, %v7380_v62 }
 0x1e3   :  { %v2485_v52 = vpop.permute.xlu0 %2484  ;;  %v9108_v36 = vpop.permute.xlu2 %2539 }
 0x1e4   :  { %10714 = vst [vmem:[#allocation80_spill] sm:$0xff] %v9108_v36  ;;  %v7444_v36 = vld [vmem:[#allocation3 + $0x780] sm:$0xf] }
 0x1e5   :  { %6447 = vmatmul.msk.bf16.gmra.mxu0 %vm1285_vm0, %v7538_v58  ;;  %v9113_v33 = vpop.f32.mrf.mxu2  ;;  %v7539_v58 = vld [vmem:[%s10636_s1 + $0xf0] sm:$0xff] }
 0x1e6   :  { %10715 = vst [vmem:[#allocation81_spill] sm:$0xff] %v9113_v33 }
 0x1e7   :  { %v4073_v27 = vpop.f32.mrf.mxu1 }
 0x1e8   :  { %v9124_v34 = vadd.f32 %v4073_v27, %v2485_v52  ;;  %2714 = vperm.xlu1 %7846, %v2436_v49   ;;  %v2442_v27 = vld [vmem:[%s10639_s4 + $0x1d8] sm:$0xff] }
 0x1e9   :  { %2709 = vperm.xlu0 %7845, %v2435_v47   ;;  %2719 = vperm.xlu2 %7847, %v2437_v13  }
 0x1ea   :  { %10716 = vst [vmem:[#allocation82_spill] sm:$0xff] %v9124_v34  ;;  %v9126_v55 = vpop.permute.xlu1 %2504  ;;  %v9130_v63 = vpop.f32.mrf.mxu0 }
 0x1eb   :  { %10717 = vst [vmem:[#allocation83_spill] sm:$0xff] %v9126_v55  ;;  %v2500_v32 = vpop.permute.xlu0 %2499  ;;  %v9128_v16 = vpop.permute.xlu2 %2554 }
 0x1ec   :  { %10718 = vst [vmem:[#allocation84_spill] sm:$0xff] %v9128_v16 }
 0x1ed   :  { %v9132_v54 = vpop.f32.mrf.mxu2 }
 0x1ef   :  { %v4076_v46 = vpop.f32.mrf.mxu1 }
 0x1f0   :  { %v9143_v26 = vadd.f32 %v4076_v46, %v2490_v18  ;;  %2729 = vperm.xlu1 %7846, %v2439_v5   ;;  %v7412_v46 = vld [vmem:[#allocation3 + $0x740] sm:$0xf] }
 0x1f1   :  { %2724 = vperm.xlu0 %7845, %v2438_v20   ;;  %2734 = vperm.xlu2 %7847, %v2440_v24   ;;  %v6900_v20 = vld [vmem:[#allocation3 + $0x340] sm:$0xf] }
 0x1f2   :  { %10719 = vst [vmem:[#allocation85_spill] sm:$0xff] %v9143_v26  ;;  %v9148_v52 = vpop.permute.xlu1 %2519  ;;  %4115 = vmatmul.bf16.gmra.mxu1 %v6869_v10  ;;  %4195 = vmatmul.bf16.gmra.mxu2 %v7381_v38  ;;  %v1597_v13 = vpop.f32.mrf.mxu0  ;;  %v7681_v38 = vld [vmem:[#allocation3 + $0x35c] sm:$0xf0]  ;;  %v1593_v26 = vadd.f32 %v9110_v3, %v10739_v19 }
 0x1f3   :  { %v9150_v49 = vpop.permute.xlu0 %2514  ;;  %v9152_v47 = vpop.permute.xlu2 %2569 }
 0x1f4   :  { %10720 = vst [vmem:[#allocation86_spill] sm:$0xff] %v9150_v49 }
 0x1f5   :  { %10721 = vst [vmem:[#allocation87_spill] sm:$0xff] %v9152_v47  ;;  %6448 = vmatmul.msk.bf16.gmra.mxu0 %vm1285_vm0, %v7539_v58  ;;  %v9155_v18 = vpop.f32.mrf.mxu2  ;;  %v7809_v58 = vld [vmem:[#allocation3 + $0x75c] sm:$0xf0] }
 0x1f6   :  { %v7413_v44 = vor.u32 %v7809_v58, %v7412_v46  ;;  %v10730_v46 = vld [vmem:[#allocation15_spill] sm:$0xff] }
 0x1f7   :  { %v9166_v62 = vpop.f32.mrf.mxu1 }
 0x1f8   :  { %10722 = vst [vmem:[#allocation88_spill] sm:$0xff] %v9166_v62  ;;  %2744 = vperm.xlu1 %7846, %v2442_v27   ;;  %v2444_v27 = vld [vmem:[%s10639_s4 + $0x1e8] sm:$0xff]  ;;  %v7541_v62 = vld [vmem:[%s10636_s1 + $0x100] sm:$0xff] }
 0x1f9   :  { %2739 = vperm.xlu0 %7845, %v2441_v17   ;;  %2749 = vperm.xlu2 %7847, %v2443_v51   ;;  %v2446_v17 = vld [vmem:[%s10639_s4 + $0x1f8] sm:$0xff]  ;;  %v6901_v51 = vor.u32 %v7681_v38, %v6900_v20  ;;  %v5529_v38 = vld [vmem:[%s10640_s5 + $0x10] sm:$0xff]  ;;  %s7908_s4 = smov [#allocation6]  }
 0x1fa   :  { %v9168_v11 = vpop.permute.xlu1 %2534  ;;  %v1599_v10 = vpop.f32.mrf.mxu0  ;;  %s6138_s11 = sshll.u32 %s7908_s4, 4  ;;  %s6139_s11 = int_to_ptr.vmem [resolvable:$true] %s6138_s11 }
 0x1fb   :  { %10723 = vst [vmem:[#allocation89_spill] sm:$0xff] %v9168_v11  ;;  %v9170_v5 = vpop.permute.xlu0 %2529  ;;  %v9172_v24 = vpop.permute.xlu2 %2584  ;;  %v7817_v11 = vld [vmem:[#allocation3 + $0x79c] sm:$0xf0] }
 0x1fc   :  { %10724 = vst [vmem:[#allocation90_spill] sm:$0xff] %v9172_v24 }
 0x1fd   :  { %v9174_v33 = vpop.f32.mrf.mxu2 }
 0x1ff   :  { %v4081_v43 = vpop.f32.mrf.mxu1 }
 0x200   :  { %v9185_v21 = vadd.f32 %v4081_v43, %v2500_v32  ;;  %2759 = vperm.xlu1 %7846, %v2445_v31   ;;  %v5528_v31 = vld [vmem:[%s10640_s5 + $0x8] sm:$0xff]  ;;  %v5527_v32 = vld [vmem:[%s10640_s5] sm:$0xff] }
 0x201   :  { %2754 = vperm.xlu0 %7845, %v2444_v27   ;;  %2764 = vperm.xlu2 %7847, %v2446_v17   ;;  %v6932_v27 = vld [vmem:[#allocation3 + $0x380] sm:$0xf]  ;;  %v10732_v17 = vld [vmem:[#allocation18_spill] sm:$0xff] }
 0x202   :  { %10725 = vst [vmem:[#allocation91_spill] sm:$0xff] %v9185_v21  ;;  %v9190_v24 = vpop.permute.xlu1 %2549  ;;  %4120 = vmatmul.bf16.gmra.mxu1 %v6901_v51  ;;  %4200 = vmatmul.bf16.gmra.mxu2 %v7413_v44  ;;  %v1602_v20 = vpop.f32.mrf.mxu0  ;;  %v1600_v51 = vadd.f32 %v1599_v10, %v10732_v17  ;;  %v5531_v10 = vld [vmem:[%s10640_s5 + $0x20] sm:$0xff]  ;;  %v5530_v17 = vld [vmem:[%s10640_s5 + $0x18] sm:$0xff] }
 0x203   :  { %10726 = vst [vmem:[#allocation92_spill] sm:$0xff] %v9190_v24  ;;  %v9192_v47 = vpop.permute.xlu0 %2544  ;;  %v9194_v16 = vpop.permute.xlu2 %2599  ;;  %v1603_v58 = vadd.f32 %v1602_v20, %v10730_v46 }
 0x204   :  { %10727 = vst [vmem:[#allocation93_spill] sm:$0xff] %v9192_v47  ;;  %v7689_v47 = vld [vmem:[#allocation3 + $0x39c] sm:$0xf0] }
 0x205   :  { %10728 = vst [vmem:[#allocation94_spill] sm:$0xff] %v9194_v16  ;;  %6449 = vmatmul.msk.bf16.gmra.mxu0 %vm1285_vm0, %v7540_v60  ;;  %v9197_v43 = vpop.f32.mrf.mxu2  ;;  %v1853_v20 = vmul.f32 0.2, %v1603_v58 }
 0x207   :  { %v9208_v44 = vpop.f32.mrf.mxu1 }
 0x208   :  { %10729 = vst [vmem:[#allocation95_spill] sm:$0xff] %v9208_v44  ;;  %5598 = vperm.xlu1 %7846, %v5528_v31   ;;  %v10735_v31 = vld [vmem:[#allocation10_spill] sm:$0xff] }
 0x209   :  { %5593 = vperm.xlu0 %7845, %v5527_v32   ;;  %5603 = vperm.xlu2 %7847, %v5529_v38   ;;  %v1598_v44 = vadd.f32 %v1597_v13, %v10735_v31  ;;  %v10736_v32 = vld [vmem:[#allocation14_spill] sm:$0xff]  ;;  %v10737_v13 = vld [vmem:[#allocation11_spill] sm:$0xff] }
 0x20a   :  { %v9211_v60 = vpop.permute.xlu1 %2564  ;;  %v1604_v49 = vpop.f32.mrf.mxu0  ;;  %v1595_v31 = vadd.f32 %v9130_v63, %v10737_v13 }
 0x20b   :  { %10731 = vst [vmem:[#allocation15_spill] sm:$0xff] %v9211_v60  ;;  %v9214_v16 = vpop.permute.xlu0 %2559  ;;  %v9216_v24 = vpop.permute.xlu2 %2614  ;;  %v1605_v38 = vadd.f32 %v1604_v49, %v10736_v32  ;;  %v6933_v60 = vor.u32 %v7689_v47, %v6932_v27  ;;  %v1852_v49 = vmul.f32 0.2, %v1600_v51  ;;  %v1851_v34 = vmul.f32 0.2, %v1598_v44 }
 0x20c   :  { %10733 = vst [vmem:[#allocation18_spill] sm:$0xff] %v9214_v16  ;;  %v7445_v16 = vor.u32 %v7817_v11, %v7444_v36  ;;  %v1981_v47 = vmax.f32 %v1603_v58, %v1853_v20  ;;  %v10741_v11 = vld [vmem:[#allocation9_spill] sm:$0xff] }
 0x20d   :  { %10734 = vst [vmem:[#allocation96_spill] sm:$0xff] %v9216_v24  ;;  %v9222_v46 = vpop.f32.mrf.mxu2  ;;  %v5532_v24 = vld [vmem:[%s10640_s5 + $0x28] sm:$0xff]  ;;  %v1854_v32 = vmul.f32 0.2, %v1605_v38 }
 0x20f   :  { %v4086_v55 = vpop.f32.mrf.mxu1  ;;  %v1982_v36 = vmax.f32 %v1605_v38, %v1854_v32  ;;  %v9260_v38 = vpop.f32.mrf.mxu3  ;;  %v10746_v32 = vld [vmem:[#allocation25_spill] sm:$0xff] }
 0x210   :  { %v9236_v21 = vadd.f32 %v4086_v55, %v9067_v25  ;;  %5613 = vperm.xlu1 %7846, %v5531_v10   ;;  %v1590_v25 = vadd.f32 %v9089_v23, %v10741_v11  ;;  %v1850_v55 = vmul.f32 0.2, %v1595_v31  ;;  %v5534_v23 = vld [vmem:[%s10640_s5 + $0x38] sm:$0xff] }
 0x211   :  { %5608 = vperm.xlu0 %7845, %v5530_v17   ;;  %5618 = vperm.xlu2 %7847, %v5532_v24   ;;  %v2086_v13 = vpack.c.bf16 %v1982_v36, %v1981_v47  ;;  %v10744_v24 = vld [vmem:[#allocation12_spill] sm:$0xff] }
 0x212   :  { %10738 = vst [vmem:[#allocation10_spill] sm:$0xff] %v9236_v21  ;;  %v9243_v63 = vpop.permute.xlu1 %2579  ;;  %4125 = vmatmul.bf16.gmra.mxu1 %v6933_v60  ;;  %4205 = vmatmul.bf16.gmra.mxu2 %v7445_v16  ;;  %v1980_v21 = vmax.f32 %v1600_v51, %v1852_v49  ;;  %v1607_v3 = vpop.f32.mrf.mxu0  ;;  %v1588_v58 = vadd.f32 %v9069_v50, %v10744_v24  ;;  %v1849_v60 = vmul.f32 0.2, %v1593_v26  ;;  %v1848_v51 = vmul.f32 0.2, %v1590_v25  ;;  %v5535_v50 = vld [vmem:[%s10640_s5 + $0x40] sm:$0xff] }
 0x213   :  { %10740 = vst [vmem:[#allocation14_spill] sm:$0xff] %v9243_v63  ;;  %v9247_v27 = vpop.permute.xlu0 %2574  ;;  %v2630_v10 = vpop.permute.xlu2 %2629  ;;  %v1979_v16 = vmax.f32 %v1598_v44, %v1851_v34  ;;  %4385 = vmatpush.bf16.msrb.mxu3 %v2086_v13  ;;  %v1978_v34 = vmax.f32 %v1595_v31, %v1850_v55  ;;  %v1608_v47 = vadd.f32 %v1607_v3, %v10746_v32  ;;  %v6964_v24 = vld [vmem:[#allocation3 + $0x3c0] sm:$0xf] }
 0x214   :  { %10742 = vst [vmem:[#allocation11_spill] sm:$0xff] %v9247_v27  ;;  %v9250_v19 = vadd.f32 %v9072_v7, %v2630_v10  ;;  %v5533_v7 = vld [vmem:[%s10640_s5 + $0x30] sm:$0xff]  ;;  %v1847_v44 = vmul.f32 0.2, %v1588_v58  ;;  %v1977_v49 = vmax.f32 %v1593_v26, %v1849_v60  ;;  %v7476_v55 = vld [vmem:[#allocation3 + $0x7c0] sm:$0xf] }
 0x215   :  { %6450 = vmatmul.msk.bf16.gmra.mxu0 %vm1285_vm0, %v7541_v62  ;;  %v9255_v20 = vpop.f32.mrf.mxu2  ;;  %v2085_v17 = vpack.c.bf16 %v1980_v21, %v1979_v16  ;;  %v1976_v21 = vmax.f32 %v1590_v25, %v1848_v51  ;;  %v7697_v16 = vld [vmem:[#allocation3 + $0x3dc] sm:$0xf0]  ;;  %v1855_v3 = vmul.f32 0.2, %v1608_v47  ;;  %v5536_v25 = vld [vmem:[%s10640_s5 + $0x48] sm:$0xff] }
 0x216   :  { %10743 = vst [vmem:[#allocation17_spill] sm:$0xff] %v9250_v19  ;;  %v2084_v13 = vpack.c.bf16 %v1978_v34, %v1977_v49  ;;  %v7825_v26 = vld [vmem:[#allocation3 + $0x7dc] sm:$0xf0]  ;;  %v1975_v60 = vmax.f32 %v1588_v58, %v1847_v44  ;;  %v6965_v51 = vor.u32 %v7697_v16, %v6964_v24  ;;  %v5538_v58 = vld [vmem:[%s10640_s5 + $0x58] sm:$0xff] }
 0x217   :  { %v9265_v62 = vpop.f32.mrf.mxu1  ;;  %4386 = vmatpush.bf16.msrb.mxu3 %v2085_v17  ;;  %v7477_v44 = vor.u32 %v7825_v26, %v7476_v55  ;;  %v9288_v32 = vpop.f32.mrf.mxu3  ;;  %v10787_v63 = vld [vmem:[#allocation13_spill] sm:$0xff] }
 0x218   :  { %10745 = vst [vmem:[#allocation9_spill] sm:$0xff] %v9265_v62  ;;  %5628 = vperm.xlu1 %7846, %v5534_v23   ;;  %v10750_v23 = vld [vmem:[#allocation36_spill] sm:$0xff]  ;;  %v2083_v49 = vpack.c.bf16 %v1976_v21, %v1975_v60  ;;  %v6684_v62 = vld [vmem:[#allocation3 + $0x188] sm:$0xf] }
 0x219   :  { %5623 = vperm.xlu0 %7845, %v5533_v7   ;;  %5633 = vperm.xlu2 %7847, %v5535_v50   ;;  %v5537_v50 = vld [vmem:[%s10640_s5 + $0x50] sm:$0xff] }
 0x21a   :  { %v9271_v36 = vpop.permute.xlu1 %2594  ;;  %v1609_v31 = vpop.f32.mrf.mxu0 }
 0x21b   :  { %10747 = vst [vmem:[#allocation12_spill] sm:$0xff] %v9271_v36  ;;  %v9273_v11 = vpop.permute.xlu0 %2589  ;;  %v2645_v10 = vpop.permute.xlu2 %2644  ;;  %v1610_v7 = vadd.f32 %v1609_v31, %v10750_v23  ;;  %4387 = vmatpush.bf16.msrb.mxu3 %v2084_v13  ;;  %v7542_v13 = vld [vmem:[%s10636_s1 + $0x108] sm:$0xff]  ;;  %v1983_v31 = vmax.f32 %v1608_v47, %v1855_v3  ;;  %v5539_v23 = vld [vmem:[%s10640_s5 + $0x60] sm:$0xff]  ;;  %v7548_v36 = vld [vmem:[%s10636_s1 + $0x138] sm:$0xff] }
 0x21c   :  { %10748 = vst [vmem:[#allocation25_spill] sm:$0xff] %v9273_v11  ;;  %v9276_v19 = vadd.f32 %v9132_v54, %v2645_v10  ;;  %v5540_v3 = vld [vmem:[%s10640_s5 + $0x68] sm:$0xff] }
 0x21d   :  { %v4168_v17 = vpop.f32.mrf.mxu2  ;;  %v1856_v54 = vmul.f32 0.2, %v1610_v7 }
 0x21e   :  { %10749 = vst [vmem:[#allocation97_spill] sm:$0xff] %v9276_v19 }
 0x21f   :  { %v4091_v34 = vpop.f32.mrf.mxu1  ;;  %4388 = vmatpush.bf16.msrb.mxu3 %v2083_v49  ;;  %v1984_v24 = vmax.f32 %v1610_v7, %v1856_v54 }
 0x220   :  { %v9291_v10 = vadd.f32 %v4091_v34, %v9148_v52  ;;  %5643 = vperm.xlu1 %7846, %v5537_v50   ;;  %v10756_v50 = vld [vmem:[#allocation33_spill] sm:$0xff] }
 0x221   :  { %5638 = vperm.xlu0 %7845, %v5536_v25   ;;  %5648 = vperm.xlu2 %7847, %v5538_v58   ;;  %v9300_v26 = vpack.c.bf16 %v1984_v24, %v1983_v31  ;;  %v6486_v31 = vld [vmem:[#allocation3 + $0x20] sm:$0xf0] }
 0x222   :  { %10751 = vst [vmem:[#allocation36_spill] sm:$0xff] %v9291_v10  ;;  %v9296_v21 = vpop.permute.xlu1 %2609  ;;  %4130 = vmatmul.bf16.gmra.mxu1 %v6965_v51  ;;  %4210 = vmatmul.bf16.gmra.mxu2 %v7477_v44  ;;  %v1612_v60 = vpop.f32.mrf.mxu0  ;;  %v5543_v44 = vld [vmem:[%s10640_s5 + $0x80] sm:$0xff] }
 0x223   :  { %10752 = vst [vmem:[#allocation98_spill] sm:$0xff] %v9296_v21  ;;  %v9298_v16 = vpop.permute.xlu0 %2604  ;;  %v2660_v55 = vpop.permute.xlu2 %2659  ;;  %4389 = vmatpush.bf16.msrb.mxu3 %v9060_v28  ;;  %v1613_v25 = vadd.f32 %v1612_v60, %v10756_v50 }
 0x224   :  { %10753 = vst [vmem:[#allocation99_spill] sm:$0xff] %v9298_v16  ;;  %v9303_v52 = vadd.f32 %v9197_v43, %v2660_v55  ;;  %v5541_v43 = vld [vmem:[%s10640_s5 + $0x70] sm:$0xff]  ;;  %v9322_v28 = vpop.f32.mrf.mxu3 }
 0x225   :  { %6451 = vmatmul.msk.bf16.gmra.mxu0 %vm1285_vm0, %v7542_v13  ;;  %v9307_v47 = vpop.f32.mrf.mxu2  ;;  %v7573_v13 = vld [vmem:[#allocation3 + $0x4] sm:$0xf]  ;;  %v1857_v24 = vmul.f32 0.2, %v1613_v25 }
 0x226   :  { %10754 = vst [vmem:[#allocation100_spill] sm:$0xff] %v9303_v52 }
 0x227   :  { %v9315_v7 = vpop.f32.mrf.mxu1  ;;  %4390 = vmatpush.bf16.msrb.mxu3 %v9020_v14  ;;  %v10760_v14 = vld [vmem:[#allocation32_spill] sm:$0xff] }
 0x228   :  { %10755 = vst [vmem:[#allocation101_spill] sm:$0xff] %v9315_v7  ;;  %5658 = vperm.xlu1 %7846, %v5540_v3   ;;  %v6492_v3 = vld [vmem:[#allocation3 + $0x8] sm:$0xf]  ;;  %v10788_v7 = vld [vmem:[#allocation20_spill] sm:$0xff] }
 0x229   :  { %5653 = vperm.xlu0 %7845, %v5539_v23   ;;  %5663 = vperm.xlu2 %7847, %v5541_v43   ;;  %v7578_v23 = vld [vmem:[#allocation3 + $0x24] sm:$0xf0] }
 0x22a   :  { %v9324_v51 = vpop.permute.xlu1 %2624  ;;  %v1614_v58 = vpop.f32.mrf.mxu0 }
 0x22b   :  { %10757 = vst [vmem:[#allocation33_spill] sm:$0xff] %v9324_v51  ;;  %v9326_v54 = vpop.permute.xlu0 %2619  ;;  %v2675_v34 = vpop.permute.xlu2 %2674  ;;  %v1615_v55 = vadd.f32 %v1614_v58, %v10760_v14  ;;  %4391 = vmatpush.bf16.msrb.mxu3 %v8972_v61  ;;  %v6493_v61 = vor.u32 %v7578_v23, %v6492_v3  ;;  %v7543_v58 = vld [vmem:[%s10636_s1 + $0x110] sm:$0xff]  ;;  %v1985_v14 = vmax.f32 %v1613_v25, %v1857_v24 }
 0x22c   :  { %10758 = vst [vmem:[#allocation102_spill] sm:$0xff] %v9326_v54  ;;  %v9328_v49 = vadd.f32 %v4168_v17, %v2675_v34  ;;  %v5542_v17 = vld [vmem:[%s10640_s5 + $0x78] sm:$0xff]  ;;  %v5544_v34 = vld [vmem:[%s10640_s5 + $0x88] sm:$0xff] }
 0x22d   :  { %v9335_v60 = vpop.f32.mrf.mxu2  ;;  %v1858_v43 = vmul.f32 0.2, %v1615_v55 }
 0x22e   :  { %10759 = vst [vmem:[#allocation103_spill] sm:$0xff] %v9328_v49  ;;  %v6489_v49 = vor.u32 %v7573_v13, %v6486_v31 }
 0x22f   :  { %v4096_v50 = vpop.f32.mrf.mxu1  ;;  %4392 = vmatpush.bf16.msrb.mxu3 %v8912_v48  ;;  %v1986_v19 = vmax.f32 %v1615_v55, %v1858_v43  ;;  %v5546_v48 = vld [vmem:[%s10640_s5 + $0x98] sm:$0xff]  ;;  %v10765_v55 = vld [vmem:[#allocation29_spill] sm:$0xff] }
 0x230   :  { %v9344_v52 = vadd.f32 %v4096_v50, %v9170_v5  ;;  %5673 = vperm.xlu1 %7846, %v5543_v44   ;;  %v9356_v5 = vpop.f32.mrf.mxu3 }
 0x231   :  { %5668 = vperm.xlu0 %7845, %v5542_v17   ;;  %5678 = vperm.xlu2 %7847, %v5544_v34   ;;  %v9354_v13 = vpack.c.bf16 %v1986_v19, %v1985_v14  ;;  %v5547_v19 = vld [vmem:[%s10640_s5 + $0xa0] sm:$0xff] }
 0x232   :  { %10761 = vst [vmem:[#allocation32_spill] sm:$0xff] %v9344_v52  ;;  %v9350_v51 = vpop.permute.xlu1 %2639  ;;  %4224 = vmatmul.bf16.vlgmr.msrb.gmra.mxu2 %v6489_v49  ;;  %v1617_v44 = vpop.f32.mrf.mxu0  ;;  %4393 = vmatmul.bf16.vlgmr.msrb.gmra.mxu3 %v6493_v61  ;;  %v5545_v49 = vld [vmem:[%s10640_s5 + $0x90] sm:$0xff]  ;;  %v6518_v14 = vld [vmem:[#allocation3 + $0x60] sm:$0xf0] }
 0x233   :  { %10762 = vst [vmem:[#allocation104_spill] sm:$0xff] %v9350_v51  ;;  %v9352_v54 = vpop.permute.xlu0 %2634  ;;  %v2690_v31 = vpop.permute.xlu2 %2689  ;;  %v1618_v3 = vadd.f32 %v1617_v44, %v10765_v55  ;;  %v5549_v61 = vld [vmem:[%s10640_s5 + $0xb0] sm:$0xff] }
 0x234   :  { %10763 = vst [vmem:[#allocation105_spill] sm:$0xff] %v9352_v54 }
 0x235   :  { %6452 = vmatmul.msk.bf16.gmra.mxu0 %vm1285_vm0, %v7543_v58  ;;  %v4176_v25 = vpop.f32.mrf.mxu2  ;;  %v7581_v58 = vld [vmem:[#allocation3 + $0x44] sm:$0xf] }
 0x236   :  { %v9362_v24 = vadd.f32 %v4176_v25, %v2690_v31  ;;  %v1859_v31 = vmul.f32 0.2, %v1618_v3  ;;  %v10768_v25 = vld [vmem:[#allocation22_spill] sm:$0xff] }
 0x238   :  { %10764 = vst [vmem:[#allocation106_spill] sm:$0xff] %v9362_v24  ;;  %5688 = vperm.xlu1 %7846, %v5546_v48  }
 0x239   :  { %5683 = vperm.xlu0 %7845, %v5545_v49   ;;  %5693 = vperm.xlu2 %7847, %v5547_v19   ;;  %v6524_v49 = vld [vmem:[#allocation3 + $0x48] sm:$0xf] }
 0x23a   :  { %v2655_v23 = vpop.permute.xlu1 %2654  ;;  %v1619_v34 = vpop.f32.mrf.mxu0  ;;  %v7586_v19 = vld [vmem:[#allocation3 + $0x64] sm:$0xf0] }
 0x23b   :  { %v9372_v17 = vadd.f32 %v9174_v33, %v2655_v23  ;;  %v2650_v43 = vpop.permute.xlu0 %2649  ;;  %v1620_v44 = vadd.f32 %v1619_v34, %v10768_v25  ;;  %v9383_v33 = vpop.f32.mrf.mxu3  ;;  %v5550_v23 = vld [vmem:[%s10640_s5 + $0xb8] sm:$0xff]  ;;  %v6525_v24 = vor.u32 %v7586_v19, %v6524_v49  ;;  %v1987_v25 = vmax.f32 %v1618_v3, %v1859_v31  ;;  %v5552_v3 = vld [vmem:[%s10640_s5 + $0xc8] sm:$0xff] }
 0x23c   :  { %v9375_v50 = vadd.f32 %v9155_v18, %v2650_v43  ;;  %v5548_v18 = vld [vmem:[%s10640_s5 + $0xa8] sm:$0xff]  ;;  %v6521_v43 = vor.u32 %v7581_v58, %v6518_v14  ;;  %v7544_v34 = vld [vmem:[%s10636_s1 + $0x118] sm:$0xff] }
 0x23d   :  { %10766 = vst [vmem:[#allocation29_spill] sm:$0xff] %v9372_v17  ;;  %v9381_v48 = vpop.f32.mrf.mxu2  ;;  %v1860_v55 = vmul.f32 0.2, %v1620_v44 }
 0x23e   :  { %10767 = vst [vmem:[#allocation107_spill] sm:$0xff] %v9375_v50 }
 0x23f   :  { %v1988_v17 = vmax.f32 %v1620_v44, %v1860_v55  ;;  %v7589_v55 = vld [vmem:[#allocation3 + $0x84] sm:$0xf] }
 0x240   :  { %5703 = vperm.xlu1 %7846, %v5549_v61  }
 0x241   :  { %5698 = vperm.xlu0 %7845, %v5548_v18   ;;  %5708 = vperm.xlu2 %7847, %v5550_v23   ;;  %v9397_v21 = vpack.c.bf16 %v1988_v17, %v1987_v25  ;;  %v5553_v17 = vld [vmem:[%s10640_s5 + $0xd0] sm:$0xff]  ;;  %v5555_v18 = vld [vmem:[%s10640_s5 + $0xe0] sm:$0xff] }
 0x242   :  { %v2670_v50 = vpop.permute.xlu1 %2669  ;;  %4229 = vmatmul.bf16.gmra.mxu2 %v6521_v43  ;;  %v1622_v61 = vpop.f32.mrf.mxu0  ;;  %4398 = vmatmul.bf16.gmra.mxu3 %v6525_v24  ;;  %v6550_v23 = vld [vmem:[#allocation3 + $0xa0] sm:$0xf0]  ;;  %v10774_v25 = vld [vmem:[#allocation30_spill] sm:$0xff] }
 0x243   :  { %v9395_v51 = vadd.f32 %v9255_v20, %v2670_v50  ;;  %v2665_v54 = vpop.permute.xlu0 %2664  ;;  %v5551_v20 = vld [vmem:[%s10640_s5 + $0xc0] sm:$0xff]  ;;  %v9412_v50 = vpop.f32.mrf.mxu3 }
 0x244   :  { %v9400_v58 = vadd.f32 %v9222_v46, %v2665_v54  ;;  %v10771_v46 = vld [vmem:[#allocation19_spill] sm:$0xff]  ;;  %v2705_v43 = vpop.permute.xlu2 %2704 }
 0x245   :  { %10769 = vst [vmem:[#allocation22_spill] sm:$0xff] %v9395_v51  ;;  %6453 = vmatmul.msk.bf16.gmra.mxu0 %vm1285_vm0, %v7544_v34  ;;  %v4181_v14 = vpop.f32.mrf.mxu2  ;;  %v1623_v54 = vadd.f32 %v1622_v61, %v10771_v46 }
 0x246   :  { %10770 = vst [vmem:[#allocation108_spill] sm:$0xff] %v9400_v58 }
 0x247   :  { %v1861_v34 = vmul.f32 0.2, %v1623_v54 }
 0x248   :  { %5718 = vperm.xlu1 %7846, %v5552_v3  }
 0x249   :  { %5713 = vperm.xlu0 %7845, %v5551_v20   ;;  %5723 = vperm.xlu2 %7847, %v5553_v17   ;;  %v6556_v20 = vld [vmem:[#allocation3 + $0x88] sm:$0xf] }
 0x24a   :  { %v2685_v24 = vpop.permute.xlu1 %2684  ;;  %v1624_v19 = vpop.f32.mrf.mxu0  ;;  %v7594_v17 = vld [vmem:[#allocation3 + $0xa4] sm:$0xf0] }
 0x24b   :  { %v9416_v31 = vadd.f32 %v9335_v60, %v2685_v24  ;;  %v2680_v44 = vpop.permute.xlu0 %2679  ;;  %v1625_v61 = vadd.f32 %v1624_v19, %v10774_v25  ;;  %v5556_v24 = vld [vmem:[%s10640_s5 + $0xe8] sm:$0xff]  ;;  %v7545_v19 = vld [vmem:[%s10636_s1 + $0x120] sm:$0xff]  ;;  %v1989_v25 = vmax.f32 %v1623_v54, %v1861_v34 }
 0x24c   :  { %v9419_v49 = vadd.f32 %v9307_v47, %v2680_v44  ;;  %v5554_v47 = vld [vmem:[%s10640_s5 + $0xd8] sm:$0xff]  ;;  %v6553_v44 = vor.u32 %v7589_v55, %v6550_v23  ;;  %v5559_v34 = vld [vmem:[%s10640_s5 + $0x100] sm:$0xff] }
 0x24d   :  { %10772 = vst [vmem:[#allocation19_spill] sm:$0xff] %v9416_v31  ;;  %v4183_v3 = vpop.f32.mrf.mxu2  ;;  %v1862_v46 = vmul.f32 0.2, %v1625_v61  ;;  %v6557_v31 = vor.u32 %v7594_v17, %v6556_v20  ;;  %v5558_v23 = vld [vmem:[%s10640_s5 + $0xf8] sm:$0xff]  ;;  %v7597_v20 = vld [vmem:[#allocation3 + $0xc4] sm:$0xf] }
 0x24e   :  { %10773 = vst [vmem:[#allocation109_spill] sm:$0xff] %v9419_v49  ;;  %v9425_v60 = vadd.f32 %v4183_v3, %v2705_v43  ;;  %v9436_v3 = vpop.f32.mrf.mxu3  ;;  %v6582_v17 = vld [vmem:[#allocation3 + $0xe0] sm:$0xf0] }
 0x24f   :  { %v1990_v43 = vmax.f32 %v1625_v61, %v1862_v46  ;;  %v5561_v46 = vld [vmem:[%s10640_s5 + $0x110] sm:$0xff] }
 0x250   :  { %10775 = vst [vmem:[#allocation30_spill] sm:$0xff] %v9425_v60  ;;  %5733 = vperm.xlu1 %7846, %v5555_v18  }
 0x251   :  { %5728 = vperm.xlu0 %7845, %v5554_v47   ;;  %5738 = vperm.xlu2 %7847, %v5556_v24   ;;  %v9440_v58 = vpack.c.bf16 %v1990_v43, %v1989_v25  ;;  %v6588_v24 = vld [vmem:[#allocation3 + $0xc8] sm:$0xf]  ;;  %v5562_v43 = vld [vmem:[%s10640_s5 + $0x118] sm:$0xff] }
 0x252   :  { %v2700_v60 = vpop.permute.xlu1 %2699  ;;  %4234 = vmatmul.bf16.gmra.mxu2 %v6553_v44  ;;  %v9445_v55 = vpop.f32.mrf.mxu0  ;;  %4403 = vmatmul.bf16.gmra.mxu3 %v6557_v31  ;;  %v7602_v44 = vld [vmem:[#allocation3 + $0xe4] sm:$0xf0] }
 0x253   :  { %v9438_v49 = vadd.f32 %v4181_v14, %v2700_v60  ;;  %v2695_v51 = vpop.permute.xlu0 %2694  ;;  %v5557_v14 = vld [vmem:[%s10640_s5 + $0xf0] sm:$0xff]  ;;  %v5560_v25 = vld [vmem:[%s10640_s5 + $0x108] sm:$0xff] }
 0x254   :  { %v9443_v18 = vadd.f32 %v9381_v48, %v2695_v51 }
 0x255   :  { %10776 = vst [vmem:[#allocation110_spill] sm:$0xff] %v9438_v49  ;;  %6454 = vmatmul.msk.bf16.gmra.mxu0 %vm1285_vm0, %v7545_v19  ;;  %v4186_v54 = vpop.f32.mrf.mxu2  ;;  %v7547_v49 = vld [vmem:[%s10636_s1 + $0x130] sm:$0xff] }
 0x256   :  { %10777 = vst [vmem:[#allocation111_spill] sm:$0xff] %v9443_v18  ;;  %v9457_v48 = vpop.f32.mrf.mxu3 }
 0x258   :  { %5748 = vperm.xlu1 %7846, %v5558_v23   ;;  %v6589_v23 = vor.u32 %v7602_v44, %v6588_v24  ;;  %v5565_v24 = vld [vmem:[%s10640_s5 + $0x130] sm:$0xff] }
 0x259   :  { %5743 = vperm.xlu0 %7845, %v5557_v14   ;;  %5753 = vperm.xlu2 %7847, %v5559_v34   ;;  %v7546_v14 = vld [vmem:[%s10636_s1 + $0x128] sm:$0xff] }
 0x25a   :  { %v9461_v61 = vpop.f32.mrf.mxu0  ;;  %v2715_v60 = vpop.permute.xlu1 %2714 }
 0x25b   :  { %v2710_v51 = vpop.permute.xlu0 %2709 }
 0x25c   :  { %v9459_v31 = vadd.f32 %v4186_v54, %v2710_v51  ;;  %v6585_v54 = vor.u32 %v7597_v20, %v6582_v17  ;;  %v2720_v51 = vpop.permute.xlu2 %2719  ;;  %v5564_v20 = vld [vmem:[%s10640_s5 + $0x128] sm:$0xff] }
 0x25d   :  { %v4188_v47 = vpop.f32.mrf.mxu2 }
 0x25e   :  { %10778 = vst [vmem:[#allocation112_spill] sm:$0xff] %v9459_v31  ;;  %v9466_v19 = vadd.f32 %v4188_v47, %v2715_v60  ;;  %v9483_v17 = vpop.f32.mrf.mxu3 }
 0x260   :  { %10779 = vst [vmem:[#allocation113_spill] sm:$0xff] %v9466_v19  ;;  %5763 = vperm.xlu1 %7846, %v5561_v46   ;;  %v5563_v46 = vld [vmem:[%s10640_s5 + $0x120] sm:$0xff] }
 0x261   :  { %5758 = vperm.xlu0 %7845, %v5560_v25   ;;  %5768 = vperm.xlu2 %7847, %v5562_v43   ;;  %v7605_v25 = vld [vmem:[#allocation3 + $0x104] sm:$0xf] }
 0x262   :  { %4239 = vmatmul.bf16.gmra.mxu2 %v6585_v54  ;;  %v9477_v34 = vpop.f32.mrf.mxu0  ;;  %4408 = vmatmul.bf16.gmra.mxu3 %v6589_v23  ;;  %v6614_v43 = vld [vmem:[#allocation3 + $0x120] sm:$0xf0] }
 0x263   :  { %v2725_v54 = vpop.permute.xlu0 %2724 }
 0x265   :  { %6455 = vmatmul.msk.bf16.gmra.mxu0 %vm1285_vm0, %v7546_v14  ;;  %v4191_v60 = vpop.f32.mrf.mxu2  ;;  %v5567_v14 = vld [vmem:[%s10640_s5 + $0x140] sm:$0xff] }
 0x266   :  { %v9485_v47 = vadd.f32 %v4191_v60, %v2720_v51  ;;  %v6620_v51 = vld [vmem:[#allocation3 + $0x108] sm:$0xf]  ;;  %v9506_v19 = vpop.f32.mrf.mxu3 }
 0x267   :  { %v7610_v60 = vld [vmem:[#allocation3 + $0x124] sm:$0xf0] }
 0x268   :  { %10780 = vst [vmem:[#allocation114_spill] sm:$0xff] %v9485_v47  ;;  %5778 = vperm.xlu1 %7846, %v5564_v20   ;;  %v5566_v20 = vld [vmem:[%s10640_s5 + $0x138] sm:$0xff]  ;;  %v6621_v31 = vor.u32 %v7610_v60, %v6620_v51  ;;  %v5571_v51 = vld [vmem:[%s10640_s5 + $0x160] sm:$0xff] }
 0x269   :  { %5773 = vperm.xlu0 %7845, %v5563_v46   ;;  %5783 = vperm.xlu2 %7847, %v5565_v24   ;;  %v5568_v46 = vld [vmem:[%s10640_s5 + $0x148] sm:$0xff]  ;;  %v6617_v24 = vor.u32 %v7605_v25, %v6614_v43  ;;  %v5570_v25 = vld [vmem:[%s10640_s5 + $0x158] sm:$0xff]  ;;  %v7613_v60 = vld [vmem:[#allocation3 + $0x144] sm:$0xf] }
 0x26a   :  { %v9493_v44 = vpop.f32.mrf.mxu0 }
 0x26d   :  { %v4193_v23 = vpop.f32.mrf.mxu2 }
 0x26e   :  { %v9498_v47 = vadd.f32 %v4193_v23, %v2725_v54  ;;  %v2730_v23 = vpop.permute.xlu1 %2729 }
 0x270   :  { %10781 = vst [vmem:[#allocation115_spill] sm:$0xff] %v9498_v47  ;;  %5793 = vperm.xlu1 %7846, %v5567_v14   ;;  %v5569_v14 = vld [vmem:[%s10640_s5 + $0x150] sm:$0xff] }
 0x271   :  { %5788 = vperm.xlu0 %7845, %v5566_v20   ;;  %5798 = vperm.xlu2 %7847, %v5568_v46   ;;  %v6646_v20 = vld [vmem:[#allocation3 + $0x160] sm:$0xf0]  ;;  %v2735_v46 = vpop.permute.xlu2 %2734 }
 0x272   :  { %4244 = vmatmul.bf16.gmra.mxu2 %v6617_v24  ;;  %v1637_v54 = vpop.f32.mrf.mxu0  ;;  %4413 = vmatmul.bf16.gmra.mxu3 %v6621_v31  ;;  %v9523_v31 = vpop.f32.mrf.mxu3 }
 0x273   :  { %v1638_v27 = vadd.f32 %v1637_v54, %v10787_v63  ;;  %v5580_v63 = vld [vmem:[%s10640_s5 + $0x1a8] sm:$0xff] }
 0x275   :  { %6456 = vmatmul.msk.bf16.gmra.mxu0 %vm1285_vm0, %v7547_v49  ;;  %v4196_v47 = vpop.f32.mrf.mxu2 }
 0x276   :  { %v9515_v43 = vadd.f32 %v4196_v47, %v2730_v23  ;;  %v5573_v47 = vld [vmem:[%s10640_s5 + $0x170] sm:$0xff]  ;;  %v6652_v23 = vld [vmem:[#allocation3 + $0x148] sm:$0xf] }
 0x278   :  { %10782 = vst [vmem:[#allocation116_spill] sm:$0xff] %v9515_v43  ;;  %5808 = vperm.xlu1 %7846, %v5570_v25   ;;  %v7618_v43 = vld [vmem:[#allocation3 + $0x164] sm:$0xf0] }
 0x279   :  { %5803 = vperm.xlu0 %7845, %v5569_v14   ;;  %5813 = vperm.xlu2 %7847, %v5571_v51   ;;  %v5572_v25 = vld [vmem:[%s10640_s5 + $0x168] sm:$0xff]  ;;  %v5574_v14 = vld [vmem:[%s10640_s5 + $0x178] sm:$0xff]  ;;  %v6649_v51 = vor.u32 %v7613_v60, %v6646_v20  ;;  %v6653_v16 = vor.u32 %v7618_v43, %v6652_v23  ;;  %v5575_v20 = vld [vmem:[%s10640_s5 + $0x180] sm:$0xff] }
 0x27a   :  { %v1639_v49 = vpop.f32.mrf.mxu0  ;;  %v5576_v60 = vld [vmem:[%s10640_s5 + $0x188] sm:$0xff] }
 0x27d   :  { %v4198_v24 = vpop.f32.mrf.mxu2 }
 0x27e   :  { %v9528_v18 = vadd.f32 %v4198_v24, %v2735_v46  ;;  %v9539_v46 = vpop.f32.mrf.mxu3 }
 0x280   :  { %10783 = vst [vmem:[#allocation117_spill] sm:$0xff] %v9528_v18  ;;  %5823 = vperm.xlu1 %7846, %v5573_v47   ;;  %v2740_v18 = vpop.permute.xlu0 %2739  ;;  %v5577_v47 = vld [vmem:[%s10640_s5 + $0x190] sm:$0xff] }
 0x281   :  { %5818 = vperm.xlu0 %7845, %v5572_v25   ;;  %5828 = vperm.xlu2 %7847, %v5574_v14  }
 0x282   :  { %4249 = vmatmul.bf16.gmra.mxu2 %v6649_v51  ;;  %v1642_v24 = vpop.f32.mrf.mxu0  ;;  %4418 = vmatmul.bf16.gmra.mxu3 %v6653_v16  ;;  %v10785_v16 = vld [vmem:[#allocation21_spill] sm:$0xff] }
 0x283   :  { %v1643_v23 = vadd.f32 %v1642_v24, %v10785_v16  ;;  %v6678_v51 = vld [vmem:[#allocation3 + $0x1a0] sm:$0xf0]  ;;  %v7626_v24 = vld [vmem:[#allocation3 + $0x1a4] sm:$0xf0]  ;;  %v10790_v16 = vld [vmem:[#allocation16_spill] sm:$0xff] }
 0x284   :  { %v6685_v54 = vor.u32 %v7626_v24, %v6684_v62  ;;  %v10793_v24 = vld [vmem:[#allocation27_spill] sm:$0xff] }
 0x285   :  { %6457 = vmatmul.msk.bf16.gmra.mxu0 %vm1285_vm0, %v7548_v36  ;;  %v4201_v11 = vpop.f32.mrf.mxu2  ;;  %v10786_v36 = vld [vmem:[#allocation24_spill] sm:$0xff]  ;;  %v1869_v52 = vmul.f32 0.2, %v1643_v23 }
 0x286   :  { %v9545_v43 = vadd.f32 %v4201_v11, %v2740_v18  ;;  %v1640_v25 = vadd.f32 %v1639_v49, %v10786_v36  ;;  %v5579_v11 = vld [vmem:[%s10640_s5 + $0x1a0] sm:$0xff]  ;;  %v5578_v49 = vld [vmem:[%s10640_s5 + $0x198] sm:$0xff]  ;;  %v1635_v36 = vadd.f32 %v9493_v44, %v10790_v16  ;;  %v10792_v16 = vld [vmem:[#allocation26_spill] sm:$0xff] }
 0x287   :  { %v7621_v18 = vld [vmem:[#allocation3 + $0x184] sm:$0xf]  ;;  %v1997_v42 = vmax.f32 %v1643_v23, %v1869_v52  ;;  %v1630_v59 = vadd.f32 %v9461_v61, %v10792_v16 }
 0x288   :  { %10784 = vst [vmem:[#allocation118_spill] sm:$0xff] %v9545_v43  ;;  %5838 = vperm.xlu1 %7846, %v5576_v60   ;;  %v2745_v43 = vpop.permute.xlu1 %2744  ;;  %v1868_v2 = vmul.f32 0.2, %v1640_v25  ;;  %v1866_v1 = vmul.f32 0.2, %v1635_v36 }
 0x289   :  { %5833 = vperm.xlu0 %7845, %v5575_v20   ;;  %5843 = vperm.xlu2 %7847, %v5577_v47   ;;  %v9565_v47 = vpop.f32.mrf.mxu3  ;;  %v1864_v23 = vmul.f32 0.2, %v1630_v59 }
 0x28a   :  { %v1644_v14 = vpop.f32.mrf.mxu0 }
 0x28b   :  { %v1645_v10 = vadd.f32 %v1644_v14, %v10788_v7  ;;  %v6681_v7 = vor.u32 %v7621_v18, %v6678_v51  ;;  %v10791_v14 = vld [vmem:[#allocation23_spill] sm:$0xff]  ;;  %v2750_v51 = vpop.permute.xlu2 %2749 }
 0x28d   :  { %v4203_v60 = vpop.f32.mrf.mxu2  ;;  %v1870_v15 = vmul.f32 0.2, %v1645_v10 }
 0x28e   :  { %v9560_v20 = vadd.f32 %v4203_v60, %v2745_v43  ;;  %v7549_v43 = vld [vmem:[%s10636_s1 + $0x140] sm:$0xff]  ;;  %v1633_v60 = vadd.f32 %v9477_v34, %v10791_v14  ;;  %v1628_v34 = vadd.f32 %v9445_v55, %v10793_v24 }
 0x28f   :  { %v1998_v44 = vmax.f32 %v1645_v10, %v1870_v15  ;;  %v5582_v10 = vld [vmem:[%s10640_s5 + $0x1b8] sm:$0xff]  ;;  %v5583_v55 = vld [vmem:[%s10640_s5 + $0x1c0] sm:$0xff] }
 0x290   :  { %10789 = vst [vmem:[#allocation21_spill] sm:$0xff] %v9560_v20  ;;  %5853 = vperm.xlu1 %7846, %v5579_v11   ;;  %v1867_v20 = vmul.f32 0.2, %v1638_v27  ;;  %v1996_v11 = vmax.f32 %v1640_v25, %v1868_v2  ;;  %v1865_v14 = vmul.f32 0.2, %v1633_v60 }
 0x291   :  { %5848 = vperm.xlu0 %7845, %v5578_v49   ;;  %5858 = vperm.xlu2 %7847, %v5580_v63   ;;  %v2094_v18 = vpack.c.bf16 %v1998_v44, %v1997_v42  ;;  %v5581_v42 = vld [vmem:[%s10640_s5 + $0x1b0] sm:$0xff]  ;;  %v1802_v2 = vpop.f32.mrf.mxu3  ;;  %v9594_v44 = vpop.f32.mrf.mxu1 }
 0x292   :  { %4254 = vmatmul.bf16.gmra.mxu2 %v6681_v7  ;;  %v1647_v62 = vpop.f32.mrf.mxu0  ;;  %4423 = vmatmul.bf16.gmra.mxu3 %v6685_v54  ;;  %v1995_v52 = vmax.f32 %v1638_v27, %v1867_v20  ;;  %v1994_v27 = vmax.f32 %v1635_v36, %v1866_v1  ;;  %v1863_v20 = vmul.f32 0.2, %v1628_v34  ;;  %v1993_v49 = vmax.f32 %v1633_v60, %v1865_v14  ;;  %v10794_v63 = vld [vmem:[#allocation35_spill] sm:$0xff]  ;;  %v2755_v36 = vpop.permute.xlu0 %2754  ;;  %v10795_v60 = vld [vmem:[#allocation28_spill] sm:$0xff] }
 0x293   :  { %4554 = vmatpush.bf16.msrb.mxu1 %v2094_v18  ;;  %v1648_v7 = vadd.f32 %v1647_v62, %v10794_v63  ;;  %v5585_v18 = vld [vmem:[%s10640_s5 + $0x1d0] sm:$0xff] }
 0x294   :  { %v2093_v25 = vpack.c.bf16 %v1996_v11, %v1995_v52  ;;  %v2092_v54 = vpack.c.bf16 %v1994_v27, %v1993_v49  ;;  %v7629_v11 = vld [vmem:[#allocation3 + $0x1c4] sm:$0xf]  ;;  %v1991_v1 = vmax.f32 %v1628_v34, %v1863_v20  ;;  %v6716_v52 = vld [vmem:[#allocation3 + $0x1c8] sm:$0xf]  ;;  %v5586_v34 = vld [vmem:[%s10640_s5 + $0x1d8] sm:$0xff] }
 0x295   :  { %6458 = vmatmul.msk.bf16.gmra.mxu0 %vm1285_vm0, %v7549_v43  ;;  %v4206_v15 = vpop.f32.mrf.mxu2  ;;  %v1992_v43 = vmax.f32 %v1630_v59, %v1864_v23  ;;  %v1871_v24 = vmul.f32 0.2, %v1648_v7  ;;  %v5584_v59 = vld [vmem:[%s10640_s5 + $0x1c8] sm:$0xff] }
 0x296   :  { %v9585_v61 = vadd.f32 %v4206_v15, %v2750_v51  ;;  %v6710_v51 = vld [vmem:[#allocation3 + $0x1e0] sm:$0xf0]  ;;  %v7634_v15 = vld [vmem:[#allocation3 + $0x1e4] sm:$0xf0] }
 0x297   :  { %4555 = vmatpush.bf16.msrb.mxu1 %v2093_v25  ;;  %v2091_v23 = vpack.c.bf16 %v1992_v43, %v1991_v1  ;;  %v6713_v25 = vor.u32 %v7629_v11, %v6710_v51  ;;  %v7550_v27 = vld [vmem:[%s10636_s1 + $0x148] sm:$0xff]  ;;  %v1999_v49 = vmax.f32 %v1648_v7, %v1871_v24  ;;  %v1803_v43 = vadd.f32 %v1802_v2, %v9041_v45  ;;  %v5587_v1 = vld [vmem:[%s10640_s5 + $0x1e0] sm:$0xff] }
 0x298   :  { %5868 = vperm.xlu1 %7846, %v5582_v10   ;;  %v5588_v7 = vld [vmem:[%s10640_s5 + $0x1e8] sm:$0xff]  ;;  %v1798_v45 = vadd.f32 %v9539_v46, %v9016_v4  ;;  %v1795_v46 = vadd.f32 %v9523_v31, %v9018_v37  ;;  %v1790_v37 = vadd.f32 %v9483_v17, %v8997_v56  ;;  %v7551_v17 = vld [vmem:[%s10636_s1 + $0x150] sm:$0xff] }
 0x299   :  { %5863 = vperm.xlu0 %7845, %v5581_v42   ;;  %5873 = vperm.xlu2 %7847, %v5583_v55   ;;  %v6717_v55 = vor.u32 %v7634_v15, %v6716_v52  ;;  %v1804_v20 = vpop.f32.mrf.mxu3  ;;  %v7637_v52 = vld [vmem:[#allocation3 + $0x204] sm:$0xf] }
 0x29a   :  { %v1649_v16 = vpop.f32.mrf.mxu0  ;;  %v1931_v4 = vmul.f32 0.2, %v1798_v45 }
 0x29b   :  { %v1650_v14 = vadd.f32 %v1649_v16, %v10795_v60  ;;  %4556 = vmatpush.bf16.msrb.mxu1 %v2092_v54  ;;  %v1805_v16 = vadd.f32 %v1804_v20, %v9039_v30  ;;  %v9625_v30 = vpop.f32.mrf.mxu1  ;;  %v10796_v60 = vld [vmem:[#allocation39_spill] sm:$0xff] }
 0x29d   :  { %v4208_v62 = vpop.f32.mrf.mxu2  ;;  %v1872_v42 = vmul.f32 0.2, %v1650_v14  ;;  %v1934_v24 = vmul.f32 0.2, %v1805_v16 }
 0x29e   :  { %v9600_v10 = vadd.f32 %v4208_v62, %v2755_v36  ;;  %v1933_v36 = vmul.f32 0.2, %v1803_v43  ;;  %v1800_v62 = vadd.f32 %v9565_v47, %v8943_v22  ;;  %v1793_v22 = vadd.f32 %v9506_v19, %v8914_v40 }
 0x29f   :  { %v2000_v63 = vmax.f32 %v1650_v14, %v1872_v42  ;;  %4557 = vmatpush.bf16.msrb.mxu1 %v2091_v23  ;;  %v6742_v23 = vld [vmem:[#allocation3 + $0x220] sm:$0xf0] }
 0x2a0   :  { %5883 = vperm.xlu1 %7846, %v5585_v18   ;;  %v2760_v18 = vpop.permute.xlu1 %2759  ;;  %v2061_v15 = vmax.f32 %v1803_v43, %v1933_v36  ;;  %v1932_v47 = vmul.f32 0.2, %v1800_v62  ;;  %v1788_v43 = vadd.f32 %v9457_v48, %v8999_v9  ;;  %v1783_v48 = vadd.f32 %v9412_v50, %v8968_v41 }
 0x2a1   :  { %5878 = vperm.xlu0 %7845, %v5584_v59   ;;  %5888 = vperm.xlu2 %7847, %v5586_v34   ;;  %v9611_v54 = vpack.c.bf16 %v2000_v63, %v1999_v49  ;;  %v2062_v59 = vmax.f32 %v1805_v16, %v1934_v24  ;;  %v7574_v34 = vld [vmem:[#allocation3 + $0xc] sm:$0xf]  ;;  %v7642_v49 = vld [vmem:[#allocation3 + $0x224] sm:$0xf0]  ;;  %v5590_v63 = vld [vmem:[%s10640_s5 + $0x1f8] sm:$0xff]  ;;  %v1780_v41 = vadd.f32 %v9383_v33, %v8970_v39 }
 0x2a2   :  { %4259 = vmatmul.bf16.gmra.mxu2 %v6713_v25  ;;  %v1652_v11 = vpop.f32.mrf.mxu0  ;;  %4428 = vmatmul.bf16.gmra.mxu3 %v6717_v55  ;;  %v6494_v25 = vld [vmem:[#allocation3 + $0x28] sm:$0xf0]  ;;  %v1930_v16 = vmul.f32 0.2, %v1795_v46  ;;  %v2060_v9 = vmax.f32 %v1800_v62, %v1932_v47  ;;  %v1928_v36 = vmul.f32 0.2, %v1790_v37  ;;  %v1773_v39 = vadd.f32 %v9288_v32, %v8939_v12 }
 0x2a3   :  { %4558 = vmatpush.bf16.msrb.mxu1 %v9440_v58  ;;  %v5589_v58 = vld [vmem:[%s10640_s5 + $0x1f0] sm:$0xff]  ;;  %v1653_v14 = vadd.f32 %v1652_v11, %v10796_v60  ;;  %v6745_v11 = vor.u32 %v7637_v52, %v6742_v23  ;;  %v9651_v19 = vpop.f32.mrf.mxu1  ;;  %v1927_v24 = vmul.f32 0.2, %v1788_v43  ;;  %v6774_v47 = vld [vmem:[#allocation3 + $0x260] sm:$0xf0]  ;;  %v1768_v12 = vadd.f32 %v9218_v35, %v8910_v0  ;;  %v7552_v0 = vld [vmem:[%s10636_s1 + $0x158] sm:$0xff] }
 0x2a4   :  { %v2058_v60 = vmax.f32 %v1795_v46, %v1930_v16  ;;  %v2056_v46 = vmax.f32 %v1790_v37, %v1928_v36  ;;  %v7582_v37 = vld [vmem:[#allocation3 + $0x4c] sm:$0xf]  ;;  %v6780_v16 = vld [vmem:[#allocation3 + $0x248] sm:$0xf]  ;;  %v10801_v35 = vld [vmem:[#allocation67_spill] sm:$0xff] }
 0x2a5   :  { %6459 = vmatmul.msk.bf16.gmra.mxu0 %vm1285_vm0, %v7550_v27  ;;  %v4211_v51 = vpop.f32.mrf.mxu2  ;;  %v1873_v55 = vmul.f32 0.2, %v1653_v14  ;;  %v10797_v27 = vld [vmem:[#allocation38_spill] sm:$0xff] }
 0x2a6   :  { %v9627_v2 = vadd.f32 %v4211_v51, %v2760_v18  ;;  %v2126_v18 = vpack.c.bf16 %v2062_v59, %v2061_v15  ;;  %v6497_v51 = vor.u32 %v7574_v34, %v6494_v25  ;;  %v1925_v59 = vmul.f32 0.2, %v1783_v48  ;;  %v10799_v34 = vld [vmem:[#allocation31_spill] sm:$0xff] }
 0x2a7   :  { %4559 = vmatpush.bf16.msrb.mxu1 %v9397_v21  ;;  %v6748_v21 = vld [vmem:[#allocation3 + $0x208] sm:$0xf] }
 0x2a8   :  { %5898 = vperm.xlu1 %7846, %v5588_v7   ;;  %v2059_v7 = vmax.f32 %v1798_v45, %v1931_v4  ;;  %v6749_v40 = vor.u32 %v7642_v49, %v6748_v21  ;;  %v1785_v4 = vadd.f32 %v9436_v3, %v8892_v6  ;;  %v1778_v6 = vadd.f32 %v9356_v5, %v8877_v29  ;;  %v10800_v29 = vld [vmem:[#allocation42_spill] sm:$0xff] }
 0x2a9   :  { %5893 = vperm.xlu0 %7845, %v5587_v1   ;;  %5903 = vperm.xlu2 %7847, %v5589_v58   ;;  %v2001_v1 = vmax.f32 %v1653_v14, %v1873_v55  ;;  %v1929_v58 = vmul.f32 0.2, %v1793_v22  ;;  %v2053_v21 = vmax.f32 %v1783_v48, %v1925_v59 }
 0x2aa   :  { %v1654_v42 = vpop.f32.mrf.mxu0  ;;  %v1926_v3 = vmul.f32 0.2, %v1785_v4 }
 0x2ab   :  { %v1655_v20 = vadd.f32 %v1654_v42, %v10797_v27  ;;  %4560 = vmatpush.bf16.msrb.mxu1 %v9354_v13  ;;  %v2057_v62 = vmax.f32 %v1793_v22, %v1929_v58  ;;  %v2055_v42 = vmax.f32 %v1788_v43, %v1927_v24  ;;  %v1775_v27 = vadd.f32 %v9322_v28, %v8937_v8  ;;  %v9676_v33 = vpop.f32.mrf.mxu1 }
 0x2ac   :  { %v1923_v8 = vmul.f32 0.2, %v1778_v6  ;;  %v2054_v28 = vmax.f32 %v1785_v4, %v1926_v3 }
 0x2ad   :  { %v9644_v31 = vpop.f32.mrf.mxu2  ;;  %v1874_v13 = vmul.f32 0.2, %v1655_v20  ;;  %v2124_v23 = vpack.c.bf16 %v2058_v60, %v2057_v62  ;;  %v2123_v22 = vpack.c.bf16 %v2056_v46, %v2055_v42  ;;  %v1922_v32 = vmul.f32 0.2, %v1775_v27 }
 0x2ae   :  { %10798 = vst [vmem:[#allocation24_spill] sm:$0xff] %v9644_v31  ;;  %v1770_v60 = vadd.f32 %v9260_v38, %v10801_v35  ;;  %v10802_v38 = vld [vmem:[#allocation74_spill] sm:$0xff] }
 0x2af   :  { %v2002_v56 = vmax.f32 %v1655_v20, %v1874_v13  ;;  %4561 = vmatpush.bf16.msrb.mxu1 %v9300_v26  ;;  %v2125_v26 = vpack.c.bf16 %v2060_v9, %v2059_v7  ;;  %v7645_v20 = vld [vmem:[#allocation3 + $0x244] sm:$0xf]  ;;  %v7650_v13 = vld [vmem:[#allocation3 + $0x264] sm:$0xf0]  ;;  %v1921_v7 = vmul.f32 0.2, %v1773_v39  ;;  %v2050_v4 = vmax.f32 %v1775_v27, %v1922_v32 }
 0x2b0   :  { %v6781_v9 = vor.u32 %v7650_v13, %v6780_v16 }
 0x2b1   :  { %5908 = vperm.xlu0 %7845, %v5590_v63   ;;  %v9659_v45 = vpack.c.bf16 %v2002_v56, %v2001_v1  ;;  %v6526_v63 = vld [vmem:[#allocation3 + $0x68] sm:$0xf0]  ;;  %v6777_v1 = vor.u32 %v7645_v20, %v6774_v47  ;;  %v2049_v62 = vmax.f32 %v1773_v39, %v1921_v7  ;;  %v7653_v39 = vld [vmem:[#allocation3 + $0x284] sm:$0xf] }
 0x2b2   :  { %4264 = vmatmul.bf16.gmra.mxu2 %v6745_v11  ;;  %v1657_v14 = vpop.f32.mrf.mxu0  ;;  %4562 = vmatmul.bf16.vlgmr.msrb.gmra.mxu1 %v6497_v51  ;;  %v6529_v58 = vor.u32 %v7582_v37, %v6526_v63  ;;  %v10804_v37 = vld [vmem:[#allocation34_spill] sm:$0xff] }
 0x2b3   :  { %5230 = vmatpush.bf16.msra.mxu1 %v2126_v18  ;;  %4433 = vmatmul.bf16.gmra.mxu3 %v6749_v40  ;;  %v1658_v25 = vadd.f32 %v1657_v14, %v10799_v34  ;;  %v2051_v14 = vmax.f32 %v1778_v6, %v1923_v8  ;;  %v2120_v34 = vpack.c.bf16 %v2050_v4, %v2049_v62  ;;  %v10805_v8 = vld [vmem:[#allocation71_spill] sm:$0xff]  ;;  %v7598_v4 = vld [vmem:[#allocation3 + $0xcc] sm:$0xf] }
 0x2b4   :  { %v6590_v62 = vld [vmem:[#allocation3 + $0xe8] sm:$0xf0] }
 0x2b5   :  { %6460 = vmatmul.msk.bf16.gmra.mxu0 %vm1285_vm0, %v7551_v17  ;;  %v4225_v52 = vpop.f32.mrf.mxu2  ;;  %v4394_v15 = vpop.f32.mrf.mxu3  ;;  %v1875_v43 = vmul.f32 0.2, %v1658_v25  ;;  %v2122_v17 = vpack.c.bf16 %v2054_v28, %v2053_v21  ;;  %v6806_v21 = vld [vmem:[#allocation3 + $0x2a0] sm:$0xf0] }
 0x2b6   :  { %v4226_v50 = vadd.f32 %v4225_v52, %v8978_v57  ;;  %v1924_v57 = vmul.f32 0.2, %v1780_v41  ;;  %v6809_v32 = vor.u32 %v7653_v39, %v6806_v21 }
 0x2b7   :  { %5231 = vmatpush.bf16.msra.mxu1 %v2125_v26  ;;  %v2003_v48 = vmax.f32 %v1658_v25, %v1875_v43  ;;  %v1919_v26 = vmul.f32 0.2, %v1768_v12  ;;  %v10803_v25 = vld [vmem:[#allocation41_spill] sm:$0xff] }
 0x2b8   :  { %v9668_v55 = vadd.f32 %v4394_v15, %v4226_v50  ;;  %v2052_v56 = vmax.f32 %v1780_v41, %v1924_v57  ;;  %v9691_v50 = vpop.f32.mrf.mxu1  ;;  %v1920_v15 = vmul.f32 0.2, %v1770_v60  ;;  %v6812_v43 = vld [vmem:[#allocation3 + $0x288] sm:$0xf] }
 0x2ba   :  { %v1659_v49 = vpop.f32.mrf.mxu0  ;;  %v2121_v41 = vpack.c.bf16 %v2052_v56, %v2051_v14  ;;  %v2048_v27 = vmax.f32 %v1770_v60, %v1920_v15  ;;  %v7661_v14 = vld [vmem:[#allocation3 + $0x2c4] sm:$0xf] }
 0x2bb   :  { %5232 = vmatpush.bf16.msra.mxu1 %v2124_v23  ;;  %v1660_v5 = vadd.f32 %v1659_v49, %v10800_v29  ;;  %v2047_v23 = vmax.f32 %v1768_v12, %v1919_v26  ;;  %v7590_v49 = vld [vmem:[#allocation3 + $0x8c] sm:$0xf]  ;;  %v7658_v29 = vld [vmem:[#allocation3 + $0x2a4] sm:$0xf0]  ;;  %v6838_v26 = vld [vmem:[#allocation3 + $0x2e0] sm:$0xf0] }
 0x2bc   :  { %v6813_v7 = vor.u32 %v7658_v29, %v6812_v43  ;;  %v7606_v43 = vld [vmem:[#allocation3 + $0x10c] sm:$0xf] }
 0x2bd   :  { %v4227_v11 = vpop.f32.mrf.mxu2  ;;  %v1876_v18 = vmul.f32 0.2, %v1660_v5  ;;  %v4396_v40 = vpop.f32.mrf.mxu3  ;;  %v2119_v20 = vpack.c.bf16 %v2048_v27, %v2047_v23  ;;  %v6593_v23 = vor.u32 %v7598_v4, %v6590_v62 }
 0x2be   :  { %v4228_v51 = vadd.f32 %v4227_v11, %v9065_v53 }
 0x2bf   :  { %5233 = vmatpush.bf16.msra.mxu1 %v2123_v22  ;;  %v2004_v36 = vmax.f32 %v1660_v5, %v1876_v18  ;;  %v6558_v22 = vld [vmem:[#allocation3 + $0xa8] sm:$0xf0] }
 0x2c0   :  { %v9682_v24 = vadd.f32 %v4396_v40, %v4228_v51  ;;  %v9699_v16 = vpop.f32.mrf.mxu1  ;;  %v6561_v11 = vor.u32 %v7590_v49, %v6558_v22 }
 0x2c1   :  { %v9689_v53 = vpack.c.bf16 %v2004_v36, %v2003_v48 }
 0x2c2   :  { %4269 = vmatmul.bf16.gmra.mxu2 %v6777_v1  ;;  %v1662_v52 = vpop.f32.mrf.mxu0  ;;  %4567 = vmatmul.bf16.gmra.mxu1 %v6529_v58  ;;  %v7553_v1 = vld [vmem:[%s10636_s1 + $0x160] sm:$0xff] }
 0x2c3   :  { %5234 = vmatpush.bf16.msra.mxu1 %v2122_v17  ;;  %4438 = vmatmul.bf16.gmra.mxu3 %v6781_v9  ;;  %v1663_v6 = vadd.f32 %v1662_v52, %v10803_v25  ;;  %v10806_v9 = vld [vmem:[#allocation76_spill] sm:$0xff]  ;;  %v6844_v52 = vld [vmem:[#allocation3 + $0x2c8] sm:$0xf] }
 0x2c5   :  { %6461 = vmatmul.msk.bf16.gmra.mxu0 %vm1285_vm0, %v7552_v0  ;;  %v4230_v59 = vpop.f32.mrf.mxu2  ;;  %v4399_v42 = vpop.f32.mrf.mxu3  ;;  %v1877_v47 = vmul.f32 0.2, %v1663_v6 }
 0x2c6   :  { %v4231_v46 = vadd.f32 %v4230_v59, %v10802_v38  ;;  %v10807_v59 = vld [vmem:[#allocation75_spill] sm:$0xff] }
 0x2c7   :  { %5235 = vmatpush.bf16.msra.mxu1 %v2121_v41  ;;  %v2005_v18 = vmax.f32 %v1663_v6, %v1877_v47  ;;  %v7666_v41 = vld [vmem:[#allocation3 + $0x2e4] sm:$0xf0] }
 0x2c8   :  { %v9696_v3 = vadd.f32 %v4399_v42, %v4231_v46  ;;  %v9713_v0 = vpop.f32.mrf.mxu1  ;;  %v6841_v42 = vor.u32 %v7661_v14, %v6838_v26  ;;  %v7554_v6 = vld [vmem:[%s10636_s1 + $0x168] sm:$0xff] }
 0x2c9   :  { %v10810_v14 = vld [vmem:[#allocation85_spill] sm:$0xff] }
 0x2ca   :  { %v1664_v57 = vpop.f32.mrf.mxu0 }
 0x2cb   :  { %5236 = vmatpush.bf16.msra.mxu1 %v2120_v34  ;;  %v1665_v63 = vadd.f32 %v1664_v57, %v10804_v37  ;;  %v6845_v34 = vor.u32 %v7666_v41, %v6844_v52  ;;  %v7669_v37 = vld [vmem:[#allocation3 + $0x304] sm:$0xf] }
 0x2cc   :  { %v7677_v41 = vld [vmem:[#allocation3 + $0x344] sm:$0xf] }
 0x2cd   :  { %v4232_v5 = vpop.f32.mrf.mxu2  ;;  %v1878_v13 = vmul.f32 0.2, %v1665_v63  ;;  %v4401_v12 = vpop.f32.mrf.mxu3 }
 0x2ce   :  { %v4233_v28 = vadd.f32 %v4232_v5, %v10805_v8  ;;  %v6622_v5 = vld [vmem:[#allocation3 + $0x128] sm:$0xf0]  ;;  %v7674_v8 = vld [vmem:[#allocation3 + $0x324] sm:$0xf0] }
 0x2cf   :  { %5237 = vmatpush.bf16.msra.mxu1 %v2119_v20  ;;  %v2006_v51 = vmax.f32 %v1665_v63, %v1878_v13  ;;  %v10808_v20 = vld [vmem:[#allocation79_spill] sm:$0xff]  ;;  %v6870_v63 = vld [vmem:[#allocation3 + $0x320] sm:$0xf0]  ;;  %v6876_v13 = vld [vmem:[#allocation3 + $0x308] sm:$0xf] }
 0x2d0   :  { %v9702_v40 = vadd.f32 %v4401_v12, %v4233_v28  ;;  %v9725_v27 = vpop.f32.mrf.mxu1  ;;  %v10809_v12 = vld [vmem:[#allocation82_spill] sm:$0xff] }
 0x2d1   :  { %v9707_v56 = vpack.c.bf16 %v2006_v51, %v2005_v18  ;;  %v6625_v18 = vor.u32 %v7606_v43, %v6622_v5  ;;  %v6877_v51 = vor.u32 %v7674_v8, %v6876_v13  ;;  %v7556_v13 = vld [vmem:[%s10636_s1 + $0x178] sm:$0xff] }
 0x2d2   :  { %4274 = vmatmul.bf16.gmra.mxu2 %v6809_v32  ;;  %v9709_v17 = vpop.f32.mrf.mxu0  ;;  %4572 = vmatmul.bf16.gmra.mxu1 %v6561_v11 }
 0x2d3   :  { %4443 = vmatmul.bf16.gmra.mxu3 %v6813_v7  ;;  %v6873_v7 = vor.u32 %v7669_v37, %v6870_v63 }
 0x2d5   :  { %6462 = vmatmul.msk.bf16.gmra.mxu0 %vm1285_vm0, %v7553_v1  ;;  %v4235_v58 = vpop.f32.mrf.mxu2  ;;  %v4404_v36 = vpop.f32.mrf.mxu3 }
 0x2d6   :  { %v4236_v48 = vadd.f32 %v4235_v58, %v10806_v9  ;;  %v7555_v58 = vld [vmem:[%s10636_s1 + $0x170] sm:$0xff] }
 0x2d8   :  { %v9715_v35 = vadd.f32 %v4404_v36, %v4236_v48  ;;  %v9735_v29 = vpop.f32.mrf.mxu1 }
 0x2da   :  { %v9717_v60 = vpop.f32.mrf.mxu0 }
 0x2dd   :  { %v4237_v15 = vpop.f32.mrf.mxu2  ;;  %v4406_v46 = vpop.f32.mrf.mxu3 }
 0x2de   :  { %v4238_v38 = vadd.f32 %v4237_v15, %v10807_v59  ;;  %v6902_v15 = vld [vmem:[#allocation3 + $0x360] sm:$0xf0]  ;;  %v7614_v59 = vld [vmem:[#allocation3 + $0x14c] sm:$0xf] }
 0x2e0   :  { %v9720_v25 = vadd.f32 %v4406_v46, %v4238_v38  ;;  %v9744_v36 = vpop.f32.mrf.mxu1  ;;  %v10811_v38 = vld [vmem:[#allocation72_spill] sm:$0xff] }
 0x2e1   :  { %v10812_v46 = vld [vmem:[#allocation88_spill] sm:$0xff] }
 0x2e2   :  { %4279 = vmatmul.bf16.gmra.mxu2 %v6841_v42  ;;  %v9727_v39 = vpop.f32.mrf.mxu0  ;;  %4577 = vmatmul.bf16.gmra.mxu1 %v6593_v23  ;;  %v4079_v42 = vadd.f32 %v10812_v46, %v10811_v38  ;;  %v6654_v23 = vld [vmem:[#allocation3 + $0x168] sm:$0xf0]  ;;  %v10816_v38 = vld [vmem:[#allocation83_spill] sm:$0xff] }
 0x2e3   :  { %4448 = vmatmul.bf16.gmra.mxu3 %v6845_v34  ;;  %v6908_v34 = vld [vmem:[#allocation3 + $0x348] sm:$0xf]  ;;  %v6657_v37 = vor.u32 %v7614_v59, %v6654_v23  ;;  %v6686_v59 = vld [vmem:[#allocation3 + $0x1a8] sm:$0xf0]  ;;  %v10817_v46 = vld [vmem:[#allocation95_spill] sm:$0xff] }
 0x2e4   :  { %v10818_v23 = vld [vmem:[#allocation47_spill] sm:$0xff] }
 0x2e5   :  { %6463 = vmatmul.msk.bf16.gmra.mxu0 %vm1285_vm0, %v7554_v6  ;;  %v4240_v57 = vpop.f32.mrf.mxu2  ;;  %v4409_v49 = vpop.f32.mrf.mxu3  ;;  %v7682_v6 = vld [vmem:[#allocation3 + $0x364] sm:$0xf0] }
 0x2e6   :  { %v4241_v21 = vadd.f32 %v4240_v57, %v10808_v20  ;;  %v6909_v63 = vor.u32 %v7682_v6, %v6908_v34 }
 0x2e8   :  { %v9731_v22 = vadd.f32 %v4409_v49, %v4241_v21  ;;  %v6905_v49 = vor.u32 %v7677_v41, %v6902_v15  ;;  %v9751_v43 = vpop.f32.mrf.mxu1  ;;  %v6934_v41 = vld [vmem:[#allocation3 + $0x3a0] sm:$0xf0]  ;;  %v7622_v15 = vld [vmem:[#allocation3 + $0x18c] sm:$0xf] }
 0x2ea   :  { %v9733_v47 = vpop.f32.mrf.mxu0 }
 0x2ed   :  { %v4242_v28 = vpop.f32.mrf.mxu2  ;;  %v4411_v11 = vpop.f32.mrf.mxu3 }
 0x2ee   :  { %v4243_v32 = vadd.f32 %v4242_v28, %v10809_v12  ;;  %v10813_v12 = vld [vmem:[#allocation91_spill] sm:$0xff] }
 0x2f0   :  { %v9738_v1 = vadd.f32 %v4411_v11, %v4243_v32 }
 0x2f2   :  { %4284 = vmatmul.bf16.gmra.mxu2 %v6873_v7  ;;  %v1677_v9 = vpop.f32.mrf.mxu0  ;;  %4582 = vmatmul.bf16.gmra.mxu1 %v6625_v18  ;;  %v10814_v7 = vld [vmem:[#allocation51_spill] sm:$0xff] }
 0x2f3   :  { %4453 = vmatmul.bf16.gmra.mxu3 %v6877_v51  ;;  %v1678_v34 = vadd.f32 %v1677_v9, %v10818_v23 }
 0x2f5   :  { %6464 = vmatmul.msk.bf16.gmra.mxu0 %vm1285_vm0, %v7555_v58  ;;  %v4245_v48 = vpop.f32.mrf.mxu2  ;;  %v4414_v4 = vpop.f32.mrf.mxu3  ;;  %v1883_v9 = vmul.f32 0.2, %v1678_v34 }
 0x2f6   :  { %v4246_v26 = vadd.f32 %v4245_v48, %v10810_v14  ;;  %v9763_v58 = vpop.f32.mrf.mxu1  ;;  %v10815_v48 = vld [vmem:[#allocation40_spill] sm:$0xff] }
 0x2f8   :  { %v9747_v62 = vadd.f32 %v4414_v4, %v4246_v26  ;;  %v7685_v26 = vld [vmem:[#allocation3 + $0x384] sm:$0xf] }
 0x2fa   :  { %v1679_v52 = vpop.f32.mrf.mxu0 }
 0x2fb   :  { %v1680_v14 = vadd.f32 %v1679_v52, %v10815_v48  ;;  %v6689_v48 = vor.u32 %v7622_v15, %v6686_v59 }
 0x2fd   :  { %v4247_v57 = vpop.f32.mrf.mxu2  ;;  %v4416_v21 = vpop.f32.mrf.mxu3  ;;  %v1884_v52 = vmul.f32 0.2, %v1680_v14 }
 0x2fe   :  { %v4248_v20 = vadd.f32 %v4247_v57, %v4079_v42  ;;  %v4084_v42 = vadd.f32 %v10817_v46, %v10816_v38  ;;  %v10819_v57 = vld [vmem:[#allocation50_spill] sm:$0xff] }
 0x300   :  { %v9753_v5 = vadd.f32 %v4416_v21, %v4248_v20  ;;  %v6940_v21 = vld [vmem:[#allocation3 + $0x388] sm:$0xf] }
 0x302   :  { %4289 = vmatmul.bf16.gmra.mxu2 %v6905_v49  ;;  %v1682_v8 = vpop.f32.mrf.mxu0  ;;  %4587 = vmatmul.bf16.gmra.mxu1 %v6657_v37  ;;  %v7690_v49 = vld [vmem:[#allocation3 + $0x3a4] sm:$0xf0]  ;;  %v10820_v37 = vld [vmem:[#allocation48_spill] sm:$0xff] }
 0x303   :  { %4458 = vmatmul.bf16.gmra.mxu3 %v6909_v63  ;;  %v1683_v18 = vadd.f32 %v1682_v8, %v10814_v7  ;;  %v1675_v63 = vadd.f32 %v9733_v47, %v10820_v37  ;;  %v6941_v38 = vor.u32 %v7690_v49, %v6940_v21  ;;  %v7557_v47 = vld [vmem:[%s10636_s1 + $0x180] sm:$0xff] }
 0x305   :  { %6465 = vmatmul.msk.bf16.gmra.mxu0 %vm1285_vm0, %v7556_v13  ;;  %v4250_v28 = vpop.f32.mrf.mxu2  ;;  %v4419_v11 = vpop.f32.mrf.mxu3  ;;  %v1885_v6 = vmul.f32 0.2, %v1683_v18 }
 0x306   :  { %v4251_v32 = vadd.f32 %v4250_v28, %v10813_v12 }
 0x307   :  { %v2013_v46 = vmax.f32 %v1683_v18, %v1885_v6  ;;  %v10823_v18 = vld [vmem:[#allocation45_spill] sm:$0xff]  ;;  %v2011_v6 = vmax.f32 %v1678_v34, %v1883_v9  ;;  %v7630_v9 = vld [vmem:[#allocation3 + $0x1cc] sm:$0xf] }
 0x308   :  { %v9761_v51 = vadd.f32 %v4419_v11, %v4251_v32  ;;  %v6937_v32 = vor.u32 %v7685_v26, %v6934_v41  ;;  %v10821_v11 = vld [vmem:[#allocation37_spill] sm:$0xff]  ;;  %v1668_v15 = vadd.f32 %v9709_v17, %v10823_v18 }
 0x309   :  { %v1673_v7 = vadd.f32 %v9727_v39, %v10821_v11  ;;  %v9783_v39 = vpop.f32.mrf.mxu1  ;;  %v7693_v34 = vld [vmem:[#allocation3 + $0x3c4] sm:$0xf] }
 0x30a   :  { %v1684_v4 = vpop.f32.mrf.mxu0 }
 0x30b   :  { %v1685_v20 = vadd.f32 %v1684_v4, %v10819_v57  ;;  %v10822_v57 = vld [vmem:[#allocation44_spill] sm:$0xff]  ;;  %v1881_v59 = vmul.f32 0.2, %v1673_v7 }
 0x30c   :  { %v1670_v37 = vadd.f32 %v9717_v60, %v10822_v57  ;;  %v6718_v57 = vld [vmem:[#allocation3 + $0x1e8] sm:$0xf0] }
 0x30d   :  { %v4252_v13 = vpop.f32.mrf.mxu2  ;;  %v1886_v8 = vmul.f32 0.2, %v1685_v20  ;;  %v4421_v12 = vpop.f32.mrf.mxu3 }
 0x30e   :  { %v4253_v28 = vadd.f32 %v4252_v13, %v4084_v42  ;;  %v1882_v42 = vmul.f32 0.2, %v1675_v63  ;;  %v2012_v13 = vmax.f32 %v1680_v14, %v1884_v52  ;;  %v1880_v60 = vmul.f32 0.2, %v1670_v37  ;;  %v10824_v14 = vld [vmem:[#allocation10_spill] sm:$0xff] }
 0x30f   :  { %v2014_v23 = vmax.f32 %v1685_v20, %v1886_v8 }
 0x310   :  { %v9774_v4 = vadd.f32 %v4421_v12, %v4253_v28  ;;  %v2010_v21 = vmax.f32 %v1675_v63, %v1882_v42  ;;  %v2101_v8 = vpack.c.bf16 %v2012_v13, %v2011_v6  ;;  %v1879_v28 = vmul.f32 0.2, %v1668_v15  ;;  %v6972_v42 = vld [vmem:[#allocation3 + $0x3c8] sm:$0xf] }
 0x311   :  { %v2102_v26 = vpack.c.bf16 %v2014_v23, %v2013_v46  ;;  %v2009_v12 = vmax.f32 %v1673_v7, %v1881_v59  ;;  %v2008_v11 = vmax.f32 %v1670_v37, %v1880_v60  ;;  %v10825_v46 = vld [vmem:[#allocation86_spill] sm:$0xff]  ;;  %v10826_v23 = vld [vmem:[#allocation9_spill] sm:$0xff]  ;;  %v9795_v7 = vpop.f32.mrf.mxu1 }
 0x312   :  { %4294 = vmatmul.bf16.gmra.mxu2 %v6937_v32  ;;  %v9781_v41 = vpop.f32.mrf.mxu0  ;;  %4592 = vmatmul.bf16.gmra.mxu1 %v6689_v48  ;;  %v2007_v63 = vmax.f32 %v1668_v15, %v1879_v28  ;;  %v7698_v13 = vld [vmem:[#allocation3 + $0x3e4] sm:$0xf0] }
 0x313   :  { %4463 = vmatmul.bf16.gmra.mxu3 %v6941_v38  ;;  %4723 = vmatpush.bf16.msra.mxu2 %v2102_v26  ;;  %v2100_v48 = vpack.c.bf16 %v2010_v21, %v2009_v12  ;;  %v6966_v38 = vld [vmem:[#allocation3 + $0x3e0] sm:$0xf0]  ;;  %v6973_v60 = vor.u32 %v7698_v13, %v6972_v42 }
 0x314   :  { %v2099_v37 = vpack.c.bf16 %v2008_v11, %v2007_v63  ;;  %v6969_v6 = vor.u32 %v7693_v34, %v6966_v38  ;;  %v6998_v34 = vld [vmem:[#allocation3 + $0x420] sm:$0xf0]  ;;  %v7638_v38 = vld [vmem:[#allocation3 + $0x20c] sm:$0xf]  ;;  %v7706_v63 = vld [vmem:[#allocation3 + $0x424] sm:$0xf0] }
 0x315   :  { %6466 = vmatmul.msk.bf16.gmra.mxu0 %vm1285_vm0, %v7557_v47  ;;  %v4255_v20 = vpop.f32.mrf.mxu2  ;;  %v4424_v52 = vpop.f32.mrf.mxu3  ;;  %v4089_v47 = vadd.f32 %v10826_v23, %v10825_v46  ;;  %v10829_v46 = vld [vmem:[#allocation101_spill] sm:$0xff] }
 0x316   :  { %v4256_v49 = vadd.f32 %v4255_v20, %v10824_v14  ;;  %v6721_v20 = vor.u32 %v7630_v9, %v6718_v57  ;;  %v10828_v9 = vld [vmem:[#allocation77_spill] sm:$0xff] }
 0x317   :  { %4724 = vmatpush.bf16.msra.mxu2 %v2101_v8  ;;  %v4094_v23 = vadd.f32 %v10829_v46, %v10828_v9  ;;  %v10833_v9 = vld [vmem:[#allocation89_spill] sm:$0xff] }
 0x318   :  { %v9789_v32 = vadd.f32 %v4424_v52, %v4256_v49  ;;  %v10827_v49 = vld [vmem:[#allocation36_spill] sm:$0xff]  ;;  %v4099_v46 = vadd.f32 %v9594_v44, %v10833_v9 }
 0x319   :  { %v9803_v28 = vpop.f32.mrf.mxu1  ;;  %v10835_v44 = vld [vmem:[#allocation80_spill] sm:$0xff] }
 0x31a   :  { %v9791_v17 = vpop.f32.mrf.mxu0 }
 0x31b   :  { %4725 = vmatpush.bf16.msra.mxu2 %v2100_v48  ;;  %v7701_v48 = vld [vmem:[#allocation3 + $0x404] sm:$0xf] }
 0x31d   :  { %v4257_v26 = vpop.f32.mrf.mxu2  ;;  %v4426_v59 = vpop.f32.mrf.mxu3 }
 0x31e   :  { %v4258_v18 = vadd.f32 %v4257_v26, %v4089_v47  ;;  %v7004_v47 = vld [vmem:[#allocation3 + $0x408] sm:$0xf]  ;;  %v7001_v26 = vor.u32 %v7701_v48, %v6998_v34 }
 0x31f   :  { %4726 = vmatpush.bf16.msra.mxu2 %v2099_v37 }
 0x320   :  { %v9797_v21 = vadd.f32 %v4426_v59, %v4258_v18  ;;  %v7005_v59 = vor.u32 %v7706_v63, %v7004_v47  ;;  %v7714_v47 = vld [vmem:[#allocation3 + $0x464] sm:$0xf0] }
 0x322   :  { %4299 = vmatmul.bf16.gmra.mxu2 %v6969_v6  ;;  %v9799_v14 = vpop.f32.mrf.mxu0  ;;  %4597 = vmatmul.bf16.gmra.mxu1 %v6721_v20 }
 0x323   :  { %4468 = vmatmul.bf16.gmra.mxu3 %v6973_v60  ;;  %4727 = vmatpush.bf16.msra.mxu2 %v9707_v56  ;;  %v6750_v56 = vld [vmem:[#allocation3 + $0x228] sm:$0xf0]  ;;  %v10831_v60 = vld [vmem:[#allocation32_spill] sm:$0xff] }
 0x324   :  { %v6753_v18 = vor.u32 %v7638_v38, %v6750_v56  ;;  %v7646_v38 = vld [vmem:[#allocation3 + $0x24c] sm:$0xf]  ;;  %v7036_v56 = vld [vmem:[#allocation3 + $0x448] sm:$0xf] }
 0x325   :  { %v4260_v15 = vpop.f32.mrf.mxu2  ;;  %v4429_v8 = vpop.f32.mrf.mxu3 }
 0x326   :  { %v4261_v52 = vadd.f32 %v4260_v15, %v10827_v49 }
 0x327   :  { %4728 = vmatpush.bf16.msra.mxu2 %v9689_v53 }
 0x328   :  { %v9805_v12 = vadd.f32 %v4429_v8, %v4261_v52 }
 0x32a   :  { %v9808_v11 = vpop.f32.mrf.mxu0 }
 0x32b   :  { %4729 = vmatpush.bf16.msra.mxu2 %v9659_v45 }
 0x32d   :  { %v4262_v57 = vpop.f32.mrf.mxu2  ;;  %v4431_v13 = vpop.f32.mrf.mxu3 }
 0x32e   :  { %v4263_v42 = vadd.f32 %v4262_v57, %v4094_v23  ;;  %v6782_v23 = vld [vmem:[#allocation3 + $0x268] sm:$0xf0] }
 0x32f   :  { %v4563_v37 = vpop.f32.mrf.mxu1  ;;  %4730 = vmatpush.bf16.msra.mxu2 %v9611_v54  ;;  %v7709_v54 = vld [vmem:[#allocation3 + $0x444] sm:$0xf] }
 0x330   :  { %v9813_v53 = vadd.f32 %v4431_v13, %v4263_v42  ;;  %v9817_v6 = vadd.f32 %v4563_v37, %v9668_v55  ;;  %v7030_v55 = vld [vmem:[#allocation3 + $0x460] sm:$0xf0] }
 0x331   :  { %v7033_v13 = vor.u32 %v7709_v54, %v7030_v55 }
 0x332   :  { %10830 = vst [vmem:[#allocation13_spill] sm:$0xff] %v9817_v6  ;;  %4304 = vmatmul.bf16.gmra.mxu2 %v7001_v26  ;;  %v9819_v20 = vpop.f32.mrf.mxu0  ;;  %4602 = vmatmul.bf16.gmra.mxu1 %v6753_v18  ;;  %v6785_v26 = vor.u32 %v7646_v38, %v6782_v23  ;;  %v7037_v18 = vor.u32 %v7714_v47, %v7036_v56  ;;  %v7654_v23 = vld [vmem:[#allocation3 + $0x28c] sm:$0xf]  ;;  %v10837_v56 = vld [vmem:[#allocation93_spill] sm:$0xff] }
 0x333   :  { %4473 = vmatmul.bf16.gmra.mxu3 %v7005_v59  ;;  %v4104_v47 = vadd.f32 %v9651_v19, %v10837_v56  ;;  %v10839_v19 = vld [vmem:[#allocation92_spill] sm:$0xff] }
 0x335   :  { %v4265_v45 = vpop.f32.mrf.mxu2 }
 0x336   :  { %v4266_v15 = vadd.f32 %v4265_v45, %v10831_v60  ;;  %v4434_v49 = vpop.f32.mrf.mxu3  ;;  %v4102_v60 = vadd.f32 %v9625_v30, %v10835_v44  ;;  %v7722_v30 = vld [vmem:[#allocation3 + $0x4a4] sm:$0xf0] }
 0x337   :  { %v4565_v8 = vpop.f32.mrf.mxu1 }
 0x338   :  { %v9822_v52 = vadd.f32 %v4434_v49, %v4266_v15  ;;  %v9825_v48 = vadd.f32 %v4565_v8, %v9682_v24 }
 0x33a   :  { %10832 = vst [vmem:[#allocation20_spill] sm:$0xff] %v9825_v48  ;;  %v9827_v34 = vpop.f32.mrf.mxu0 }
 0x33d   :  { %v4267_v63 = vpop.f32.mrf.mxu2 }
 0x33e   :  { %v4268_v57 = vadd.f32 %v4267_v63, %v4099_v46  ;;  %v4436_v42 = vpop.f32.mrf.mxu3  ;;  %v7062_v46 = vld [vmem:[#allocation3 + $0x4a0] sm:$0xf0]  ;;  %v6814_v63 = vld [vmem:[#allocation3 + $0x2a8] sm:$0xf0] }
 0x33f   :  { %v4568_v24 = vpop.f32.mrf.mxu1 }
 0x340   :  { %v9831_v59 = vadd.f32 %v4436_v42, %v4268_v57  ;;  %v9834_v37 = vadd.f32 %v4568_v24, %v9696_v3  ;;  %v7717_v3 = vld [vmem:[#allocation3 + $0x484] sm:$0xf]  ;;  %v7068_v57 = vld [vmem:[#allocation3 + $0x488] sm:$0xf]  ;;  %v6817_v24 = vor.u32 %v7654_v23, %v6814_v63 }
 0x341   :  { %v7069_v44 = vor.u32 %v7722_v30, %v7068_v57  ;;  %v7094_v57 = vld [vmem:[#allocation3 + $0x4e0] sm:$0xf0]  ;;  %v7662_v30 = vld [vmem:[#allocation3 + $0x2cc] sm:$0xf] }
 0x342   :  { %10834 = vst [vmem:[#allocation16_spill] sm:$0xff] %v9834_v37  ;;  %4309 = vmatmul.bf16.gmra.mxu2 %v7033_v13  ;;  %v9836_v45 = vpop.f32.mrf.mxu0  ;;  %4607 = vmatmul.bf16.gmra.mxu1 %v6785_v26  ;;  %v10859_v37 = vld [vmem:[#allocation62_spill] sm:$0xff] }
 0x343   :  { %4478 = vmatmul.bf16.gmra.mxu3 %v7037_v18  ;;  %v7065_v18 = vor.u32 %v7717_v3, %v7062_v46 }
 0x345   :  { %v4270_v15 = vpop.f32.mrf.mxu2 }
 0x346   :  { %v4271_v49 = vadd.f32 %v4270_v15, %v4102_v60  ;;  %v4439_v8 = vpop.f32.mrf.mxu3 }
 0x347   :  { %v4570_v55 = vpop.f32.mrf.mxu1 }
 0x348   :  { %v9840_v54 = vadd.f32 %v4439_v8, %v4271_v49  ;;  %v9843_v38 = vadd.f32 %v4570_v55, %v9702_v40  ;;  %v4107_v8 = vadd.f32 %v9676_v33, %v10839_v19  ;;  %v7730_v33 = vld [vmem:[#allocation3 + $0x4e4] sm:$0xf0] }
 0x34a   :  { %10836 = vst [vmem:[#allocation23_spill] sm:$0xff] %v9843_v38  ;;  %v9845_v9 = vpop.f32.mrf.mxu0 }
 0x34d   :  { %v4272_v42 = vpop.f32.mrf.mxu2 }
 0x34e   :  { %v4273_v13 = vadd.f32 %v4272_v42, %v4104_v47  ;;  %v4441_v26 = vpop.f32.mrf.mxu3  ;;  %v10841_v42 = vld [vmem:[#allocation84_spill] sm:$0xff] }
 0x34f   :  { %v4573_v40 = vpop.f32.mrf.mxu1 }
 0x350   :  { %v9849_v60 = vadd.f32 %v4441_v26, %v4273_v13  ;;  %v9852_v15 = vadd.f32 %v4573_v40, %v9715_v35  ;;  %v7725_v35 = vld [vmem:[#allocation3 + $0x4c4] sm:$0xf]  ;;  %v4109_v13 = vadd.f32 %v9691_v50, %v10841_v42  ;;  %v6846_v26 = vld [vmem:[#allocation3 + $0x2e8] sm:$0xf0] }
 0x351   :  { %v7097_v19 = vor.u32 %v7725_v35, %v7094_v57  ;;  %v10843_v50 = vld [vmem:[#allocation18_spill] sm:$0xff] }
 0x352   :  { %10838 = vst [vmem:[#allocation26_spill] sm:$0xff] %v9852_v15  ;;  %4314 = vmatmul.bf16.gmra.mxu2 %v7065_v18  ;;  %v9854_v49 = vpop.f32.mrf.mxu0  ;;  %4612 = vmatmul.bf16.gmra.mxu1 %v6817_v24  ;;  %v7100_v18 = vld [vmem:[#allocation3 + $0x4c8] sm:$0xf]  ;;  %v4112_v42 = vadd.f32 %v9699_v16, %v10843_v50 }
 0x353   :  { %4483 = vmatmul.bf16.gmra.mxu3 %v7069_v44  ;;  %v7738_v16 = vld [vmem:[#allocation3 + $0x524] sm:$0xf0] }
 0x355   :  { %v4275_v55 = vpop.f32.mrf.mxu2 }
 0x356   :  { %v4276_v56 = vadd.f32 %v4275_v55, %v4107_v8  ;;  %v4444_v47 = vpop.f32.mrf.mxu3  ;;  %v6849_v8 = vor.u32 %v7662_v30, %v6846_v26  ;;  %v7101_v55 = vor.u32 %v7730_v33, %v7100_v18  ;;  %v7126_v18 = vld [vmem:[#allocation3 + $0x520] sm:$0xf0]  ;;  %v7670_v33 = vld [vmem:[#allocation3 + $0x30c] sm:$0xf] }
 0x357   :  { %v4575_v46 = vpop.f32.mrf.mxu1 }
 0x358   :  { %v9858_v3 = vadd.f32 %v4444_v47, %v4276_v56  ;;  %v9861_v23 = vadd.f32 %v4575_v46, %v9720_v25 }
 0x35a   :  { %10840 = vst [vmem:[#allocation27_spill] sm:$0xff] %v9861_v23  ;;  %v9863_v63 = vpop.f32.mrf.mxu0 }
 0x35d   :  { %v4277_v24 = vpop.f32.mrf.mxu2 }
 0x35e   :  { %v4278_v44 = vadd.f32 %v4277_v24, %v4109_v13  ;;  %v4446_v40 = vpop.f32.mrf.mxu3 }
 0x35f   :  { %v4578_v25 = vpop.f32.mrf.mxu1 }
 0x360   :  { %v9867_v56 = vadd.f32 %v4446_v40, %v4278_v44  ;;  %v9870_v47 = vadd.f32 %v4578_v25, %v9731_v22  ;;  %v7733_v22 = vld [vmem:[#allocation3 + $0x504] sm:$0xf]  ;;  %v10845_v44 = vld [vmem:[#allocation15_spill] sm:$0xff] }
 0x361   :  { %v4114_v40 = vadd.f32 %v9713_v0, %v10845_v44  ;;  %v7129_v50 = vor.u32 %v7733_v22, %v7126_v18  ;;  %v10847_v0 = vld [vmem:[#allocation87_spill] sm:$0xff] }
 0x362   :  { %10842 = vst [vmem:[#allocation35_spill] sm:$0xff] %v9870_v47  ;;  %4319 = vmatmul.bf16.gmra.mxu2 %v7097_v19  ;;  %v9872_v46 = vpop.f32.mrf.mxu0  ;;  %4617 = vmatmul.bf16.gmra.mxu1 %v6849_v8  ;;  %v6878_v19 = vld [vmem:[#allocation3 + $0x328] sm:$0xf0]  ;;  %v7132_v8 = vld [vmem:[#allocation3 + $0x508] sm:$0xf]  ;;  %v4117_v44 = vadd.f32 %v9725_v27, %v10847_v0 }
 0x363   :  { %4488 = vmatmul.bf16.gmra.mxu3 %v7101_v55  ;;  %v1713_v48 = vadd.f32 %v9872_v46, %v10859_v37  ;;  %v10861_v37 = vld [vmem:[#allocation25_spill] sm:$0xff] }
 0x364   :  { %v4127_v46 = vadd.f32 %v9763_v58, %v10861_v37  ;;  %v6974_v37 = vld [vmem:[#allocation3 + $0x3e8] sm:$0xf0] }
 0x365   :  { %v4280_v23 = vpop.f32.mrf.mxu2 }
 0x366   :  { %v4281_v13 = vadd.f32 %v4280_v23, %v4112_v42  ;;  %v4449_v24 = vpop.f32.mrf.mxu3  ;;  %v6881_v42 = vor.u32 %v7670_v33, %v6878_v19  ;;  %v7741_v19 = vld [vmem:[#allocation3 + $0x544] sm:$0xf] }
 0x367   :  { %v4580_v57 = vpop.f32.mrf.mxu1 }
 0x368   :  { %v9876_v35 = vadd.f32 %v4449_v24, %v4281_v13  ;;  %v9879_v30 = vadd.f32 %v4580_v57, %v9738_v1  ;;  %v7133_v13 = vor.u32 %v7738_v16, %v7132_v8  ;;  %v7678_v8 = vld [vmem:[#allocation3 + $0x34c] sm:$0xf]  ;;  %v10849_v16 = vld [vmem:[#allocation11_spill] sm:$0xff] }
 0x36a   :  { %10844 = vst [vmem:[#allocation28_spill] sm:$0xff] %v9879_v30  ;;  %v9881_v26 = vpop.f32.mrf.mxu0 }
 0x36d   :  { %v4282_v55 = vpop.f32.mrf.mxu2 }
 0x36e   :  { %v4283_v23 = vadd.f32 %v4282_v55, %v4114_v40  ;;  %v4451_v25 = vpop.f32.mrf.mxu3 }
 0x36f   :  { %v4583_v1 = vpop.f32.mrf.mxu1 }
 0x370   :  { %v9885_v24 = vadd.f32 %v4451_v25, %v4283_v23  ;;  %v9888_v57 = vadd.f32 %v4583_v1, %v9747_v62  ;;  %v7158_v62 = vld [vmem:[#allocation3 + $0x560] sm:$0xf0]  ;;  %v4119_v23 = vadd.f32 %v9735_v29, %v10849_v16  ;;  %v6910_v25 = vld [vmem:[#allocation3 + $0x368] sm:$0xf0] }
 0x371   :  { %v7161_v1 = vor.u32 %v7741_v19, %v7158_v62  ;;  %v10851_v29 = vld [vmem:[#allocation14_spill] sm:$0xff] }
 0x372   :  { %10846 = vst [vmem:[#allocation39_spill] sm:$0xff] %v9888_v57  ;;  %4324 = vmatmul.bf16.gmra.mxu2 %v7129_v50  ;;  %v1717_v30 = vpop.f32.mrf.mxu0  ;;  %4622 = vmatmul.bf16.gmra.mxu1 %v6881_v42  ;;  %v7164_v50 = vld [vmem:[#allocation3 + $0x548] sm:$0xf]  ;;  %v4122_v16 = vadd.f32 %v9744_v36, %v10851_v29 }
 0x373   :  { %4493 = vmatmul.bf16.gmra.mxu3 %v7133_v13  ;;  %v7746_v42 = vld [vmem:[#allocation3 + $0x564] sm:$0xf0] }
 0x374   :  { %v7165_v0 = vor.u32 %v7746_v42, %v7164_v50  ;;  %v7749_v42 = vld [vmem:[#allocation3 + $0x584] sm:$0xf] }
 0x375   :  { %v4285_v47 = vpop.f32.mrf.mxu2 }
 0x376   :  { %v4286_v15 = vadd.f32 %v4285_v47, %v4117_v44  ;;  %v4454_v40 = vpop.f32.mrf.mxu3 }
 0x377   :  { %v4585_v22 = vpop.f32.mrf.mxu1 }
 0x378   :  { %v9892_v55 = vadd.f32 %v4454_v40, %v4286_v15  ;;  %v9895_v18 = vadd.f32 %v4585_v22, %v9753_v5  ;;  %v6913_v15 = vor.u32 %v7678_v8, %v6910_v25 }
 0x37a   :  { %10848 = vst [vmem:[#allocation38_spill] sm:$0xff] %v9895_v18  ;;  %v1719_v33 = vpop.f32.mrf.mxu0 }
 0x37d   :  { %v4287_v27 = vpop.f32.mrf.mxu2 }
 0x37e   :  { %v4288_v13 = vadd.f32 %v4287_v27, %v4119_v23  ;;  %v4456_v47 = vpop.f32.mrf.mxu3  ;;  %v10852_v27 = vld [vmem:[#allocation63_spill] sm:$0xff] }
 0x37f   :  { %v4588_v5 = vpop.f32.mrf.mxu1 }
 0x380   :  { %v9899_v44 = vadd.f32 %v4456_v47, %v4288_v13  ;;  %v9902_v40 = vadd.f32 %v4588_v5, %v9761_v51  ;;  %v10854_v51 = vld [vmem:[#allocation64_spill] sm:$0xff]  ;;  %v7190_v47 = vld [vmem:[#allocation3 + $0x5a0] sm:$0xf0] }
 0x381   :  { %v1720_v50 = vadd.f32 %v1719_v33, %v10854_v51  ;;  %v7193_v38 = vor.u32 %v7749_v42, %v7190_v47 }
 0x382   :  { %10850 = vst [vmem:[#allocation31_spill] sm:$0xff] %v9902_v40  ;;  %4329 = vmatmul.bf16.gmra.mxu2 %v7161_v1  ;;  %v1722_v22 = vpop.f32.mrf.mxu0  ;;  %4627 = vmatmul.bf16.gmra.mxu1 %v6913_v15  ;;  %v7686_v1 = vld [vmem:[#allocation3 + $0x38c] sm:$0xf] }
 0x383   :  { %4498 = vmatmul.bf16.gmra.mxu3 %v7165_v0  ;;  %v1723_v19 = vadd.f32 %v1722_v22, %v10852_v27  ;;  %v6942_v15 = vld [vmem:[#allocation3 + $0x3a8] sm:$0xf0]  ;;  %v10858_v27 = vld [vmem:[#allocation61_spill] sm:$0xff]  ;;  %v1900_v33 = vmul.f32 0.2, %v1720_v50 }
 0x384   :  { %v10855_v0 = vld [vmem:[#allocation90_spill] sm:$0xff] }
 0x385   :  { %v4290_v18 = vpop.f32.mrf.mxu2  ;;  %v4124_v36 = vadd.f32 %v9751_v43, %v10855_v0  ;;  %v1901_v29 = vmul.f32 0.2, %v1723_v19  ;;  %v10857_v22 = vld [vmem:[#allocation58_spill] sm:$0xff]  ;;  %v6945_v43 = vor.u32 %v7686_v1, %v6942_v15 }
 0x386   :  { %v4291_v57 = vadd.f32 %v4290_v18, %v4122_v16  ;;  %v4459_v23 = vpop.f32.mrf.mxu3  ;;  %v10856_v18 = vld [vmem:[#allocation55_spill] sm:$0xff]  ;;  %v7196_v16 = vld [vmem:[#allocation3 + $0x588] sm:$0xf] }
 0x387   :  { %v4590_v8 = vpop.f32.mrf.mxu1  ;;  %v1718_v5 = vadd.f32 %v1717_v30, %v10856_v18  ;;  %v2029_v18 = vmax.f32 %v1723_v19, %v1901_v29  ;;  %v10862_v19 = vld [vmem:[#allocation59_spill] sm:$0xff] }
 0x388   :  { %v9907_v62 = vadd.f32 %v4459_v23, %v4291_v57  ;;  %v9910_v25 = vadd.f32 %v4590_v8, %v9774_v4  ;;  %v7754_v23 = vld [vmem:[#allocation3 + $0x5a4] sm:$0xf0]  ;;  %v1715_v4 = vadd.f32 %v9881_v26, %v10858_v27  ;;  %v10860_v26 = vld [vmem:[#allocation52_spill] sm:$0xff] }
 0x389   :  { %v7197_v0 = vor.u32 %v7754_v23, %v7196_v16  ;;  %v1899_v30 = vmul.f32 0.2, %v1718_v5  ;;  %v1710_v27 = vadd.f32 %v9863_v63, %v10860_v26  ;;  %v10864_v63 = vld [vmem:[#allocation60_spill] sm:$0xff]  ;;  %v7757_v26 = vld [vmem:[#allocation3 + $0x5c4] sm:$0xf] }
 0x38a   :  { %10853 = vst [vmem:[#allocation42_spill] sm:$0xff] %v9910_v25  ;;  %v1724_v13 = vpop.f32.mrf.mxu0 }
 0x38b   :  { %v1725_v57 = vadd.f32 %v1724_v13, %v10857_v22  ;;  %v2027_v1 = vmax.f32 %v1718_v5, %v1899_v30 }
 0x38d   :  { %v4292_v8 = vpop.f32.mrf.mxu2  ;;  %v1902_v51 = vmul.f32 0.2, %v1725_v57 }
 0x38e   :  { %v4293_v25 = vadd.f32 %v4292_v8, %v4124_v36  ;;  %v4461_v40 = vpop.f32.mrf.mxu3  ;;  %v1898_v36 = vmul.f32 0.2, %v1715_v4  ;;  %v2028_v8 = vmax.f32 %v1720_v50, %v1900_v33  ;;  %v1705_v50 = vadd.f32 %v9845_v9, %v10864_v63  ;;  %v7762_v63 = vld [vmem:[#allocation3 + $0x5e4] sm:$0xf0] }
 0x38f   :  { %v2030_v6 = vmax.f32 %v1725_v57, %v1902_v51  ;;  %v4593_v22 = vpop.f32.mrf.mxu1  ;;  %v10865_v51 = vld [vmem:[#allocation66_spill] sm:$0xff] }
 0x390   :  { %v9921_v13 = vadd.f32 %v4461_v40, %v4293_v25  ;;  %v9924_v31 = vadd.f32 %v4593_v22, %v9789_v32  ;;  %v1708_v40 = vadd.f32 %v9854_v49, %v10862_v19  ;;  %v1897_v25 = vmul.f32 0.2, %v1713_v48  ;;  %v10863_v32 = vld [vmem:[#allocation49_spill] sm:$0xff] }
 0x391   :  { %v2110_v42 = vpack.c.bf16 %v2030_v6, %v2029_v18  ;;  %v1703_v15 = vadd.f32 %v9836_v45, %v10863_v32  ;;  %v2026_v29 = vmax.f32 %v1715_v4, %v1898_v36  ;;  %v2109_v23 = vpack.c.bf16 %v2028_v8, %v2027_v1  ;;  %v10867_v36 = vld [vmem:[#allocation57_spill] sm:$0xff] }
 0x392   :  { %4334 = vmatmul.bf16.gmra.mxu2 %v7193_v38  ;;  %v1727_v47 = vpop.f32.mrf.mxu0  ;;  %4632 = vmatmul.bf16.gmra.mxu1 %v6945_v43  ;;  %v1896_v38 = vmul.f32 0.2, %v1710_v27  ;;  %v1895_v33 = vmul.f32 0.2, %v1708_v40  ;;  %v2025_v58 = vmax.f32 %v1713_v48, %v1897_v25  ;;  %v1894_v30 = vmul.f32 0.2, %v1705_v50 }
 0x393   :  { %4503 = vmatmul.bf16.gmra.mxu3 %v7197_v0  ;;  %v1728_v43 = vadd.f32 %v1727_v47, %v10865_v51  ;;  %v10866_v0 = vld [vmem:[#allocation56_spill] sm:$0xff]  ;;  %v1893_v18 = vmul.f32 0.2, %v1703_v15  ;;  %v1698_v48 = vadd.f32 %v9819_v20, %v10867_v36  ;;  %v7694_v47 = vld [vmem:[#allocation3 + $0x3cc] sm:$0xf]  ;;  %v10869_v1 = vld [vmem:[#allocation65_spill] sm:$0xff] }
 0x394   :  { %4892 = vmatpush.bf16.msra.mxu3 %v2110_v42  ;;  %v1700_v45 = vadd.f32 %v9827_v34, %v10866_v0  ;;  %v2024_v4 = vmax.f32 %v1710_v27, %v1896_v38  ;;  %v2108_v22 = vpack.c.bf16 %v2026_v29, %v2025_v58  ;;  %v7222_v42 = vld [vmem:[#allocation3 + $0x5e0] sm:$0xf0]  ;;  %v2023_v25 = vmax.f32 %v1708_v40, %v1895_v33  ;;  %v10870_v27 = vld [vmem:[#allocation46_spill] sm:$0xff] }
 0x395   :  { %v4295_v6 = vpop.f32.mrf.mxu2  ;;  %v1903_v34 = vmul.f32 0.2, %v1728_v43  ;;  %v2022_v29 = vmax.f32 %v1705_v50, %v1894_v30  ;;  %v7225_v51 = vor.u32 %v7757_v26, %v7222_v42  ;;  %v1891_v40 = vmul.f32 0.2, %v1698_v48  ;;  %v10872_v50 = vld [vmem:[#allocation54_spill] sm:$0xff] }
 0x396   :  { %v4296_v57 = vadd.f32 %v4295_v6, %v4127_v46  ;;  %v4464_v16 = vpop.f32.mrf.mxu3  ;;  %v10868_v46 = vld [vmem:[#allocation12_spill] sm:$0xff]  ;;  %v1695_v6 = vadd.f32 %v9808_v11, %v10870_v27  ;;  %v1892_v38 = vmul.f32 0.2, %v1700_v45  ;;  %v2107_v58 = vpack.c.bf16 %v2024_v4, %v2023_v25 }
 0x397   :  { %v4595_v5 = vpop.f32.mrf.mxu1  ;;  %v4129_v19 = vadd.f32 %v9783_v39, %v10868_v46  ;;  %v6977_v33 = vor.u32 %v7694_v47, %v6974_v37  ;;  %v2031_v36 = vmax.f32 %v1728_v43, %v1903_v34  ;;  %v1690_v30 = vadd.f32 %v9791_v17, %v10872_v50 }
 0x398   :  { %v9937_v49 = vadd.f32 %v4464_v16, %v4296_v57  ;;  %4893 = vmatpush.bf16.msra.mxu3 %v2109_v23  ;;  %v9942_v9 = vadd.f32 %v4595_v5, %v9797_v21  ;;  %v7228_v21 = vld [vmem:[#allocation3 + $0x5c8] sm:$0xf]  ;;  %v1890_v4 = vmul.f32 0.2, %v1695_v6  ;;  %v2020_v26 = vmax.f32 %v1700_v45, %v1892_v38 }
 0x399   :  { %v10871_v5 = vld [vmem:[#allocation53_spill] sm:$0xff]  ;;  %v7229_v0 = vor.u32 %v7762_v63, %v7228_v21  ;;  %v2019_v25 = vmax.f32 %v1698_v48, %v1891_v40 }
 0x39a   :  { %v1729_v8 = vpop.f32.mrf.mxu0  ;;  %v1693_v39 = vadd.f32 %v9799_v14, %v10871_v5  ;;  %v2018_v34 = vmax.f32 %v1695_v6, %v1890_v4  ;;  %v7765_v48 = vld [vmem:[#allocation3 + $0x604] sm:$0xf]  ;;  %v7770_v5 = vld [vmem:[#allocation3 + $0x624] sm:$0xf0] }
 0x39b   :  { %v1730_v32 = vadd.f32 %v1729_v8, %v10869_v1 }
 0x39c   :  { %4894 = vmatpush.bf16.msra.mxu3 %v2108_v22  ;;  %v2021_v22 = vmax.f32 %v1703_v15, %v1893_v18  ;;  %v10873_v15 = vld [vmem:[#allocation94_spill] sm:$0xff]  ;;  %v10874_v18 = vld [vmem:[#allocation43_spill] sm:$0xff]  ;;  %v1889_v37 = vmul.f32 0.2, %v1693_v39 }
 0x39d   :  { %v4297_v20 = vpop.f32.mrf.mxu2  ;;  %v1904_v57 = vmul.f32 0.2, %v1730_v32  ;;  %v4132_v43 = vadd.f32 %v9795_v7, %v10873_v15  ;;  %v1688_v47 = vadd.f32 %v9781_v41, %v10874_v18 }
 0x39e   :  { %v4298_v16 = vadd.f32 %v4297_v20, %v4129_v19  ;;  %v4466_v23 = vpop.f32.mrf.mxu3  ;;  %v2106_v14 = vpack.c.bf16 %v2022_v29, %v2021_v22  ;;  %v2017_v63 = vmax.f32 %v1693_v39, %v1889_v37  ;;  %v7254_v20 = vld [vmem:[#allocation3 + $0x620] sm:$0xf0] }
 0x39f   :  { %v4598_v46 = vpop.f32.mrf.mxu1  ;;  %v2032_v11 = vmax.f32 %v1730_v32, %v1904_v57  ;;  %v2105_v32 = vpack.c.bf16 %v2020_v26, %v2019_v25  ;;  %v1887_v21 = vmul.f32 0.2, %v1688_v47  ;;  %v7702_v57 = vld [vmem:[#allocation3 + $0x40c] sm:$0xf]  ;;  %v7257_v22 = vor.u32 %v7765_v48, %v7254_v20  ;;  %v7286_v37 = vld [vmem:[#allocation3 + $0x660] sm:$0xf0] }
 0x3a0   :  { %v9953_v8 = vadd.f32 %v4466_v23, %v4298_v16  ;;  %4895 = vmatpush.bf16.msra.mxu3 %v2107_v58  ;;  %v9958_v19 = vadd.f32 %v4598_v46, %v9805_v12  ;;  %v1888_v12 = vmul.f32 0.2, %v1690_v30  ;;  %v2104_v29 = vpack.c.bf16 %v2018_v34, %v2017_v63  ;;  %v10875_v16 = vld [vmem:[#allocation99_spill] sm:$0xff]  ;;  %v7006_v58 = vld [vmem:[#allocation3 + $0x428] sm:$0xf0] }
 0x3a1   :  { %v2111_v42 = vpack.c.bf16 %v2032_v11, %v2031_v36  ;;  %v4134_v6 = vadd.f32 %v9803_v28, %v10875_v16  ;;  %v2015_v23 = vmax.f32 %v1688_v47, %v1887_v21  ;;  %v10876_v28 = vld [vmem:[#allocation98_spill] sm:$0xff]  ;;  %v7773_v47 = vld [vmem:[#allocation3 + $0x644] sm:$0xf] }
 0x3a2   :  { %4339 = vmatmul.bf16.gmra.mxu2 %v7225_v51  ;;  %4637 = vmatmul.bf16.gmra.mxu1 %v6977_v33  ;;  %v2016_v41 = vmax.f32 %v1690_v30, %v1888_v12  ;;  %v7260_v51 = vld [vmem:[#allocation3 + $0x608] sm:$0xf]  ;;  %v10877_v30 = vld [vmem:[#allocation68_spill] sm:$0xff]  ;;  %v7710_v25 = vld [vmem:[#allocation3 + $0x44c] sm:$0xf] }
 0x3a3   :  { %4508 = vmatmul.bf16.gmra.mxu3 %v7229_v0  ;;  %5068 = vmatpush.bf16.msrb.mxu0 %v2111_v42  ;;  %v7261_v36 = vor.u32 %v7770_v5, %v7260_v51  ;;  %v4137_v4 = vadd.f32 %v10877_v30, %v10876_v28  ;;  %v7038_v34 = vld [vmem:[#allocation3 + $0x468] sm:$0xf0]  ;;  %v7324_v28 = vld [vmem:[#allocation3 + $0x688] sm:$0xf] }
 0x3a4   :  { %4896 = vmatpush.bf16.msra.mxu3 %v2106_v14  ;;  %v2103_v0 = vpack.c.bf16 %v2016_v41, %v2015_v23  ;;  %v7041_v41 = vor.u32 %v7710_v25, %v7038_v34  ;;  %v10881_v16 = vld [vmem:[#allocation70_spill] sm:$0xff] }
 0x3a5   :  { %v4300_v17 = vpop.f32.mrf.mxu2  ;;  %v7786_v30 = vld [vmem:[#allocation3 + $0x6a4] sm:$0xf0] }
 0x3a6   :  { %v4301_v1 = vadd.f32 %v4300_v17, %v4132_v43  ;;  %v4469_v45 = vpop.f32.mrf.mxu3  ;;  %v10879_v17 = vld [vmem:[#allocation69_spill] sm:$0xff] }
 0x3a7   :  { %v4600_v38 = vpop.f32.mrf.mxu1 }
 0x3a8   :  { %v9964_v27 = vadd.f32 %v4469_v45, %v4301_v1  ;;  %4897 = vmatpush.bf16.msra.mxu3 %v2105_v32  ;;  %v9967_v7 = vadd.f32 %v4600_v38, %v9813_v53  ;;  %v7009_v53 = vor.u32 %v7702_v57, %v7006_v58  ;;  %v7292_v1 = vld [vmem:[#allocation3 + $0x648] sm:$0xf]  ;;  %v7289_v38 = vor.u32 %v7773_v47, %v7286_v37 }
 0x3a9   :  { %v7778_v45 = vld [vmem:[#allocation3 + $0x664] sm:$0xf0]  ;;  %v7325_v47 = vor.u32 %v7786_v30, %v7324_v28 }
 0x3aa   :  { %v10880_v57 = vld [vmem:[#allocation102_spill] sm:$0xff] }
 0x3ac   :  { %4898 = vmatpush.bf16.msra.mxu3 %v2104_v29  ;;  %v7293_v29 = vor.u32 %v7778_v45, %v7292_v1 }
 0x3ad   :  { %v4302_v39 = vpop.f32.mrf.mxu2 }
 0x3ae   :  { %v4303_v40 = vadd.f32 %v4302_v39, %v4134_v6  ;;  %v4471_v33 = vpop.f32.mrf.mxu3  ;;  %v4142_v6 = vadd.f32 %v10881_v16, %v10880_v57  ;;  %v7356_v57 = vld [vmem:[#allocation3 + $0x6c8] sm:$0xf] }
 0x3af   :  { %v4603_v11 = vpop.f32.mrf.mxu1  ;;  %v7794_v16 = vld [vmem:[#allocation3 + $0x6e4] sm:$0xf0] }
 0x3b0   :  { %v9971_v46 = vadd.f32 %v4471_v33, %v4303_v40  ;;  %4899 = vmatpush.bf16.msra.mxu3 %v2103_v0  ;;  %v9974_v50 = vadd.f32 %v4603_v11, %v9822_v52  ;;  %v10878_v52 = vld [vmem:[#allocation96_spill] sm:$0xff]  ;;  %v7781_v33 = vld [vmem:[#allocation3 + $0x684] sm:$0xf]  ;;  %v7070_v11 = vld [vmem:[#allocation3 + $0x4a8] sm:$0xf0] }
 0x3b1   :  { %v4139_v12 = vadd.f32 %v10879_v17, %v10878_v52  ;;  %v7318_v0 = vld [vmem:[#allocation3 + $0x6a0] sm:$0xf0] }
 0x3b2   :  { %4344 = vmatmul.bf16.gmra.mxu2 %v7257_v22  ;;  %4642 = vmatmul.bf16.gmra.mxu1 %v7009_v53  ;;  %v7718_v22 = vld [vmem:[#allocation3 + $0x48c] sm:$0xf]  ;;  %v10883_v53 = vld [vmem:[#allocation73_spill] sm:$0xff] }
 0x3b3   :  { %4513 = vmatmul.bf16.gmra.mxu3 %v7261_v36  ;;  %v10884_v17 = vld [vmem:[#allocation17_spill] sm:$0xff] }
 0x3b5   :  { %v4305_v26 = vpop.f32.mrf.mxu2 }
 0x3b6   :  { %v4306_v14 = vadd.f32 %v4305_v26, %v4137_v4  ;;  %v4474_v42 = vpop.f32.mrf.mxu3 }
 0x3b7   :  { %v4605_v43 = vpop.f32.mrf.mxu1 }
 0x3b8   :  { %v9978_v15 = vadd.f32 %v4474_v42, %v4306_v14  ;;  %v9981_v18 = vadd.f32 %v4605_v43, %v9831_v59  ;;  %v7321_v42 = vor.u32 %v7781_v33, %v7318_v0  ;;  %v7073_v43 = vor.u32 %v7718_v22, %v7070_v11 }
 0x3b9   :  { %v7357_v33 = vor.u32 %v7794_v16, %v7356_v57 }
 0x3bd   :  { %v4307_v32 = vpop.f32.mrf.mxu2 }
 0x3be   :  { %v4308_v21 = vadd.f32 %v4307_v32, %v4139_v12  ;;  %v4476_v63 = vpop.f32.mrf.mxu3 }
 0x3bf   :  { %v4608_v20 = vpop.f32.mrf.mxu1 }
 0x3c0   :  { %v9985_v48 = vadd.f32 %v4476_v63, %v4308_v21  ;;  %v9988_v59 = vadd.f32 %v4608_v20, %v9840_v54  ;;  %v10882_v54 = vld [vmem:[#allocation33_spill] sm:$0xff]  ;;  %v7102_v20 = vld [vmem:[#allocation3 + $0x4e8] sm:$0xf0] }
 0x3c1   :  { %v4144_v36 = vadd.f32 %v10883_v53, %v10882_v54  ;;  %v7789_v21 = vld [vmem:[#allocation3 + $0x6c4] sm:$0xf]  ;;  %v10887_v54 = vld [vmem:[#allocation104_spill] sm:$0xff] }
 0x3c2   :  { %4349 = vmatmul.bf16.gmra.mxu2 %v7289_v38  ;;  %4647 = vmatmul.bf16.gmra.mxu1 %v7041_v41  ;;  %v7350_v63 = vld [vmem:[#allocation3 + $0x6e0] sm:$0xf0]  ;;  %v7726_v38 = vld [vmem:[#allocation3 + $0x4cc] sm:$0xf] }
 0x3c3   :  { %4518 = vmatmul.bf16.gmra.mxu3 %v7293_v29  ;;  %v10885_v41 = vld [vmem:[#allocation105_spill] sm:$0xff]  ;;  %v10886_v29 = vld [vmem:[#allocation78_spill] sm:$0xff] }
 0x3c4   :  { %v10888_v53 = vld [vmem:[#allocation81_spill] sm:$0xff] }
 0x3c5   :  { %v4310_v23 = vpop.f32.mrf.mxu2 }
 0x3c6   :  { %v4311_v58 = vadd.f32 %v4310_v23, %v4142_v6  ;;  %v4479_v51 = vpop.f32.mrf.mxu3 }
 0x3c7   :  { %v4610_v39 = vpop.f32.mrf.mxu1 }
 0x3c8   :  { %v9992_v5 = vadd.f32 %v4479_v51, %v4311_v58  ;;  %v9995_v40 = vadd.f32 %v4610_v39, %v9849_v60  ;;  %v7353_v51 = vor.u32 %v7789_v21, %v7350_v63  ;;  %v7105_v39 = vor.u32 %v7726_v38, %v7102_v20  ;;  %v10890_v20 = vld [vmem:[#allocation107_spill] sm:$0xff] }
 0x3cd   :  { %v4312_v4 = vpop.f32.mrf.mxu2 }
 0x3ce   :  { %v4313_v26 = vadd.f32 %v4312_v4, %v4144_v36  ;;  %v4481_v14 = vpop.f32.mrf.mxu3  ;;  %v4152_v36 = vadd.f32 %v10888_v53, %v10887_v54  ;;  %v7420_v54 = vld [vmem:[#allocation3 + $0x748] sm:$0xf] }
 0x3cf   :  { %v4613_v25 = vpop.f32.mrf.mxu1 }
 0x3d0   :  { %v9999_v37 = vadd.f32 %v4481_v14, %v4313_v26  ;;  %v10002_v60 = vadd.f32 %v4613_v25, %v9858_v3  ;;  %v4149_v3 = vadd.f32 %v10886_v29, %v10885_v41  ;;  %v7388_v25 = vld [vmem:[#allocation3 + $0x708] sm:$0xf] }
 0x3d2   :  { %4354 = vmatmul.bf16.gmra.mxu2 %v7321_v42  ;;  %4652 = vmatmul.bf16.gmra.mxu1 %v7073_v43  ;;  %v7797_v42 = vld [vmem:[#allocation3 + $0x704] sm:$0xf] }
 0x3d3   :  { %4523 = vmatmul.bf16.gmra.mxu3 %v7325_v47  ;;  %v7382_v43 = vld [vmem:[#allocation3 + $0x720] sm:$0xf0]  ;;  %v7734_v47 = vld [vmem:[#allocation3 + $0x50c] sm:$0xf] }
 0x3d4   :  { %v7385_v21 = vor.u32 %v7797_v42, %v7382_v43 }
 0x3d5   :  { %v4315_v52 = vpop.f32.mrf.mxu2 }
 0x3d6   :  { %v4316_v12 = vadd.f32 %v4315_v52, %v10884_v17  ;;  %v4484_v34 = vpop.f32.mrf.mxu3  ;;  %v7802_v52 = vld [vmem:[#allocation3 + $0x724] sm:$0xf0] }
 0x3d7   :  { %v4615_v45 = vpop.f32.mrf.mxu1  ;;  %v7389_v38 = vor.u32 %v7802_v52, %v7388_v25  ;;  %v10892_v25 = vld [vmem:[#allocation100_spill] sm:$0xff] }
 0x3d8   :  { %v10005_v1 = vadd.f32 %v4484_v34, %v4316_v12  ;;  %v10008_v32 = vadd.f32 %v4615_v45, %v9867_v56  ;;  %v10889_v12 = vld [vmem:[#allocation97_spill] sm:$0xff] }
 0x3dd   :  { %v4317_v6 = vpop.f32.mrf.mxu2 }
 0x3de   :  { %v4318_v23 = vadd.f32 %v4317_v6, %v4149_v3  ;;  %v4486_v58 = vpop.f32.mrf.mxu3 }
 0x3df   :  { %v4618_v22 = vpop.f32.mrf.mxu1 }
 0x3e0   :  { %v10012_v0 = vadd.f32 %v4486_v58, %v4318_v23  ;;  %v10015_v56 = vadd.f32 %v4618_v22, %v9876_v35  ;;  %v7134_v35 = vld [vmem:[#allocation3 + $0x528] sm:$0xf0] }
 0x3e1   :  { %v7137_v63 = vor.u32 %v7734_v47, %v7134_v35  ;;  %v7166_v22 = vld [vmem:[#allocation3 + $0x568] sm:$0xf0] }
 0x3e2   :  { %4359 = vmatmul.bf16.gmra.mxu2 %v7353_v51  ;;  %4657 = vmatmul.bf16.gmra.mxu1 %v7105_v39  ;;  %v7805_v51 = vld [vmem:[#allocation3 + $0x744] sm:$0xf] }
 0x3e3   :  { %4528 = vmatmul.bf16.gmra.mxu3 %v7357_v33  ;;  %v7414_v39 = vld [vmem:[#allocation3 + $0x760] sm:$0xf0]  ;;  %v7742_v33 = vld [vmem:[#allocation3 + $0x54c] sm:$0xf] }
 0x3e5   :  { %v4320_v11 = vpop.f32.mrf.mxu2 }
 0x3e6   :  { %v4321_v28 = vadd.f32 %v4320_v11, %v4152_v36  ;;  %v4489_v30 = vpop.f32.mrf.mxu3  ;;  %v10891_v36 = vld [vmem:[#allocation29_spill] sm:$0xff] }
 0x3e7   :  { %v4620_v26 = vpop.f32.mrf.mxu1 }
 0x3e8   :  { %v10019_v4 = vadd.f32 %v4489_v30, %v4321_v28  ;;  %v10022_v14 = vadd.f32 %v4620_v26, %v9885_v24  ;;  %v7417_v30 = vor.u32 %v7805_v51, %v7414_v39  ;;  %v7169_v26 = vor.u32 %v7742_v33, %v7166_v22 }
 0x3ed   :  { %v4322_v17 = vpop.f32.mrf.mxu2 }
 0x3ee   :  { %v4323_v34 = vadd.f32 %v4322_v17, %v10889_v12  ;;  %v4491_v45 = vpop.f32.mrf.mxu3 }
 0x3ef   :  { %v4623_v29 = vpop.f32.mrf.mxu1 }
 0x3f0   :  { %v10025_v41 = vadd.f32 %v4491_v45, %v4323_v34  ;;  %v10028_v3 = vadd.f32 %v4623_v29, %v9892_v55  ;;  %v7810_v55 = vld [vmem:[#allocation3 + $0x764] sm:$0xf0]  ;;  %v7198_v29 = vld [vmem:[#allocation3 + $0x5a8] sm:$0xf0] }
 0x3f1   :  { %v7421_v42 = vor.u32 %v7810_v55, %v7420_v54 }
 0x3f2   :  { %4364 = vmatmul.bf16.gmra.mxu2 %v7385_v21  ;;  %4662 = vmatmul.bf16.gmra.mxu1 %v7137_v63  ;;  %v7813_v21 = vld [vmem:[#allocation3 + $0x784] sm:$0xf] }
 0x3f3   :  { %4533 = vmatmul.bf16.gmra.mxu3 %v7389_v38  ;;  %v7446_v63 = vld [vmem:[#allocation3 + $0x7a0] sm:$0xf0]  ;;  %v7750_v38 = vld [vmem:[#allocation3 + $0x58c] sm:$0xf] }
 0x3f4   :  { %v7449_v51 = vor.u32 %v7813_v21, %v7446_v63  ;;  %v7201_v39 = vor.u32 %v7750_v38, %v7198_v29  ;;  %v7826_v21 = vld [vmem:[#allocation3 + $0x7e4] sm:$0xf0]  ;;  %v10895_v38 = vld [vmem:[#allocation103_spill] sm:$0xff] }
 0x3f5   :  { %v4325_v24 = vpop.f32.mrf.mxu2 }
 0x3f6   :  { %v4326_v57 = vadd.f32 %v4325_v24, %v10890_v20  ;;  %v4494_v16 = vpop.f32.mrf.mxu3  ;;  %v7452_v24 = vld [vmem:[#allocation3 + $0x788] sm:$0xf] }
 0x3f7   :  { %v4625_v23 = vpop.f32.mrf.mxu1 }
 0x3f8   :  { %v10031_v6 = vadd.f32 %v4494_v16, %v4326_v57  ;;  %v10034_v58 = vadd.f32 %v4625_v23, %v9899_v44  ;;  %v10893_v57 = vld [vmem:[#allocation108_spill] sm:$0xff] }
 0x3fd   :  { %v4327_v53 = vpop.f32.mrf.mxu2 }
 0x3fe   :  { %v4328_v11 = vadd.f32 %v4327_v53, %v10891_v36  ;;  %v4496_v28 = vpop.f32.mrf.mxu3  ;;  %v10894_v53 = vld [vmem:[#allocation22_spill] sm:$0xff] }
 0x3ff   :  { %v4628_v47 = vpop.f32.mrf.mxu1 }
 0x400   :  { %v10037_v43 = vadd.f32 %v4496_v28, %v4328_v11  ;;  %v10040_v35 = vadd.f32 %v4628_v47, %v9907_v62  ;;  %v7818_v62 = vld [vmem:[#allocation3 + $0x7a4] sm:$0xf0]  ;;  %v7580_v47 = vld [vmem:[#allocation3 + $0x34] sm:$0xf0] }
 0x401   :  { %v7453_v33 = vor.u32 %v7818_v62, %v7452_v24 }
 0x402   :  { %4369 = vmatmul.bf16.gmra.mxu2 %v7417_v30  ;;  %4667 = vmatmul.bf16.gmra.mxu1 %v7169_v26 }
 0x403   :  { %4538 = vmatmul.bf16.gmra.mxu3 %v7421_v42  ;;  %v6508_v42 = vld [vmem:[#allocation3 + $0x18] sm:$0xf] }
 0x405   :  { %v4330_v44 = vpop.f32.mrf.mxu2 }
 0x406   :  { %v4331_v52 = vadd.f32 %v4330_v44, %v10892_v25  ;;  %v4499_v17 = vpop.f32.mrf.mxu3  ;;  %v6509_v44 = vor.u32 %v7580_v47, %v6508_v42  ;;  %v7821_v25 = vld [vmem:[#allocation3 + $0x7c4] sm:$0xf]  ;;  %v7766_v47 = vld [vmem:[#allocation3 + $0x60c] sm:$0xf] }
 0x407   :  { %v4630_v34 = vpop.f32.mrf.mxu1 }
 0x408   :  { %v10043_v12 = vadd.f32 %v4499_v17, %v4331_v52  ;;  %v10046_v45 = vadd.f32 %v4630_v34, %v9921_v13  ;;  %v7478_v52 = vld [vmem:[#allocation3 + $0x7e0] sm:$0xf0]  ;;  %v7230_v17 = vld [vmem:[#allocation3 + $0x5e8] sm:$0xf0]  ;;  %v7484_v34 = vld [vmem:[#allocation3 + $0x7c8] sm:$0xf]  ;;  %5069 = vmatmul.bf16.vlgmr.msrb.gmra.mxu0 %v6509_v44 }
 0x409   :  { %v7481_v62 = vor.u32 %v7821_v25, %v7478_v52  ;;  %v6500_v44 = vld [vmem:[#allocation3 + $0x10] sm:$0xf]  ;;  %v7262_v25 = vld [vmem:[#allocation3 + $0x628] sm:$0xf0]  ;;  %v7575_v52 = vld [vmem:[#allocation3 + $0x14] sm:$0xf] }
 0x40d   :  { %v4332_v20 = vpop.f32.mrf.mxu2 }
 0x40e   :  { %v4333_v16 = vadd.f32 %v4332_v20, %v10893_v57  ;;  %v4501_v23 = vpop.f32.mrf.mxu3  ;;  %v7485_v57 = vor.u32 %v7826_v21, %v7484_v34  ;;  %v10897_v34 = vld [vmem:[#allocation19_spill] sm:$0xff] }
 0x40f   :  { %v4633_v54 = vpop.f32.mrf.mxu1 }
 0x410   :  { %v10049_v22 = vadd.f32 %v4501_v23, %v4333_v16  ;;  %v10052_v55 = vadd.f32 %v4633_v54, %v9937_v49  ;;  %v7758_v49 = vld [vmem:[#allocation3 + $0x5cc] sm:$0xf] }
 0x411   :  { %v7233_v20 = vor.u32 %v7758_v49, %v7230_v17  ;;  %v6502_v49 = vld [vmem:[#allocation3 + $0x30] sm:$0xf0] }
 0x412   :  { %4374 = vmatmul.bf16.gmra.mxu2 %v7449_v51  ;;  %4672 = vmatmul.bf16.gmra.mxu1 %v7201_v39  ;;  %v10896_v39 = vld [vmem:[#allocation109_spill] sm:$0xff] }
 0x413   :  { %4543 = vmatmul.bf16.gmra.mxu3 %v7453_v33 }
 0x415   :  { %v4335_v13 = vpop.f32.mrf.mxu2 }
 0x416   :  { %v4336_v36 = vadd.f32 %v4335_v13, %v10894_v53  ;;  %v4504_v11 = vpop.f32.mrf.mxu3 }
 0x417   :  { %v4635_v30 = vpop.f32.mrf.mxu1 }
 0x418   :  { %v10055_v28 = vadd.f32 %v4504_v11, %v4336_v36  ;;  %v10058_v26 = vadd.f32 %v4635_v30, %v9953_v8  ;;  %v6540_v11 = vld [vmem:[#allocation3 + $0x58] sm:$0xf] }
 0x419   :  { %v7588_v30 = vld [vmem:[#allocation3 + $0x74] sm:$0xf0] }
 0x41a   :  { %v6541_v42 = vor.u32 %v7588_v30, %v6540_v11  ;;  %v6572_v11 = vld [vmem:[#allocation3 + $0x98] sm:$0xf] }
 0x41b   :  { %v7596_v30 = vld [vmem:[#allocation3 + $0xb4] sm:$0xf0] }
 0x41c   :  { %5074 = vmatmul.bf16.gmra.mxu0 %v6541_v42  ;;  %v6573_v42 = vor.u32 %v7596_v30, %v6572_v11 }
 0x41d   :  { %v4337_v63 = vpop.f32.mrf.mxu2 }
 0x41e   :  { %v4338_v29 = vadd.f32 %v4337_v63, %v10895_v38  ;;  %v4506_v24 = vpop.f32.mrf.mxu3 }
 0x41f   :  { %v4638_v8 = vpop.f32.mrf.mxu1 }
 0x420   :  { %v10061_v16 = vadd.f32 %v4506_v24, %v4338_v29  ;;  %v10064_v23 = vadd.f32 %v4638_v8, %v9964_v27  ;;  %v7579_v27 = vld [vmem:[#allocation3 + $0x2c] sm:$0xf0]  ;;  %v7265_v29 = vor.u32 %v7766_v47, %v7262_v25  ;;  %v6505_v24 = vor.u32 %v7575_v52, %v6502_v49  ;;  %v7774_v47 = vld [vmem:[#allocation3 + $0x64c] sm:$0xf]  ;;  %v7583_v25 = vld [vmem:[#allocation3 + $0x54] sm:$0xf] }
 0x421   :  { %v6501_v38 = vor.u32 %v7579_v27, %v6500_v44  ;;  %v10898_v8 = vld [vmem:[#allocation106_spill] sm:$0xff]  ;;  %v6534_v52 = vld [vmem:[#allocation3 + $0x70] sm:$0xf0] }
 0x422   :  { %4379 = vmatmul.bf16.gmra.mxu2 %v7481_v62  ;;  %4677 = vmatmul.bf16.gmra.mxu1 %v7233_v20  ;;  %v6532_v44 = vld [vmem:[#allocation3 + $0x50] sm:$0xf]  ;;  %v7294_v27 = vld [vmem:[#allocation3 + $0x668] sm:$0xf0] }
 0x423   :  { %4548 = vmatmul.bf16.gmra.mxu3 %v7485_v57 }
 0x425   :  { %v4340_v51 = vpop.f32.mrf.mxu2 }
 0x426   :  { %v4341_v33 = vadd.f32 %v4340_v51, %v10896_v39  ;;  %v4509_v54 = vpop.f32.mrf.mxu3 }
 0x427   :  { %v4640_v53 = vpop.f32.mrf.mxu1 }
 0x428   :  { %v10067_v13 = vadd.f32 %v4509_v54, %v4341_v33  ;;  %v10070_v36 = vadd.f32 %v4640_v53, %v9971_v46 }
 0x42c   :  { %5079 = vmatmul.bf16.gmra.mxu0 %v6573_v42  ;;  %v6604_v42 = vld [vmem:[#allocation3 + $0xd8] sm:$0xf] }
 0x42d   :  { %v4342_v17 = vpop.f32.mrf.mxu2 }
 0x42e   :  { %v4343_v21 = vadd.f32 %v4342_v17, %v10897_v34  ;;  %v4511_v63 = vpop.f32.mrf.mxu3  ;;  %v10899_v17 = vld [vmem:[#allocation111_spill] sm:$0xff] }
 0x42f   :  { %v4643_v46 = vpop.f32.mrf.mxu1 }
 0x430   :  { %v10073_v62 = vadd.f32 %v4511_v63, %v4343_v21  ;;  %v10076_v20 = vadd.f32 %v4643_v46, %v9978_v15  ;;  %v7587_v15 = vld [vmem:[#allocation3 + $0x6c] sm:$0xf0] }
 0x431   :  { %v6533_v63 = vor.u32 %v7587_v15, %v6532_v44  ;;  %v7782_v15 = vld [vmem:[#allocation3 + $0x68c] sm:$0xf] }
 0x432   :  { %4731 = vmatmul.bf16.vlgmr.msra.gmra.mxu2 %v6501_v38  ;;  %4682 = vmatmul.bf16.gmra.mxu1 %v7265_v29  ;;  %v7297_v38 = vor.u32 %v7774_v47, %v7294_v27  ;;  %v6537_v29 = vor.u32 %v7583_v25, %v6534_v52  ;;  %v7604_v47 = vld [vmem:[#allocation3 + $0xf4] sm:$0xf0]  ;;  %v6564_v27 = vld [vmem:[#allocation3 + $0x90] sm:$0xf]  ;;  %v7326_v25 = vld [vmem:[#allocation3 + $0x6a8] sm:$0xf0] }
 0x433   :  { %4900 = vmatmul.bf16.vlgmr.msra.gmra.mxu3 %v6505_v24  ;;  %v6605_v44 = vor.u32 %v7604_v47, %v6604_v42  ;;  %v7591_v52 = vld [vmem:[#allocation3 + $0x94] sm:$0xf] }
 0x435   :  { %v4345_v57 = vpop.f32.mrf.mxu2 }
 0x436   :  { %v4346_v51 = vadd.f32 %v4345_v57, %v10898_v8  ;;  %v4514_v39 = vpop.f32.mrf.mxu3  ;;  %v10900_v8 = vld [vmem:[#allocation110_spill] sm:$0xff] }
 0x437   :  { %v4645_v54 = vpop.f32.mrf.mxu1 }
 0x438   :  { %v10079_v33 = vadd.f32 %v4514_v39, %v4346_v51  ;;  %v10082_v53 = vadd.f32 %v4645_v54, %v9985_v48 }
 0x43c   :  { %5084 = vmatmul.bf16.gmra.mxu0 %v6605_v44 }
 0x43d   :  { %v4347_v49 = vpop.f32.mrf.mxu2 }
 0x43e   :  { %v4348_v34 = vadd.f32 %v4347_v49, %v10899_v17  ;;  %v4516_v21 = vpop.f32.mrf.mxu3  ;;  %v6566_v49 = vld [vmem:[#allocation3 + $0xb0] sm:$0xf0] }
 0x43f   :  { %v4648_v48 = vpop.f32.mrf.mxu1 }
 0x440   :  { %v10085_v24 = vadd.f32 %v4516_v21, %v4348_v34  ;;  %v10088_v46 = vadd.f32 %v4648_v48, %v9992_v5  ;;  %v7595_v5 = vld [vmem:[#allocation3 + $0xac] sm:$0xf0]  ;;  %v6569_v48 = vor.u32 %v7591_v52, %v6566_v49  ;;  %v7790_v52 = vld [vmem:[#allocation3 + $0x6cc] sm:$0xf] }
 0x441   :  { %v10901_v34 = vld [vmem:[#allocation30_spill] sm:$0xff] }
 0x442   :  { %4736 = vmatmul.bf16.gmra.mxu2 %v6533_v63  ;;  %4687 = vmatmul.bf16.gmra.mxu1 %v7297_v38  ;;  %v6565_v38 = vor.u32 %v7595_v5, %v6564_v27  ;;  %v7612_v5 = vld [vmem:[#allocation3 + $0x134] sm:$0xf0]  ;;  %v6596_v49 = vld [vmem:[#allocation3 + $0xd0] sm:$0xf] }
 0x443   :  { %4905 = vmatmul.bf16.gmra.mxu3 %v6537_v29  ;;  %v7329_v29 = vor.u32 %v7782_v15, %v7326_v25  ;;  %v6636_v15 = vld [vmem:[#allocation3 + $0x118] sm:$0xf] }
 0x444   :  { %v6637_v25 = vor.u32 %v7612_v5, %v6636_v15  ;;  %v10907_v15 = vld [vmem:[#allocation114_spill] sm:$0xff] }
 0x445   :  { %v4350_v57 = vpop.f32.mrf.mxu2 }
 0x446   :  { %v4351_v51 = vadd.f32 %v4350_v57, %v10900_v8  ;;  %v4519_v39 = vpop.f32.mrf.mxu3 }
 0x447   :  { %v4650_v11 = vpop.f32.mrf.mxu1 }
 0x448   :  { %v10091_v54 = vadd.f32 %v4519_v39, %v4351_v51  ;;  %v10094_v30 = vadd.f32 %v4650_v11, %v9999_v37  ;;  %v10903_v39 = vld [vmem:[#allocation112_spill] sm:$0xff] }
 0x44c   :  { %5089 = vmatmul.bf16.gmra.mxu0 %v6637_v25 }
 0x44d   :  { %v4352_v17 = vpop.f32.mrf.mxu2 }
 0x44e   :  { %v4353_v21 = vadd.f32 %v4352_v17, %v10901_v34  ;;  %v4521_v63 = vpop.f32.mrf.mxu3  ;;  %v7358_v17 = vld [vmem:[#allocation3 + $0x6e8] sm:$0xf0]  ;;  %v7599_v34 = vld [vmem:[#allocation3 + $0xd4] sm:$0xf] }
 0x44f   :  { %v4653_v37 = vpop.f32.mrf.mxu1 }
 0x450   :  { %v10097_v57 = vadd.f32 %v4521_v63, %v4353_v21  ;;  %v10100_v8 = vadd.f32 %v4653_v37, %v10005_v1  ;;  %v7603_v1 = vld [vmem:[#allocation3 + $0xec] sm:$0xf0]  ;;  %v6598_v21 = vld [vmem:[#allocation3 + $0xf0] sm:$0xf0] }
 0x451   :  { %v6597_v37 = vor.u32 %v7603_v1, %v6596_v49  ;;  %v7620_v1 = vld [vmem:[#allocation3 + $0x174] sm:$0xf0] }
 0x452   :  { %10902 = vst [vmem:[#allocation67_spill] sm:$0xff] %v10100_v8  ;;  %4741 = vmatmul.bf16.gmra.mxu2 %v6565_v38  ;;  %4692 = vmatmul.bf16.gmra.mxu1 %v7329_v29  ;;  %v10905_v38 = vld [vmem:[#allocation113_spill] sm:$0xff] }
 0x453   :  { %4910 = vmatmul.bf16.gmra.mxu3 %v6569_v48 }
 0x455   :  { %v4355_v51 = vpop.f32.mrf.mxu2 }
 0x456   :  { %v4356_v11 = vadd.f32 %v4355_v51, %v10903_v39  ;;  %v4524_v42 = vpop.f32.mrf.mxu3  ;;  %v7361_v51 = vor.u32 %v7790_v52, %v7358_v17  ;;  %v6601_v39 = vor.u32 %v7599_v34, %v6598_v21  ;;  %v6668_v52 = vld [vmem:[#allocation3 + $0x158] sm:$0xf]  ;;  %v7798_v34 = vld [vmem:[#allocation3 + $0x70c] sm:$0xf]  ;;  %v6628_v21 = vld [vmem:[#allocation3 + $0x110] sm:$0xf] }
 0x457   :  { %v4655_v44 = vpop.f32.mrf.mxu1  ;;  %v6669_v17 = vor.u32 %v7620_v1, %v6668_v52  ;;  %v10911_v1 = vld [vmem:[#allocation116_spill] sm:$0xff] }
 0x458   :  { %v10103_v47 = vadd.f32 %v4524_v42, %v4356_v11  ;;  %v10106_v27 = vadd.f32 %v4655_v44, %v10012_v0 }
 0x45a   :  { %10904 = vst [vmem:[#allocation74_spill] sm:$0xff] %v10106_v27 }
 0x45c   :  { %5094 = vmatmul.bf16.gmra.mxu0 %v6669_v17 }
 0x45d   :  { %v4357_v63 = vpop.f32.mrf.mxu2 }
 0x45e   :  { %v4358_v29 = vadd.f32 %v4357_v63, %v10905_v38  ;;  %v4526_v48 = vpop.f32.mrf.mxu3  ;;  %v7390_v38 = vld [vmem:[#allocation3 + $0x728] sm:$0xf0] }
 0x45f   :  { %v4658_v0 = vpop.f32.mrf.mxu1 }
 0x460   :  { %v10109_v11 = vadd.f32 %v4526_v48, %v4358_v29  ;;  %v10112_v42 = vadd.f32 %v4658_v0, %v10019_v4  ;;  %v7611_v4 = vld [vmem:[#allocation3 + $0x12c] sm:$0xf0]  ;;  %v7607_v29 = vld [vmem:[#allocation3 + $0x114] sm:$0xf] }
 0x461   :  { %v6630_v48 = vld [vmem:[#allocation3 + $0x130] sm:$0xf0] }
 0x462   :  { %10906 = vst [vmem:[#allocation41_spill] sm:$0xff] %v10112_v42  ;;  %4746 = vmatmul.bf16.gmra.mxu2 %v6597_v37  ;;  %4697 = vmatmul.bf16.gmra.mxu1 %v7361_v51  ;;  %v10909_v51 = vld [vmem:[#allocation115_spill] sm:$0xff] }
 0x463   :  { %4915 = vmatmul.bf16.gmra.mxu3 %v6601_v39 }
 0x465   :  { %v4360_v44 = vpop.f32.mrf.mxu2 }
 0x466   :  { %v4361_v5 = vadd.f32 %v4360_v44, %v10907_v15  ;;  %v4529_v25 = vpop.f32.mrf.mxu3  ;;  %v6629_v44 = vor.u32 %v7611_v4, %v6628_v21  ;;  %v7393_v15 = vor.u32 %v7798_v34, %v7390_v38  ;;  %v6700_v34 = vld [vmem:[#allocation3 + $0x198] sm:$0xf] }
 0x467   :  { %v4660_v63 = vpop.f32.mrf.mxu1  ;;  %v7628_v4 = vld [vmem:[#allocation3 + $0x1b4] sm:$0xf0] }
 0x468   :  { %v10115_v27 = vadd.f32 %v4529_v25, %v4361_v5  ;;  %v10118_v49 = vadd.f32 %v4660_v63, %v10025_v41  ;;  %v6633_v5 = vor.u32 %v7607_v29, %v6630_v48  ;;  %v6701_v38 = vor.u32 %v7628_v4, %v6700_v34  ;;  %v7806_v29 = vld [vmem:[#allocation3 + $0x74c] sm:$0xf]  ;;  %v6660_v48 = vld [vmem:[#allocation3 + $0x150] sm:$0xf] }
 0x469   :  { %v10915_v4 = vld [vmem:[#allocation118_spill] sm:$0xff] }
 0x46a   :  { %10908 = vst [vmem:[#allocation34_spill] sm:$0xff] %v10118_v49 }
 0x46c   :  { %5099 = vmatmul.bf16.gmra.mxu0 %v6701_v38 }
 0x46d   :  { %v4362_v37 = vpop.f32.mrf.mxu2 }
 0x46e   :  { %v4363_v39 = vadd.f32 %v4362_v37, %v10909_v51  ;;  %v4531_v0 = vpop.f32.mrf.mxu3  ;;  %v7422_v51 = vld [vmem:[#allocation3 + $0x768] sm:$0xf0] }
 0x46f   :  { %v4663_v41 = vpop.f32.mrf.mxu1 }
 0x470   :  { %v10121_v25 = vadd.f32 %v4531_v0, %v4363_v39  ;;  %v10124_v63 = vadd.f32 %v4663_v41, %v10031_v6  ;;  %v7619_v6 = vld [vmem:[#allocation3 + $0x16c] sm:$0xf0]  ;;  %v7615_v39 = vld [vmem:[#allocation3 + $0x154] sm:$0xf] }
 0x471   :  { %v6662_v0 = vld [vmem:[#allocation3 + $0x170] sm:$0xf0] }
 0x472   :  { %10910 = vst [vmem:[#allocation71_spill] sm:$0xff] %v10124_v63  ;;  %4751 = vmatmul.bf16.gmra.mxu2 %v6629_v44  ;;  %4702 = vmatmul.bf16.gmra.mxu1 %v7393_v15  ;;  %v10913_v15 = vld [vmem:[#allocation117_spill] sm:$0xff] }
 0x473   :  { %4920 = vmatmul.bf16.gmra.mxu3 %v6633_v5 }
 0x475   :  { %v4365_v52 = vpop.f32.mrf.mxu2 }
 0x476   :  { %v4366_v49 = vadd.f32 %v4365_v52, %v10911_v1  ;;  %v4534_v17 = vpop.f32.mrf.mxu3  ;;  %v7425_v52 = vor.u32 %v7806_v29, %v7422_v51  ;;  %v6665_v1 = vor.u32 %v7615_v39, %v6662_v0  ;;  %v6732_v29 = vld [vmem:[#allocation3 + $0x1d8] sm:$0xf]  ;;  %v7814_v39 = vld [vmem:[#allocation3 + $0x78c] sm:$0xf]  ;;  %v6692_v0 = vld [vmem:[#allocation3 + $0x190] sm:$0xf] }
 0x477   :  { %v4665_v37 = vpop.f32.mrf.mxu1 }
 0x478   :  { %v10127_v42 = vadd.f32 %v4534_v17, %v4366_v49  ;;  %v10130_v21 = vadd.f32 %v4665_v37, %v10037_v43  ;;  %v6661_v49 = vor.u32 %v7619_v6, %v6660_v48  ;;  %v7636_v6 = vld [vmem:[#allocation3 + $0x1f4] sm:$0xf0] }
 0x479   :  { %v6733_v51 = vor.u32 %v7636_v6, %v6732_v29 }
 0x47a   :  { %10912 = vst [vmem:[#allocation76_spill] sm:$0xff] %v10130_v21 }
 0x47c   :  { %5104 = vmatmul.bf16.gmra.mxu0 %v6733_v51 }
 0x47d   :  { %v4367_v44 = vpop.f32.mrf.mxu2 }
 0x47e   :  { %v4368_v5 = vadd.f32 %v4367_v44, %v10913_v15  ;;  %v4536_v41 = vpop.f32.mrf.mxu3  ;;  %v7454_v15 = vld [vmem:[#allocation3 + $0x7a8] sm:$0xf0] }
 0x47f   :  { %v4668_v43 = vpop.f32.mrf.mxu1 }
 0x480   :  { %v10133_v17 = vadd.f32 %v4536_v41, %v4368_v5  ;;  %v10136_v37 = vadd.f32 %v4668_v43, %v10043_v12  ;;  %v7627_v12 = vld [vmem:[#allocation3 + $0x1ac] sm:$0xf0]  ;;  %v7623_v5 = vld [vmem:[#allocation3 + $0x194] sm:$0xf] }
 0x481   :  { %v6694_v41 = vld [vmem:[#allocation3 + $0x1b0] sm:$0xf0] }
 0x482   :  { %10914 = vst [vmem:[#allocation75_spill] sm:$0xff] %v10136_v37  ;;  %4756 = vmatmul.bf16.gmra.mxu2 %v6661_v49  ;;  %4707 = vmatmul.bf16.gmra.mxu1 %v7425_v52  ;;  %v10917_v52 = vld [vmem:[#allocation21_spill] sm:$0xff] }
 0x483   :  { %4925 = vmatmul.bf16.gmra.mxu3 %v6665_v1 }
 0x485   :  { %v4370_v34 = vpop.f32.mrf.mxu2 }
 0x486   :  { %v4371_v21 = vadd.f32 %v4370_v34, %v10915_v4  ;;  %v4539_v38 = vpop.f32.mrf.mxu3  ;;  %v7457_v34 = vor.u32 %v7814_v39, %v7454_v15  ;;  %v6697_v4 = vor.u32 %v7623_v5, %v6694_v41  ;;  %v10156_v39 = vpop.f32.mrf.mxu0  ;;  %v7644_v15 = vld [vmem:[#allocation3 + $0x234] sm:$0xf0]  ;;  %v7822_v5 = vld [vmem:[#allocation3 + $0x7cc] sm:$0xf]  ;;  %v7635_v41 = vld [vmem:[#allocation3 + $0x1ec] sm:$0xf0] }
 0x487   :  { %v4670_v44 = vpop.f32.mrf.mxu1 }
 0x488   :  { %v10139_v63 = vadd.f32 %v4539_v38, %v4371_v21  ;;  %v10142_v48 = vadd.f32 %v4670_v44, %v10049_v22  ;;  %v6693_v21 = vor.u32 %v7627_v12, %v6692_v0  ;;  %v6764_v12 = vld [vmem:[#allocation3 + $0x218] sm:$0xf] }
 0x48a   :  { %10916 = vst [vmem:[#allocation79_spill] sm:$0xff] %v10142_v48 }
 0x48d   :  { %v4372_v49 = vpop.f32.mrf.mxu2 }
 0x48e   :  { %v4373_v1 = vadd.f32 %v4372_v49, %v10917_v52  ;;  %v4541_v43 = vpop.f32.mrf.mxu3  ;;  %v6765_v52 = vor.u32 %v7644_v15, %v6764_v12 }
 0x48f   :  { %v4673_v22 = vpop.f32.mrf.mxu1 }
 0x490   :  { %v10145_v38 = vadd.f32 %v4541_v43, %v4373_v1  ;;  %v10148_v44 = vadd.f32 %v4673_v22, %v10055_v28  ;;  %v6724_v28 = vld [vmem:[#allocation3 + $0x1d0] sm:$0xf]  ;;  %v7486_v1 = vld [vmem:[#allocation3 + $0x7e8] sm:$0xf0]  ;;  %v7631_v43 = vld [vmem:[#allocation3 + $0x1d4] sm:$0xf]  ;;  %5109 = vmatmul.bf16.gmra.mxu0 %v6765_v52 }
 0x491   :  { %v6725_v22 = vor.u32 %v7635_v41, %v6724_v28 }
 0x492   :  { %10918 = vst [vmem:[#allocation82_spill] sm:$0xff] %v10148_v44  ;;  %4761 = vmatmul.bf16.gmra.mxu2 %v6693_v21  ;;  %4712 = vmatmul.bf16.gmra.mxu1 %v7457_v34  ;;  %v6726_v21 = vld [vmem:[#allocation3 + $0x1f0] sm:$0xf0] }
 0x493   :  { %4930 = vmatmul.bf16.gmra.mxu3 %v6697_v4 }
 0x495   :  { %v4375_v29 = vpop.f32.mrf.mxu2 }
 0x496   :  { %v4376_v6 = vadd.f32 %v4375_v29, %v9585_v61  ;;  %v4544_v51 = vpop.f32.mrf.mxu3  ;;  %v7489_v29 = vor.u32 %v7822_v5, %v7486_v1  ;;  %v6796_v1 = vld [vmem:[#allocation3 + $0x258] sm:$0xf] }
 0x497   :  { %v4675_v49 = vpop.f32.mrf.mxu1 }
 0x498   :  { %v10151_v48 = vadd.f32 %v4544_v51, %v4376_v6  ;;  %v10154_v0 = vadd.f32 %v4675_v49, %v10061_v16  ;;  %v6729_v16 = vor.u32 %v7631_v43, %v6726_v21  ;;  %v2765_v43 = vpop.permute.xlu2 %2764  ;;  %v6756_v21 = vld [vmem:[#allocation3 + $0x210] sm:$0xf] }
 0x49a   :  { %10919 = vst [vmem:[#allocation85_spill] sm:$0xff] %v10154_v0  ;;  %v10164_v0 = vpop.f32.mrf.mxu0 }
 0x49d   :  { %v4377_v34 = vpop.f32.mrf.mxu2 }
 0x49e   :  { %v4378_v61 = vadd.f32 %v4377_v34, %v9600_v10  ;;  %v4546_v4 = vpop.f32.mrf.mxu3  ;;  %v7643_v34 = vld [vmem:[#allocation3 + $0x22c] sm:$0xf0] }
 0x49f   :  { %v4678_v51 = vpop.f32.mrf.mxu1 }
 0x4a0   :  { %v10159_v6 = vadd.f32 %v4546_v4, %v4378_v61  ;;  %v10162_v49 = vadd.f32 %v4678_v51, %v10067_v13  ;;  %v7652_v13 = vld [vmem:[#allocation3 + $0x274] sm:$0xf0]  ;;  %v7576_v61 = vld [vmem:[#allocation3 + $0x1c] sm:$0xf]  ;;  %v6758_v51 = vld [vmem:[#allocation3 + $0x230] sm:$0xf0] }
 0x4a1   :  { %v6797_v4 = vor.u32 %v7652_v13, %v6796_v1  ;;  %v10923_v13 = vld [vmem:[#allocation13_spill] sm:$0xff] }
 0x4a2   :  { %10920 = vst [vmem:[#allocation72_spill] sm:$0xff] %v10162_v49  ;;  %4766 = vmatmul.bf16.gmra.mxu2 %v6725_v22  ;;  %4717 = vmatmul.bf16.gmra.mxu1 %v7489_v29  ;;  %v10172_v41 = vpop.f32.mrf.mxu0  ;;  %v10922_v22 = vld [vmem:[#allocation24_spill] sm:$0xff] }
 0x4a3   :  { %4935 = vmatmul.bf16.gmra.mxu3 %v6729_v16  ;;  %v4214_v29 = vadd.f32 %v10922_v22, %v2765_v43  ;;  %v6510_v16 = vld [vmem:[#allocation3 + $0x38] sm:$0xf0]  ;;  %5114 = vmatmul.bf16.gmra.mxu0 %v6797_v4 }
 0x4a5   :  { %v4380_v12 = vpop.f32.mrf.mxu2 }
 0x4a6   :  { %v4381_v15 = vadd.f32 %v4380_v12, %v9627_v2  ;;  %v4549_v52 = vpop.f32.mrf.mxu3  ;;  %v7639_v2 = vld [vmem:[#allocation3 + $0x214] sm:$0xf] }
 0x4a7   :  { %v4680_v28 = vpop.f32.mrf.mxu1 }
 0x4a8   :  { %v10167_v10 = vadd.f32 %v4549_v52, %v4381_v15  ;;  %v10170_v5 = vadd.f32 %v4680_v28, %v10073_v62  ;;  %v6757_v62 = vor.u32 %v7643_v34, %v6756_v21  ;;  %v6513_v28 = vor.u32 %v7576_v61, %v6510_v16  ;;  %v6788_v16 = vld [vmem:[#allocation3 + $0x250] sm:$0xf] }
 0x4aa   :  { %10921 = vst [vmem:[#allocation88_spill] sm:$0xff] %v10170_v5  ;;  %v6761_v5 = vor.u32 %v7639_v2, %v6758_v51  ;;  %v10180_v8 = vpop.f32.mrf.mxu0  ;;  %v7651_v2 = vld [vmem:[#allocation3 + $0x26c] sm:$0xf0]  ;;  %v7584_v51 = vld [vmem:[#allocation3 + $0x5c] sm:$0xf] }
 0x4ad   :  { %v4382_v12 = vpop.f32.mrf.mxu2 }
 0x4ae   :  { %v4383_v15 = vadd.f32 %v4382_v12, %v4214_v29  ;;  %v4551_v52 = vpop.f32.mrf.mxu3  ;;  %v6542_v12 = vld [vmem:[#allocation3 + $0x78] sm:$0xf0] }
 0x4af   :  { %v4683_v44 = vpop.f32.mrf.mxu1 }
 0x4b0   :  { %v10175_v49 = vadd.f32 %v4551_v52, %v4383_v15  ;;  %v10178_v37 = vadd.f32 %v4683_v44, %v10079_v33  ;;  %v6828_v33 = vld [vmem:[#allocation3 + $0x298] sm:$0xf]  ;;  %v7647_v15 = vld [vmem:[#allocation3 + $0x254] sm:$0xf] }
 0x4b1   :  { %v7660_v44 = vld [vmem:[#allocation3 + $0x2b4] sm:$0xf0]  ;;  %v6790_v52 = vld [vmem:[#allocation3 + $0x270] sm:$0xf0] }
 0x4b2   :  { %4771 = vmatmul.bf16.gmra.mxu2 %v6757_v62  ;;  %5238 = vmatmul.bf16.vlgmr.msra.gmra.mxu1 %v6513_v28  ;;  %v10186_v34 = vpop.f32.mrf.mxu0  ;;  %v10925_v28 = vld [vmem:[#allocation20_spill] sm:$0xff] }
 0x4b3   :  { %4940 = vmatmul.bf16.gmra.mxu3 %v6761_v5  ;;  %v6829_v5 = vor.u32 %v7660_v44, %v6828_v33 }
 0x4b5   :  { %v4732_v1 = vpop.f32.mrf.mxu2  ;;  %5119 = vmatmul.bf16.gmra.mxu0 %v6829_v5  ;;  %v10927_v5 = vld [vmem:[#allocation16_spill] sm:$0xff] }
 0x4b6   :  { %v4733_v43 = vadd.f32 %v4732_v1, %v10923_v13  ;;  %v4901_v4 = vpop.f32.mrf.mxu3  ;;  %v6789_v13 = vor.u32 %v7651_v2, %v6788_v16 }
 0x4b7   :  { %v4685_v22 = vpop.f32.mrf.mxu1 }
 0x4b8   :  { %v4902_v29 = vadd.f32 %v4901_v4, %v4733_v43  ;;  %v10184_v21 = vadd.f32 %v4685_v22, %v10085_v24  ;;  %v6545_v43 = vor.u32 %v7584_v51, %v6542_v12  ;;  %v6793_v4 = vor.u32 %v7647_v15, %v6790_v52  ;;  %v6860_v15 = vld [vmem:[#allocation3 + $0x2d8] sm:$0xf]  ;;  %v6820_v52 = vld [vmem:[#allocation3 + $0x290] sm:$0xf] }
 0x4ba   :  { %10924 = vst [vmem:[#allocation91_spill] sm:$0xff] %v10184_v21  ;;  %v10189_v61 = vadd.f32 %v10156_v39, %v4902_v29  ;;  %v10195_v21 = vpop.f32.mrf.mxu0 }
 0x4bd   :  { %v4734_v62 = vpop.f32.mrf.mxu2 }
 0x4be   :  { %v4735_v1 = vadd.f32 %v4734_v62, %v10925_v28  ;;  %v4903_v24 = vpop.f32.mrf.mxu3 }
 0x4bf   :  { %v4688_v22 = vpop.f32.mrf.mxu1 }
 0x4c0   :  { %v4904_v39 = vadd.f32 %v4903_v24, %v4735_v1  ;;  %v10193_v29 = vadd.f32 %v4688_v22, %v10091_v54  ;;  %v7659_v1 = vld [vmem:[#allocation3 + $0x2ac] sm:$0xf0]  ;;  %v7592_v24 = vld [vmem:[#allocation3 + $0x9c] sm:$0xf]  ;;  %v6822_v22 = vld [vmem:[#allocation3 + $0x2b0] sm:$0xf0] }
 0x4c2   :  { %10926 = vst [vmem:[#allocation51_spill] sm:$0xff] %v10193_v29  ;;  %v10198_v33 = vadd.f32 %v10164_v0, %v4904_v39  ;;  %4776 = vmatmul.bf16.gmra.mxu2 %v6789_v13  ;;  %5243 = vmatmul.bf16.gmra.mxu1 %v6545_v43  ;;  %v10204_v12 = vpop.f32.mrf.mxu0  ;;  %v7668_v0 = vld [vmem:[#allocation3 + $0x2f4] sm:$0xf0]  ;;  %v6574_v43 = vld [vmem:[#allocation3 + $0xb8] sm:$0xf0] }
 0x4c3   :  { %4945 = vmatmul.bf16.gmra.mxu3 %v6793_v4  ;;  %v6861_v13 = vor.u32 %v7668_v0, %v6860_v15  ;;  %v7655_v4 = vld [vmem:[#allocation3 + $0x294] sm:$0xf] }
 0x4c5   :  { %v4737_v44 = vpop.f32.mrf.mxu2  ;;  %5124 = vmatmul.bf16.gmra.mxu0 %v6861_v13  ;;  %v10931_v13 = vld [vmem:[#allocation26_spill] sm:$0xff] }
 0x4c6   :  { %v4738_v62 = vadd.f32 %v4737_v44, %v10927_v5  ;;  %v4906_v28 = vpop.f32.mrf.mxu3  ;;  %v10929_v44 = vld [vmem:[#allocation23_spill] sm:$0xff] }
 0x4c7   :  { %v4690_v16 = vpop.f32.mrf.mxu1 }
 0x4c8   :  { %v4907_v2 = vadd.f32 %v4906_v28, %v4738_v62  ;;  %v10202_v51 = vadd.f32 %v4690_v16, %v10097_v57  ;;  %v6821_v62 = vor.u32 %v7659_v1, %v6820_v52  ;;  %v6577_v28 = vor.u32 %v7592_v24, %v6574_v43 }
 0x4c9   :  { %v6825_v16 = vor.u32 %v7655_v4, %v6822_v22  ;;  %v6852_v4 = vld [vmem:[#allocation3 + $0x2d0] sm:$0xf] }
 0x4ca   :  { %10928 = vst [vmem:[#allocation40_spill] sm:$0xff] %v10202_v51  ;;  %v10207_v54 = vadd.f32 %v10172_v41, %v4907_v2  ;;  %v10213_v29 = vpop.f32.mrf.mxu0  ;;  %v7667_v22 = vld [vmem:[#allocation3 + $0x2ec] sm:$0xf0] }
 0x4cd   :  { %v4739_v39 = vpop.f32.mrf.mxu2 }
 0x4ce   :  { %v4740_v5 = vadd.f32 %v4739_v39, %v10929_v44  ;;  %v4908_v57 = vpop.f32.mrf.mxu3 }
 0x4cf   :  { %v4693_v51 = vpop.f32.mrf.mxu1 }
 0x4d0   :  { %v4909_v41 = vadd.f32 %v4908_v57, %v4740_v5  ;;  %v10211_v2 = vadd.f32 %v4693_v51, %v10103_v47  ;;  %v6892_v51 = vld [vmem:[#allocation3 + $0x318] sm:$0xf]  ;;  %v7600_v5 = vld [vmem:[#allocation3 + $0xdc] sm:$0xf] }
 0x4d2   :  { %10930 = vst [vmem:[#allocation83_spill] sm:$0xff] %v10211_v2  ;;  %v10216_v15 = vadd.f32 %v10180_v8, %v4909_v41  ;;  %4781 = vmatmul.bf16.gmra.mxu2 %v6821_v62  ;;  %5248 = vmatmul.bf16.gmra.mxu1 %v6577_v28  ;;  %v10222_v43 = vpop.f32.mrf.mxu0  ;;  %v7676_v8 = vld [vmem:[#allocation3 + $0x334] sm:$0xf0]  ;;  %v6606_v62 = vld [vmem:[#allocation3 + $0xf8] sm:$0xf0] }
 0x4d3   :  { %4950 = vmatmul.bf16.gmra.mxu3 %v6825_v16  ;;  %v6893_v57 = vor.u32 %v7676_v8, %v6892_v51  ;;  %v7663_v28 = vld [vmem:[#allocation3 + $0x2d4] sm:$0xf] }
 0x4d4   :  { %v6854_v16 = vld [vmem:[#allocation3 + $0x2f0] sm:$0xf0] }
 0x4d5   :  { %v4742_v0 = vpop.f32.mrf.mxu2  ;;  %5129 = vmatmul.bf16.gmra.mxu0 %v6893_v57  ;;  %v10935_v57 = vld [vmem:[#allocation35_spill] sm:$0xff] }
 0x4d6   :  { %v4743_v39 = vadd.f32 %v4742_v0, %v10931_v13  ;;  %v4911_v44 = vpop.f32.mrf.mxu3  ;;  %v10933_v0 = vld [vmem:[#allocation27_spill] sm:$0xff] }
 0x4d7   :  { %v4695_v52 = vpop.f32.mrf.mxu1 }
 0x4d8   :  { %v4912_v1 = vadd.f32 %v4911_v44, %v4743_v39  ;;  %v10220_v24 = vadd.f32 %v4695_v52, %v10109_v11  ;;  %v6853_v39 = vor.u32 %v7667_v22, %v6852_v4  ;;  %v6609_v44 = vor.u32 %v7600_v5, %v6606_v62 }
 0x4d9   :  { %v6857_v52 = vor.u32 %v7663_v28, %v6854_v16  ;;  %v6884_v28 = vld [vmem:[#allocation3 + $0x310] sm:$0xf] }
 0x4da   :  { %10932 = vst [vmem:[#allocation95_spill] sm:$0xff] %v10220_v24  ;;  %v10225_v47 = vadd.f32 %v10186_v34, %v4912_v1  ;;  %v10231_v2 = vpop.f32.mrf.mxu0  ;;  %v7675_v16 = vld [vmem:[#allocation3 + $0x32c] sm:$0xf0] }
 0x4dd   :  { %v4744_v41 = vpop.f32.mrf.mxu2 }
 0x4de   :  { %v4745_v13 = vadd.f32 %v4744_v41, %v10933_v0  ;;  %v4913_v11 = vpop.f32.mrf.mxu3 }
 0x4df   :  { %v4698_v24 = vpop.f32.mrf.mxu1 }
 0x4e0   :  { %v4914_v34 = vadd.f32 %v4913_v11, %v4745_v13  ;;  %v10229_v1 = vadd.f32 %v4698_v24, %v10115_v27  ;;  %v6924_v24 = vld [vmem:[#allocation3 + $0x358] sm:$0xf]  ;;  %v7608_v13 = vld [vmem:[#allocation3 + $0x11c] sm:$0xf] }
 0x4e2   :  { %10934 = vst [vmem:[#allocation47_spill] sm:$0xff] %v10229_v1  ;;  %v10234_v51 = vadd.f32 %v10195_v21, %v4914_v34  ;;  %4786 = vmatmul.bf16.gmra.mxu2 %v6853_v39  ;;  %5253 = vmatmul.bf16.gmra.mxu1 %v6609_v44  ;;  %v10240_v62 = vpop.f32.mrf.mxu0  ;;  %v7684_v21 = vld [vmem:[#allocation3 + $0x374] sm:$0xf0]  ;;  %v6638_v39 = vld [vmem:[#allocation3 + $0x138] sm:$0xf0] }
 0x4e3   :  { %4955 = vmatmul.bf16.gmra.mxu3 %v6857_v52  ;;  %v6925_v11 = vor.u32 %v7684_v21, %v6924_v24  ;;  %v7671_v44 = vld [vmem:[#allocation3 + $0x314] sm:$0xf] }
 0x4e4   :  { %v6886_v52 = vld [vmem:[#allocation3 + $0x330] sm:$0xf0] }
 0x4e5   :  { %v4747_v8 = vpop.f32.mrf.mxu2  ;;  %5134 = vmatmul.bf16.gmra.mxu0 %v6925_v11  ;;  %v10939_v11 = vld [vmem:[#allocation39_spill] sm:$0xff] }
 0x4e6   :  { %v4748_v41 = vadd.f32 %v4747_v8, %v10935_v57  ;;  %v4916_v0 = vpop.f32.mrf.mxu3  ;;  %v10937_v8 = vld [vmem:[#allocation28_spill] sm:$0xff] }
 0x4e7   :  { %v4700_v4 = vpop.f32.mrf.mxu1 }
 0x4e8   :  { %v4917_v22 = vadd.f32 %v4916_v0, %v4748_v41  ;;  %v10238_v5 = vadd.f32 %v4700_v4, %v10121_v25  ;;  %v6885_v41 = vor.u32 %v7675_v16, %v6884_v28  ;;  %v6641_v0 = vor.u32 %v7608_v13, %v6638_v39 }
 0x4e9   :  { %v6889_v4 = vor.u32 %v7671_v44, %v6886_v52  ;;  %v6916_v44 = vld [vmem:[#allocation3 + $0x350] sm:$0xf] }
 0x4ea   :  { %10936 = vst [vmem:[#allocation50_spill] sm:$0xff] %v10238_v5  ;;  %v10243_v27 = vadd.f32 %v10204_v12, %v4917_v22  ;;  %v10249_v1 = vpop.f32.mrf.mxu0  ;;  %v7683_v52 = vld [vmem:[#allocation3 + $0x36c] sm:$0xf0] }
 0x4ed   :  { %v4749_v34 = vpop.f32.mrf.mxu2 }
 0x4ee   :  { %v4750_v57 = vadd.f32 %v4749_v34, %v10937_v8  ;;  %v4918_v25 = vpop.f32.mrf.mxu3 }
 0x4ef   :  { %v4703_v5 = vpop.f32.mrf.mxu1 }
 0x4f0   :  { %v4919_v12 = vadd.f32 %v4918_v25, %v4750_v57  ;;  %v10247_v22 = vadd.f32 %v4703_v5, %v10127_v42  ;;  %v6956_v5 = vld [vmem:[#allocation3 + $0x398] sm:$0xf]  ;;  %v7616_v57 = vld [vmem:[#allocation3 + $0x15c] sm:$0xf] }
 0x4f2   :  { %10938 = vst [vmem:[#allocation48_spill] sm:$0xff] %v10247_v22  ;;  %v10252_v24 = vadd.f32 %v10213_v29, %v4919_v12  ;;  %4791 = vmatmul.bf16.gmra.mxu2 %v6885_v41  ;;  %5258 = vmatmul.bf16.gmra.mxu1 %v6641_v0  ;;  %v10258_v39 = vpop.f32.mrf.mxu0  ;;  %v7692_v29 = vld [vmem:[#allocation3 + $0x3b4] sm:$0xf0]  ;;  %v6670_v41 = vld [vmem:[#allocation3 + $0x178] sm:$0xf0] }
 0x4f3   :  { %4960 = vmatmul.bf16.gmra.mxu3 %v6889_v4  ;;  %v6957_v25 = vor.u32 %v7692_v29, %v6956_v5  ;;  %v7679_v0 = vld [vmem:[#allocation3 + $0x354] sm:$0xf] }
 0x4f4   :  { %v6918_v4 = vld [vmem:[#allocation3 + $0x370] sm:$0xf0] }
 0x4f5   :  { %v4752_v21 = vpop.f32.mrf.mxu2  ;;  %5139 = vmatmul.bf16.gmra.mxu0 %v6957_v25  ;;  %v10943_v25 = vld [vmem:[#allocation31_spill] sm:$0xff] }
 0x4f6   :  { %v4753_v34 = vadd.f32 %v4752_v21, %v10939_v11  ;;  %v4921_v8 = vpop.f32.mrf.mxu3  ;;  %v10941_v21 = vld [vmem:[#allocation38_spill] sm:$0xff] }
 0x4f7   :  { %v4705_v28 = vpop.f32.mrf.mxu1 }
 0x4f8   :  { %v4922_v16 = vadd.f32 %v4921_v8, %v4753_v34  ;;  %v10256_v13 = vadd.f32 %v4705_v28, %v10133_v17  ;;  %v6917_v34 = vor.u32 %v7683_v52, %v6916_v44  ;;  %v6673_v8 = vor.u32 %v7616_v57, %v6670_v41 }
 0x4f9   :  { %v6921_v28 = vor.u32 %v7679_v0, %v6918_v4  ;;  %v6948_v0 = vld [vmem:[#allocation3 + $0x390] sm:$0xf] }
 0x4fa   :  { %10940 = vst [vmem:[#allocation37_spill] sm:$0xff] %v10256_v13  ;;  %v10261_v42 = vadd.f32 %v10222_v43, %v4922_v16  ;;  %v10267_v22 = vpop.f32.mrf.mxu0  ;;  %v7691_v4 = vld [vmem:[#allocation3 + $0x3ac] sm:$0xf0] }
 0x4fd   :  { %v4754_v12 = vpop.f32.mrf.mxu2 }
 0x4fe   :  { %v4755_v11 = vadd.f32 %v4754_v12, %v10941_v21  ;;  %v4923_v17 = vpop.f32.mrf.mxu3 }
 0x4ff   :  { %v4708_v13 = vpop.f32.mrf.mxu1 }
 0x500   :  { %v4924_v43 = vadd.f32 %v4923_v17, %v4755_v11  ;;  %v10265_v16 = vadd.f32 %v4708_v13, %v10139_v63  ;;  %v6988_v13 = vld [vmem:[#allocation3 + $0x3d8] sm:$0xf]  ;;  %v7624_v11 = vld [vmem:[#allocation3 + $0x19c] sm:$0xf] }
 0x502   :  { %10942 = vst [vmem:[#allocation44_spill] sm:$0xff] %v10265_v16  ;;  %v10270_v5 = vadd.f32 %v10231_v2, %v4924_v43  ;;  %4796 = vmatmul.bf16.gmra.mxu2 %v6917_v34  ;;  %5263 = vmatmul.bf16.gmra.mxu1 %v6673_v8  ;;  %v10276_v41 = vpop.f32.mrf.mxu0  ;;  %v7700_v2 = vld [vmem:[#allocation3 + $0x3f4] sm:$0xf0]  ;;  %v6702_v34 = vld [vmem:[#allocation3 + $0x1b8] sm:$0xf0] }
 0x503   :  { %4965 = vmatmul.bf16.gmra.mxu3 %v6921_v28  ;;  %v6989_v17 = vor.u32 %v7700_v2, %v6988_v13  ;;  %v7687_v8 = vld [vmem:[#allocation3 + $0x394] sm:$0xf] }
 0x504   :  { %v6950_v28 = vld [vmem:[#allocation3 + $0x3b0] sm:$0xf0] }
 0x505   :  { %v4757_v29 = vpop.f32.mrf.mxu2  ;;  %5144 = vmatmul.bf16.gmra.mxu0 %v6989_v17 }
 0x506   :  { %v4758_v12 = vadd.f32 %v4757_v29, %v10943_v25  ;;  %v4926_v21 = vpop.f32.mrf.mxu3  ;;  %v10945_v29 = vld [vmem:[#allocation42_spill] sm:$0xff] }
 0x507   :  { %v4710_v44 = vpop.f32.mrf.mxu1 }
 0x508   :  { %v4927_v52 = vadd.f32 %v4926_v21, %v4758_v12  ;;  %v10274_v57 = vadd.f32 %v4710_v44, %v10145_v38  ;;  %v6949_v12 = vor.u32 %v7691_v4, %v6948_v0  ;;  %v6705_v21 = vor.u32 %v7624_v11, %v6702_v34  ;;  %v6980_v34 = vld [vmem:[#allocation3 + $0x3d0] sm:$0xf] }
 0x509   :  { %v6953_v44 = vor.u32 %v7687_v8, %v6950_v28  ;;  %v7699_v8 = vld [vmem:[#allocation3 + $0x3ec] sm:$0xf0]  ;;  %v7632_v28 = vld [vmem:[#allocation3 + $0x1dc] sm:$0xf] }
 0x50a   :  { %10944 = vst [vmem:[#allocation45_spill] sm:$0xff] %v10274_v57  ;;  %v10279_v63 = vadd.f32 %v10240_v62, %v4927_v52  ;;  %v5107_v13 = vpop.f32.mrf.mxu0 }
 0x50d   :  { %v4759_v43 = vpop.f32.mrf.mxu2 }
 0x50e   :  { %v4760_v25 = vadd.f32 %v4759_v43, %v10945_v29  ;;  %v4928_v38 = vpop.f32.mrf.mxu3 }
 0x50f   :  { %v4713_v57 = vpop.f32.mrf.mxu1 }
 0x510   :  { %v4929_v62 = vadd.f32 %v4928_v38, %v4760_v25  ;;  %v10283_v52 = vadd.f32 %v4713_v57, %v10151_v48  ;;  %v7708_v57 = vld [vmem:[#allocation3 + $0x434] sm:$0xf0]  ;;  %v6734_v38 = vld [vmem:[#allocation3 + $0x1f8] sm:$0xf0] }
 0x512   :  { %10946 = vst [vmem:[#allocation10_spill] sm:$0xff] %v10283_v52  ;;  %v10286_v16 = vadd.f32 %v10249_v1, %v4929_v62  ;;  %4801 = vmatmul.bf16.gmra.mxu2 %v6949_v12  ;;  %5268 = vmatmul.bf16.gmra.mxu1 %v6705_v21  ;;  %v10295_v48 = vpop.f32.mrf.mxu0  ;;  %v7020_v1 = vld [vmem:[#allocation3 + $0x418] sm:$0xf]  ;;  %v7695_v12 = vld [vmem:[#allocation3 + $0x3d4] sm:$0xf]  ;;  %v6981_v62 = vor.u32 %v7699_v8, %v6980_v34 }
 0x513   :  { %4970 = vmatmul.bf16.gmra.mxu3 %v6953_v44  ;;  %v7021_v25 = vor.u32 %v7708_v57, %v7020_v1 }
 0x515   :  { %v4762_v2 = vpop.f32.mrf.mxu2  ;;  %5149 = vmatmul.bf16.gmra.mxu0 %v7021_v25 }
 0x516   :  { %v4763_v17 = vadd.f32 %v4762_v2, %v9924_v31  ;;  %v4931_v43 = vpop.f32.mrf.mxu3  ;;  %v6982_v31 = vld [vmem:[#allocation3 + $0x3f0] sm:$0xf0]  ;;  %v6737_v2 = vor.u32 %v7632_v28, %v6734_v38 }
 0x517   :  { %v4715_v29 = vpop.f32.mrf.mxu1 }
 0x518   :  { %v4932_v0 = vadd.f32 %v4931_v43, %v4763_v17  ;;  %v10290_v4 = vadd.f32 %v4715_v29, %v10159_v6 }
 0x51a   :  { %10947 = vst [vmem:[#allocation86_spill] sm:$0xff] %v10290_v4  ;;  %v10293_v11 = vadd.f32 %v10258_v39, %v4932_v0  ;;  %v6985_v39 = vor.u32 %v7695_v12, %v6982_v31  ;;  %v10304_v1 = vpop.f32.mrf.mxu0  ;;  %v7716_v12 = vld [vmem:[#allocation3 + $0x474] sm:$0xf0]  ;;  %v7012_v31 = vld [vmem:[#allocation3 + $0x410] sm:$0xf] }
 0x51d   :  { %v4764_v21 = vpop.f32.mrf.mxu2 }
 0x51e   :  { %v4765_v44 = vadd.f32 %v4764_v21, %v9942_v9  ;;  %v4933_v6 = vpop.f32.mrf.mxu3  ;;  %v7707_v21 = vld [vmem:[#allocation3 + $0x42c] sm:$0xf0] }
 0x51f   :  { %v4718_v17 = vpop.f32.mrf.mxu1 }
 0x520   :  { %v4934_v43 = vadd.f32 %v4933_v6, %v4765_v44  ;;  %v10299_v29 = vadd.f32 %v4718_v17, %v10167_v10  ;;  %v7640_v44 = vld [vmem:[#allocation3 + $0x21c] sm:$0xf] }
 0x522   :  { %10948 = vst [vmem:[#allocation9_spill] sm:$0xff] %v10299_v29  ;;  %v10302_v0 = vadd.f32 %v10267_v22, %v4934_v43  ;;  %4806 = vmatmul.bf16.gmra.mxu2 %v6981_v62  ;;  %5273 = vmatmul.bf16.gmra.mxu1 %v6737_v2  ;;  %v10313_v38 = vpop.f32.mrf.mxu0  ;;  %v7052_v22 = vld [vmem:[#allocation3 + $0x458] sm:$0xf]  ;;  %v6766_v62 = vld [vmem:[#allocation3 + $0x238] sm:$0xf0]  ;;  %v7013_v43 = vor.u32 %v7707_v21, %v7012_v31 }
 0x523   :  { %4975 = vmatmul.bf16.gmra.mxu3 %v6985_v39  ;;  %v7053_v6 = vor.u32 %v7716_v12, %v7052_v22  ;;  %v7703_v2 = vld [vmem:[#allocation3 + $0x414] sm:$0xf] }
 0x525   :  { %v4767_v57 = vpop.f32.mrf.mxu2  ;;  %5154 = vmatmul.bf16.gmra.mxu0 %v7053_v6 }
 0x526   :  { %v4768_v9 = vadd.f32 %v4767_v57, %v9958_v19  ;;  %v4936_v25 = vpop.f32.mrf.mxu3  ;;  %v7014_v19 = vld [vmem:[#allocation3 + $0x430] sm:$0xf0]  ;;  %v6769_v57 = vor.u32 %v7640_v44, %v6766_v62 }
 0x527   :  { %v4720_v34 = vpop.f32.mrf.mxu1 }
 0x528   :  { %v4937_v8 = vadd.f32 %v4936_v25, %v4768_v9  ;;  %v10308_v28 = vadd.f32 %v4720_v34, %v10175_v49 }
 0x52a   :  { %10949 = vst [vmem:[#allocation36_spill] sm:$0xff] %v10308_v28  ;;  %v10311_v10 = vadd.f32 %v10276_v41, %v4937_v8  ;;  %v7017_v41 = vor.u32 %v7703_v2, %v7014_v19  ;;  %v10319_v28 = vpop.f32.mrf.mxu0  ;;  %v7084_v2 = vld [vmem:[#allocation3 + $0x498] sm:$0xf] }
 0x52b   :  { %v7724_v19 = vld [vmem:[#allocation3 + $0x4b4] sm:$0xf0] }
 0x52d   :  { %v4769_v39 = vpop.f32.mrf.mxu2 }
 0x52e   :  { %v4770_v17 = vadd.f32 %v4769_v39, %v9967_v7  ;;  %v4938_v49 = vpop.f32.mrf.mxu3 }
 0x52f   :  { %v5239_v25 = vpop.f32.mrf.mxu1 }
 0x530   :  { %v4939_v9 = vadd.f32 %v4938_v49, %v4770_v17  ;;  %v5240_v34 = vadd.f32 %v5239_v25, %v10189_v61  ;;  %v7044_v61 = vld [vmem:[#allocation3 + $0x450] sm:$0xf]  ;;  %v7046_v25 = vld [vmem:[#allocation3 + $0x470] sm:$0xf0] }
 0x531   :  { %v7715_v49 = vld [vmem:[#allocation3 + $0x46c] sm:$0xf0] }
 0x532   :  { %v10317_v8 = vadd.f32 %v5107_v13, %v4939_v9  ;;  %4811 = vmatmul.bf16.gmra.mxu2 %v7013_v43  ;;  %5278 = vmatmul.bf16.gmra.mxu1 %v6769_v57  ;;  %v5399_v22 = vmul.f32 0.2, %v5240_v34  ;;  %v10326_v13 = vpop.f32.mrf.mxu0  ;;  %v7648_v43 = vld [vmem:[#allocation3 + $0x25c] sm:$0xf]  ;;  %v7085_v57 = vor.u32 %v7724_v19, %v7084_v2  ;;  %v7711_v9 = vld [vmem:[#allocation3 + $0x454] sm:$0xf] }
 0x533   :  { %4980 = vmatmul.bf16.gmra.mxu3 %v7017_v41  ;;  %v5594_v41 = vpop.permute.xlu0 %5593  ;;  %v7049_v29 = vor.u32 %v7711_v9, %v7046_v25 }
 0x534   :  { %v5463_v21 = vmax.f32 %v5240_v34, %v5399_v22 }
 0x535   :  { %v4772_v12 = vpop.f32.mrf.mxu2  ;;  %5159 = vmatmul.bf16.gmra.mxu0 %v7085_v57 }
 0x536   :  { %v4773_v6 = vadd.f32 %v4772_v12, %v9974_v50  ;;  %v4941_v7 = vpop.f32.mrf.mxu3  ;;  %v6798_v50 = vld [vmem:[#allocation3 + $0x278] sm:$0xf0]  ;;  %v5911_v12 = vmul.f32 %v5594_v41, %v5463_v21 }
 0x537   :  { %v5241_v31 = vpop.f32.mrf.mxu1 }
 0x538   :  { %v4942_v39 = vadd.f32 %v4941_v7, %v4773_v6  ;;  %v5242_v44 = vadd.f32 %v5241_v31, %v10198_v33  ;;  %v5599_v33 = vpop.permute.xlu1 %5598  ;;  %v7045_v7 = vor.u32 %v7715_v49, %v7044_v61  ;;  %v6801_v31 = vor.u32 %v7648_v43, %v6798_v50  ;;  %v5604_v43 = vpop.permute.xlu2 %5603 }
 0x539   :  { %v5976_v2 = vsel %vm5975_vm1, %v5911_v12, 0.0 }
 0x53a   :  { %v10324_v62 = vadd.f32 %v10295_v48, %v4942_v39  ;;  %v5400_v17 = vmul.f32 0.2, %v5242_v44  ;;  %v10335_v57 = vpop.f32.mrf.mxu0 }
 0x53c   :  { %v5464_v34 = vmax.f32 %v5242_v44, %v5400_v17 }
 0x53d   :  { %v4774_v22 = vpop.f32.mrf.mxu2 }
 0x53e   :  { %v4775_v48 = vadd.f32 %v4774_v22, %v9981_v18  ;;  %v4943_v6 = vpop.f32.mrf.mxu3  ;;  %v5912_v39 = vmul.f32 %v5599_v33, %v5464_v34  ;;  %v7076_v34 = vld [vmem:[#allocation3 + $0x490] sm:$0xf]  ;;  %v7732_v33 = vld [vmem:[#allocation3 + $0x4f4] sm:$0xf0] }
 0x53f   :  { %v5244_v52 = vpop.f32.mrf.mxu1 }
 0x540   :  { %v4944_v4 = vadd.f32 %v4943_v6, %v4775_v48  ;;  %v5977_v19 = vsel %vm5975_vm1, %v5912_v39, 0.0  ;;  %v5245_v21 = vadd.f32 %v5244_v52, %v10207_v54  ;;  %v7723_v6 = vld [vmem:[#allocation3 + $0x4ac] sm:$0xf0]  ;;  %v6830_v39 = vld [vmem:[#allocation3 + $0x2b8] sm:$0xf0] }
 0x541   :  { %v5978_v44 = vadd.f32 %v5977_v19, %v5976_v2  ;;  %v7078_v2 = vld [vmem:[#allocation3 + $0x4b0] sm:$0xf0] }
 0x542   :  { %v10333_v17 = vadd.f32 %v10304_v1, %v4944_v4  ;;  %4816 = vmatmul.bf16.gmra.mxu2 %v7045_v7  ;;  %v5401_v18 = vmul.f32 0.2, %v5245_v21  ;;  %5283 = vmatmul.bf16.gmra.mxu1 %v6801_v31  ;;  %v10343_v22 = vpop.f32.mrf.mxu0  ;;  %v7719_v31 = vld [vmem:[#allocation3 + $0x494] sm:$0xf] }
 0x543   :  { %4985 = vmatmul.bf16.gmra.mxu3 %v7049_v29  ;;  %v7116_v29 = vld [vmem:[#allocation3 + $0x4d8] sm:$0xf] }
 0x544   :  { %v5465_v61 = vmax.f32 %v5245_v21, %v5401_v18  ;;  %v7117_v7 = vor.u32 %v7732_v33, %v7116_v29  ;;  %v7077_v18 = vor.u32 %v7723_v6, %v7076_v34  ;;  %v5614_v33 = vpop.permute.xlu1 %5613 }
 0x545   :  { %v4777_v49 = vpop.f32.mrf.mxu2 }
 0x546   :  { %v4778_v41 = vadd.f32 %v4777_v49, %v9988_v59  ;;  %v4946_v50 = vpop.f32.mrf.mxu3  ;;  %v5913_v9 = vmul.f32 %v5604_v43, %v5465_v61  ;;  %v7656_v59 = vld [vmem:[#allocation3 + $0x29c] sm:$0xf]  ;;  %5164 = vmatmul.bf16.gmra.mxu0 %v7117_v7  ;;  %v7081_v43 = vor.u32 %v7719_v31, %v7078_v2  ;;  %v7108_v2 = vld [vmem:[#allocation3 + $0x4d0] sm:$0xf] }
 0x547   :  { %v5246_v12 = vpop.f32.mrf.mxu1  ;;  %v6833_v49 = vor.u32 %v7656_v59, %v6830_v39 }
 0x548   :  { %v4947_v25 = vadd.f32 %v4946_v50, %v4778_v41  ;;  %v5979_v54 = vsel %vm5975_vm1, %v5913_v9, 0.0  ;;  %v5247_v52 = vadd.f32 %v5246_v12, %v10216_v15  ;;  %v5609_v15 = vpop.permute.xlu0 %5608 }
 0x549   :  { %v5980_v4 = vadd.f32 %v5979_v54, %v5978_v44 }
 0x54a   :  { %v10341_v1 = vadd.f32 %v10313_v38, %v4947_v25  ;;  %v5402_v48 = vmul.f32 0.2, %v5247_v52 }
 0x54c   :  { %v5466_v19 = vmax.f32 %v5247_v52, %v5402_v48  ;;  %v10351_v52 = vpop.f32.mrf.mxu0 }
 0x54d   :  { %v4779_v21 = vpop.f32.mrf.mxu2 }
 0x54e   :  { %v4780_v44 = vadd.f32 %v4779_v21, %v9995_v40  ;;  %v4948_v38 = vpop.f32.mrf.mxu3  ;;  %v5914_v61 = vmul.f32 %v5609_v15, %v5466_v19  ;;  %v7148_v21 = vld [vmem:[#allocation3 + $0x518] sm:$0xf] }
 0x54f   :  { %v5249_v50 = vpop.f32.mrf.mxu1  ;;  %v7740_v15 = vld [vmem:[#allocation3 + $0x534] sm:$0xf0] }
 0x550   :  { %v4949_v41 = vadd.f32 %v4948_v38, %v4780_v44  ;;  %v5981_v9 = vsel %vm5975_vm1, %v5914_v61, 0.0  ;;  %v5250_v25 = vadd.f32 %v5249_v50, %v10225_v47  ;;  %v7731_v38 = vld [vmem:[#allocation3 + $0x4ec] sm:$0xf0]  ;;  %v6862_v61 = vld [vmem:[#allocation3 + $0x2f8] sm:$0xf0] }
 0x551   :  { %v5982_v12 = vadd.f32 %v5981_v9, %v5980_v4 }
 0x552   :  { %v10349_v54 = vadd.f32 %v10319_v28, %v4949_v41  ;;  %4821 = vmatmul.bf16.gmra.mxu2 %v7077_v18  ;;  %v5403_v29 = vmul.f32 0.2, %v5250_v25  ;;  %5288 = vmatmul.bf16.gmra.mxu1 %v6833_v49  ;;  %v7149_v18 = vor.u32 %v7740_v15, %v7148_v21  ;;  %v7727_v49 = vld [vmem:[#allocation3 + $0x4d4] sm:$0xf] }
 0x553   :  { %4990 = vmatmul.bf16.gmra.mxu3 %v7081_v43  ;;  %v7110_v43 = vld [vmem:[#allocation3 + $0x4f0] sm:$0xf0] }
 0x554   :  { %v5467_v40 = vmax.f32 %v5250_v25, %v5403_v29  ;;  %v10359_v19 = vpop.f32.mrf.mxu0  ;;  %v7109_v25 = vor.u32 %v7731_v38, %v7108_v2  ;;  %v5624_v2 = vpop.permute.xlu0 %5623 }
 0x555   :  { %v4782_v34 = vpop.f32.mrf.mxu2 }
 0x556   :  { %v4783_v48 = vadd.f32 %v4782_v34, %v10002_v60  ;;  %v4951_v6 = vpop.f32.mrf.mxu3  ;;  %v5915_v59 = vmul.f32 %v5614_v33, %v5467_v40  ;;  %v7664_v60 = vld [vmem:[#allocation3 + $0x2dc] sm:$0xf]  ;;  %5169 = vmatmul.bf16.gmra.mxu0 %v7149_v18  ;;  %v7113_v40 = vor.u32 %v7727_v49, %v7110_v43  ;;  %v7180_v43 = vld [vmem:[#allocation3 + $0x558] sm:$0xf] }
 0x557   :  { %v5251_v39 = vpop.f32.mrf.mxu1  ;;  %v6865_v29 = vor.u32 %v7664_v60, %v6862_v61  ;;  %v7140_v61 = vld [vmem:[#allocation3 + $0x510] sm:$0xf] }
 0x558   :  { %v4952_v7 = vadd.f32 %v4951_v6, %v4783_v48  ;;  %v5983_v47 = vsel %vm5975_vm1, %v5915_v59, 0.0  ;;  %v5252_v28 = vadd.f32 %v5251_v39, %v10234_v51  ;;  %v5619_v51 = vpop.permute.xlu2 %5618 }
 0x559   :  { %v5984_v4 = vadd.f32 %v5983_v47, %v5982_v12 }
 0x55a   :  { %v10357_v31 = vadd.f32 %v10326_v13, %v4952_v7  ;;  %v5404_v44 = vmul.f32 0.2, %v5252_v28 }
 0x55c   :  { %v5468_v41 = vmax.f32 %v5252_v28, %v5404_v44  ;;  %v10367_v39 = vpop.f32.mrf.mxu0 }
 0x55d   :  { %v4784_v50 = vpop.f32.mrf.mxu2 }
 0x55e   :  { %v4785_v9 = vadd.f32 %v4784_v50, %v10008_v32  ;;  %v4953_v13 = vpop.f32.mrf.mxu3  ;;  %v5916_v12 = vmul.f32 %v5619_v51, %v5468_v41  ;;  %v7748_v41 = vld [vmem:[#allocation3 + $0x574] sm:$0xf0]  ;;  %v7739_v51 = vld [vmem:[#allocation3 + $0x52c] sm:$0xf0] }
 0x55f   :  { %v5254_v33 = vpop.f32.mrf.mxu1 }
 0x560   :  { %v4954_v34 = vadd.f32 %v4953_v13, %v4785_v9  ;;  %v5985_v48 = vsel %vm5975_vm1, %v5916_v12, 0.0  ;;  %v5255_v6 = vadd.f32 %v5254_v33, %v10243_v27  ;;  %v7181_v9 = vor.u32 %v7748_v41, %v7180_v43  ;;  %v6894_v13 = vld [vmem:[#allocation3 + $0x338] sm:$0xf0]  ;;  %v7142_v12 = vld [vmem:[#allocation3 + $0x530] sm:$0xf0] }
 0x561   :  { %v5986_v59 = vadd.f32 %v5985_v48, %v5984_v4  ;;  %v7141_v33 = vor.u32 %v7739_v51, %v7140_v61 }
 0x562   :  { %v10365_v7 = vadd.f32 %v10335_v57, %v4954_v34  ;;  %4826 = vmatmul.bf16.gmra.mxu2 %v7109_v25  ;;  %v5405_v47 = vmul.f32 0.2, %v5255_v6  ;;  %5293 = vmatmul.bf16.gmra.mxu1 %v6865_v29  ;;  %v7735_v25 = vld [vmem:[#allocation3 + $0x514] sm:$0xf] }
 0x563   :  { %4995 = vmatmul.bf16.gmra.mxu3 %v7113_v40 }
 0x564   :  { %v5469_v32 = vmax.f32 %v5255_v6, %v5405_v47  ;;  %v10375_v49 = vpop.f32.mrf.mxu0 }
 0x565   :  { %v4787_v28 = vpop.f32.mrf.mxu2 }
 0x566   :  { %v4788_v21 = vadd.f32 %v4787_v28, %v10015_v56  ;;  %v4956_v15 = vpop.f32.mrf.mxu3  ;;  %v5917_v44 = vmul.f32 %v5624_v2, %v5469_v32  ;;  %v7672_v56 = vld [vmem:[#allocation3 + $0x31c] sm:$0xf]  ;;  %5174 = vmatmul.bf16.gmra.mxu0 %v7181_v9 }
 0x567   :  { %v5256_v60 = vpop.f32.mrf.mxu1  ;;  %v6897_v6 = vor.u32 %v7672_v56, %v6894_v13  ;;  %v7172_v56 = vld [vmem:[#allocation3 + $0x550] sm:$0xf]  ;;  %v7212_v13 = vld [vmem:[#allocation3 + $0x598] sm:$0xf] }
 0x568   :  { %v4957_v38 = vadd.f32 %v4956_v15, %v4788_v21  ;;  %v5987_v27 = vsel %vm5975_vm1, %v5917_v44, 0.0  ;;  %v5257_v57 = vadd.f32 %v5256_v60, %v10252_v24  ;;  %v5629_v24 = vpop.permute.xlu1 %5628 }
 0x569   :  { %v5988_v4 = vadd.f32 %v5987_v27, %v5986_v59  ;;  %v7145_v59 = vor.u32 %v7735_v25, %v7142_v12  ;;  %v5634_v27 = vpop.permute.xlu2 %5633  ;;  %v7756_v25 = vld [vmem:[#allocation3 + $0x5b4] sm:$0xf0] }
 0x56a   :  { %v10373_v18 = vadd.f32 %v10343_v22, %v4957_v38  ;;  %v5406_v50 = vmul.f32 0.2, %v5257_v57 }
 0x56c   :  { %v5470_v29 = vmax.f32 %v5257_v57, %v5406_v50  ;;  %v10383_v44 = vpop.f32.mrf.mxu0 }
 0x56d   :  { %v4789_v40 = vpop.f32.mrf.mxu2 }
 0x56e   :  { %v4790_v34 = vadd.f32 %v4789_v40, %v10022_v14  ;;  %v4958_v22 = vpop.f32.mrf.mxu3  ;;  %v5918_v48 = vmul.f32 %v5629_v24, %v5470_v29  ;;  %v7747_v29 = vld [vmem:[#allocation3 + $0x56c] sm:$0xf0]  ;;  %v7213_v40 = vor.u32 %v7756_v25, %v7212_v13  ;;  %v6926_v24 = vld [vmem:[#allocation3 + $0x378] sm:$0xf0] }
 0x56f   :  { %v5259_v32 = vpop.f32.mrf.mxu1 }
 0x570   :  { %v4959_v47 = vadd.f32 %v4958_v22, %v4790_v34  ;;  %v5989_v28 = vsel %vm5975_vm1, %v5918_v48, 0.0  ;;  %v5260_v2 = vadd.f32 %v5259_v32, %v10261_v42  ;;  %v7743_v34 = vld [vmem:[#allocation3 + $0x554] sm:$0xf] }
 0x571   :  { %v5990_v21 = vadd.f32 %v5989_v28, %v5988_v4  ;;  %v7174_v22 = vld [vmem:[#allocation3 + $0x570] sm:$0xf0] }
 0x572   :  { %v10381_v15 = vadd.f32 %v10351_v52, %v4959_v47  ;;  %4831 = vmatmul.bf16.gmra.mxu2 %v7141_v33  ;;  %v5407_v38 = vmul.f32 0.2, %v5260_v2  ;;  %5298 = vmatmul.bf16.gmra.mxu1 %v6897_v6  ;;  %v7177_v28 = vor.u32 %v7743_v34, %v7174_v22  ;;  %v7755_v34 = vld [vmem:[#allocation3 + $0x5ac] sm:$0xf0] }
 0x573   :  { %5000 = vmatmul.bf16.gmra.mxu3 %v7145_v59  ;;  %v7173_v59 = vor.u32 %v7747_v29, %v7172_v56 }
 0x574   :  { %v5471_v14 = vmax.f32 %v5260_v2, %v5407_v38  ;;  %v10391_v9 = vpop.f32.mrf.mxu0 }
 0x575   :  { %v4792_v60 = vpop.f32.mrf.mxu2 }
 0x576   :  { %v4793_v57 = vadd.f32 %v4792_v60, %v10028_v3  ;;  %v4961_v61 = vpop.f32.mrf.mxu3  ;;  %v5919_v43 = vmul.f32 %v5634_v27, %v5471_v14  ;;  %v7680_v3 = vld [vmem:[#allocation3 + $0x35c] sm:$0xf]  ;;  %5179 = vmatmul.bf16.gmra.mxu0 %v7213_v40  ;;  %v7764_v40 = vld [vmem:[#allocation3 + $0x5f4] sm:$0xf0] }
 0x577   :  { %v5261_v50 = vpop.f32.mrf.mxu1  ;;  %v6929_v32 = vor.u32 %v7680_v3, %v6926_v24  ;;  %v7244_v3 = vld [vmem:[#allocation3 + $0x5d8] sm:$0xf] }
 0x578   :  { %v4962_v41 = vadd.f32 %v4961_v61, %v4793_v57  ;;  %v5991_v42 = vsel %vm5975_vm1, %v5919_v43, 0.0  ;;  %v5262_v52 = vadd.f32 %v5261_v50, %v10270_v5  ;;  %v5639_v5 = vpop.permute.xlu0 %5638  ;;  %v7245_v22 = vor.u32 %v7764_v40, %v7244_v3  ;;  %v7236_v3 = vld [vmem:[#allocation3 + $0x5d0] sm:$0xf] }
 0x579   :  { %v5992_v4 = vadd.f32 %v5991_v42, %v5990_v21 }
 0x57a   :  { %v10389_v51 = vadd.f32 %v10359_v19, %v4962_v41  ;;  %v5408_v12 = vmul.f32 0.2, %v5262_v52  ;;  %v5644_v41 = vpop.permute.xlu1 %5643 }
 0x57c   :  { %v5472_v33 = vmax.f32 %v5262_v52, %v5408_v12  ;;  %v10399_v57 = vpop.f32.mrf.mxu0  ;;  %v7204_v12 = vld [vmem:[#allocation3 + $0x590] sm:$0xf] }
 0x57d   :  { %v4794_v48 = vpop.f32.mrf.mxu2 }
 0x57e   :  { %v4795_v6 = vadd.f32 %v4794_v48, %v10034_v58  ;;  %v4963_v19 = vpop.f32.mrf.mxu3  ;;  %v5920_v47 = vmul.f32 %v5639_v5, %v5472_v33  ;;  %v6958_v33 = vld [vmem:[#allocation3 + $0x3b8] sm:$0xf0]  ;;  %v7751_v48 = vld [vmem:[#allocation3 + $0x594] sm:$0xf] }
 0x57f   :  { %v5264_v21 = vpop.f32.mrf.mxu1  ;;  %v7206_v5 = vld [vmem:[#allocation3 + $0x5b0] sm:$0xf0] }
 0x580   :  { %v4964_v2 = vadd.f32 %v4963_v19, %v4795_v6  ;;  %v5993_v38 = vsel %vm5975_vm1, %v5920_v47, 0.0  ;;  %v5265_v14 = vadd.f32 %v5264_v21, %v10279_v63  ;;  %v7205_v47 = vor.u32 %v7755_v34, %v7204_v12  ;;  %v7772_v34 = vld [vmem:[#allocation3 + $0x634] sm:$0xf0] }
 0x581   :  { %v5994_v60 = vadd.f32 %v5993_v38, %v5992_v4 }
 0x582   :  { %v10397_v27 = vadd.f32 %v10367_v39, %v4964_v2  ;;  %4836 = vmatmul.bf16.gmra.mxu2 %v7173_v59  ;;  %v5409_v61 = vmul.f32 0.2, %v5265_v14  ;;  %5303 = vmatmul.bf16.gmra.mxu1 %v6929_v32  ;;  %v7209_v2 = vor.u32 %v7751_v48, %v7206_v5  ;;  %v6990_v48 = vld [vmem:[#allocation3 + $0x3f8] sm:$0xf0]  ;;  %v7759_v5 = vld [vmem:[#allocation3 + $0x5d4] sm:$0xf] }
 0x583   :  { %5005 = vmatmul.bf16.gmra.mxu3 %v7177_v28 }
 0x584   :  { %v5473_v58 = vmax.f32 %v5265_v14, %v5409_v61  ;;  %v10407_v29 = vpop.f32.mrf.mxu0 }
 0x585   :  { %v4797_v43 = vpop.f32.mrf.mxu2 }
 0x586   :  { %v4798_v50 = vadd.f32 %v4797_v43, %v10040_v35  ;;  %v4966_v42 = vpop.f32.mrf.mxu3  ;;  %v5921_v52 = vmul.f32 %v5644_v41, %v5473_v58  ;;  %v7688_v35 = vld [vmem:[#allocation3 + $0x39c] sm:$0xf]  ;;  %5184 = vmatmul.bf16.gmra.mxu0 %v7245_v22  ;;  %v7763_v22 = vld [vmem:[#allocation3 + $0x5ec] sm:$0xf0] }
 0x587   :  { %v5266_v13 = vpop.f32.mrf.mxu1  ;;  %v6961_v28 = vor.u32 %v7688_v35, %v6958_v33 }
 0x588   :  { %v4967_v56 = vadd.f32 %v4966_v42, %v4798_v50  ;;  %v5995_v63 = vsel %vm5975_vm1, %v5921_v52, 0.0  ;;  %v5267_v39 = vadd.f32 %v5266_v13, %v10286_v16  ;;  %v5649_v16 = vpop.permute.xlu2 %5648  ;;  %v5654_v42 = vpop.permute.xlu0 %5653 }
 0x589   :  { %v5996_v4 = vadd.f32 %v5995_v63, %v5994_v60 }
 0x58a   :  { %v10405_v25 = vadd.f32 %v10375_v49, %v4967_v56  ;;  %v5410_v24 = vmul.f32 0.2, %v5267_v39 }
 0x58c   :  { %v5474_v6 = vmax.f32 %v5267_v39, %v5410_v24  ;;  %v10415_v43 = vpop.f32.mrf.mxu0  ;;  %v7276_v24 = vld [vmem:[#allocation3 + $0x618] sm:$0xf] }
 0x58d   :  { %v4799_v19 = vpop.f32.mrf.mxu2  ;;  %v7277_v33 = vor.u32 %v7772_v34, %v7276_v24  ;;  %v7308_v24 = vld [vmem:[#allocation3 + $0x658] sm:$0xf] }
 0x58e   :  { %v4800_v59 = vadd.f32 %v4799_v19, %v10046_v45  ;;  %v4968_v49 = vpop.f32.mrf.mxu3  ;;  %v5922_v32 = vmul.f32 %v5649_v16, %v5474_v6  ;;  %v7238_v6 = vld [vmem:[#allocation3 + $0x5f0] sm:$0xf0]  ;;  %v7780_v34 = vld [vmem:[#allocation3 + $0x674] sm:$0xf0] }
 0x58f   :  { %v5269_v38 = vpop.f32.mrf.mxu1 }
 0x590   :  { %v4969_v21 = vadd.f32 %v4968_v49, %v4800_v59  ;;  %v5997_v14 = vsel %vm5975_vm1, %v5922_v32, 0.0  ;;  %v5270_v60 = vadd.f32 %v5269_v38, %v10293_v11  ;;  %v7237_v49 = vor.u32 %v7763_v22, %v7236_v3  ;;  %v7771_v22 = vld [vmem:[#allocation3 + $0x62c] sm:$0xf0] }
 0x591   :  { %v5998_v61 = vadd.f32 %v5997_v14, %v5996_v4 }
 0x592   :  { %v10413_v58 = vadd.f32 %v10383_v44, %v4969_v21  ;;  %4841 = vmatmul.bf16.gmra.mxu2 %v7205_v47  ;;  %v5411_v41 = vmul.f32 0.2, %v5270_v60  ;;  %5308 = vmatmul.bf16.gmra.mxu1 %v6961_v28  ;;  %v7241_v28 = vor.u32 %v7759_v5, %v7238_v6  ;;  %v7270_v5 = vld [vmem:[#allocation3 + $0x630] sm:$0xf0] }
 0x593   :  { %5010 = vmatmul.bf16.gmra.mxu3 %v7209_v2 }
 0x594   :  { %v5475_v45 = vmax.f32 %v5270_v60, %v5411_v41  ;;  %v10423_v40 = vpop.f32.mrf.mxu0 }
 0x595   :  { %v4802_v50 = vpop.f32.mrf.mxu2 }
 0x596   :  { %v4803_v52 = vadd.f32 %v4802_v50, %v10052_v55  ;;  %v4971_v56 = vpop.f32.mrf.mxu3  ;;  %v5923_v13 = vmul.f32 %v5654_v42, %v5475_v45  ;;  %v7696_v55 = vld [vmem:[#allocation3 + $0x3dc] sm:$0xf]  ;;  %5189 = vmatmul.bf16.gmra.mxu0 %v7277_v33  ;;  %v5664_v42 = vpop.permute.xlu2 %5663 }
 0x597   :  { %v5271_v39 = vpop.f32.mrf.mxu1  ;;  %v6993_v32 = vor.u32 %v7696_v55, %v6990_v48  ;;  %v7309_v55 = vor.u32 %v7780_v34, %v7308_v24  ;;  %v7022_v33 = vld [vmem:[#allocation3 + $0x438] sm:$0xf0]  ;;  %v7767_v48 = vld [vmem:[#allocation3 + $0x614] sm:$0xf]  ;;  %v7779_v34 = vld [vmem:[#allocation3 + $0x66c] sm:$0xf0] }
 0x598   :  { %v4972_v63 = vadd.f32 %v4971_v56, %v4803_v52  ;;  %v5999_v11 = vsel %vm5975_vm1, %v5923_v13, 0.0  ;;  %v5272_v44 = vadd.f32 %v5271_v39, %v10302_v0  ;;  %v5659_v0 = vpop.permute.xlu1 %5658 }
 0x599   :  { %v6000_v4 = vadd.f32 %v5999_v11, %v5998_v61 }
 0x59a   :  { %v10421_v12 = vadd.f32 %v10391_v9, %v4972_v63  ;;  %v5412_v35 = vmul.f32 0.2, %v5272_v44 }
 0x59c   :  { %v5476_v19 = vmax.f32 %v5272_v44, %v5412_v35  ;;  %v10431_v41 = vpop.f32.mrf.mxu0 }
 0x59d   :  { %v4804_v16 = vpop.f32.mrf.mxu2 }
 0x59e   :  { %v4805_v59 = vadd.f32 %v4804_v16, %v10058_v26  ;;  %v4973_v9 = vpop.f32.mrf.mxu3  ;;  %v5924_v47 = vmul.f32 %v5659_v0, %v5476_v19 }
 0x59f   :  { %v5274_v21 = vpop.f32.mrf.mxu1 }
 0x5a0   :  { %v4974_v2 = vadd.f32 %v4973_v9, %v4805_v59  ;;  %v6001_v38 = vsel %vm5975_vm1, %v5924_v47, 0.0  ;;  %v5275_v14 = vadd.f32 %v5274_v21, %v10311_v10 }
 0x5a1   :  { %v6002_v60 = vadd.f32 %v6001_v38, %v6000_v4  ;;  %v7268_v4 = vld [vmem:[#allocation3 + $0x610] sm:$0xf] }
 0x5a2   :  { %v10429_v61 = vadd.f32 %v10399_v57, %v4974_v2  ;;  %4846 = vmatmul.bf16.gmra.mxu2 %v7237_v49  ;;  %v5413_v45 = vmul.f32 0.2, %v5275_v14  ;;  %5313 = vmatmul.bf16.gmra.mxu1 %v6993_v32  ;;  %v7269_v0 = vor.u32 %v7771_v22, %v7268_v4  ;;  %v7273_v49 = vor.u32 %v7767_v48, %v7270_v5  ;;  %v7788_v4 = vld [vmem:[#allocation3 + $0x6b4] sm:$0xf0]  ;;  %v7054_v22 = vld [vmem:[#allocation3 + $0x478] sm:$0xf0] }
 0x5a3   :  { %5015 = vmatmul.bf16.gmra.mxu3 %v7241_v28 }
 0x5a4   :  { %v5477_v26 = vmax.f32 %v5275_v14, %v5413_v45  ;;  %v10439_v3 = vpop.f32.mrf.mxu0 }
 0x5a5   :  { %v4807_v50 = vpop.f32.mrf.mxu2 }
 0x5a6   :  { %v4808_v52 = vadd.f32 %v4807_v50, %v10064_v23  ;;  %v4976_v56 = vpop.f32.mrf.mxu3  ;;  %v5925_v13 = vmul.f32 %v5664_v42, %v5477_v26  ;;  %v7704_v23 = vld [vmem:[#allocation3 + $0x41c] sm:$0xf]  ;;  %5194 = vmatmul.bf16.gmra.mxu0 %v7309_v55  ;;  %v5674_v26 = vpop.permute.xlu1 %5673  ;;  %v7302_v55 = vld [vmem:[#allocation3 + $0x670] sm:$0xf0] }
 0x5a7   :  { %v5276_v39 = vpop.f32.mrf.mxu1  ;;  %v7025_v9 = vor.u32 %v7704_v23, %v7022_v33  ;;  %v7775_v23 = vld [vmem:[#allocation3 + $0x654] sm:$0xf] }
 0x5a8   :  { %v4977_v63 = vadd.f32 %v4976_v56, %v4808_v52  ;;  %v6003_v10 = vsel %vm5975_vm1, %v5925_v13, 0.0  ;;  %v5277_v57 = vadd.f32 %v5276_v39, %v10317_v8  ;;  %v5669_v8 = vpop.permute.xlu0 %5668 }
 0x5a9   :  { %v6004_v11 = vadd.f32 %v6003_v10, %v6002_v60  ;;  %v7300_v10 = vld [vmem:[#allocation3 + $0x650] sm:$0xf] }
 0x5aa   :  { %v10437_v44 = vadd.f32 %v10407_v29, %v4977_v63  ;;  %v5414_v35 = vmul.f32 0.2, %v5277_v57 }
 0x5ac   :  { %v5478_v6 = vmax.f32 %v5277_v57, %v5414_v35  ;;  %v10447_v14 = vpop.f32.mrf.mxu0 }
 0x5ad   :  { %v4809_v19 = vpop.f32.mrf.mxu2 }
 0x5ae   :  { %v4810_v16 = vadd.f32 %v4809_v19, %v10070_v36  ;;  %v4978_v29 = vpop.f32.mrf.mxu3  ;;  %v5926_v59 = vmul.f32 %v5669_v8, %v5478_v6  ;;  %v7301_v6 = vor.u32 %v7779_v34, %v7300_v10  ;;  %v7720_v10 = vld [vmem:[#allocation3 + $0x49c] sm:$0xf]  ;;  %v7334_v34 = vld [vmem:[#allocation3 + $0x6b0] sm:$0xf0] }
 0x5af   :  { %v5279_v32 = vpop.f32.mrf.mxu1 }
 0x5b0   :  { %v4979_v47 = vadd.f32 %v4978_v29, %v4810_v16  ;;  %v6005_v28 = vsel %vm5975_vm1, %v5926_v59, 0.0  ;;  %v5280_v2 = vadd.f32 %v5279_v32, %v10324_v62  ;;  %v7305_v16 = vor.u32 %v7775_v23, %v7302_v55 }
 0x5b1   :  { %v6006_v21 = vadd.f32 %v6005_v28, %v6004_v11  ;;  %v7340_v11 = vld [vmem:[#allocation3 + $0x698] sm:$0xf] }
 0x5b2   :  { %v10445_v38 = vadd.f32 %v10415_v43, %v4979_v47  ;;  %4851 = vmatmul.bf16.gmra.mxu2 %v7269_v0  ;;  %v5415_v60 = vmul.f32 0.2, %v5280_v2  ;;  %5318 = vmatmul.bf16.gmra.mxu1 %v7025_v9  ;;  %v7341_v35 = vor.u32 %v7788_v4, %v7340_v11  ;;  %v7086_v4 = vld [vmem:[#allocation3 + $0x4b8] sm:$0xf0] }
 0x5b3   :  { %5020 = vmatmul.bf16.gmra.mxu3 %v7273_v49 }
 0x5b4   :  { %v5479_v36 = vmax.f32 %v5280_v2, %v5415_v60  ;;  %v10455_v57 = vpop.f32.mrf.mxu0 }
 0x5b5   :  { %v4812_v45 = vpop.f32.mrf.mxu2 }
 0x5b6   :  { %v4813_v50 = vadd.f32 %v4812_v45, %v10076_v20  ;;  %v4981_v42 = vpop.f32.mrf.mxu3  ;;  %v5927_v52 = vmul.f32 %v5674_v26, %v5479_v36  ;;  %v7712_v20 = vld [vmem:[#allocation3 + $0x45c] sm:$0xf]  ;;  %5199 = vmatmul.bf16.gmra.mxu0 %v7341_v35 }
 0x5b7   :  { %v5281_v13 = vpop.f32.mrf.mxu1  ;;  %v7057_v8 = vor.u32 %v7712_v20, %v7054_v22 }
 0x5b8   :  { %v4982_v56 = vadd.f32 %v4981_v42, %v4813_v50  ;;  %v6007_v62 = vsel %vm5975_vm1, %v5927_v52, 0.0  ;;  %v5282_v43 = vadd.f32 %v5281_v13, %v10333_v17  ;;  %v5679_v17 = vpop.permute.xlu2 %5678  ;;  %v7372_v13 = vld [vmem:[#allocation3 + $0x6d8] sm:$0xf] }
 0x5b9   :  { %v6008_v63 = vadd.f32 %v6007_v62, %v6006_v21  ;;  %v5684_v21 = vpop.permute.xlu0 %5683  ;;  %v7796_v62 = vld [vmem:[#allocation3 + $0x6f4] sm:$0xf0] }
 0x5ba   :  { %v10453_v39 = vadd.f32 %v10423_v40, %v4982_v56  ;;  %v5416_v24 = vmul.f32 0.2, %v5282_v43  ;;  %v7332_v56 = vld [vmem:[#allocation3 + $0x690] sm:$0xf] }
 0x5bc   :  { %v5480_v33 = vmax.f32 %v5282_v43, %v5416_v24  ;;  %v10463_v32 = vpop.f32.mrf.mxu0  ;;  %v7783_v24 = vld [vmem:[#allocation3 + $0x694] sm:$0xf] }
 0x5bd   :  { %v4814_v48 = vpop.f32.mrf.mxu2 }
 0x5be   :  { %v4815_v5 = vadd.f32 %v4814_v48, %v10082_v53  ;;  %v4983_v40 = vpop.f32.mrf.mxu3  ;;  %v5928_v19 = vmul.f32 %v5679_v17, %v5480_v33  ;;  %v7089_v33 = vor.u32 %v7720_v10, %v7086_v4  ;;  %v7337_v48 = vor.u32 %v7783_v24, %v7334_v34  ;;  %v10951_v4 = vld [vmem:[#allocation74_spill] sm:$0xff] }
 0x5bf   :  { %v5284_v0 = vpop.f32.mrf.mxu1 }
 0x5c0   :  { %v4984_v29 = vadd.f32 %v4983_v40, %v4815_v5  ;;  %v6009_v59 = vsel %vm5975_vm1, %v5928_v19, 0.0  ;;  %v5285_v9 = vadd.f32 %v5284_v0, %v10341_v1 }
 0x5c1   :  { %v6010_v49 = vadd.f32 %v6009_v59, %v6008_v63  ;;  %v7787_v63 = vld [vmem:[#allocation3 + $0x6ac] sm:$0xf0]  ;;  %v5694_v59 = vpop.permute.xlu2 %5693 }
 0x5c2   :  { %v10461_v47 = vadd.f32 %v10431_v41, %v4984_v29  ;;  %4856 = vmatmul.bf16.gmra.mxu2 %v7301_v6  ;;  %v5417_v28 = vmul.f32 0.2, %v5285_v9  ;;  %5323 = vmatmul.bf16.gmra.mxu1 %v7057_v8  ;;  %v7333_v23 = vor.u32 %v7787_v63, %v7332_v56 }
 0x5c3   :  { %5025 = vmatmul.bf16.gmra.mxu3 %v7305_v16 }
 0x5c4   :  { %v5481_v53 = vmax.f32 %v5285_v9, %v5417_v28  ;;  %v10471_v11 = vpop.f32.mrf.mxu0  ;;  %v10950_v9 = vld [vmem:[#allocation67_spill] sm:$0xff] }
 0x5c5   :  { %v4817_v2 = vpop.f32.mrf.mxu2 }
 0x5c6   :  { %v4818_v60 = vadd.f32 %v4817_v2, %v10088_v46  ;;  %v4986_v36 = vpop.f32.mrf.mxu3  ;;  %v5929_v45 = vmul.f32 %v5684_v21, %v5481_v53  ;;  %v7373_v46 = vor.u32 %v7796_v62, %v7372_v13  ;;  %v7118_v13 = vld [vmem:[#allocation3 + $0x4f8] sm:$0xf0]  ;;  %v7791_v62 = vld [vmem:[#allocation3 + $0x6d4] sm:$0xf] }
 0x5c7   :  { %v5286_v50 = vpop.f32.mrf.mxu1 }
 0x5c8   :  { %v4987_v26 = vadd.f32 %v4986_v36, %v4818_v60  ;;  %v6011_v1 = vsel %vm5975_vm1, %v5929_v45, 0.0  ;;  %v5287_v41 = vadd.f32 %v5286_v50, %v10349_v54  ;;  %5204 = vmatmul.bf16.gmra.mxu0 %v7373_v46  ;;  %v5689_v54 = vpop.permute.xlu1 %5688  ;;  %v7364_v45 = vld [vmem:[#allocation3 + $0x6d0] sm:$0xf]  ;;  %v7804_v50 = vld [vmem:[#allocation3 + $0x734] sm:$0xf0]  ;;  %v5699_v46 = vpop.permute.xlu0 %5698 }
 0x5c9   :  { %v6012_v42 = vadd.f32 %v6011_v1, %v6010_v49 }
 0x5ca   :  { %v10469_v52 = vadd.f32 %v10439_v3, %v4987_v26  ;;  %v5418_v43 = vmul.f32 0.2, %v5287_v41  ;;  %v7404_v26 = vld [vmem:[#allocation3 + $0x718] sm:$0xf] }
 0x5cb   :  { %v7405_v56 = vor.u32 %v7804_v50, %v7404_v26  ;;  %v7150_v50 = vld [vmem:[#allocation3 + $0x538] sm:$0xf0] }
 0x5cc   :  { %v5482_v20 = vmax.f32 %v5287_v41, %v5418_v43  ;;  %v10479_v0 = vpop.f32.mrf.mxu0  ;;  %v7795_v41 = vld [vmem:[#allocation3 + $0x6ec] sm:$0xf0]  ;;  %v7366_v43 = vld [vmem:[#allocation3 + $0x6f0] sm:$0xf0] }
 0x5cd   :  { %v4819_v35 = vpop.f32.mrf.mxu2  ;;  %v7365_v34 = vor.u32 %v7795_v41, %v7364_v45  ;;  %v7736_v45 = vld [vmem:[#allocation3 + $0x51c] sm:$0xf]  ;;  %v7398_v41 = vld [vmem:[#allocation3 + $0x730] sm:$0xf0] }
 0x5ce   :  { %v4820_v22 = vadd.f32 %v4819_v35, %v10094_v30  ;;  %v4988_v3 = vpop.f32.mrf.mxu3  ;;  %v5930_v55 = vmul.f32 %v5689_v54, %v5482_v20  ;;  %v7369_v35 = vor.u32 %v7791_v62, %v7366_v43 }
 0x5cf   :  { %v5289_v5 = vpop.f32.mrf.mxu1 }
 0x5d0   :  { %v4989_v17 = vadd.f32 %v4988_v3, %v4820_v22  ;;  %v6013_v40 = vsel %vm5975_vm1, %v5930_v55, 0.0  ;;  %v5290_v6 = vadd.f32 %v5289_v5, %v10357_v31 }
 0x5d1   :  { %v6014_v19 = vadd.f32 %v6013_v40, %v6012_v42  ;;  %v7728_v42 = vld [vmem:[#allocation3 + $0x4dc] sm:$0xf] }
 0x5d2   :  { %v10477_v8 = vadd.f32 %v10447_v14, %v4989_v17  ;;  %4861 = vmatmul.bf16.gmra.mxu2 %v7333_v23  ;;  %v5419_v16 = vmul.f32 0.2, %v5290_v6  ;;  %5328 = vmatmul.bf16.gmra.mxu1 %v7089_v33  ;;  %v7121_v20 = vor.u32 %v7728_v42, %v7118_v13  ;;  %v10953_v13 = vld [vmem:[#allocation34_spill] sm:$0xff] }
 0x5d3   :  { %5030 = vmatmul.bf16.gmra.mxu3 %v7337_v48 }
 0x5d4   :  { %v5483_v30 = vmax.f32 %v5290_v6, %v5419_v16  ;;  %v10488_v54 = vpop.f32.mrf.mxu0  ;;  %v5704_v6 = vpop.permute.xlu1 %5703 }
 0x5d5   :  { %v4822_v29 = vpop.f32.mrf.mxu2 }
 0x5d6   :  { %v4823_v49 = vadd.f32 %v4822_v29, %v10950_v9  ;;  %v4991_v28 = vpop.f32.mrf.mxu3  ;;  %v5931_v53 = vmul.f32 %v5694_v59, %v5483_v30 }
 0x5d7   :  { %v5291_v21 = vpop.f32.mrf.mxu1 }
 0x5d8   :  { %v4992_v2 = vadd.f32 %v4991_v28, %v4823_v49  ;;  %v6015_v31 = vsel %vm5975_vm1, %v5931_v53, 0.0  ;;  %v5292_v14 = vadd.f32 %v5291_v21, %v10365_v7  ;;  %5209 = vmatmul.bf16.gmra.mxu0 %v7405_v56  ;;  %v7436_v21 = vld [vmem:[#allocation3 + $0x758] sm:$0xf] }
 0x5d9   :  { %v6016_v60 = vadd.f32 %v6015_v31, %v6014_v19  ;;  %v10952_v19 = vld [vmem:[#allocation41_spill] sm:$0xff]  ;;  %v7812_v31 = vld [vmem:[#allocation3 + $0x774] sm:$0xf0] }
 0x5da   :  { %v10485_v36 = vadd.f32 %v10455_v57, %v4992_v2  ;;  %v5420_v1 = vmul.f32 0.2, %v5292_v14  ;;  %v7396_v2 = vld [vmem:[#allocation3 + $0x710] sm:$0xf]  ;;  %v7437_v26 = vor.u32 %v7812_v31, %v7436_v21  ;;  %v7182_v21 = vld [vmem:[#allocation3 + $0x578] sm:$0xf0] }
 0x5db   :  { %v7807_v31 = vld [vmem:[#allocation3 + $0x754] sm:$0xf] }
 0x5dc   :  { %v5484_v63 = vmax.f32 %v5292_v14, %v5420_v1  ;;  %v10498_v28 = vpop.f32.mrf.mxu0  ;;  %v7799_v1 = vld [vmem:[#allocation3 + $0x714] sm:$0xf] }
 0x5dd   :  { %v4824_v10 = vpop.f32.mrf.mxu2 }
 0x5de   :  { %v4825_v7 = vadd.f32 %v4824_v10, %v10951_v4  ;;  %v4993_v24 = vpop.f32.mrf.mxu3  ;;  %v5932_v57 = vmul.f32 %v5699_v46, %v5484_v63  ;;  %v7153_v10 = vor.u32 %v7736_v45, %v7150_v50  ;;  %v7401_v46 = vor.u32 %v7799_v1, %v7398_v41  ;;  %v5719_v50 = vpop.permute.xlu1 %5718 }
 0x5df   :  { %v5294_v3 = vpop.f32.mrf.mxu1 }
 0x5e0   :  { %v4994_v22 = vadd.f32 %v4993_v24, %v4825_v7  ;;  %v6017_v23 = vsel %vm5975_vm1, %v5932_v57, 0.0  ;;  %v5295_v55 = vadd.f32 %v5294_v3, %v10373_v18 }
 0x5e1   :  { %v6018_v33 = vadd.f32 %v6017_v23, %v6016_v60  ;;  %v7803_v60 = vld [vmem:[#allocation3 + $0x72c] sm:$0xf0] }
 0x5e2   :  { %v10493_v48 = vadd.f32 %v10463_v32, %v4994_v22  ;;  %4866 = vmatmul.bf16.gmra.mxu2 %v7365_v34  ;;  %v5421_v17 = vmul.f32 0.2, %v5295_v55  ;;  %5333 = vmatmul.bf16.gmra.mxu1 %v7121_v20  ;;  %v7397_v63 = vor.u32 %v7803_v60, %v7396_v2 }
 0x5e3   :  { %5035 = vmatmul.bf16.gmra.mxu3 %v7369_v35 }
 0x5e4   :  { %v5485_v5 = vmax.f32 %v5295_v55, %v5421_v17  ;;  %v5175_v22 = vpop.f32.mrf.mxu0  ;;  %v5714_v55 = vpop.permute.xlu0 %5713 }
 0x5e5   :  { %v4827_v40 = vpop.f32.mrf.mxu2 }
 0x5e6   :  { %v4828_v16 = vadd.f32 %v4827_v40, %v10952_v19  ;;  %v4996_v30 = vpop.f32.mrf.mxu3  ;;  %v5933_v29 = vmul.f32 %v5704_v6, %v5485_v5 }
 0x5e7   :  { %v5296_v9 = vpop.f32.mrf.mxu1 }
 0x5e8   :  { %v4997_v59 = vadd.f32 %v4996_v30, %v4828_v16  ;;  %v6019_v49 = vsel %vm5975_vm1, %v5933_v29, 0.0  ;;  %v5297_v18 = vadd.f32 %v5296_v9, %v10381_v15  ;;  %5214 = vmatmul.bf16.gmra.mxu0 %v7437_v26  ;;  %v5709_v15 = vpop.permute.xlu2 %5708  ;;  %v7428_v29 = vld [vmem:[#allocation3 + $0x750] sm:$0xf]  ;;  %v7820_v9 = vld [vmem:[#allocation3 + $0x7b4] sm:$0xf0] }
 0x5e9   :  { %v6020_v32 = vadd.f32 %v6019_v49, %v6018_v33  ;;  %v10954_v33 = vld [vmem:[#allocation71_spill] sm:$0xff] }
 0x5ea   :  { %v10501_v53 = vadd.f32 %v10471_v11, %v4997_v59  ;;  %v5422_v14 = vmul.f32 0.2, %v5297_v18  ;;  %v7468_v59 = vld [vmem:[#allocation3 + $0x798] sm:$0xf] }
 0x5eb   :  { %v7469_v2 = vor.u32 %v7820_v9, %v7468_v59  ;;  %v7214_v59 = vld [vmem:[#allocation3 + $0x5b8] sm:$0xf0]  ;;  %v7815_v9 = vld [vmem:[#allocation3 + $0x794] sm:$0xf] }
 0x5ec   :  { %v5486_v42 = vmax.f32 %v5297_v18, %v5422_v14  ;;  %v7811_v18 = vld [vmem:[#allocation3 + $0x76c] sm:$0xf0]  ;;  %v7430_v14 = vld [vmem:[#allocation3 + $0x770] sm:$0xf0]  ;;  %v5177_v26 = vpop.f32.mrf.mxu0 }
 0x5ed   :  { %v4829_v56 = vpop.f32.mrf.mxu2 }
 0x5ee   :  { %v4830_v62 = vadd.f32 %v4829_v56, %v10953_v13  ;;  %v4998_v43 = vpop.f32.mrf.mxu3  ;;  %v5934_v11 = vmul.f32 %v5709_v15, %v5486_v42  ;;  %v7433_v15 = vor.u32 %v7807_v31, %v7430_v14 }
 0x5ef   :  { %v5299_v7 = vpop.f32.mrf.mxu1 }
 0x5f0   :  { %v4999_v4 = vadd.f32 %v4998_v43, %v4830_v62  ;;  %v6021_v24 = vsel %vm5975_vm1, %v5934_v11, 0.0  ;;  %v5300_v34 = vadd.f32 %v5299_v7, %v10389_v51 }
 0x5f1   :  { %v6022_v57 = vadd.f32 %v6021_v24, %v6020_v32  ;;  %v7744_v32 = vld [vmem:[#allocation3 + $0x55c] sm:$0xf]  ;;  %v5724_v24 = vpop.permute.xlu2 %5723 }
 0x5f2   :  { %v10507_v20 = vadd.f32 %v10479_v0, %v4999_v4  ;;  %4871 = vmatmul.bf16.gmra.mxu2 %v7397_v63  ;;  %v5423_v35 = vmul.f32 0.2, %v5300_v34  ;;  %5338 = vmatmul.bf16.gmra.mxu1 %v7153_v10  ;;  %v7185_v56 = vor.u32 %v7744_v32, %v7182_v21  ;;  %v10957_v21 = vld [vmem:[#allocation79_spill] sm:$0xff] }
 0x5f3   :  { %5040 = vmatmul.bf16.gmra.mxu3 %v7401_v46 }
 0x5f4   :  { %v5487_v3 = vmax.f32 %v5300_v34, %v5423_v35  ;;  %v10956_v34 = vld [vmem:[#allocation75_spill] sm:$0xff] }
 0x5f5   :  { %v4832_v23 = vpop.f32.mrf.mxu2 }
 0x5f6   :  { %v4833_v17 = vadd.f32 %v4832_v23, %v10954_v33  ;;  %v5001_v5 = vpop.f32.mrf.mxu3  ;;  %v5935_v40 = vmul.f32 %v5714_v55, %v5487_v3  ;;  %v5180_v23 = vpop.f32.mrf.mxu0 }
 0x5f7   :  { %v5301_v19 = vpop.f32.mrf.mxu1 }
 0x5f8   :  { %v5002_v6 = vadd.f32 %v5001_v5, %v4833_v17  ;;  %v6023_v51 = vsel %vm5975_vm1, %v5935_v40, 0.0  ;;  %v5302_v16 = vadd.f32 %v5301_v19, %v10397_v27  ;;  %5219 = vmatmul.bf16.gmra.mxu0 %v7469_v2  ;;  %v10955_v27 = vld [vmem:[#allocation76_spill] sm:$0xff]  ;;  %v7460_v40 = vld [vmem:[#allocation3 + $0x790] sm:$0xf]  ;;  %v5729_v2 = vpop.permute.xlu0 %5728 }
 0x5f9   :  { %v6024_v0 = vadd.f32 %v6023_v51, %v6022_v57  ;;  %v7828_v19 = vld [vmem:[#allocation3 + $0x7f4] sm:$0xf0] }
 0x5fa   :  { %v10513_v30 = vadd.f32 %v10488_v54, %v5002_v6  ;;  %v5424_v49 = vmul.f32 0.2, %v5302_v16  ;;  %v7429_v54 = vor.u32 %v7811_v18, %v7428_v29  ;;  %v7500_v6 = vld [vmem:[#allocation3 + $0x7d8] sm:$0xf] }
 0x5fb   :  { %v7501_v29 = vor.u32 %v7828_v19, %v7500_v6 }
 0x5fc   :  { %v5488_v60 = vmax.f32 %v5302_v16, %v5424_v49  ;;  %v7819_v16 = vld [vmem:[#allocation3 + $0x7ac] sm:$0xf0]  ;;  %v7462_v49 = vld [vmem:[#allocation3 + $0x7b0] sm:$0xf0] }
 0x5fd   :  { %v4834_v45 = vpop.f32.mrf.mxu2  ;;  %v7461_v14 = vor.u32 %v7819_v16, %v7460_v40  ;;  %v7494_v40 = vld [vmem:[#allocation3 + $0x7f0] sm:$0xf0]  ;;  %v10959_v16 = vld [vmem:[#allocation85_spill] sm:$0xff] }
 0x5fe   :  { %v4835_v1 = vadd.f32 %v4834_v45, %v10955_v27  ;;  %v5003_v41 = vpop.f32.mrf.mxu3  ;;  %v5936_v42 = vmul.f32 %v5719_v50, %v5488_v60  ;;  %v7465_v45 = vor.u32 %v7815_v9, %v7462_v49 }
 0x5ff   :  { %v5304_v62 = vpop.f32.mrf.mxu1 }
 0x600   :  { %v5004_v13 = vadd.f32 %v5003_v41, %v4835_v1  ;;  %v6025_v43 = vsel %vm5975_vm1, %v5936_v42, 0.0  ;;  %v5305_v63 = vadd.f32 %v5304_v62, %v10405_v25 }
 0x601   :  { %v6026_v11 = vadd.f32 %v6025_v43, %v6024_v0  ;;  %v7752_v0 = vld [vmem:[#allocation3 + $0x59c] sm:$0xf]  ;;  %v5734_v43 = vpop.permute.xlu1 %5733 }
 0x602   :  { %v10519_v10 = vadd.f32 %v10498_v28, %v5004_v13  ;;  %4876 = vmatmul.bf16.gmra.mxu2 %v7429_v54  ;;  %v5425_v46 = vmul.f32 0.2, %v5305_v63  ;;  %5343 = vmatmul.bf16.gmra.mxu1 %v7185_v56  ;;  %v7217_v60 = vor.u32 %v7752_v0, %v7214_v59  ;;  %v5182_v54 = vpop.f32.mrf.mxu0 }
 0x603   :  { %5045 = vmatmul.bf16.gmra.mxu3 %v7433_v15 }
 0x604   :  { %v5489_v4 = vmax.f32 %v5305_v63, %v5425_v46  ;;  %v10958_v63 = vld [vmem:[#allocation82_spill] sm:$0xff] }
 0x605   :  { %v4837_v7 = vpop.f32.mrf.mxu2 }
 0x606   :  { %v4838_v57 = vadd.f32 %v4837_v7, %v10956_v34  ;;  %v5006_v35 = vpop.f32.mrf.mxu3  ;;  %v5937_v3 = vmul.f32 %v5724_v24, %v5489_v4 }
 0x607   :  { %v5306_v33 = vpop.f32.mrf.mxu1 }
 0x608   :  { %v5007_v55 = vadd.f32 %v5006_v35, %v4838_v57  ;;  %v6027_v25 = vsel %vm5975_vm1, %v5937_v3, 0.0  ;;  %v5307_v17 = vadd.f32 %v5306_v33, %v10413_v58  ;;  %5224 = vmatmul.bf16.gmra.mxu0 %v7501_v29  ;;  %v7492_v35 = vld [vmem:[#allocation3 + $0x7d0] sm:$0xf]  ;;  %v7760_v33 = vld [vmem:[#allocation3 + $0x5dc] sm:$0xf] }
 0x609   :  { %v6028_v28 = vadd.f32 %v6027_v25, %v6026_v11 }
 0x60a   :  { %v10524_v5 = vadd.f32 %v5175_v22, %v5007_v55  ;;  %v5426_v51 = vmul.f32 0.2, %v5307_v17  ;;  %v7827_v55 = vld [vmem:[#allocation3 + $0x7ec] sm:$0xf0]  ;;  %v5185_v25 = vpop.f32.mrf.mxu0 }
 0x60b   :  { %v7493_v59 = vor.u32 %v7827_v55, %v7492_v35 }
 0x60c   :  { %v5490_v18 = vmax.f32 %v5307_v17, %v5426_v51  ;;  %v7246_v17 = vld [vmem:[#allocation3 + $0x5f8] sm:$0xf0]  ;;  %v5739_v51 = vpop.permute.xlu2 %5738 }
 0x60d   :  { %v4839_v32 = vpop.f32.mrf.mxu2 }
 0x60e   :  { %v4840_v31 = vadd.f32 %v4839_v32, %v10957_v21  ;;  %v5008_v58 = vpop.f32.mrf.mxu3  ;;  %v5938_v22 = vmul.f32 %v5729_v2, %v5490_v18 }
 0x60f   :  { %v5309_v27 = vpop.f32.mrf.mxu1 }
 0x610   :  { %v5009_v50 = vadd.f32 %v5008_v58, %v4840_v31  ;;  %v6029_v1 = vsel %vm5975_vm1, %v5938_v22, 0.0  ;;  %v5310_v41 = vadd.f32 %v5309_v27, %v10421_v12 }
 0x611   :  { %v6030_v42 = vadd.f32 %v6029_v1, %v6028_v28  ;;  %v7823_v28 = vld [vmem:[#allocation3 + $0x7d4] sm:$0xf] }
 0x612   :  { %v10529_v56 = vadd.f32 %v5177_v26, %v5009_v50  ;;  %4881 = vmatmul.bf16.gmra.mxu2 %v7461_v14  ;;  %v5427_v15 = vmul.f32 0.2, %v5310_v41  ;;  %5348 = vmatmul.bf16.gmra.mxu1 %v7217_v60  ;;  %v7497_v49 = vor.u32 %v7823_v28, %v7494_v40  ;;  %v5187_v60 = vpop.f32.mrf.mxu0  ;;  %v10960_v50 = vld [vmem:[#allocation72_spill] sm:$0xff] }
 0x613   :  { %5050 = vmatmul.bf16.gmra.mxu3 %v7465_v45  ;;  %v5744_v45 = vpop.permute.xlu0 %5743 }
 0x614   :  { %v5491_v13 = vmax.f32 %v5310_v41, %v5427_v15 }
 0x615   :  { %v4842_v62 = vpop.f32.mrf.mxu2 }
 0x616   :  { %v4843_v11 = vadd.f32 %v4842_v62, %v10958_v63  ;;  %v5011_v46 = vpop.f32.mrf.mxu3  ;;  %v5939_v4 = vmul.f32 %v5734_v43, %v5491_v13  ;;  %v7768_v63 = vld [vmem:[#allocation3 + $0x61c] sm:$0xf] }
 0x617   :  { %v5311_v24 = vpop.f32.mrf.mxu1 }
 0x618   :  { %v5012_v7 = vadd.f32 %v5011_v46, %v4843_v11  ;;  %v6031_v34 = vsel %vm5975_vm1, %v5939_v4, 0.0  ;;  %v5312_v12 = vadd.f32 %v5311_v24, %v10429_v61  ;;  %v7249_v61 = vor.u32 %v7760_v33, %v7246_v17  ;;  %v7278_v11 = vld [vmem:[#allocation3 + $0x638] sm:$0xf0] }
 0x619   :  { %v6032_v57 = vadd.f32 %v6031_v34, %v6030_v42  ;;  %v10961_v24 = vld [vmem:[#allocation88_spill] sm:$0xff]  ;;  %v7281_v35 = vor.u32 %v7768_v63, %v7278_v11 }
 0x61a   :  { %v10534_v26 = vadd.f32 %v5180_v23, %v5012_v7  ;;  %v5428_v3 = vmul.f32 0.2, %v5312_v12  ;;  %v5749_v7 = vpop.permute.xlu1 %5748 }
 0x61c   :  { %v5492_v6 = vmax.f32 %v5312_v12, %v5428_v3  ;;  %v5190_v3 = vpop.f32.mrf.mxu0 }
 0x61d   :  { %v4844_v19 = vpop.f32.mrf.mxu2 }
 0x61e   :  { %v4845_v0 = vadd.f32 %v4844_v19, %v10959_v16  ;;  %v5013_v29 = vpop.f32.mrf.mxu3  ;;  %v5940_v9 = vmul.f32 %v5739_v51, %v5492_v6  ;;  %v5754_v51 = vpop.permute.xlu2 %5753 }
 0x61f   :  { %v5314_v18 = vpop.f32.mrf.mxu1 }
 0x620   :  { %v5014_v23 = vadd.f32 %v5013_v29, %v4845_v0  ;;  %v6033_v32 = vsel %vm5975_vm1, %v5940_v9, 0.0  ;;  %v5315_v2 = vadd.f32 %v5314_v18, %v10437_v44 }
 0x621   :  { %v6034_v21 = vadd.f32 %v6033_v32, %v6032_v57 }
 0x622   :  { %v10539_v31 = vadd.f32 %v5182_v54, %v5014_v23  ;;  %4886 = vmatmul.bf16.gmra.mxu2 %v7493_v59  ;;  %v5429_v58 = vmul.f32 0.2, %v5315_v2  ;;  %5353 = vmatmul.bf16.gmra.mxu1 %v7249_v61  ;;  %v5764_v11 = vpop.permute.xlu1 %5763 }
 0x623   :  { %5055 = vmatmul.bf16.gmra.mxu3 %v7497_v49 }
 0x624   :  { %v5493_v14 = vmax.f32 %v5315_v2, %v5429_v58  ;;  %v5192_v23 = vpop.f32.mrf.mxu0  ;;  %v7776_v2 = vld [vmem:[#allocation3 + $0x65c] sm:$0xf] }
 0x625   :  { %v4847_v22 = vpop.f32.mrf.mxu2 }
 0x626   :  { %v4848_v27 = vadd.f32 %v4847_v22, %v10960_v50  ;;  %v5016_v1 = vpop.f32.mrf.mxu3  ;;  %v5941_v41 = vmul.f32 %v5744_v45, %v5493_v14  ;;  %v5759_v22 = vpop.permute.xlu0 %5758 }
 0x627   :  { %v5316_v15 = vpop.f32.mrf.mxu1 }
 0x628   :  { %v5017_v42 = vadd.f32 %v5016_v1, %v4848_v27  ;;  %v6035_v13 = vsel %vm5975_vm1, %v5941_v41, 0.0  ;;  %v5317_v44 = vadd.f32 %v5316_v15, %v10445_v38 }
 0x629   :  { %v6036_v54 = vadd.f32 %v6035_v13, %v6034_v21  ;;  %v7310_v21 = vld [vmem:[#allocation3 + $0x678] sm:$0xf0] }
 0x62a   :  { %v10544_v62 = vadd.f32 %v5185_v25, %v5017_v42  ;;  %v5430_v43 = vmul.f32 0.2, %v5317_v44  ;;  %v7313_v27 = vor.u32 %v7776_v2, %v7310_v21 }
 0x62c   :  { %v5494_v46 = vmax.f32 %v5317_v44, %v5430_v43 }
 0x62d   :  { %v4849_v4 = vpop.f32.mrf.mxu2 }
 0x62e   :  { %v4850_v34 = vadd.f32 %v4849_v4, %v10961_v24  ;;  %v5018_v12 = vpop.f32.mrf.mxu3  ;;  %v5942_v57 = vmul.f32 %v5749_v7, %v5494_v46  ;;  %v10963_v46 = vld [vmem:[#allocation51_spill] sm:$0xff]  ;;  %v5774_v21 = vpop.permute.xlu0 %5773 }
 0x62f   :  { %v5319_v33 = vpop.f32.mrf.mxu1 }
 0x630   :  { %v5019_v55 = vadd.f32 %v5018_v12, %v4850_v34  ;;  %v6037_v17 = vsel %vm5975_vm1, %v5942_v57, 0.0  ;;  %v5320_v38 = vadd.f32 %v5319_v33, %v10453_v39  ;;  %v7784_v33 = vld [vmem:[#allocation3 + $0x69c] sm:$0xf] }
 0x631   :  { %v6038_v25 = vadd.f32 %v6037_v17, %v6036_v54  ;;  %v5195_v54 = vpop.f32.mrf.mxu0  ;;  %v7342_v17 = vld [vmem:[#allocation3 + $0x6b8] sm:$0xf0] }
 0x632   :  { %v10549_v28 = vadd.f32 %v5187_v60, %v5019_v55  ;;  %v5431_v40 = vmul.f32 0.2, %v5320_v38  ;;  %5358 = vmatmul.bf16.gmra.mxu1 %v7281_v35  ;;  %v10962_v60 = vld [vmem:[#allocation91_spill] sm:$0xff] }
 0x634   :  { %v5495_v6 = vmax.f32 %v5320_v38, %v5431_v40 }
 0x635   :  { %v4852_v19 = vpop.f32.mrf.mxu2 }
 0x636   :  { %v4853_v16 = vadd.f32 %v4852_v19, %v10178_v37  ;;  %v5021_v0 = vpop.f32.mrf.mxu3  ;;  %v5943_v29 = vmul.f32 %v5754_v51, %v5495_v6  ;;  %v5769_v6 = vpop.permute.xlu2 %5768  ;;  %v10964_v19 = vld [vmem:[#allocation40_spill] sm:$0xff] }
 0x637   :  { %v5321_v9 = vpop.f32.mrf.mxu1 }
 0x638   :  { %v5022_v59 = vadd.f32 %v5021_v0, %v4853_v16  ;;  %v6039_v61 = vsel %vm5975_vm1, %v5943_v29, 0.0  ;;  %v5322_v49 = vadd.f32 %v5321_v9, %v10461_v47  ;;  %v7345_v29 = vor.u32 %v7784_v33, %v7342_v17  ;;  %v7800_v17 = vld [vmem:[#allocation3 + $0x71c] sm:$0xf] }
 0x639   :  { %v6040_v39 = vadd.f32 %v6039_v61, %v6038_v25  ;;  %v5197_v40 = vpop.f32.mrf.mxu0 }
 0x63a   :  { %v10554_v18 = vadd.f32 %v5190_v3, %v5022_v59  ;;  %v5432_v32 = vmul.f32 0.2, %v5322_v49 }
 0x63c   :  { %v5496_v58 = vmax.f32 %v5322_v49, %v5432_v32 }
 0x63d   :  { %v4854_v14 = vpop.f32.mrf.mxu2 }
 0x63e   :  { %v4855_v37 = vadd.f32 %v4854_v14, %v10962_v60  ;;  %v5023_v45 = vpop.f32.mrf.mxu3  ;;  %v5944_v50 = vmul.f32 %v5759_v22, %v5496_v58  ;;  %v10965_v58 = vld [vmem:[#allocation83_spill] sm:$0xff] }
 0x63f   :  { %v5324_v41 = vpop.f32.mrf.mxu1 }
 0x640   :  { %v5024_v1 = vadd.f32 %v5023_v45, %v4855_v37  ;;  %v6041_v42 = vsel %vm5975_vm1, %v5944_v50, 0.0  ;;  %v5325_v47 = vadd.f32 %v5324_v41, %v10469_v52 }
 0x641   :  { %v6042_v15 = vadd.f32 %v6041_v42, %v6040_v39  ;;  %v5200_v37 = vpop.f32.mrf.mxu0 }
 0x642   :  { %v10559_v13 = vadd.f32 %v5192_v23, %v5024_v1  ;;  %v5433_v44 = vmul.f32 0.2, %v5325_v47  ;;  %5363 = vmatmul.bf16.gmra.mxu1 %v7313_v27 }
 0x644   :  { %v5497_v43 = vmax.f32 %v5325_v47, %v5433_v44  ;;  %v7792_v47 = vld [vmem:[#allocation3 + $0x6dc] sm:$0xf] }
 0x645   :  { %v4857_v63 = vpop.f32.mrf.mxu2 }
 0x646   :  { %v4858_v4 = vadd.f32 %v4857_v63, %v10963_v46  ;;  %v5026_v7 = vpop.f32.mrf.mxu3  ;;  %v5945_v24 = vmul.f32 %v5764_v11, %v5497_v43 }
 0x647   :  { %v5326_v12 = vpop.f32.mrf.mxu1 }
 0x648   :  { %v5027_v34 = vadd.f32 %v5026_v7, %v4858_v4  ;;  %v6043_v57 = vsel %vm5975_vm1, %v5945_v24, 0.0  ;;  %v5327_v35 = vadd.f32 %v5326_v12, %v10477_v8 }
 0x649   :  { %v6044_v52 = vadd.f32 %v6043_v57, %v6042_v15  ;;  %v7374_v15 = vld [vmem:[#allocation3 + $0x6f8] sm:$0xf0] }
 0x64a   :  { %v10564_v3 = vadd.f32 %v5195_v54, %v5027_v34  ;;  %v5434_v55 = vmul.f32 0.2, %v5327_v35  ;;  %v5779_v54 = vpop.permute.xlu1 %5778  ;;  %v7377_v63 = vor.u32 %v7792_v47, %v7374_v15 }
 0x64c   :  { %v5498_v38 = vmax.f32 %v5327_v35, %v5434_v55 }
 0x64d   :  { %v4859_v25 = vpop.f32.mrf.mxu2 }
 0x64e   :  { %v4860_v51 = vadd.f32 %v4859_v25, %v10964_v19  ;;  %v5028_v16 = vpop.f32.mrf.mxu3  ;;  %v5946_v0 = vmul.f32 %v5769_v6, %v5498_v38  ;;  %v7406_v38 = vld [vmem:[#allocation3 + $0x738] sm:$0xf0] }
 0x64f   :  { %v5329_v9 = vpop.f32.mrf.mxu1  ;;  %v7409_v19 = vor.u32 %v7800_v17, %v7406_v38 }
 0x650   :  { %v5029_v59 = vadd.f32 %v5028_v16, %v4860_v51  ;;  %v6045_v61 = vsel %vm5975_vm1, %v5946_v0, 0.0  ;;  %v5330_v8 = vadd.f32 %v5329_v9, %v10485_v36 }
 0x651   :  { %v6046_v49 = vadd.f32 %v6045_v61, %v6044_v52 }
 0x652   :  { %v10569_v23 = vadd.f32 %v5197_v40, %v5029_v59  ;;  %v5435_v39 = vmul.f32 0.2, %v5330_v8  ;;  %5368 = vmatmul.bf16.gmra.mxu1 %v7345_v29  ;;  %v5789_v40 = vpop.permute.xlu0 %5788  ;;  %v5794_v9 = vpop.permute.xlu1 %5793 }
 0x654   :  { %v5499_v32 = vmax.f32 %v5330_v8, %v5435_v39 }
 0x655   :  { %v4862_v2 = vpop.f32.mrf.mxu2 }
 0x656   :  { %v4863_v14 = vadd.f32 %v4862_v2, %v10965_v58  ;;  %v5031_v22 = vpop.f32.mrf.mxu3  ;;  %v5947_v60 = vmul.f32 %v5774_v21, %v5499_v32  ;;  %v7808_v2 = vld [vmem:[#allocation3 + $0x75c] sm:$0xf] }
 0x657   :  { %v5331_v50 = vpop.f32.mrf.mxu1  ;;  %v7438_v21 = vld [vmem:[#allocation3 + $0x778] sm:$0xf0] }
 0x658   :  { %v5032_v45 = vadd.f32 %v5031_v22, %v4863_v14  ;;  %v6047_v27 = vsel %vm5975_vm1, %v5947_v60, 0.0  ;;  %v5332_v1 = vadd.f32 %v5331_v50, %v10493_v48  ;;  %v5784_v48 = vpop.permute.xlu2 %5783  ;;  %v7441_v60 = vor.u32 %v7808_v2, %v7438_v21 }
 0x659   :  { %v6048_v36 = vadd.f32 %v6047_v27, %v6046_v49 }
 0x65a   :  { %v10574_v41 = vadd.f32 %v5200_v37, %v5032_v45  ;;  %v5436_v42 = vmul.f32 0.2, %v5332_v1 }
 0x65c   :  { %v5500_v44 = vmax.f32 %v5332_v1, %v5436_v42 }
 0x65e   :  { %v5948_v43 = vmul.f32 %v5779_v54, %v5500_v44 }
 0x65f   :  { %v5334_v11 = vpop.f32.mrf.mxu1 }
 0x660   :  { %v6049_v46 = vsel %vm5975_vm1, %v5948_v43, 0.0  ;;  %v5335_v4 = vadd.f32 %v5334_v11, %v10501_v53  ;;  %v5799_v14 = vpop.permute.xlu2 %5798  ;;  %v7816_v43 = vld [vmem:[#allocation3 + $0x79c] sm:$0xf] }
 0x661   :  { %v6050_v7 = vadd.f32 %v6049_v46, %v6048_v36  ;;  %v5804_v36 = vpop.permute.xlu0 %5803  ;;  %v5809_v46 = vpop.permute.xlu1 %5808 }
 0x662   :  { %v5437_v24 = vmul.f32 0.2, %v5335_v4  ;;  %5373 = vmatmul.bf16.gmra.mxu1 %v7377_v63  ;;  %v7470_v63 = vld [vmem:[#allocation3 + $0x7b8] sm:$0xf0] }
 0x664   :  { %v5501_v34 = vmax.f32 %v5335_v4, %v5437_v24 }
 0x666   :  { %v5949_v12 = vmul.f32 %v5784_v48, %v5501_v34 }
 0x667   :  { %v5336_v57 = vpop.f32.mrf.mxu1 }
 0x668   :  { %v6051_v35 = vsel %vm5975_vm1, %v5949_v12, 0.0  ;;  %v5337_v52 = vadd.f32 %v5336_v57, %v10507_v20 }
 0x669   :  { %v6052_v55 = vadd.f32 %v6051_v35, %v6050_v7  ;;  %v7473_v7 = vor.u32 %v7816_v43, %v7470_v63  ;;  %v5814_v35 = vpop.permute.xlu2 %5813  ;;  %v5202_v43 = vpop.f32.mrf.mxu0 }
 0x66a   :  { %v5438_v33 = vmul.f32 0.2, %v5337_v52 }
 0x66c   :  { %v5502_v25 = vmax.f32 %v5337_v52, %v5438_v33 }
 0x66e   :  { %v5950_v6 = vmul.f32 %v5789_v40, %v5502_v25  ;;  %v7824_v25 = vld [vmem:[#allocation3 + $0x7dc] sm:$0xf] }
 0x66f   :  { %v5339_v53 = vpop.f32.mrf.mxu1  ;;  %v7502_v40 = vld [vmem:[#allocation3 + $0x7f8] sm:$0xf0] }
 0x670   :  { %v6053_v51 = vsel %vm5975_vm1, %v5950_v6, 0.0  ;;  %v5340_v16 = vadd.f32 %v5339_v53, %v10513_v30 }
 0x671   :  { %v6054_v0 = vadd.f32 %v6053_v51, %v6052_v55  ;;  %v7505_v51 = vor.u32 %v7824_v25, %v7502_v40  ;;  %v5829_v21 = vpop.permute.xlu2 %5828 }
 0x672   :  { %v5439_v29 = vmul.f32 0.2, %v5340_v16  ;;  %5378 = vmatmul.bf16.gmra.mxu1 %v7409_v19  ;;  %v5819_v19 = vpop.permute.xlu0 %5818 }
 0x674   :  { %v5503_v59 = vmax.f32 %v5340_v16, %v5439_v29 }
 0x676   :  { %v5951_v61 = vmul.f32 %v5794_v9, %v5503_v59 }
 0x677   :  { %v5341_v20 = vpop.f32.mrf.mxu1 }
 0x678   :  { %v6055_v8 = vsel %vm5975_vm1, %v5951_v61, 0.0  ;;  %v5342_v49 = vadd.f32 %v5341_v20, %v10519_v10  ;;  %v5824_v61 = vpop.permute.xlu1 %5823 }
 0x679   :  { %v6056_v39 = vadd.f32 %v6055_v8, %v6054_v0 }
 0x67a   :  { %v5440_v32 = vmul.f32 0.2, %v5342_v49 }
 0x67c   :  { %v5504_v58 = vmax.f32 %v5342_v49, %v5440_v32 }
 0x67e   :  { %v5952_v22 = vmul.f32 %v5799_v14, %v5504_v58 }
 0x67f   :  { %v5344_v30 = vpop.f32.mrf.mxu1 }
 0x680   :  { %v6057_v37 = vsel %vm5975_vm1, %v5952_v22, 0.0  ;;  %v5345_v45 = vadd.f32 %v5344_v30, %v10524_v5 }
 0x681   :  { %v6058_v50 = vadd.f32 %v6057_v37, %v6056_v39 }
 0x682   :  { %v5441_v27 = vmul.f32 0.2, %v5345_v45  ;;  %5383 = vmatmul.bf16.gmra.mxu1 %v7441_v60 }
 0x684   :  { %v5505_v1 = vmax.f32 %v5345_v45, %v5441_v27  ;;  %v5834_v45 = vpop.permute.xlu0 %5833  ;;  %v4864_v27 = vpop.f32.mrf.mxu2 }
 0x686   :  { %v5953_v42 = vmul.f32 %v5804_v36, %v5505_v1 }
 0x687   :  { %v5346_v10 = vpop.f32.mrf.mxu1 }
 0x688   :  { %v6059_v47 = vsel %vm5975_vm1, %v5953_v42, 0.0  ;;  %v5347_v15 = vadd.f32 %v5346_v10, %v10529_v56 }
 0x689   :  { %v6060_v44 = vadd.f32 %v6059_v47, %v6058_v50  ;;  %v5033_v47 = vpop.f32.mrf.mxu3 }
 0x68a   :  { %v5442_v54 = vmul.f32 0.2, %v5347_v15 }
 0x68c   :  { %v5506_v11 = vmax.f32 %v5347_v15, %v5442_v54 }
 0x68e   :  { %v5954_v4 = vmul.f32 %v5809_v46, %v5506_v11  ;;  %v4867_v46 = vpop.f32.mrf.mxu2 }
 0x68f   :  { %v5349_v5 = vpop.f32.mrf.mxu1 }
 0x690   :  { %v6061_v24 = vsel %vm5975_vm1, %v5954_v4, 0.0  ;;  %v5350_v34 = vadd.f32 %v5349_v5, %v10534_v26 }
 0x691   :  { %v6062_v48 = vadd.f32 %v6061_v24, %v6060_v44  ;;  %v5839_v44 = vpop.permute.xlu1 %5838  ;;  %v5844_v24 = vpop.permute.xlu2 %5843 }
 0x692   :  { %v5443_v12 = vmul.f32 0.2, %v5350_v34  ;;  %5388 = vmatmul.bf16.gmra.mxu1 %v7473_v7 }
 0x694   :  { %v5507_v57 = vmax.f32 %v5350_v34, %v5443_v12  ;;  %v5036_v34 = vpop.f32.mrf.mxu3 }
 0x696   :  { %v5955_v52 = vmul.f32 %v5814_v35, %v5507_v57  ;;  %v5205_v35 = vpop.f32.mrf.mxu0 }
 0x697   :  { %v5351_v56 = vpop.f32.mrf.mxu1 }
 0x698   :  { %v6063_v55 = vsel %vm5975_vm1, %v5955_v52, 0.0  ;;  %v5352_v33 = vadd.f32 %v5351_v56, %v10539_v31 }
 0x699   :  { %v6064_v17 = vadd.f32 %v6063_v55, %v6062_v48  ;;  %v4869_v55 = vpop.f32.mrf.mxu2 }
 0x69a   :  { %v5444_v38 = vmul.f32 0.2, %v5352_v33 }
 0x69c   :  { %v5508_v6 = vmax.f32 %v5352_v33, %v5444_v38  ;;  %v10966_v38 = vld [vmem:[#allocation95_spill] sm:$0xff]  ;;  %v5038_v40 = vpop.f32.mrf.mxu3 }
 0x69e   :  { %v5956_v53 = vmul.f32 %v5819_v19, %v5508_v6 }
 0x69f   :  { %v5354_v26 = vpop.f32.mrf.mxu1 }
 0x6a0   :  { %v6065_v16 = vsel %vm5975_vm1, %v5956_v53, 0.0  ;;  %v5355_v0 = vadd.f32 %v5354_v26, %v10544_v62 }
 0x6a1   :  { %v6066_v29 = vadd.f32 %v6065_v16, %v6064_v17  ;;  %v5849_v17 = vpop.permute.xlu0 %5848 }
 0x6a2   :  { %v5445_v59 = vmul.f32 0.2, %v5355_v0  ;;  %5393 = vmatmul.bf16.gmra.mxu1 %v7505_v51 }
 0x6a4   :  { %v5509_v9 = vmax.f32 %v5355_v0, %v5445_v59  ;;  %v5207_v0 = vpop.f32.mrf.mxu0  ;;  %v4872_v59 = vpop.f32.mrf.mxu2 }
 0x6a6   :  { %v5957_v20 = vmul.f32 %v5824_v61, %v5509_v9  ;;  %v10967_v61 = vld [vmem:[#allocation47_spill] sm:$0xff] }
 0x6a7   :  { %v5356_v31 = vpop.f32.mrf.mxu1 }
 0x6a8   :  { %v6067_v8 = vsel %vm5975_vm1, %v5957_v20, 0.0  ;;  %v5357_v49 = vadd.f32 %v5356_v31, %v10549_v28  ;;  %v4868_v20 = vadd.f32 %v4867_v46, %v10967_v61 }
 0x6a9   :  { %v6068_v39 = vadd.f32 %v6067_v8, %v6066_v29  ;;  %v5854_v29 = vpop.permute.xlu1 %5853 }
 0x6aa   :  { %v5446_v32 = vmul.f32 0.2, %v5357_v49 }
 0x6ac   :  { %v5510_v2 = vmax.f32 %v5357_v49, %v5446_v32  ;;  %v5041_v32 = vpop.f32.mrf.mxu3 }
 0x6ae   :  { %v5958_v58 = vmul.f32 %v5829_v21, %v5510_v2  ;;  %v5037_v21 = vadd.f32 %v5036_v34, %v4868_v20 }
 0x6af   :  { %v5359_v14 = vpop.f32.mrf.mxu1 }
 0x6b0   :  { %v6069_v22 = vsel %vm5975_vm1, %v5958_v58, 0.0  ;;  %v5360_v62 = vadd.f32 %v5359_v14, %v10554_v18  ;;  %v5859_v14 = vpop.permute.xlu2 %5858 }
 0x6b1   :  { %v6070_v60 = vadd.f32 %v6069_v22, %v6068_v39  ;;  %v5210_v22 = vpop.f32.mrf.mxu0 }
 0x6b2   :  { %v5447_v30 = vmul.f32 0.2, %v5360_v62 }
 0x6b4   :  { %v5511_v37 = vmax.f32 %v5360_v62, %v5447_v30  ;;  %v5206_v62 = vadd.f32 %v5205_v35, %v5037_v21  ;;  %v10970_v35 = vld [vmem:[#allocation37_spill] sm:$0xff] }
 0x6b5   :  { %v10972_v21 = vld [vmem:[#allocation45_spill] sm:$0xff] }
 0x6b6   :  { %v5959_v50 = vmul.f32 %v5834_v45, %v5511_v37  ;;  %v4874_v45 = vpop.f32.mrf.mxu2 }
 0x6b7   :  { %v5361_v1 = vpop.f32.mrf.mxu1 }
 0x6b8   :  { %v6071_v36 = vsel %vm5975_vm1, %v5959_v50, 0.0  ;;  %v5362_v28 = vadd.f32 %v5361_v1, %v10559_v13 }
 0x6b9   :  { %v6072_v42 = vadd.f32 %v6071_v36, %v6070_v60  ;;  %v10968_v60 = vld [vmem:[#allocation50_spill] sm:$0xff] }
 0x6ba   :  { %v5448_v10 = vmul.f32 0.2, %v5362_v28  ;;  %v4870_v30 = vadd.f32 %v4869_v55, %v10968_v60 }
 0x6bc   :  { %v5512_v15 = vmax.f32 %v5362_v28, %v5448_v10  ;;  %v5039_v28 = vadd.f32 %v5038_v40, %v4870_v30  ;;  %v5043_v10 = vpop.f32.mrf.mxu3 }
 0x6be   :  { %v5960_v54 = vmul.f32 %v5839_v44, %v5512_v15  ;;  %v5864_v15 = vpop.permute.xlu0 %5863  ;;  %v5208_v44 = vadd.f32 %v5207_v0, %v5039_v28  ;;  %v10973_v28 = vld [vmem:[#allocation10_spill] sm:$0xff] }
 0x6bf   :  { %v5364_v63 = vpop.f32.mrf.mxu1 }
 0x6c0   :  { %v6073_v18 = vsel %vm5975_vm1, %v5960_v54, 0.0  ;;  %v5365_v11 = vadd.f32 %v5364_v63, %v10564_v3  ;;  %v4865_v3 = vadd.f32 %v4864_v27, %v10966_v38  ;;  %v10969_v54 = vld [vmem:[#allocation48_spill] sm:$0xff] }
 0x6c1   :  { %v6074_v4 = vadd.f32 %v6073_v18, %v6072_v42  ;;  %v5212_v18 = vpop.f32.mrf.mxu0 }
 0x6c2   :  { %v5449_v7 = vmul.f32 0.2, %v5365_v11  ;;  %v5034_v26 = vadd.f32 %v5033_v47, %v4865_v3 }
 0x6c4   :  { %v5513_v5 = vmax.f32 %v5365_v11, %v5449_v7  ;;  %v5203_v9 = vadd.f32 %v5202_v43, %v5034_v26  ;;  %v4873_v43 = vadd.f32 %v4872_v59, %v10969_v54  ;;  %v4877_v7 = vpop.f32.mrf.mxu2  ;;  %v10971_v26 = vld [vmem:[#allocation44_spill] sm:$0xff] }
 0x6c6   :  { %v5961_v48 = vmul.f32 %v5844_v24, %v5513_v5  ;;  %v5042_v24 = vadd.f32 %v5041_v32, %v4873_v43 }
 0x6c7   :  { %v5366_v13 = vpop.f32.mrf.mxu1 }
 0x6c8   :  { %v6075_v12 = vsel %vm5975_vm1, %v5961_v48, 0.0  ;;  %v5367_v57 = vadd.f32 %v5366_v13, %v10569_v23  ;;  %v5869_v13 = vpop.permute.xlu1 %5868 }
 0x6c9   :  { %v6076_v52 = vadd.f32 %v6075_v12, %v6074_v4  ;;  %v5046_v12 = vpop.f32.mrf.mxu3  ;;  %v5215_v38 = vpop.f32.mrf.mxu0 }
 0x6ca   :  { %v5450_v56 = vmul.f32 0.2, %v5367_v57 }
 0x6cc   :  { %v5514_v33 = vmax.f32 %v5367_v57, %v5450_v56  ;;  %v5211_v57 = vadd.f32 %v5210_v22, %v5042_v24 }
 0x6ce   :  { %v5962_v25 = vmul.f32 %v5849_v17, %v5514_v33 }
 0x6cf   :  { %v5369_v6 = vpop.f32.mrf.mxu1 }
 0x6d0   :  { %v6077_v19 = vsel %vm5975_vm1, %v5962_v25, 0.0  ;;  %v5370_v53 = vadd.f32 %v5369_v6, %v10574_v41  ;;  %v4879_v6 = vpop.f32.mrf.mxu2 }
 0x6d1   :  { %v6078_v51 = vadd.f32 %v6077_v19, %v6076_v52  ;;  %v4875_v52 = vadd.f32 %v4874_v45, %v10970_v35 }
 0x6d2   :  { %v5451_v16 = vmul.f32 0.2, %v5370_v53 }
 0x6d3   :  { %v5044_v25 = vadd.f32 %v5043_v10, %v4875_v52 }
 0x6d4   :  { %v5515_v23 = vmax.f32 %v5370_v53, %v5451_v16  ;;  %v5874_v53 = vpop.permute.xlu2 %5873  ;;  %v4878_v16 = vadd.f32 %v4877_v7, %v10971_v26 }
 0x6d6   :  { %v5963_v31 = vmul.f32 %v5854_v29, %v5515_v23  ;;  %v5048_v23 = vpop.f32.mrf.mxu3  ;;  %v5047_v20 = vadd.f32 %v5046_v12, %v4878_v16 }
 0x6d7   :  { %v5371_v8 = vpop.f32.mrf.mxu1 }
 0x6d8   :  { %v6079_v49 = vsel %vm5975_vm1, %v5963_v31, 0.0  ;;  %v5372_v39 = vadd.f32 %v5371_v8, %v5203_v9  ;;  %v5217_v8 = vpop.f32.mrf.mxu0  ;;  %v4882_v32 = vpop.f32.mrf.mxu2 }
 0x6d9   :  { %v6080_v2 = vadd.f32 %v6079_v49, %v6078_v51  ;;  %v5213_v51 = vadd.f32 %v5212_v18, %v5044_v25  ;;  %v10975_v25 = vld [vmem:[#allocation9_spill] sm:$0xff] }
 0x6da   :  { %v5452_v58 = vmul.f32 0.2, %v5372_v39 }
 0x6dc   :  { %v5516_v41 = vmax.f32 %v5372_v39, %v5452_v58  ;;  %v5879_v39 = vpop.permute.xlu0 %5878  ;;  %v4880_v58 = vadd.f32 %v4879_v6, %v10972_v21 }
 0x6de   :  { %v5964_v37 = vmul.f32 %v5859_v14, %v5516_v41  ;;  %v5051_v60 = vpop.f32.mrf.mxu3 }
 0x6df   :  { %v5374_v50 = vpop.f32.mrf.mxu1 }
 0x6e0   :  { %v6081_v27 = vsel %vm5975_vm1, %v5964_v37, 0.0  ;;  %v5375_v1 = vadd.f32 %v5374_v50, %v5206_v62  ;;  %v5049_v37 = vadd.f32 %v5048_v23, %v4880_v58 }
 0x6e1   :  { %v6082_v36 = vadd.f32 %v6081_v27, %v6080_v2  ;;  %v5216_v2 = vadd.f32 %v5215_v38, %v5047_v20  ;;  %v5884_v27 = vpop.permute.xlu1 %5883  ;;  %v10976_v20 = vld [vmem:[#allocation36_spill] sm:$0xff] }
 0x6e2   :  { %v5453_v42 = vmul.f32 0.2, %v5375_v1 }
 0x6e4   :  { %v5517_v47 = vmax.f32 %v5375_v1, %v5453_v42  ;;  %v5220_v1 = vpop.f32.mrf.mxu0  ;;  %v4883_v42 = vadd.f32 %v4882_v32, %v10973_v28 }
 0x6e6   :  { %v5965_v63 = vmul.f32 %v5864_v15, %v5517_v47  ;;  %v4884_v47 = vpop.f32.mrf.mxu2 }
 0x6e7   :  { %v5376_v11 = vpop.f32.mrf.mxu1 }
 0x6e8   :  { %v6083_v46 = vsel %vm5975_vm1, %v5965_v63, 0.0  ;;  %v5377_v4 = vadd.f32 %v5376_v11, %v5208_v44  ;;  %v5052_v63 = vadd.f32 %v5051_v60, %v4883_v42  ;;  %v5053_v11 = vpop.f32.mrf.mxu3 }
 0x6e9   :  { %v6084_v5 = vadd.f32 %v6083_v46, %v6082_v36  ;;  %v5218_v36 = vadd.f32 %v5217_v8, %v5049_v37 }
 0x6ea   :  { %v5454_v34 = vmul.f32 0.2, %v5377_v4  ;;  %v5221_v7 = vadd.f32 %v5220_v1, %v5052_v63 }
 0x6ec   :  { %v5518_v48 = vmax.f32 %v5377_v4, %v5454_v34  ;;  %v5889_v4 = vpop.permute.xlu2 %5888 }
 0x6ee   :  { %v5966_v56 = vmul.f32 %v5869_v13, %v5518_v48  ;;  %v5222_v48 = vpop.f32.mrf.mxu0  ;;  %v4887_v35 = vpop.f32.mrf.mxu2 }
 0x6ef   :  { %v5379_v55 = vpop.f32.mrf.mxu1 }
 0x6f0   :  { %v6085_v33 = vsel %vm5975_vm1, %v5966_v56, 0.0  ;;  %v5380_v17 = vadd.f32 %v5379_v55, %v5211_v57  ;;  %v5056_v38 = vpop.f32.mrf.mxu3 }
 0x6f1   :  { %v6086_v3 = vadd.f32 %v6085_v33, %v6084_v5  ;;  %v10974_v5 = vld [vmem:[#allocation86_spill] sm:$0xff] }
 0x6f2   :  { %v5455_v40 = vmul.f32 0.2, %v5380_v17  ;;  %v4885_v24 = vadd.f32 %v4884_v47, %v10974_v5 }
 0x6f4   :  { %v5519_v19 = vmax.f32 %v5380_v17, %v5455_v40  ;;  %v5054_v56 = vadd.f32 %v5053_v11, %v4885_v24  ;;  %v5894_v17 = vpop.permute.xlu0 %5893  ;;  %v4888_v40 = vadd.f32 %v4887_v35, %v10975_v25 }
 0x6f6   :  { %v5967_v0 = vmul.f32 %v5874_v53, %v5519_v19  ;;  %v5225_v26 = vpop.f32.mrf.mxu0 }
 0x6f7   :  { %v5381_v29 = vpop.f32.mrf.mxu1 }
 0x6f8   :  { %v6087_v59 = vsel %vm5975_vm1, %v5967_v0, 0.0  ;;  %v5382_v9 = vadd.f32 %v5381_v29, %v5213_v51  ;;  %v5057_v0 = vadd.f32 %v5056_v38, %v4888_v40  ;;  %v4889_v29 = vpop.f32.mrf.mxu2 }
 0x6f9   :  { %v6088_v61 = vadd.f32 %v6087_v59, %v6086_v3  ;;  %v5223_v3 = vadd.f32 %v5222_v48, %v5054_v56 }
 0x6fa   :  { %v5456_v31 = vmul.f32 0.2, %v5382_v9 }
 0x6fc   :  { %v5520_v49 = vmax.f32 %v5382_v9, %v5456_v31  ;;  %v5899_v9 = vpop.permute.xlu1 %5898  ;;  %v4890_v31 = vadd.f32 %v4889_v29, %v10976_v20  ;;  %v5909_v28 = vpop.permute.xlu0 %5908 }
 0x6fe   :  { %v5968_v41 = vmul.f32 %v5879_v39, %v5520_v49  ;;  %v5058_v49 = vpop.f32.mrf.mxu3 }
 0x6ff   :  { %v5384_v14 = vpop.f32.mrf.mxu1  ;;  %v5059_v58 = vadd.f32 %v5058_v49, %v4890_v31 }
 0x700   :  { %v6089_v22 = vsel %vm5975_vm1, %v5968_v41, 0.0  ;;  %v5385_v62 = vadd.f32 %v5384_v14, %v5216_v2  ;;  %v5227_v14 = vpop.f32.mrf.mxu0 }
 0x701   :  { %v6090_v30 = vadd.f32 %v6089_v22, %v6088_v61  ;;  %v5226_v61 = vadd.f32 %v5225_v26, %v5057_v0  ;;  %v5228_v60 = vadd.f32 %v5227_v14, %v5059_v58 }
 0x702   :  { %v5457_v45 = vmul.f32 0.2, %v5385_v62 }
 0x704   :  { %v5521_v50 = vmax.f32 %v5385_v62, %v5457_v45  ;;  %v5904_v62 = vpop.permute.xlu2 %5903 }
 0x706   :  { %v5969_v10 = vmul.f32 %v5884_v27, %v5521_v50 }
 0x707   :  { %v5386_v15 = vpop.f32.mrf.mxu1 }
 0x708   :  { %v6091_v44 = vsel %vm5975_vm1, %v5969_v10, 0.0  ;;  %v5387_v54 = vadd.f32 %v5386_v15, %v5218_v36 }
 0x709   :  { %v6092_v43 = vadd.f32 %v6091_v44, %v6090_v30 }
 0x70a   :  { %v5458_v18 = vmul.f32 0.2, %v5387_v54 }
 0x70c   :  { %v5522_v46 = vmax.f32 %v5387_v54, %v5458_v18  ;;  %v6110_v18 = vstv %s10641_s6  ;;  %s6140_s6 = sshll.u32 %s10642_s7, 4  ;;  %s6141_s6 = int_to_ptr.hbm [resolvable:$true] %s6140_s6 }
 0x70e   :  { %v5970_v34 = vmul.f32 %v5889_v4, %v5522_v46 }
 0x70f   :  { %v5389_v13 = vpop.f32.mrf.mxu1 }
 0x710   :  { %v6093_v12 = vsel %vm5975_vm1, %v5970_v34, 0.0  ;;  %v5390_v57 = vadd.f32 %v5389_v13, %v5221_v7 }
 0x711   :  { %v6094_v52 = vadd.f32 %v6093_v12, %v6092_v43 }
 0x712   :  { %v5459_v55 = vmul.f32 0.2, %v5390_v57 }
 0x714   :  { %v5523_v33 = vmax.f32 %v5390_v57, %v5459_v55 }
 0x716   :  { %v5971_v6 = vmul.f32 %v5894_v17, %v5523_v33 }
 0x717   :  { %v5391_v19 = vpop.f32.mrf.mxu1 }
 0x718   :  { %v6095_v53 = vsel %vm5975_vm1, %v5971_v6, 0.0  ;;  %v5392_v51 = vadd.f32 %v5391_v19, %v5223_v3 }
 0x719   :  { %v6096_v16 = vadd.f32 %v6095_v53, %v6094_v52 }
 0x71a   :  { %v5460_v23 = vmul.f32 0.2, %v5392_v51 }
 0x71c   :  { %v5524_v59 = vmax.f32 %v5392_v51, %v5460_v23 }
 0x71e   :  { %v5972_v8 = vmul.f32 %v5899_v9, %v5524_v59 }
 0x71f   :  { %v5394_v39 = vpop.f32.mrf.mxu1 }
 0x720   :  { %v6097_v32 = vsel %vm5975_vm1, %v5972_v8, 0.0  ;;  %v5395_v2 = vadd.f32 %v5394_v39, %v5226_v61 }
 0x721   :  { %v6098_v21 = vadd.f32 %v6097_v32, %v6096_v16 }
 0x722   :  { %v5461_v41 = vmul.f32 0.2, %v5395_v2 }
 0x724   :  { %v5525_v22 = vmax.f32 %v5395_v2, %v5461_v41 }
 0x726   :  { %v5973_v30 = vmul.f32 %v5904_v62, %v5525_v22 }
 0x727   :  { %v5396_v37 = vpop.f32.mrf.mxu1 }
 0x728   :  { %v6099_v45 = vsel %vm5975_vm1, %v5973_v30, 0.0  ;;  %v5397_v50 = vadd.f32 %v5396_v37, %v5228_v60 }
 0x729   :  { %v6100_v27 = vadd.f32 %v6099_v45, %v6098_v21 }
 0x72a   :  { %v5462_v1 = vmul.f32 0.2, %v5397_v50 }
 0x72c   :  { %v5526_v36 = vmax.f32 %v5397_v50, %v5462_v1 }
 0x72e   :  { %v5974_v42 = vmul.f32 %v5909_v28, %v5526_v36 }
 0x730   :  { %v6101_v10 = vsel %vm5975_vm1, %v5974_v42, 0.0 }
 0x731   :  { %v6102_v47 = vadd.f32 %v6101_v10, %v6100_v27 }
 0x733   :  { %v6103_v15 = vrot.slane %v6102_v47, 4 }
 0x735   :  { %v6104_v44 = vadd.f32 %v6103_v15, %v6102_v47 }
 0x737   :  { %v6105_v54 = vrot.slane %v6104_v44, 2 }
 0x739   :  { %v6106_v43 = vadd.f32 %v6105_v54, %v6104_v44 }
 0x73b   :  { %v6107_v63 = vrot.slane %v6106_v43, 1 }
 0x73d   :  { %v6108_v11 = vadd.f32 %v6107_v63, %v6106_v43 }
 0x73f   :  { %v6111_v46 = vadd.f32 %v6110_v18, %v6108_v11 }
 0x741   :  { %v6112_v4 = vsub.f32 0.0, %v6111_v46 }
 0x743   :  { %v6113_v7 = vmul.f32 1.442695, %v6112_v4 }
 0x745   :  { %7848 = vpow2.f32 %v6113_v7 }
 0x74b   :  { %v7849_v5 = vpop.eup %7848 }
 0x74c   :  { %v6115_v24 = vadd.f32 1.0, %v7849_v5 }
 0x74e   :  { %7850 = vrcp.f32 %v6115_v24  ;;  %v6127_v12 = vand.u32 2147483648, %v6115_v24  ;;  %v6125_v35 = vand.u32 2147483647, %v6115_v24  ;;  %vm6121_vm3 = vweird.f32 %v6115_v24 }
 0x750   :  { %v6128_v56 = vor.u32 1.1754944e-38, %v6127_v12  ;;  %vm6126_vm6 = vcmp.eq.f32.partialorder %v6125_v35, 8.507059e+37 }
 0x754   :  { %v7851_v34 = vpop.eup %7850 }
 0x755   :  { %v6117_v48 = vmul.f32 %v7851_v34, %v6115_v24  ;;  %vm6122_vm2 = vweird.f32 %v7851_v34 }
 0x756   :  { %vm6123_vm4 = vmor %vm6121_vm3, %vm6122_vm2 }
 0x757   :  { %v6118_v13 = vsub.f32 1.0, %v6117_v48 }
 0x759   :  { %v6119_v57 = vmul.f32 %v7851_v34, %v6118_v13 }
 0x75b   :  { %v6120_v52 = vadd.f32 %v7851_v34, %v6119_v57 }
 0x75d   :  { %v6124_v55 = vsel %vm6123_vm4, %v7851_v34, %v6120_v52 }
 0x75e   :  { %v6129_v33 = vsel %vm6126_vm6, %v6128_v56, %v6124_v55 }
 0x75f   :  { %6132 = vst.msk [vmem:[#allocation6] sm:$0x1] %vm6131_vm5, %v6129_v33 }
 0x760   :  { %6143 = dma.vmem_to_hbm [thread:$0]  %s6139_s11, 16, %s6141_s6, [#allocation5]  }
 0x761   :  { %7902 = dma.done.wait [#allocation5], 16  }
 0x762   :  { %7903 = vsyncadd [#allocation5], 4294967280 }
 0x763   :  { %6148 = vsyncpa [#allocation4], 1 }
 0x764   :  { %6149 = vsyncpa [#allocation5], 1 }

</bundles_post_ra>
